<compile_context>
chip_gen: v7x
topology: tpu7x:2x2x1
jax: 0.10.0
libtpu: 0.0.40
codegen_flags: <defaults>
</compile_context>

<pallas_src>
import functools
import math

import jax
import jax.numpy as jnp
from jax.experimental import pallas as pl
from jax.experimental.pallas import tpu as pltpu

BN_EPS = 1e-5
LANE = 128
KPAD = 32          # bf16 packing granularity for the contraction dim (zero-padded)

# Layer config of Wav2LipHD_disc_patchIN.face_encoder_blocks
# (cin, cout, k, stride, pad, batchnorm, act)
LAYERS = [
    (3,   16, 3, 1, 1, True,  "relu"),      # Conv2D
    (16,  32, 3, 2, 1, True,  "relu"),      # Conv2D
    (32,  64, 3, 2, 1, True,  "relu"),      # Conv2D
    (64, 128, 3, 2, 1, True,  "relu"),      # Conv2D
    (128, 256, 3, 2, 1, True, "relu"),      # Conv2D
    (256,   1, 3, 1, 1, False, "sigmoid"),  # nn.Conv2d + nn.Sigmoid
]


def _rup(x, m):
    return ((x + m - 1) // m) * m


@functools.lru_cache(maxsize=None)
def _vmem_config():
    """Generation-aware (working-set budget, vmem_limit_bytes)."""
    cap = None
    try:
        cap = getattr(pltpu.get_tpu_info(), "vmem_capacity_bytes", None)
    except Exception:
        cap = None
    if cap is None or cap <= 64 * 1024 * 1024:
        # v7x-class (64 MiB physical per TC) or unknown: stay conservative.
        return 16 * 1024 * 1024, 32 * 1024 * 1024
    # v5e / v6e: 128 MiB physical VMEM -> allow bigger tiles and a higher scoped limit.
    return 28 * 1024 * 1024, 64 * 1024 * 1024


# --------------------------------------------------------------------------- #
# Pallas fused GEMM:  out = act( scale * (P @ W) + bias )
# Single full-K block -> no K grid axis / accumulator scratch needed.
# --------------------------------------------------------------------------- #
def _make_kernel(act):
    def kernel(p_ref, w_ref, s_ref, b_ref, o_ref):
        acc = jnp.dot(p_ref[...], w_ref[...], preferred_element_type=jnp.float32)
        y = acc * s_ref[...] + b_ref[...]
        if act == "relu":
            y = jnp.maximum(y, 0.0)
        elif act == "sigmoid":
            y = jax.nn.sigmoid(y)
        o_ref[...] = y.astype(o_ref.dtype)
    return kernel


@functools.lru_cache(maxsize=None)
def _get_gemm(Mp, Kp, Np, TM, TN, act, out_dtype_name, vmem_limit):
    out_dtype = jnp.dtype(out_dtype_name)
    mi, nj = Mp // TM, Np // TN
    flops = 2 * Mp * Kp * Np
    transc = Mp * Np if act == "sigmoid" else 0
    bytes_accessed = (Mp * Kp * 2            # bf16 patches
                      + Kp * Np * 2          # bf16 weights
                      + 2 * Np * 4           # f32 scale + bias
                      + Mp * Np * out_dtype.itemsize)
    if nj == 1:
        # 1-D grid over M: weight/scale/bias blocks are constant across steps, so the
        # pipeline keeps them VMEM-resident (no per-step re-DMA).
        grid = (mi,)
        in_specs = [
            pl.BlockSpec((TM, Kp), lambda i: (i, 0)),   # patches (bf16)
            pl.BlockSpec((Kp, TN), lambda i: (0, 0)),   # weights (bf16)
            pl.BlockSpec((1, TN), lambda i: (0, 0)),    # folded BN scale (f32)
            pl.BlockSpec((1, TN), lambda i: (0, 0)),    # folded BN bias  (f32)
        ]
        out_specs = pl.BlockSpec((TM, TN), lambda i: (i, 0))
        dims = ("parallel",)
    else:
        # Fallback 2-D grid (unused by this model's layer shapes): M outer / N inner so
        # the (large) patch tile stays resident across the N sweep.
        grid = (mi, nj)
        in_specs = [
            pl.BlockSpec((TM, Kp), lambda i, j: (i, 0)),
            pl.BlockSpec((Kp, TN), lambda i, j: (0, j)),
            pl.BlockSpec((1, TN), lambda i, j: (0, j)),
            pl.BlockSpec((1, TN), lambda i, j: (0, j)),
        ]
        out_specs = pl.BlockSpec((TM, TN), lambda i, j: (i, j))
        dims = ("parallel", "parallel")
    return pl.pallas_call(
        _make_kernel(act),
        out_shape=jax.ShapeDtypeStruct((Mp, Np), out_dtype),
        grid_spec=pltpu.PrefetchScalarGridSpec(
            num_scalar_prefetch=0, grid=grid,
            in_specs=in_specs, out_specs=out_specs),
        compiler_params=pltpu.CompilerParams(
            dimension_semantics=dims, vmem_limit_bytes=vmem_limit),
        cost_estimate=pl.CostEstimate(
            flops=flops, transcendentals=transc, bytes_accessed=bytes_accessed),
    )


def _pick_tiles(M, Kp, Np, out_itemsize, vmem_budget):
    """Per-layer tile selection: K-aware TM under a VMEM budget, >=2 M-blocks for megacore."""
    TN = 256 if Np % 256 == 0 else 128
    # Double-buffered working set: weights (resident) + patch rows + output rows.
    fixed = 2 * Kp * TN * 2
    per_row = 2 * (Kp * 2 + TN * out_itemsize)
    cap = (vmem_budget - fixed) // per_row
    cap = max(256, min(2048, (cap // 256) * 256))
    if M <= 256:
        TM = max(_rup(M, 16), 16)          # single tiny block (16-row bf16 granularity)
        Mp = TM
    elif M <= 2 * cap:
        TM = _rup(-(-M // 2), 128)         # exactly 2 M-blocks -> both v7x TCs get work
        Mp = 2 * TM
    else:
        TM = cap
        Mp = _rup(M, TM)
    return Mp, TM, TN


def fused_gemm(patches, w_mat, scale, bias, act, out_dtype):
    M, K = patches.shape
    Kp, Np = w_mat.shape
    out_dtype = jnp.dtype(out_dtype)
    budget, vmem_limit = _vmem_config()
    Mp, TM, TN = _pick_tiles(M, Kp, Np, out_dtype.itemsize, budget)
    # Zero-pad rows to Mp and the contraction dim to Kp(=mult. of 32); the zero columns
    # match zero rows in w_mat, so they contribute nothing to the accumulation.
    p = jnp.pad(patches.astype(jnp.bfloat16), ((0, Mp - M), (0, Kp - K)))
    out = _get_gemm(Mp, Kp, Np, TM, TN, act, out_dtype.name, vmem_limit)(
        p, w_mat, scale, bias)
    return out[:M]


# --------------------------------------------------------------------------- #
# Conv block = im2col glue (fused by the outer jit) + fused Pallas GEMM
# --------------------------------------------------------------------------- #
def _im2col(xp, k, stride, Ho, Wo):
    N, _, _, C = xp.shape
    cols = []
    for dy in range(k):
        for dx in range(k):
            cols.append(xp[:, dy:dy + (Ho - 1) * stride + 1:stride,
                           dx:dx + (Wo - 1) * stride + 1:stride, :])
    # last-dim order (dy, dx, c) matches the pre-transposed weight layout
    return jnp.concatenate(cols, axis=-1).reshape(N * Ho * Wo, k * k * C)


def conv2d_block(x, layer_p, cout, k, stride, pad, act, out_dtype):
    N, H, W, _ = x.shape
    Ho = (H + 2 * pad - k) // stride + 1
    Wo = (W + 2 * pad - k) // stride + 1
    xp = jnp.pad(x, ((0, 0), (pad, pad), (pad, pad), (0, 0)))
    patches = _im2col(xp, k, stride, Ho, Wo)
    y = fused_gemm(patches, layer_p["w_mat"], layer_p["scale"], layer_p["bias"],
                   act, out_dtype)
    return y[:, :cout].reshape(N, Ho, Wo, cout)


# --------------------------------------------------------------------------- #
# Parameters (weights pre-transposed / padded / cast to bf16 once at init)
# --------------------------------------------------------------------------- #
def _fold_bn(conv_bias, gamma, beta, mean, var):
    scale = gamma / jnp.sqrt(var + BN_EPS)
    return scale, scale * (conv_bias - mean) + beta


def init_params(key):
    params = []
    keys = jax.random.split(key, len(LAYERS))
    for (cin, cout, k, _s, _p, bn, _a), kk in zip(LAYERS, keys):
        kw, kb = jax.random.split(kk)
        w = jax.random.normal(kw, (cout, cin, k, k), jnp.float32) / math.sqrt(cin * k * k)
        b = jax.random.normal(kb, (cout,), jnp.float32) * 0.01
        if bn:
            # eval-mode BatchNorm with default running stats (see TODO at top of file)
            s, bias = _fold_bn(b,
                               jnp.ones((cout,), jnp.float32),
                               jnp.zeros((cout,), jnp.float32),
                               jnp.zeros((cout,), jnp.float32),
                               jnp.ones((cout,), jnp.float32))
        else:
            s, bias = jnp.ones((cout,), jnp.float32), b
        K = cin * k * k
        # K padded only to 32 (bf16 packing), NOT 128: pad columns are zeros in both
        # operands, and the shallow layers' patch-matrix HBM traffic drops ~4x (L0).
        Kp, Np = _rup(K, KPAD), _rup(cout, LANE)
        w_mat = jnp.transpose(w, (2, 3, 1, 0)).reshape(K, cout)       # (kh,kw,cin,cout)
        w_mat = jnp.pad(w_mat, ((0, Kp - K), (0, Np - cout))).astype(jnp.bfloat16)
        scale = jnp.pad(s.reshape(1, -1), ((0, 0), (0, Np - cout)))
        bias = jnp.pad(bias.reshape(1, -1), ((0, 0), (0, Np - cout)))
        params.append({"w_mat": w_mat, "scale": scale, "bias": bias})
    return params


# --------------------------------------------------------------------------- #
# Forward pass (PyTorch Wav2LipHD_disc_patchIN.forward semantics)
# --------------------------------------------------------------------------- #
def wav2lip_disc_forward(params, face_sequences):
    # face_sequences: (B, 3, T, H, W)
    B, C, T, H, W = face_sequences.shape
    # to_2d: torch.cat([fs[:, :, i] for i in range(T)], dim=0) -> index = t*B + b
    x = jnp.transpose(face_sequences, (2, 0, 1, 3, 4)).reshape(T * B, C, H, W)
    # get_lower_half: keep the lower half of H
    x = x[:, :, H // 2:, :]
    # NCHW -> NHWC, bf16 activations everywhere
    x = jnp.transpose(x, (0, 2, 3, 1)).astype(jnp.bfloat16)

    for spec, p in zip(LAYERS, params):
        _cin, cout, k, stride, pad, _bn, act = spec
        out_dtype = jnp.float32 if act == "sigmoid" else jnp.bfloat16
        x = conv2d_block(x, p, cout, k, stride, pad, act, out_dtype)

    # x: (T*B, h, w, 1) f32 -> squeeze channel
    x = x[..., 0]
    # torch.cat([x[:, :, i] for i in range(w)], dim=1) then torch.flatten
    # == transpose the last two dims then flatten (n-major, then column, then row)
    return jnp.transpose(x, (0, 2, 1)).reshape(-1)


# --------------------------------------------------------------------------- #
if __name__ == "__main__":
    key = jax.random.PRNGKey(0)
    pkey, fkey = jax.random.split(key)
    params = init_params(pkey)

    # Small but architecture-consistent shapes: (B, 3, T, H, W)
    B, T, H, W = 2, 2, 64, 64
    face = jax.random.uniform(fkey, (B, 3, T, H, W), jnp.float32)

    fwd = jax.jit(wav2lip_disc_forward)
    out = jax.block_until_ready(fwd(params, face))

    # Expected flat length: T*B * h_final * w_final
    h, w = H // 2, W
    for (_, _, k, stride, pad, _, _) in LAYERS:
        h = (h + 2 * pad - k) // stride + 1
        w = (w + 2 * pad - k) // stride + 1
    assert out.shape == (T * B * h * w,), out.shape
    assert bool(jnp.all(jnp.isfinite(out)))
    assert bool(jnp.all((out >= 0.0) & (out <= 1.0)))   # sigmoid output range
    print("KERNEL_OK")
</pallas_src>

<mosaic_0001>
module attributes {stable_mosaic.version = 11 : i64} {
  func.func @kernel(%arg0: i32, %arg1: memref<2048x32xbf16, #tpu.memory_space<vmem>>, %arg2: memref<32x128xbf16, #tpu.memory_space<vmem>>, %arg3: memref<1x128xf32, #tpu.memory_space<vmem>>, %arg4: memref<1x128xf32, #tpu.memory_space<vmem>>, %arg5: memref<2048x128xbf16, #tpu.memory_space<vmem>>) attributes {dimension_semantics = [#tpu.dimension_semantics<parallel>], iteration_bounds = array<i64: 4>, scalar_prefetch = 0 : i64, scratch_operands = 0 : i64, tpu.core_type = #tpu.core_type<tc>, window_params = [{transform_indices = @transform_0, window_bounds = array<i64: 2048, 32>}, {pipeline_mode = #tpu.pipeline_mode<synchronous>, transform_indices = @transform_1, window_bounds = array<i64: 32, 128>}, {pipeline_mode = #tpu.pipeline_mode<synchronous>, transform_indices = @transform_2, window_bounds = array<i64: 1, 128>}, {pipeline_mode = #tpu.pipeline_mode<synchronous>, transform_indices = @transform_3, window_bounds = array<i64: 1, 128>}, {transform_indices = @transform_4, window_bounds = array<i64: 2048, 128>}]} {
    %c0 = arith.constant 0 : index
    %c0_0 = arith.constant 0 : index
    %0 = vector.load %arg1[%c0, %c0_0] : memref<2048x32xbf16, #tpu.memory_space<vmem>>, vector<2048x32xbf16>
    %c0_1 = arith.constant 0 : index
    %c0_2 = arith.constant 0 : index
    %1 = vector.load %arg2[%c0_1, %c0_2] : memref<32x128xbf16, #tpu.memory_space<vmem>>, vector<32x128xbf16>
    %cst = arith.constant dense<0.000000e+00> : vector<2048x128xf32>
    %2 = tpu.matmul %0, %1, %cst {dimension_numbers = #tpu.dot_dimension_numbers<[1], [0], [0], [1], [0, 0, 1, 1], [], []>} : vector<2048x32xbf16>, vector<32x128xbf16>, vector<2048x128xf32> -> vector<2048x128xf32>
    %c0_3 = arith.constant 0 : index
    %c0_4 = arith.constant 0 : index
    %3 = vector.load %arg3[%c0_3, %c0_4] : memref<1x128xf32, #tpu.memory_space<vmem>>, vector<1x128xf32>
    %4 = vector.broadcast %3 : vector<1x128xf32> to vector<2048x128xf32>
    %5 = arith.mulf %2, %4 : vector<2048x128xf32>
    %c0_5 = arith.constant 0 : index
    %c0_6 = arith.constant 0 : index
    %6 = vector.load %arg4[%c0_5, %c0_6] : memref<1x128xf32, #tpu.memory_space<vmem>>, vector<1x128xf32>
    %7 = vector.broadcast %6 : vector<1x128xf32> to vector<2048x128xf32>
    %8 = arith.addf %5, %7 : vector<2048x128xf32>
    %cst_7 = arith.constant 0.000000e+00 : f32
    %9 = vector.broadcast %cst_7 : f32 to vector<2048x128xf32>
    %10 = arith.maximumf %8, %9 : vector<2048x128xf32>
    %11 = arith.truncf %10 : vector<2048x128xf32> to vector<2048x128xbf16>
    %c0_8 = arith.constant 0 : index
    %c0_9 = arith.constant 0 : index
    %12 = vector.load %arg5[%c0_8, %c0_9] : memref<2048x128xbf16, #tpu.memory_space<vmem>>, vector<2048x128xbf16>
    tpu.vector_store %arg5[%c0_8, %c0_9], %11 {strides = array<i32>} : memref<2048x128xbf16, #tpu.memory_space<vmem>>, vector<2048x128xbf16>,
    return
  }
  func.func @transform_0(%arg0: i32) -> (i32, i32) {
    %c0_i32 = arith.constant 0 : i32
    %c0_i32_0 = arith.constant 0 : i32
    return %arg0, %c0_i32 : i32, i32
  }
  func.func @transform_1(%arg0: i32) -> (i32, i32) {
    %c0_i32 = arith.constant 0 : i32
    %c0_i32_0 = arith.constant 0 : i32
    %c0_i32_1 = arith.constant 0 : i32
    return %c0_i32, %c0_i32_0 : i32, i32
  }
  func.func @transform_2(%arg0: i32) -> (i32, i32) {
    %c0_i32 = arith.constant 0 : i32
    %c0_i32_0 = arith.constant 0 : i32
    %c0_i32_1 = arith.constant 0 : i32
    return %c0_i32, %c0_i32_0 : i32, i32
  }
  func.func @transform_3(%arg0: i32) -> (i32, i32) {
    %c0_i32 = arith.constant 0 : i32
    %c0_i32_0 = arith.constant 0 : i32
    %c0_i32_1 = arith.constant 0 : i32
    return %c0_i32, %c0_i32_0 : i32, i32
  }
  func.func @transform_4(%arg0: i32) -> (i32, i32) {
    %c0_i32 = arith.constant 0 : i32
    %c0_i32_0 = arith.constant 0 : i32
    return %arg0, %c0_i32 : i32, i32
  }
}

module attributes {stable_mosaic.version = 11 : i64} {
  func.func @kernel(%arg0: i32, %arg1: memref<1024x160xbf16, #tpu.memory_space<vmem>>, %arg2: memref<160x128xbf16, #tpu.memory_space<vmem>>, %arg3: memref<1x128xf32, #tpu.memory_space<vmem>>, %arg4: memref<1x128xf32, #tpu.memory_space<vmem>>, %arg5: memref<1024x128xbf16, #tpu.memory_space<vmem>>) attributes {dimension_semantics = [#tpu.dimension_semantics<parallel>], iteration_bounds = array<i64: 2>, scalar_prefetch = 0 : i64, scratch_operands = 0 : i64, tpu.core_type = #tpu.core_type<tc>, window_params = [{transform_indices = @transform_0, window_bounds = array<i64: 1024, 160>}, {pipeline_mode = #tpu.pipeline_mode<synchronous>, transform_indices = @transform_1, window_bounds = array<i64: 160, 128>}, {pipeline_mode = #tpu.pipeline_mode<synchronous>, transform_indices = @transform_2, window_bounds = array<i64: 1, 128>}, {pipeline_mode = #tpu.pipeline_mode<synchronous>, transform_indices = @transform_3, window_bounds = array<i64: 1, 128>}, {transform_indices = @transform_4, window_bounds = array<i64: 1024, 128>}]} {
    %c0 = arith.constant 0 : index
    %c0_0 = arith.constant 0 : index
    %0 = vector.load %arg1[%c0, %c0_0] : memref<1024x160xbf16, #tpu.memory_space<vmem>>, vector<1024x160xbf16>
    %c0_1 = arith.constant 0 : index
    %c0_2 = arith.constant 0 : index
    %1 = vector.load %arg2[%c0_1, %c0_2] : memref<160x128xbf16, #tpu.memory_space<vmem>>, vector<160x128xbf16>
    %cst = arith.constant dense<0.000000e+00> : vector<1024x128xf32>
    %2 = tpu.matmul %0, %1, %cst {dimension_numbers = #tpu.dot_dimension_numbers<[1], [0], [0], [1], [0, 0, 1, 1], [], []>} : vector<1024x160xbf16>, vector<160x128xbf16>, vector<1024x128xf32> -> vector<1024x128xf32>
    %c0_3 = arith.constant 0 : index
    %c0_4 = arith.constant 0 : index
    %3 = vector.load %arg3[%c0_3, %c0_4] : memref<1x128xf32, #tpu.memory_space<vmem>>, vector<1x128xf32>
    %4 = vector.broadcast %3 : vector<1x128xf32> to vector<1024x128xf32>
    %5 = arith.mulf %2, %4 : vector<1024x128xf32>
    %c0_5 = arith.constant 0 : index
    %c0_6 = arith.constant 0 : index
    %6 = vector.load %arg4[%c0_5, %c0_6] : memref<1x128xf32, #tpu.memory_space<vmem>>, vector<1x128xf32>
    %7 = vector.broadcast %6 : vector<1x128xf32> to vector<1024x128xf32>
    %8 = arith.addf %5, %7 : vector<1024x128xf32>
    %cst_7 = arith.constant 0.000000e+00 : f32
    %9 = vector.broadcast %cst_7 : f32 to vector<1024x128xf32>
    %10 = arith.maximumf %8, %9 : vector<1024x128xf32>
    %11 = arith.truncf %10 : vector<1024x128xf32> to vector<1024x128xbf16>
    %c0_8 = arith.constant 0 : index
    %c0_9 = arith.constant 0 : index
    %12 = vector.load %arg5[%c0_8, %c0_9] : memref<1024x128xbf16, #tpu.memory_space<vmem>>, vector<1024x128xbf16>
    tpu.vector_store %arg5[%c0_8, %c0_9], %11 {strides = array<i32>} : memref<1024x128xbf16, #tpu.memory_space<vmem>>, vector<1024x128xbf16>,
    return
  }
  func.func @transform_0(%arg0: i32) -> (i32, i32) {
    %c0_i32 = arith.constant 0 : i32
    %c0_i32_0 = arith.constant 0 : i32
    return %arg0, %c0_i32 : i32, i32
  }
  func.func @transform_1(%arg0: i32) -> (i32, i32) {
    %c0_i32 = arith.constant 0 : i32
    %c0_i32_0 = arith.constant 0 : i32
    %c0_i32_1 = arith.constant 0 : i32
    return %c0_i32, %c0_i32_0 : i32, i32
  }
  func.func @transform_2(%arg0: i32) -> (i32, i32) {
    %c0_i32 = arith.constant 0 : i32
    %c0_i32_0 = arith.constant 0 : i32
    %c0_i32_1 = arith.constant 0 : i32
    return %c0_i32, %c0_i32_0 : i32, i32
  }
  func.func @transform_3(%arg0: i32) -> (i32, i32) {
    %c0_i32 = arith.constant 0 : i32
    %c0_i32_0 = arith.constant 0 : i32
    %c0_i32_1 = arith.constant 0 : i32
    return %c0_i32, %c0_i32_0 : i32, i32
  }
  func.func @transform_4(%arg0: i32) -> (i32, i32) {
    %c0_i32 = arith.constant 0 : i32
    %c0_i32_0 = arith.constant 0 : i32
    return %arg0, %c0_i32 : i32, i32
  }
}

module attributes {stable_mosaic.version = 11 : i64} {
  func.func @kernel(%arg0: i32, %arg1: memref<256x288xbf16, #tpu.memory_space<vmem>>, %arg2: memref<288x128xbf16, #tpu.memory_space<vmem>>, %arg3: memref<1x128xf32, #tpu.memory_space<vmem>>, %arg4: memref<1x128xf32, #tpu.memory_space<vmem>>, %arg5: memref<256x128xbf16, #tpu.memory_space<vmem>>) attributes {dimension_semantics = [#tpu.dimension_semantics<parallel>], iteration_bounds = array<i64: 2>, scalar_prefetch = 0 : i64, scratch_operands = 0 : i64, tpu.core_type = #tpu.core_type<tc>, window_params = [{transform_indices = @transform_0, window_bounds = array<i64: 256, 288>}, {pipeline_mode = #tpu.pipeline_mode<synchronous>, transform_indices = @transform_1, window_bounds = array<i64: 288, 128>}, {pipeline_mode = #tpu.pipeline_mode<synchronous>, transform_indices = @transform_2, window_bounds = array<i64: 1, 128>}, {pipeline_mode = #tpu.pipeline_mode<synchronous>, transform_indices = @transform_3, window_bounds = array<i64: 1, 128>}, {transform_indices = @transform_4, window_bounds = array<i64: 256, 128>}]} {
    %c0 = arith.constant 0 : index
    %c0_0 = arith.constant 0 : index
    %0 = vector.load %arg1[%c0, %c0_0] : memref<256x288xbf16, #tpu.memory_space<vmem>>, vector<256x288xbf16>
    %c0_1 = arith.constant 0 : index
    %c0_2 = arith.constant 0 : index
    %1 = vector.load %arg2[%c0_1, %c0_2] : memref<288x128xbf16, #tpu.memory_space<vmem>>, vector<288x128xbf16>
    %cst = arith.constant dense<0.000000e+00> : vector<256x128xf32>
    %2 = tpu.matmul %0, %1, %cst {dimension_numbers = #tpu.dot_dimension_numbers<[1], [0], [0], [1], [0, 0, 1, 1], [], []>} : vector<256x288xbf16>, vector<288x128xbf16>, vector<256x128xf32> -> vector<256x128xf32>
    %c0_3 = arith.constant 0 : index
    %c0_4 = arith.constant 0 : index
    %3 = vector.load %arg3[%c0_3, %c0_4] : memref<1x128xf32, #tpu.memory_space<vmem>>, vector<1x128xf32>
    %4 = vector.broadcast %3 : vector<1x128xf32> to vector<256x128xf32>
    %5 = arith.mulf %2, %4 : vector<256x128xf32>
    %c0_5 = arith.constant 0 : index
    %c0_6 = arith.constant 0 : index
    %6 = vector.load %arg4[%c0_5, %c0_6] : memref<1x128xf32, #tpu.memory_space<vmem>>, vector<1x128xf32>
    %7 = vector.broadcast %6 : vector<1x128xf32> to vector<256x128xf32>
    %8 = arith.addf %5, %7 : vector<256x128xf32>
    %cst_7 = arith.constant 0.000000e+00 : f32
    %9 = vector.broadcast %cst_7 : f32 to vector<256x128xf32>
    %10 = arith.maximumf %8, %9 : vector<256x128xf32>
    %11 = arith.truncf %10 : vector<256x128xf32> to vector<256x128xbf16>
    %c0_8 = arith.constant 0 : index
    %c0_9 = arith.constant 0 : index
    %12 = vector.load %arg5[%c0_8, %c0_9] : memref<256x128xbf16, #tpu.memory_space<vmem>>, vector<256x128xbf16>
    tpu.vector_store %arg5[%c0_8, %c0_9], %11 {strides = array<i32>} : memref<256x128xbf16, #tpu.memory_space<vmem>>, vector<256x128xbf16>,
    return
  }
  func.func @transform_0(%arg0: i32) -> (i32, i32) {
    %c0_i32 = arith.constant 0 : i32
    %c0_i32_0 = arith.constant 0 : i32
    return %arg0, %c0_i32 : i32, i32
  }
  func.func @transform_1(%arg0: i32) -> (i32, i32) {
    %c0_i32 = arith.constant 0 : i32
    %c0_i32_0 = arith.constant 0 : i32
    %c0_i32_1 = arith.constant 0 : i32
    return %c0_i32, %c0_i32_0 : i32, i32
  }
  func.func @transform_2(%arg0: i32) -> (i32, i32) {
    %c0_i32 = arith.constant 0 : i32
    %c0_i32_0 = arith.constant 0 : i32
    %c0_i32_1 = arith.constant 0 : i32
    return %c0_i32, %c0_i32_0 : i32, i32
  }
  func.func @transform_3(%arg0: i32) -> (i32, i32) {
    %c0_i32 = arith.constant 0 : i32
    %c0_i32_0 = arith.constant 0 : i32
    %c0_i32_1 = arith.constant 0 : i32
    return %c0_i32, %c0_i32_0 : i32, i32
  }
  func.func @transform_4(%arg0: i32) -> (i32, i32) {
    %c0_i32 = arith.constant 0 : i32
    %c0_i32_0 = arith.constant 0 : i32
    return %arg0, %c0_i32 : i32, i32
  }
}

module attributes {stable_mosaic.version = 11 : i64} {
  func.func @kernel(%arg0: i32, %arg1: memref<128x576xbf16, #tpu.memory_space<vmem>>, %arg2: memref<576x128xbf16, #tpu.memory_space<vmem>>, %arg3: memref<1x128xf32, #tpu.memory_space<vmem>>, %arg4: memref<1x128xf32, #tpu.memory_space<vmem>>, %arg5: memref<128x128xbf16, #tpu.memory_space<vmem>>) attributes {dimension_semantics = [#tpu.dimension_semantics<parallel>], iteration_bounds = array<i64: 1>, scalar_prefetch = 0 : i64, scratch_operands = 0 : i64, tpu.core_type = #tpu.core_type<tc>, window_params = [{transform_indices = @transform_0, window_bounds = array<i64: 128, 576>}, {pipeline_mode = #tpu.pipeline_mode<synchronous>, transform_indices = @transform_1, window_bounds = array<i64: 576, 128>}, {pipeline_mode = #tpu.pipeline_mode<synchronous>, transform_indices = @transform_2, window_bounds = array<i64: 1, 128>}, {pipeline_mode = #tpu.pipeline_mode<synchronous>, transform_indices = @transform_3, window_bounds = array<i64: 1, 128>}, {transform_indices = @transform_4, window_bounds = array<i64: 128, 128>}]} {
    %c0 = arith.constant 0 : index
    %c0_0 = arith.constant 0 : index
    %0 = vector.load %arg1[%c0, %c0_0] : memref<128x576xbf16, #tpu.memory_space<vmem>>, vector<128x576xbf16>
    %c0_1 = arith.constant 0 : index
    %c0_2 = arith.constant 0 : index
    %1 = vector.load %arg2[%c0_1, %c0_2] : memref<576x128xbf16, #tpu.memory_space<vmem>>, vector<576x128xbf16>
    %cst = arith.constant dense<0.000000e+00> : vector<128x128xf32>
    %2 = tpu.matmul %0, %1, %cst {dimension_numbers = #tpu.dot_dimension_numbers<[1], [0], [0], [1], [0, 0, 1, 1], [], []>} : vector<128x576xbf16>, vector<576x128xbf16>, vector<128x128xf32> -> vector<128x128xf32>
    %c0_3 = arith.constant 0 : index
    %c0_4 = arith.constant 0 : index
    %3 = vector.load %arg3[%c0_3, %c0_4] : memref<1x128xf32, #tpu.memory_space<vmem>>, vector<1x128xf32>
    %4 = vector.broadcast %3 : vector<1x128xf32> to vector<128x128xf32>
    %5 = arith.mulf %2, %4 : vector<128x128xf32>
    %c0_5 = arith.constant 0 : index
    %c0_6 = arith.constant 0 : index
    %6 = vector.load %arg4[%c0_5, %c0_6] : memref<1x128xf32, #tpu.memory_space<vmem>>, vector<1x128xf32>
    %7 = vector.broadcast %6 : vector<1x128xf32> to vector<128x128xf32>
    %8 = arith.addf %5, %7 : vector<128x128xf32>
    %cst_7 = arith.constant 0.000000e+00 : f32
    %9 = vector.broadcast %cst_7 : f32 to vector<128x128xf32>
    %10 = arith.maximumf %8, %9 : vector<128x128xf32>
    %11 = arith.truncf %10 : vector<128x128xf32> to vector<128x128xbf16>
    %c0_8 = arith.constant 0 : index
    %c0_9 = arith.constant 0 : index
    %12 = vector.load %arg5[%c0_8, %c0_9] : memref<128x128xbf16, #tpu.memory_space<vmem>>, vector<128x128xbf16>
    tpu.vector_store %arg5[%c0_8, %c0_9], %11 {strides = array<i32>} : memref<128x128xbf16, #tpu.memory_space<vmem>>, vector<128x128xbf16>,
    return
  }
  func.func @transform_0(%arg0: i32) -> (i32, i32) {
    %c0_i32 = arith.constant 0 : i32
    %c0_i32_0 = arith.constant 0 : i32
    return %arg0, %c0_i32 : i32, i32
  }
  func.func @transform_1(%arg0: i32) -> (i32, i32) {
    %c0_i32 = arith.constant 0 : i32
    %c0_i32_0 = arith.constant 0 : i32
    %c0_i32_1 = arith.constant 0 : i32
    return %c0_i32, %c0_i32_0 : i32, i32
  }
  func.func @transform_2(%arg0: i32) -> (i32, i32) {
    %c0_i32 = arith.constant 0 : i32
    %c0_i32_0 = arith.constant 0 : i32
    %c0_i32_1 = arith.constant 0 : i32
    return %c0_i32, %c0_i32_0 : i32, i32
  }
  func.func @transform_3(%arg0: i32) -> (i32, i32) {
    %c0_i32 = arith.constant 0 : i32
    %c0_i32_0 = arith.constant 0 : i32
    %c0_i32_1 = arith.constant 0 : i32
    return %c0_i32, %c0_i32_0 : i32, i32
  }
  func.func @transform_4(%arg0: i32) -> (i32, i32) {
    %c0_i32 = arith.constant 0 : i32
    %c0_i32_0 = arith.constant 0 : i32
    return %arg0, %c0_i32 : i32, i32
  }
}

module attributes {stable_mosaic.version = 11 : i64} {
  func.func @kernel(%arg0: i32, %arg1: memref<32x1152xbf16, #tpu.memory_space<vmem>>, %arg2: memref<1152x256xbf16, #tpu.memory_space<vmem>>, %arg3: memref<1x256xf32, #tpu.memory_space<vmem>>, %arg4: memref<1x256xf32, #tpu.memory_space<vmem>>, %arg5: memref<32x256xbf16, #tpu.memory_space<vmem>>) attributes {dimension_semantics = [#tpu.dimension_semantics<parallel>], iteration_bounds = array<i64: 1>, scalar_prefetch = 0 : i64, scratch_operands = 0 : i64, tpu.core_type = #tpu.core_type<tc>, window_params = [{transform_indices = @transform_0, window_bounds = array<i64: 32, 1152>}, {pipeline_mode = #tpu.pipeline_mode<synchronous>, transform_indices = @transform_1, window_bounds = array<i64: 1152, 256>}, {pipeline_mode = #tpu.pipeline_mode<synchronous>, transform_indices = @transform_2, window_bounds = array<i64: 1, 256>}, {pipeline_mode = #tpu.pipeline_mode<synchronous>, transform_indices = @transform_3, window_bounds = array<i64: 1, 256>}, {transform_indices = @transform_4, window_bounds = array<i64: 32, 256>}]} {
    %c0 = arith.constant 0 : index
    %c0_0 = arith.constant 0 : index
    %0 = vector.load %arg1[%c0, %c0_0] : memref<32x1152xbf16, #tpu.memory_space<vmem>>, vector<32x1152xbf16>
    %c0_1 = arith.constant 0 : index
    %c0_2 = arith.constant 0 : index
    %1 = vector.load %arg2[%c0_1, %c0_2] : memref<1152x256xbf16, #tpu.memory_space<vmem>>, vector<1152x256xbf16>
    %cst = arith.constant dense<0.000000e+00> : vector<32x256xf32>
    %2 = tpu.matmul %0, %1, %cst {dimension_numbers = #tpu.dot_dimension_numbers<[1], [0], [0], [1], [0, 0, 1, 1], [], []>} : vector<32x1152xbf16>, vector<1152x256xbf16>, vector<32x256xf32> -> vector<32x256xf32>
    %c0_3 = arith.constant 0 : index
    %c0_4 = arith.constant 0 : index
    %3 = vector.load %arg3[%c0_3, %c0_4] : memref<1x256xf32, #tpu.memory_space<vmem>>, vector<1x256xf32>
    %4 = vector.broadcast %3 : vector<1x256xf32> to vector<32x256xf32>
    %5 = arith.mulf %2, %4 : vector<32x256xf32>
    %c0_5 = arith.constant 0 : index
    %c0_6 = arith.constant 0 : index
    %6 = vector.load %arg4[%c0_5, %c0_6] : memref<1x256xf32, #tpu.memory_space<vmem>>, vector<1x256xf32>
    %7 = vector.broadcast %6 : vector<1x256xf32> to vector<32x256xf32>
    %8 = arith.addf %5, %7 : vector<32x256xf32>
    %cst_7 = arith.constant 0.000000e+00 : f32
    %9 = vector.broadcast %cst_7 : f32 to vector<32x256xf32>
    %10 = arith.maximumf %8, %9 : vector<32x256xf32>
    %11 = arith.truncf %10 : vector<32x256xf32> to vector<32x256xbf16>
    %c0_8 = arith.constant 0 : index
    %c0_9 = arith.constant 0 : index
    %12 = vector.load %arg5[%c0_8, %c0_9] : memref<32x256xbf16, #tpu.memory_space<vmem>>, vector<32x256xbf16>
    tpu.vector_store %arg5[%c0_8, %c0_9], %11 {strides = array<i32>} : memref<32x256xbf16, #tpu.memory_space<vmem>>, vector<32x256xbf16>,
    return
  }
  func.func @transform_0(%arg0: i32) -> (i32, i32) {
    %c0_i32 = arith.constant 0 : i32
    %c0_i32_0 = arith.constant 0 : i32
    return %arg0, %c0_i32 : i32, i32
  }
  func.func @transform_1(%arg0: i32) -> (i32, i32) {
    %c0_i32 = arith.constant 0 : i32
    %c0_i32_0 = arith.constant 0 : i32
    %c0_i32_1 = arith.constant 0 : i32
    return %c0_i32, %c0_i32_0 : i32, i32
  }
  func.func @transform_2(%arg0: i32) -> (i32, i32) {
    %c0_i32 = arith.constant 0 : i32
    %c0_i32_0 = arith.constant 0 : i32
    %c0_i32_1 = arith.constant 0 : i32
    return %c0_i32, %c0_i32_0 : i32, i32
  }
  func.func @transform_3(%arg0: i32) -> (i32, i32) {
    %c0_i32 = arith.constant 0 : i32
    %c0_i32_0 = arith.constant 0 : i32
    %c0_i32_1 = arith.constant 0 : i32
    return %c0_i32, %c0_i32_0 : i32, i32
  }
  func.func @transform_4(%arg0: i32) -> (i32, i32) {
    %c0_i32 = arith.constant 0 : i32
    %c0_i32_0 = arith.constant 0 : i32
    return %arg0, %c0_i32 : i32, i32
  }
}

module attributes {stable_mosaic.version = 11 : i64} {
  func.func @kernel(%arg0: i32, %arg1: memref<32x2304xbf16, #tpu.memory_space<vmem>>, %arg2: memref<2304x128xbf16, #tpu.memory_space<vmem>>, %arg3: memref<1x128xf32, #tpu.memory_space<vmem>>, %arg4: memref<1x128xf32, #tpu.memory_space<vmem>>, %arg5: memref<32x128xf32, #tpu.memory_space<vmem>>) attributes {dimension_semantics = [#tpu.dimension_semantics<parallel>], iteration_bounds = array<i64: 1>, scalar_prefetch = 0 : i64, scratch_operands = 0 : i64, tpu.core_type = #tpu.core_type<tc>, window_params = [{transform_indices = @transform_0, window_bounds = array<i64: 32, 2304>}, {pipeline_mode = #tpu.pipeline_mode<synchronous>, transform_indices = @transform_1, window_bounds = array<i64: 2304, 128>}, {pipeline_mode = #tpu.pipeline_mode<synchronous>, transform_indices = @transform_2, window_bounds = array<i64: 1, 128>}, {pipeline_mode = #tpu.pipeline_mode<synchronous>, transform_indices = @transform_3, window_bounds = array<i64: 1, 128>}, {transform_indices = @transform_4, window_bounds = array<i64: 32, 128>}]} {
    %c0 = arith.constant 0 : index
    %c0_0 = arith.constant 0 : index
    %0 = vector.load %arg1[%c0, %c0_0] : memref<32x2304xbf16, #tpu.memory_space<vmem>>, vector<32x2304xbf16>
    %c0_1 = arith.constant 0 : index
    %c0_2 = arith.constant 0 : index
    %1 = vector.load %arg2[%c0_1, %c0_2] : memref<2304x128xbf16, #tpu.memory_space<vmem>>, vector<2304x128xbf16>
    %cst = arith.constant dense<0.000000e+00> : vector<32x128xf32>
    %2 = tpu.matmul %0, %1, %cst {dimension_numbers = #tpu.dot_dimension_numbers<[1], [0], [0], [1], [0, 0, 1, 1], [], []>} : vector<32x2304xbf16>, vector<2304x128xbf16>, vector<32x128xf32> -> vector<32x128xf32>
    %c0_3 = arith.constant 0 : index
    %c0_4 = arith.constant 0 : index
    %3 = vector.load %arg3[%c0_3, %c0_4] : memref<1x128xf32, #tpu.memory_space<vmem>>, vector<1x128xf32>
    %4 = vector.broadcast %3 : vector<1x128xf32> to vector<32x128xf32>
    %5 = arith.mulf %2, %4 : vector<32x128xf32>
    %c0_5 = arith.constant 0 : index
    %c0_6 = arith.constant 0 : index
    %6 = vector.load %arg4[%c0_5, %c0_6] : memref<1x128xf32, #tpu.memory_space<vmem>>, vector<1x128xf32>
    %7 = vector.broadcast %6 : vector<1x128xf32> to vector<32x128xf32>
    %8 = arith.addf %5, %7 : vector<32x128xf32>
    %9 = arith.negf %8 : vector<32x128xf32>
    %10 = math.exp %9 : vector<32x128xf32>
    %cst_7 = arith.constant 1.000000e+00 : f32
    %11 = vector.broadcast %cst_7 : f32 to vector<32x128xf32>
    %12 = arith.addf %11, %10 : vector<32x128xf32>
    %13 = arith.divf %11, %12 : vector<32x128xf32>
    %c0_8 = arith.constant 0 : index
    %c0_9 = arith.constant 0 : index
    %14 = vector.load %arg5[%c0_8, %c0_9] : memref<32x128xf32, #tpu.memory_space<vmem>>, vector<32x128xf32>
    tpu.vector_store %arg5[%c0_8, %c0_9], %13 {strides = array<i32>} : memref<32x128xf32, #tpu.memory_space<vmem>>, vector<32x128xf32>,
    return
  }
  func.func @transform_0(%arg0: i32) -> (i32, i32) {
    %c0_i32 = arith.constant 0 : i32
    %c0_i32_0 = arith.constant 0 : i32
    return %arg0, %c0_i32 : i32, i32
  }
  func.func @transform_1(%arg0: i32) -> (i32, i32) {
    %c0_i32 = arith.constant 0 : i32
    %c0_i32_0 = arith.constant 0 : i32
    %c0_i32_1 = arith.constant 0 : i32
    return %c0_i32, %c0_i32_0 : i32, i32
  }
  func.func @transform_2(%arg0: i32) -> (i32, i32) {
    %c0_i32 = arith.constant 0 : i32
    %c0_i32_0 = arith.constant 0 : i32
    %c0_i32_1 = arith.constant 0 : i32
    return %c0_i32, %c0_i32_0 : i32, i32
  }
  func.func @transform_3(%arg0: i32) -> (i32, i32) {
    %c0_i32 = arith.constant 0 : i32
    %c0_i32_0 = arith.constant 0 : i32
    %c0_i32_1 = arith.constant 0 : i32
    return %c0_i32, %c0_i32_0 : i32, i32
  }
  func.func @transform_4(%arg0: i32) -> (i32, i32) {
    %c0_i32 = arith.constant 0 : i32
    %c0_i32_0 = arith.constant 0 : i32
    return %arg0, %c0_i32 : i32, i32
  }
}

</mosaic_0001>

<bundles_post_ra>
// kernel: wav2lip_disc_forward.6
= control target key start
LH: loop header
LB: loop body
LE: loop exit
PB: predicated region body
PF: predicated region fallthrough
CT: control target
= control target key end

     0   :  { %s6793_s15 = smov 0   ;;  %s7753_s0 = inlined_call_operand.vmem [shape: bf16[8192,32], index: 0, kind: input, shape index: {}]   ;;  %s7754_s1 = inlined_call_operand.vmem [shape: bf16[32,128], index: 1, kind: input, shape index: {}]   ;;  %s7755_s2 = inlined_call_operand.vmem [shape: f32[1,128], index: 2, kind: input, shape index: {}]   ;;  %s7756_s3 = inlined_call_operand.vmem [shape: f32[1,128], index: 3, kind: input, shape index: {}]   ;;  %s7757_s4 = inlined_call_operand.vmem [shape: bf16[8192,128], index: 4, kind: output, shape index: {}]  }
   0x1 LB: > { %s4674_s16 = sadd.s32 4294967295, %s6766_s15   ;;  %p4678_p0 = scmp.ge.s32.totalorder %s6766_s15, 1  ;;  %s6766_s15 = sphi %s6793_s15, %s14_s15  }
   0x2   : > { %p163_p1 = scmp.lt.s32.totalorder %s6766_s15, 5 }
   0x4   : > { %p164_p2 = pnand %p4678_p0, %p163_p1 }
   0x5   : > { %v6626_v0 = vld [vmem:[%s7754_s1] sm:$0xff] (!%p164_p2)   ;;  %s4679_s19 = sshll.u32 (!%p164_p2), %s4674_s16, 8  ;;  %v6627_v1 = vld [vmem:[%s7754_s1 + $0x8] sm:$0xff] (!%p164_p2)   ;;  %vm1114_vm0 = vcmask (!%p164_p2), 261120  }
   0x6   : > { %167 = sbr.rel (%p164_p2) target bundleno = 492 (0x1ec), region = 36  ;;  %p190_p3 = scmp.lt.s32.totalorder (!%p164_p2), %s4679_s19, 1023  ;;  %6354 = vmatprep.subr.bf16.mxu0 (!%p164_p2), %v6626_v0  ;;  %6614 = vmatprep.subr.bf16.mxu1 (!%p164_p2), %v6626_v0 }
   0x7   : > { %6355 = vmatpush3.bf16.msra.mxu0 (!%p164_p2), %v6626_v0  ;;  %6616 = vmatpush3.bf16.msra.mxu1 (!%p164_p2), %v6626_v0 }
   0x8   : > { %6356 = vmatprep.subr.bf16.mxu0 (!%p164_p2), %v6627_v1  ;;  %6615 = vmatprep.subr.bf16.mxu1 (!%p164_p2), %v6627_v1 }
   0xb   : > { %6357 = vmatpush3.bf16.msra.mxu0 (!%p164_p2), %v6627_v1  ;;  %6617 = vmatpush3.bf16.msra.mxu1 (!%p164_p2), %v6627_v1 }
   0xd   : > { %s7759_s19 = smov (!%p190_p3, %s4679_s19), 1023 }
   0xe   : > { %s4680_s22 = sshll.u32 %s7759_s19, 2 }
   0xf   : > { %s6815_s25 = scalar_lea.vmem %s7753_s0, %s4680_s22  ;;  %s7076_s6 = scalar_lea.vmem %s7757_s4, %s4680_s22 }
  0x10   : > { %v6628_v2 = vld [vmem:[%s6815_s25] sm:$0xff]   ;;  %v6630_v4 = vld [vmem:[%s6815_s25 + $0x8] sm:$0xff]   ;;  %v6632_v6 = vld [vmem:[%s6815_s25 + $0x10] sm:$0xff]  }
  0x11   : > { %v6629_v3 = vld [vmem:[%s6815_s25 + $0x200] sm:$0xff]   ;;  %6358 = vmatprep.mubr.msk.bf16.mxu0 %vm1114_vm0, %v6628_v2  ;;  %v6631_v5 = vld [vmem:[%s6815_s25 + $0x208] sm:$0xff]   ;;  %v6633_v7 = vld [vmem:[%s6815_s25 + $0x210] sm:$0xff]  }
  0x12   : > { %6486 = vmatprep.mubr.msk.bf16.mxu1 %vm1114_vm0, %v6629_v3  ;;  %6359 = vmatmul.mubr.msk.bf16.vlgmr.msra.gmra.mrb[0].mxu0 %vm1114_vm0, %v6630_v4  ;;  %v6634_v8 = vld [vmem:[%s6815_s25 + $0x18] sm:$0xff]   ;;  %v6636_v10 = vld [vmem:[%s6815_s25 + $0x20] sm:$0xff]   ;;  %v6638_v12 = vld [vmem:[%s6815_s25 + $0x28] sm:$0xff]  }
  0x13   : > { %6487 = vmatmul.mubr.msk.bf16.vlgmr.msra.gmra.mrb[0].mxu1 %vm1114_vm0, %v6631_v5  ;;  %6362 = vmatprep.mubr.msk.bf16.mxu0 %vm1114_vm0, %v6632_v6  ;;  %v6635_v9 = vld [vmem:[%s6815_s25 + $0x218] sm:$0xff]   ;;  %v6637_v11 = vld [vmem:[%s6815_s25 + $0x220] sm:$0xff]   ;;  %v6639_v13 = vld [vmem:[%s6815_s25 + $0x228] sm:$0xff]  }
  0x14   : > { %6490 = vmatprep.mubr.msk.bf16.mxu1 %vm1114_vm0, %v6633_v7  ;;  %v6640_v14 = vld [vmem:[%s6815_s25 + $0x30] sm:$0xff]   ;;  %v6642_v16 = vld [vmem:[%s6815_s25 + $0x38] sm:$0xff]   ;;  %v6644_v18 = vld [vmem:[%s6815_s25 + $0x40] sm:$0xff]  }
  0x15   : > { %v6641_v15 = vld [vmem:[%s6815_s25 + $0x230] sm:$0xff]   ;;  %v6643_v17 = vld [vmem:[%s6815_s25 + $0x238] sm:$0xff]   ;;  %v6645_v19 = vld [vmem:[%s6815_s25 + $0x240] sm:$0xff]  }
  0x16   : > { %v6646_v20 = vld [vmem:[%s6815_s25 + $0x48] sm:$0xff]   ;;  %v6648_v22 = vld [vmem:[%s6815_s25 + $0x50] sm:$0xff]   ;;  %v6650_v24 = vld [vmem:[%s6815_s25 + $0x58] sm:$0xff]  }
  0x17   : > { %v6647_v21 = vld [vmem:[%s6815_s25 + $0x248] sm:$0xff]   ;;  %v6649_v23 = vld [vmem:[%s6815_s25 + $0x250] sm:$0xff]   ;;  %v6651_v25 = vld [vmem:[%s6815_s25 + $0x258] sm:$0xff]  }
  0x18   : > { %v6652_v26 = vld [vmem:[%s6815_s25 + $0x60] sm:$0xff]   ;;  %v6654_v28 = vld [vmem:[%s6815_s25 + $0x68] sm:$0xff]   ;;  %v6656_v30 = vld [vmem:[%s6815_s25 + $0x70] sm:$0xff]  }
  0x19   : > { %v6653_v27 = vld [vmem:[%s6815_s25 + $0x260] sm:$0xff]   ;;  %v6655_v29 = vld [vmem:[%s6815_s25 + $0x268] sm:$0xff]   ;;  %v6657_v31 = vld [vmem:[%s6815_s25 + $0x270] sm:$0xff]  }
  0x1a   : > { %6363 = vmatmul.mubr.msk.bf16.gmra.mrb[4].mxu0 %vm1114_vm0, %v6634_v8  ;;  %v6658_v32 = vld [vmem:[%s6815_s25 + $0x78] sm:$0xff]   ;;  %v6660_v34 = vld [vmem:[%s6815_s25 + $0x80] sm:$0xff]   ;;  %v6662_v36 = vld [vmem:[%s6815_s25 + $0x88] sm:$0xff]  }
  0x1b   : > { %6491 = vmatmul.mubr.msk.bf16.gmra.mrb[4].mxu1 %vm1114_vm0, %v6635_v9  ;;  %6366 = vmatprep.mubr.msk.bf16.mxu0 %vm1114_vm0, %v6636_v10  ;;  %v6659_v33 = vld [vmem:[%s6815_s25 + $0x278] sm:$0xff]   ;;  %v6661_v35 = vld [vmem:[%s6815_s25 + $0x280] sm:$0xff]   ;;  %v6663_v37 = vld [vmem:[%s6815_s25 + $0x288] sm:$0xff]  }
  0x1c   : > { %6494 = vmatprep.mubr.msk.bf16.mxu1 %vm1114_vm0, %v6637_v11  ;;  %v6664_v38 = vld [vmem:[%s6815_s25 + $0x90] sm:$0xff]   ;;  %v6666_v40 = vld [vmem:[%s6815_s25 + $0x98] sm:$0xff]   ;;  %v6668_v42 = vld [vmem:[%s6815_s25 + $0xa0] sm:$0xff]  }
  0x1d   : > { %v6665_v39 = vld [vmem:[%s6815_s25 + $0x290] sm:$0xff]   ;;  %v6667_v41 = vld [vmem:[%s6815_s25 + $0x298] sm:$0xff]   ;;  %v6669_v43 = vld [vmem:[%s6815_s25 + $0x2a0] sm:$0xff]  }
  0x1e   : > { %v6670_v44 = vld [vmem:[%s6815_s25 + $0xa8] sm:$0xff]   ;;  %v6672_v46 = vld [vmem:[%s6815_s25 + $0xb0] sm:$0xff]   ;;  %v6674_v48 = vld [vmem:[%s6815_s25 + $0xb8] sm:$0xff]  }
  0x1f   : > { %v6671_v45 = vld [vmem:[%s6815_s25 + $0x2a8] sm:$0xff]   ;;  %v6673_v47 = vld [vmem:[%s6815_s25 + $0x2b0] sm:$0xff]   ;;  %v6675_v49 = vld [vmem:[%s6815_s25 + $0x2b8] sm:$0xff]  }
  0x20   : > { %v6676_v50 = vld [vmem:[%s6815_s25 + $0xc0] sm:$0xff]   ;;  %v6678_v52 = vld [vmem:[%s6815_s25 + $0xc8] sm:$0xff]   ;;  %v6680_v54 = vld [vmem:[%s6815_s25 + $0xd0] sm:$0xff]  }
  0x21   : > { %v6677_v51 = vld [vmem:[%s6815_s25 + $0x2c0] sm:$0xff]   ;;  %v6679_v53 = vld [vmem:[%s6815_s25 + $0x2c8] sm:$0xff]   ;;  %v6681_v55 = vld [vmem:[%s6815_s25 + $0x2d0] sm:$0xff]  }
  0x22   : > { %6367 = vmatmul.mubr.msk.bf16.gmra.mrb[8].mxu0 %vm1114_vm0, %v6638_v12  ;;  %v6682_v56 = vld [vmem:[%s6815_s25 + $0xd8] sm:$0xff]   ;;  %v6684_v58 = vld [vmem:[%s6815_s25 + $0xe0] sm:$0xff]   ;;  %v6686_v60 = vld [vmem:[%s6815_s25 + $0xe8] sm:$0xff]  }
  0x23   : > { %6495 = vmatmul.mubr.msk.bf16.gmra.mrb[8].mxu1 %vm1114_vm0, %v6639_v13  ;;  %6370 = vmatprep.mubr.msk.bf16.mxu0 %vm1114_vm0, %v6640_v14  ;;  %v6683_v57 = vld [vmem:[%s6815_s25 + $0x2d8] sm:$0xff]   ;;  %v6685_v59 = vld [vmem:[%s6815_s25 + $0x2e0] sm:$0xff]   ;;  %v6687_v61 = vld [vmem:[%s6815_s25 + $0x2e8] sm:$0xff]  }
  0x24   : > { %6498 = vmatprep.mubr.msk.bf16.mxu1 %vm1114_vm0, %v6641_v15  ;;  %v6688_v62 = vld [vmem:[%s6815_s25 + $0xf0] sm:$0xff]   ;;  %v6690_v0 = vld [vmem:[%s6815_s25 + $0xf8] sm:$0xff]   ;;  %v6692_v2 = vld [vmem:[%s6815_s25 + $0x100] sm:$0xff]  }
  0x25   : > { %v6689_v63 = vld [vmem:[%s6815_s25 + $0x2f0] sm:$0xff]   ;;  %v6691_v1 = vld [vmem:[%s6815_s25 + $0x2f8] sm:$0xff]   ;;  %v6693_v3 = vld [vmem:[%s6815_s25 + $0x300] sm:$0xff]  }
  0x26   : > { %v6694_v4 = vld [vmem:[%s6815_s25 + $0x108] sm:$0xff]   ;;  %v6696_v6 = vld [vmem:[%s6815_s25 + $0x110] sm:$0xff]   ;;  %v6698_v8 = vld [vmem:[%s6815_s25 + $0x118] sm:$0xff]  }
  0x27   : > { %v6695_v5 = vld [vmem:[%s6815_s25 + $0x308] sm:$0xff]   ;;  %v6697_v7 = vld [vmem:[%s6815_s25 + $0x310] sm:$0xff]   ;;  %v6699_v9 = vld [vmem:[%s6815_s25 + $0x318] sm:$0xff]  }
  0x28   : > { %v6700_v10 = vld [vmem:[%s6815_s25 + $0x120] sm:$0xff]   ;;  %v6702_v12 = vld [vmem:[%s6815_s25 + $0x128] sm:$0xff]   ;;  %v6704_v14 = vld [vmem:[%s6815_s25 + $0x130] sm:$0xff]  }
  0x29   : > { %v6701_v11 = vld [vmem:[%s6815_s25 + $0x320] sm:$0xff]   ;;  %v6703_v13 = vld [vmem:[%s6815_s25 + $0x328] sm:$0xff]   ;;  %v6705_v15 = vld [vmem:[%s6815_s25 + $0x330] sm:$0xff]  }
  0x2a   : > { %6371 = vmatmul.mubr.msk.bf16.gmra.mrb[12].mxu0 %vm1114_vm0, %v6642_v16  ;;  %v6706_v16 = vld [vmem:[%s6815_s25 + $0x138] sm:$0xff]  }
  0x2b   : > { %6499 = vmatmul.mubr.msk.bf16.gmra.mrb[12].mxu1 %vm1114_vm0, %v6643_v17  ;;  %6374 = vmatprep.mubr.msk.bf16.mxu0 %vm1114_vm0, %v6644_v18  ;;  %v6707_v17 = vld [vmem:[%s6815_s25 + $0x338] sm:$0xff]   ;;  %v6708_v18 = vld [vmem:[%s6815_s25 + $0x140] sm:$0xff]  }
  0x2c   : > { %6502 = vmatprep.mubr.msk.bf16.mxu1 %vm1114_vm0, %v6645_v19  ;;  %v6709_v19 = vld [vmem:[%s6815_s25 + $0x340] sm:$0xff]  }
  0x32   : > { %6375 = vmatmul.mubr.msk.bf16.gmra.mrb[16].mxu0 %vm1114_vm0, %v6646_v20  ;;  %v6710_v20 = vld [vmem:[%s6815_s25 + $0x148] sm:$0xff]  }
  0x33   : > { %6503 = vmatmul.mubr.msk.bf16.gmra.mrb[16].mxu1 %vm1114_vm0, %v6647_v21  ;;  %6378 = vmatprep.mubr.msk.bf16.mxu0 %vm1114_vm0, %v6648_v22  ;;  %v6711_v21 = vld [vmem:[%s6815_s25 + $0x348] sm:$0xff]   ;;  %v6712_v22 = vld [vmem:[%s6815_s25 + $0x150] sm:$0xff]  }
  0x34   : > { %6506 = vmatprep.mubr.msk.bf16.mxu1 %vm1114_vm0, %v6649_v23  ;;  %v6713_v23 = vld [vmem:[%s6815_s25 + $0x350] sm:$0xff]  }
  0x3a   : > { %6379 = vmatmul.mubr.msk.bf16.gmra.mrb[20].mxu0 %vm1114_vm0, %v6650_v24  ;;  %v6714_v24 = vld [vmem:[%s6815_s25 + $0x158] sm:$0xff]  }
  0x3b   : > { %6507 = vmatmul.mubr.msk.bf16.gmra.mrb[20].mxu1 %vm1114_vm0, %v6651_v25  ;;  %6382 = vmatprep.mubr.msk.bf16.mxu0 %vm1114_vm0, %v6652_v26  ;;  %v6715_v25 = vld [vmem:[%s6815_s25 + $0x358] sm:$0xff]   ;;  %v6716_v26 = vld [vmem:[%s6815_s25 + $0x160] sm:$0xff]  }
  0x3c   : > { %6510 = vmatprep.mubr.msk.bf16.mxu1 %vm1114_vm0, %v6653_v27  ;;  %v6717_v27 = vld [vmem:[%s6815_s25 + $0x360] sm:$0xff]  }
  0x42   : > { %6383 = vmatmul.mubr.msk.bf16.gmra.mrb[24].mxu0 %vm1114_vm0, %v6654_v28  ;;  %v6718_v28 = vld [vmem:[%s6815_s25 + $0x168] sm:$0xff]  }
  0x43   : > { %6511 = vmatmul.mubr.msk.bf16.gmra.mrb[24].mxu1 %vm1114_vm0, %v6655_v29  ;;  %6386 = vmatprep.mubr.msk.bf16.mxu0 %vm1114_vm0, %v6656_v30  ;;  %v6719_v29 = vld [vmem:[%s6815_s25 + $0x368] sm:$0xff]   ;;  %v6720_v30 = vld [vmem:[%s6815_s25 + $0x170] sm:$0xff]  }
  0x44   : > { %6514 = vmatprep.mubr.msk.bf16.mxu1 %vm1114_vm0, %v6657_v31  ;;  %v6721_v31 = vld [vmem:[%s6815_s25 + $0x370] sm:$0xff]  }
  0x4a   : > { %6387 = vmatmul.mubr.msk.bf16.gmra.mrb[28].mxu0 %vm1114_vm0, %v6658_v32  ;;  %v6722_v32 = vld [vmem:[%s6815_s25 + $0x178] sm:$0xff]  }
  0x4b   : > { %6515 = vmatmul.mubr.msk.bf16.gmra.mrb[28].mxu1 %vm1114_vm0, %v6659_v33  ;;  %6390 = vmatprep.mubr.msk.bf16.mxu0 %vm1114_vm0, %v6660_v34  ;;  %v6723_v33 = vld [vmem:[%s6815_s25 + $0x378] sm:$0xff]   ;;  %v6724_v34 = vld [vmem:[%s6815_s25 + $0x180] sm:$0xff]  }
  0x4c   : > { %6518 = vmatprep.mubr.msk.bf16.mxu1 %vm1114_vm0, %v6661_v35  ;;  %v6725_v35 = vld [vmem:[%s6815_s25 + $0x380] sm:$0xff]  }
  0x52   : > { %6391 = vmatmul.mubr.msk.bf16.gmra.mrb[32].mxu0 %vm1114_vm0, %v6662_v36  ;;  %v6726_v36 = vld [vmem:[%s6815_s25 + $0x188] sm:$0xff]  }
  0x53   : > { %6519 = vmatmul.mubr.msk.bf16.gmra.mrb[32].mxu1 %vm1114_vm0, %v6663_v37  ;;  %6394 = vmatprep.mubr.msk.bf16.mxu0 %vm1114_vm0, %v6664_v38  ;;  %v6727_v37 = vld [vmem:[%s6815_s25 + $0x388] sm:$0xff]   ;;  %v6728_v38 = vld [vmem:[%s6815_s25 + $0x190] sm:$0xff]  }
  0x54   : > { %6522 = vmatprep.mubr.msk.bf16.mxu1 %vm1114_vm0, %v6665_v39  ;;  %v6729_v39 = vld [vmem:[%s6815_s25 + $0x390] sm:$0xff]  }
  0x5a   : > { %6395 = vmatmul.mubr.msk.bf16.gmra.mrb[36].mxu0 %vm1114_vm0, %v6666_v40  ;;  %v6730_v40 = vld [vmem:[%s6815_s25 + $0x198] sm:$0xff]  }
  0x5b   : > { %6523 = vmatmul.mubr.msk.bf16.gmra.mrb[36].mxu1 %vm1114_vm0, %v6667_v41  ;;  %6398 = vmatprep.mubr.msk.bf16.mxu0 %vm1114_vm0, %v6668_v42  ;;  %v6731_v41 = vld [vmem:[%s6815_s25 + $0x398] sm:$0xff]   ;;  %v6732_v42 = vld [vmem:[%s6815_s25 + $0x1a0] sm:$0xff]  }
  0x5c   : > { %6526 = vmatprep.mubr.msk.bf16.mxu1 %vm1114_vm0, %v6669_v43  ;;  %v6733_v43 = vld [vmem:[%s6815_s25 + $0x3a0] sm:$0xff]  }
  0x62   : > { %6399 = vmatmul.mubr.msk.bf16.gmra.mrb[40].mxu0 %vm1114_vm0, %v6670_v44  ;;  %v6734_v44 = vld [vmem:[%s6815_s25 + $0x1a8] sm:$0xff]  }
  0x63   : > { %6527 = vmatmul.mubr.msk.bf16.gmra.mrb[40].mxu1 %vm1114_vm0, %v6671_v45  ;;  %6402 = vmatprep.mubr.msk.bf16.mxu0 %vm1114_vm0, %v6672_v46  ;;  %v6735_v45 = vld [vmem:[%s6815_s25 + $0x3a8] sm:$0xff]   ;;  %v6736_v46 = vld [vmem:[%s6815_s25 + $0x1b0] sm:$0xff]  }
  0x64   : > { %6530 = vmatprep.mubr.msk.bf16.mxu1 %vm1114_vm0, %v6673_v47  ;;  %v6737_v47 = vld [vmem:[%s6815_s25 + $0x3b0] sm:$0xff]  }
  0x6a   : > { %6403 = vmatmul.mubr.msk.bf16.gmra.mrb[44].mxu0 %vm1114_vm0, %v6674_v48  ;;  %v7038_v48 = vld [vmem:[%s7755_s2] ss:$0 sm:$0xff] }
  0x6b   : > { %6531 = vmatmul.mubr.msk.bf16.gmra.mrb[44].mxu1 %vm1114_vm0, %v6675_v49  ;;  %6406 = vmatprep.mubr.msk.bf16.mxu0 %vm1114_vm0, %v6676_v50  ;;  %v7045_v50 = vld [vmem:[%s7756_s3] ss:$0 sm:$0xff] }
  0x6c   : > { %6534 = vmatprep.mubr.msk.bf16.mxu1 %vm1114_vm0, %v6677_v51 }
  0x72   : > { %6407 = vmatmul.mubr.msk.bf16.gmra.mrb[48].mxu0 %vm1114_vm0, %v6678_v52 }
  0x73   : > { %6535 = vmatmul.mubr.msk.bf16.gmra.mrb[48].mxu1 %vm1114_vm0, %v6679_v53  ;;  %6410 = vmatprep.mubr.msk.bf16.mxu0 %vm1114_vm0, %v6680_v54  ;;  %v6738_v54 = vld [vmem:[%s6815_s25 + $0x1b8] sm:$0xff]  }
  0x74   : > { %6538 = vmatprep.mubr.msk.bf16.mxu1 %vm1114_vm0, %v6681_v55 }
  0x7a   : > { %6411 = vmatmul.mubr.msk.bf16.gmra.mrb[52].mxu0 %vm1114_vm0, %v6682_v56 }
  0x7b   : > { %6539 = vmatmul.mubr.msk.bf16.gmra.mrb[52].mxu1 %vm1114_vm0, %v6683_v57  ;;  %6414 = vmatprep.mubr.msk.bf16.mxu0 %vm1114_vm0, %v6684_v58 }
  0x7c   : > { %6542 = vmatprep.mubr.msk.bf16.mxu1 %vm1114_vm0, %v6685_v59  ;;  %v6739_v59 = vld [vmem:[%s6815_s25 + $0x3b8] sm:$0xff]  }
  0x82   : > { %6415 = vmatmul.mubr.msk.bf16.gmra.mrb[56].mxu0 %vm1114_vm0, %v6686_v60  ;;  %v6740_v60 = vld [vmem:[%s6815_s25 + $0x1c0] sm:$0xff]  }
  0x83   : > { %6543 = vmatmul.mubr.msk.bf16.gmra.mrb[56].mxu1 %vm1114_vm0, %v6687_v61  ;;  %6418 = vmatprep.mubr.msk.bf16.mxu0 %vm1114_vm0, %v6688_v62 }
  0x84   : > { %6546 = vmatprep.mubr.msk.bf16.mxu1 %vm1114_vm0, %v6689_v63 }
  0x8a   : > { %6419 = vmatmul.mubr.msk.bf16.gmra.mrb[60].mxu0 %vm1114_vm0, %v6690_v0 }
  0x8b   : > { %6547 = vmatmul.mubr.msk.bf16.gmra.mrb[60].mxu1 %vm1114_vm0, %v6691_v1  ;;  %6422 = vmatprep.mubr.msk.bf16.mxu0 %vm1114_vm0, %v6692_v2  ;;  %v6741_v2 = vld [vmem:[%s6815_s25 + $0x3c0] sm:$0xff]  }
  0x8c   : > { %6550 = vmatprep.mubr.msk.bf16.mxu1 %vm1114_vm0, %v6693_v3 }
  0x92   : > { %6423 = vmatmul.mubr.msk.bf16.gmra.mrb[64].mxu0 %vm1114_vm0, %v6694_v4 }
  0x93   : > { %6551 = vmatmul.mubr.msk.bf16.gmra.mrb[64].mxu1 %vm1114_vm0, %v6695_v5  ;;  %6426 = vmatprep.mubr.msk.bf16.mxu0 %vm1114_vm0, %v6696_v6 }
  0x94   : > { %6554 = vmatprep.mubr.msk.bf16.mxu1 %vm1114_vm0, %v6697_v7 }
  0x9a   : > { %6427 = vmatmul.mubr.msk.bf16.gmra.mrb[68].mxu0 %vm1114_vm0, %v6698_v8 }
  0x9b   : > { %6555 = vmatmul.mubr.msk.bf16.gmra.mrb[68].mxu1 %vm1114_vm0, %v6699_v9  ;;  %6430 = vmatprep.mubr.msk.bf16.mxu0 %vm1114_vm0, %v6700_v10 }
  0x9c   : > { %6558 = vmatprep.mubr.msk.bf16.mxu1 %vm1114_vm0, %v6701_v11 }
  0xa2   : > { %6431 = vmatmul.mubr.msk.bf16.gmra.mrb[72].mxu0 %vm1114_vm0, %v6702_v12 }
  0xa3   : > { %6559 = vmatmul.mubr.msk.bf16.gmra.mrb[72].mxu1 %vm1114_vm0, %v6703_v13  ;;  %6434 = vmatprep.mubr.msk.bf16.mxu0 %vm1114_vm0, %v6704_v14 }
  0xa4   : > { %6562 = vmatprep.mubr.msk.bf16.mxu1 %vm1114_vm0, %v6705_v15 }
  0xaa   : > { %6435 = vmatmul.mubr.msk.bf16.gmra.mrb[76].mxu0 %vm1114_vm0, %v6706_v16 }
  0xab   : > { %6563 = vmatmul.mubr.msk.bf16.gmra.mrb[76].mxu1 %vm1114_vm0, %v6707_v17  ;;  %6438 = vmatprep.mubr.msk.bf16.mxu0 %vm1114_vm0, %v6708_v18 }
  0xac   : > { %6566 = vmatprep.mubr.msk.bf16.mxu1 %vm1114_vm0, %v6709_v19 }
  0xb2   : > { %6439 = vmatmul.mubr.msk.bf16.gmra.mrb[80].mxu0 %vm1114_vm0, %v6710_v20 }
  0xb3   : > { %6567 = vmatmul.mubr.msk.bf16.gmra.mrb[80].mxu1 %vm1114_vm0, %v6711_v21  ;;  %6442 = vmatprep.mubr.msk.bf16.mxu0 %vm1114_vm0, %v6712_v22 }
  0xb4   : > { %6570 = vmatprep.mubr.msk.bf16.mxu1 %vm1114_vm0, %v6713_v23 }
  0xba   : > { %6443 = vmatmul.mubr.msk.bf16.gmra.mrb[84].mxu0 %vm1114_vm0, %v6714_v24 }
  0xbb   : > { %6571 = vmatmul.mubr.msk.bf16.gmra.mrb[84].mxu1 %vm1114_vm0, %v6715_v25  ;;  %6446 = vmatprep.mubr.msk.bf16.mxu0 %vm1114_vm0, %v6716_v26 }
  0xbc   : > { %6574 = vmatprep.mubr.msk.bf16.mxu1 %vm1114_vm0, %v6717_v27  ;;  %v6742_v27 = vld [vmem:[%s6815_s25 + $0x1c8] sm:$0xff]  }
  0xc2   : > { %6447 = vmatmul.mubr.msk.bf16.gmra.mrb[88].mxu0 %vm1114_vm0, %v6718_v28 }
  0xc3   : > { %6575 = vmatmul.mubr.msk.bf16.gmra.mrb[88].mxu1 %vm1114_vm0, %v6719_v29  ;;  %6450 = vmatprep.mubr.msk.bf16.mxu0 %vm1114_vm0, %v6720_v30 }
  0xc4   : > { %6578 = vmatprep.mubr.msk.bf16.mxu1 %vm1114_vm0, %v6721_v31 }
  0xca   : > { %6451 = vmatmul.mubr.msk.bf16.gmra.mrb[92].mxu0 %vm1114_vm0, %v6722_v32 }
  0xcb   : > { %6579 = vmatmul.mubr.msk.bf16.gmra.mrb[92].mxu1 %vm1114_vm0, %v6723_v33  ;;  %6454 = vmatprep.mubr.msk.bf16.mxu0 %vm1114_vm0, %v6724_v34  ;;  %v6743_v34 = vld [vmem:[%s6815_s25 + $0x3c8] sm:$0xff]  }
  0xcc   : > { %6582 = vmatprep.mubr.msk.bf16.mxu1 %vm1114_vm0, %v6725_v35  ;;  %v6744_v35 = vld [vmem:[%s6815_s25 + $0x1d0] sm:$0xff]  }
  0xd2   : > { %6455 = vmatmul.mubr.msk.bf16.gmra.mrb[96].mxu0 %vm1114_vm0, %v6726_v36 }
  0xd3   : > { %6583 = vmatmul.mubr.msk.bf16.gmra.mrb[96].mxu1 %vm1114_vm0, %v6727_v37  ;;  %6458 = vmatprep.mubr.msk.bf16.mxu0 %vm1114_vm0, %v6728_v38 }
  0xd4   : > { %6586 = vmatprep.mubr.msk.bf16.mxu1 %vm1114_vm0, %v6729_v39 }
  0xda   : > { %6459 = vmatmul.mubr.msk.bf16.gmra.mrb[100].mxu0 %vm1114_vm0, %v6730_v40 }
  0xdb   : > { %6587 = vmatmul.mubr.msk.bf16.gmra.mrb[100].mxu1 %vm1114_vm0, %v6731_v41  ;;  %6462 = vmatprep.mubr.msk.bf16.mxu0 %vm1114_vm0, %v6732_v42  ;;  %v6745_v42 = vld [vmem:[%s6815_s25 + $0x3d0] sm:$0xff]  }
  0xdc   : > { %6590 = vmatprep.mubr.msk.bf16.mxu1 %vm1114_vm0, %v6733_v43 }
  0xe2   : > { %6463 = vmatmul.mubr.msk.bf16.gmra.mrb[104].mxu0 %vm1114_vm0, %v6734_v44 }
  0xe3   : > { %6591 = vmatmul.mubr.msk.bf16.gmra.mrb[104].mxu1 %vm1114_vm0, %v6735_v45  ;;  %6466 = vmatprep.mubr.msk.bf16.mxu0 %vm1114_vm0, %v6736_v46 }
  0xe4   : > { %6594 = vmatprep.mubr.msk.bf16.mxu1 %vm1114_vm0, %v6737_v47 }
  0xe5   : > { %v6360_v49 = vpop.f32.mrb[0].mxu0 }
  0xe6   : > { %v2565_v51 = vmul.f32 %v6360_v49, %v7038_v48  ;;  %v6488_v52 = vpop.f32.mrb[0].mxu1  ;;  %v1533_v53 = vpop.f32.mrb[1].mxu0 }
  0xe7   : > { %v2693_v55 = vmul.f32 %v6488_v52, %v7038_v48  ;;  %v2563_v56 = vmul.f32 %v7038_v48, %v1533_v53  ;;  %v2045_v57 = vpop.f32.mrb[1].mxu1  ;;  %v6361_v58 = vpop.f32.mrb[2].mxu0 }
  0xe8   : > { %v2828_v61 = vadd.f32 %v7045_v50, %v2565_v51  ;;  %v2691_v62 = vmul.f32 %v7038_v48, %v2045_v57  ;;  %v2566_v63 = vmul.f32 %v6361_v58, %v7038_v48  ;;  %v6489_v0 = vpop.f32.mrb[2].mxu1  ;;  %v1536_v1 = vpop.f32.mrb[3].mxu0 }
  0xe9   : > { %v2956_v3 = vadd.f32 %v7045_v50, %v2693_v55  ;;  %v2826_v4 = vadd.f32 %v7045_v50, %v2563_v56  ;;  %v2694_v5 = vmul.f32 %v6489_v0, %v7038_v48  ;;  %v2564_v6 = vmul.f32 %v7038_v48, %v1536_v1  ;;  %v2048_v7 = vpop.f32.mrb[3].mxu1 }
  0xea   : > { %v2954_v8 = vadd.f32 %v7045_v50, %v2691_v62  ;;  %v2829_v9 = vadd.f32 %v7045_v50, %v2566_v63  ;;  %v2692_v10 = vmul.f32 %v7038_v48, %v2048_v7  ;;  %6467 = vmatmul.mubr.msk.bf16.gmra.mrb[108].mxu0 %vm1114_vm0, %v6738_v54  ;;  %v3084_v13 = vmax.f32 %v2828_v61, 0.0 }
  0xeb   : > { %v2957_v11 = vadd.f32 %v7045_v50, %v2694_v5  ;;  %v2827_v12 = vadd.f32 %v7045_v50, %v2564_v6  ;;  %6595 = vmatmul.mubr.msk.bf16.gmra.mrb[108].mxu1 %vm1114_vm0, %v6739_v59  ;;  %6470 = vmatprep.mubr.msk.bf16.mxu0 %vm1114_vm0, %v6740_v60  ;;  %v3212_v16 = vmax.f32 %v2956_v3, 0.0  ;;  %v3082_v17 = vmax.f32 %v2826_v4, 0.0  ;;  %v6746_v5 = vld [vmem:[%s6815_s25 + $0x1d8] sm:$0xff]  }
  0xec   : > { %v3085_v14 = vmax.f32 %v2829_v9, 0.0  ;;  %v2955_v15 = vadd.f32 %v7045_v50, %v2692_v10  ;;  %6598 = vmatprep.mubr.msk.bf16.mxu1 %vm1114_vm0, %v6741_v2  ;;  %v3210_v21 = vmax.f32 %v2954_v8, 0.0 }
  0xed   : > { %v3213_v18 = vmax.f32 %v2957_v11, 0.0  ;;  %v3083_v19 = vmax.f32 %v2827_v12, 0.0  ;;  %v6364_v20 = vpop.f32.mrb[4].mxu0  ;;  %v6747_v12 = vld [vmem:[%s6815_s25 + $0x3d8] sm:$0xff]  }
  0xee   : > { %v5465_v22 = vpack.c.bf16 %v3085_v14, %v3084_v13  ;;  %v3211_v23 = vmax.f32 %v2955_v15, 0.0  ;;  %v2569_v24 = vmul.f32 %v6364_v20, %v7038_v48  ;;  %v6492_v25 = vpop.f32.mrb[4].mxu1  ;;  %v1549_v26 = vpop.f32.mrb[5].mxu0  ;;  %v6748_v13 = vld [vmem:[%s6815_s25 + $0x1e0] sm:$0xff]  }
  0xef   : > { %v5785_v28 = vpack.c.bf16 %v3213_v18, %v3212_v16  ;;  %v5460_v29 = vpack.c.bf16 %v3083_v19, %v3082_v17  ;;  %v2697_v30 = vmul.f32 %v6492_v25, %v7038_v48  ;;  %v2567_v31 = vmul.f32 %v7038_v48, %v1549_v26  ;;  %v2061_v32 = vpop.f32.mrb[5].mxu1  ;;  %v6365_v33 = vpop.f32.mrb[6].mxu0  ;;  %v6749_v20 = vld [vmem:[%s6815_s25 + $0x3e0] sm:$0xff]  }
  0xf0   : > { %6097 = vst [vmem:[%s7076_s6 + $0x8] sm:$0xff] %v5465_v22   ;;  %v5780_v36 = vpack.c.bf16 %v3211_v23, %v3210_v21  ;;  %v2832_v37 = vadd.f32 %v7045_v50, %v2569_v24  ;;  %v2695_v38 = vmul.f32 %v7038_v48, %v2061_v32  ;;  %v2570_v39 = vmul.f32 %v6365_v33, %v7038_v48  ;;  %v6493_v40 = vpop.f32.mrb[6].mxu1  ;;  %v1552_v41 = vpop.f32.mrb[7].mxu0 }
  0xf1   : > { %6161 = vst [vmem:[%s7076_s6 + $0x208] sm:$0xff] %v5785_v28   ;;  %5461 = vst [vmem:[%s7076_s6] sm:$0xff] %v5460_v29   ;;  %v2960_v43 = vadd.f32 %v7045_v50, %v2697_v30  ;;  %v2830_v44 = vadd.f32 %v7045_v50, %v2567_v31  ;;  %v2698_v45 = vmul.f32 %v6493_v40, %v7038_v48  ;;  %v2064_v47 = vpop.f32.mrb[7].mxu1 }
  0xf2   : > { %v2568_v46 = vmul.f32 %v7038_v48, %v1552_v41  ;;  %6160 = vst [vmem:[%s7076_s6 + $0x200] sm:$0xff] %v5780_v36   ;;  %v2958_v49 = vadd.f32 %v7045_v50, %v2695_v38  ;;  %v2833_v51 = vadd.f32 %v7045_v50, %v2570_v39  ;;  %v2696_v52 = vmul.f32 %v7038_v48, %v2064_v47 }
  0xf3   : > { %6471 = vmatmul.mubr.msk.bf16.gmra.mrb[112].mxu0 %vm1114_vm0, %v6742_v27  ;;  %v2961_v53 = vadd.f32 %v7045_v50, %v2698_v45  ;;  %6599 = vmatmul.mubr.msk.bf16.gmra.mrb[112].mxu1 %vm1114_vm0, %v6743_v34  ;;  %v3088_v55 = vmax.f32 %v2832_v37, 0.0  ;;  %v3216_v58 = vmax.f32 %v2960_v43, 0.0  ;;  %v3086_v59 = vmax.f32 %v2830_v44, 0.0  ;;  %v6750_v45 = vld [vmem:[%s6815_s25 + $0x1e8] sm:$0xff]  }
  0xf4   : > { %v2831_v54 = vadd.f32 %v7045_v50, %v2568_v46  ;;  %6474 = vmatprep.mubr.msk.bf16.mxu0 %vm1114_vm0, %v6744_v35  ;;  %v3089_v56 = vmax.f32 %v2833_v51, 0.0  ;;  %v2959_v57 = vadd.f32 %v7045_v50, %v2696_v52  ;;  %6602 = vmatprep.mubr.msk.bf16.mxu1 %vm1114_vm0, %v6745_v42  ;;  %v3214_v63 = vmax.f32 %v2958_v49, 0.0 }
  0xf5   : > { %v3217_v60 = vmax.f32 %v2961_v53, 0.0  ;;  %v6368_v62 = vpop.f32.mrb[8].mxu0 }
  0xf6   : > { %v3087_v61 = vmax.f32 %v2831_v54, 0.0  ;;  %v5475_v0 = vpack.c.bf16 %v3089_v56, %v3088_v55  ;;  %v3215_v1 = vmax.f32 %v2959_v57, 0.0  ;;  %v2573_v2 = vmul.f32 %v6368_v62, %v7038_v48  ;;  %v6496_v3 = vpop.f32.mrb[8].mxu1  ;;  %v1565_v4 = vpop.f32.mrb[9].mxu0  ;;  %v6751_v54 = vld [vmem:[%s6815_s25 + $0x3e8] sm:$0xff]   ;;  %v6752_v55 = vld [vmem:[%s6815_s25 + $0x1f0] sm:$0xff]  }
  0xf7   : > { %v5795_v6 = vpack.c.bf16 %v3217_v60, %v3216_v58  ;;  %v2701_v8 = vmul.f32 %v6496_v3, %v7038_v48  ;;  %v2571_v9 = vmul.f32 %v7038_v48, %v1565_v4  ;;  %v2077_v10 = vpop.f32.mrb[9].mxu1  ;;  %v6369_v11 = vpop.f32.mrb[10].mxu0  ;;  %v6753_v62 = vld [vmem:[%s6815_s25 + $0x3f0] sm:$0xff]  }
  0xf8   : > { %v5470_v7 = vpack.c.bf16 %v3087_v61, %v3086_v59  ;;  %6099 = vst [vmem:[%s7076_s6 + $0x18] sm:$0xff] %v5475_v0   ;;  %v5790_v14 = vpack.c.bf16 %v3215_v1, %v3214_v63  ;;  %v2836_v15 = vadd.f32 %v7045_v50, %v2573_v2  ;;  %v2699_v16 = vmul.f32 %v7038_v48, %v2077_v10  ;;  %v6497_v18 = vpop.f32.mrb[10].mxu1  ;;  %v1568_v19 = vpop.f32.mrb[11].mxu0 }
  0xf9   : > { %v2574_v17 = vmul.f32 %v6369_v11, %v7038_v48  ;;  %6163 = vst [vmem:[%s7076_s6 + $0x218] sm:$0xff] %v5795_v6   ;;  %v2964_v21 = vadd.f32 %v7045_v50, %v2701_v8  ;;  %v2834_v22 = vadd.f32 %v7045_v50, %v2571_v9  ;;  %v2702_v23 = vmul.f32 %v6497_v18, %v7038_v48  ;;  %v2080_v25 = vpop.f32.mrb[11].mxu1 }
  0xfa   : > { %6098 = vst [vmem:[%s7076_s6 + $0x10] sm:$0xff] %v5470_v7   ;;  %v2572_v24 = vmul.f32 %v7038_v48, %v1568_v19  ;;  %6162 = vst [vmem:[%s7076_s6 + $0x210] sm:$0xff] %v5790_v14   ;;  %v2962_v26 = vadd.f32 %v7045_v50, %v2699_v16  ;;  %v2700_v28 = vmul.f32 %v7038_v48, %v2080_v25  ;;  %v3092_v31 = vmax.f32 %v2836_v15, 0.0 }
  0xfb   : > { %v2837_v27 = vadd.f32 %v7045_v50, %v2574_v17  ;;  %6475 = vmatmul.mubr.msk.bf16.gmra.mrb[116].mxu0 %vm1114_vm0, %v6746_v5  ;;  %v2965_v29 = vadd.f32 %v7045_v50, %v2702_v23  ;;  %6603 = vmatmul.mubr.msk.bf16.gmra.mrb[116].mxu1 %vm1114_vm0, %v6747_v12  ;;  %v3220_v34 = vmax.f32 %v2964_v21, 0.0  ;;  %v3090_v35 = vmax.f32 %v2834_v22, 0.0  ;;  %v6754_v23 = vld [vmem:[%s6815_s25 + $0x1f8] sm:$0xff]  }
  0xfc   : > { %v2835_v30 = vadd.f32 %v7045_v50, %v2572_v24  ;;  %6478 = vmatprep.mubr.msk.bf16.mxu0 %vm1114_vm0, %v6748_v13  ;;  %v2963_v33 = vadd.f32 %v7045_v50, %v2700_v28  ;;  %6606 = vmatprep.mubr.msk.bf16.mxu1 %vm1114_vm0, %v6749_v20  ;;  %v3218_v39 = vmax.f32 %v2962_v26, 0.0 }
  0xfd   : > { %v3093_v32 = vmax.f32 %v2837_v27, 0.0  ;;  %v3221_v36 = vmax.f32 %v2965_v29, 0.0  ;;  %v6372_v38 = vpop.f32.mrb[12].mxu0 }
  0xfe   : > { %v3091_v37 = vmax.f32 %v2835_v30, 0.0  ;;  %v3219_v41 = vmax.f32 %v2963_v33, 0.0  ;;  %v2577_v42 = vmul.f32 %v6372_v38, %v7038_v48  ;;  %v6500_v43 = vpop.f32.mrb[12].mxu1  ;;  %v1581_v44 = vpop.f32.mrb[13].mxu0  ;;  %v6755_v30 = vld [vmem:[%s6815_s25 + $0x3f8] sm:$0xff]  }
  0xff   : > { %v5485_v40 = vpack.c.bf16 %v3093_v32, %v3092_v31  ;;  %v5805_v46 = vpack.c.bf16 %v3221_v36, %v3220_v34  ;;  %v2705_v49 = vmul.f32 %v6500_v43, %v7038_v48  ;;  %v2575_v51 = vmul.f32 %v7038_v48, %v1581_v44  ;;  %v2093_v52 = vpop.f32.mrb[13].mxu1  ;;  %v6373_v53 = vpop.f32.mrb[14].mxu0 }
 0x100   : > { %v5480_v47 = vpack.c.bf16 %v3091_v37, %v3090_v35  ;;  %v5800_v56 = vpack.c.bf16 %v3219_v41, %v3218_v39  ;;  %v2840_v57 = vadd.f32 %v7045_v50, %v2577_v42  ;;  %v2703_v58 = vmul.f32 %v7038_v48, %v2093_v52  ;;  %v6501_v60 = vpop.f32.mrb[14].mxu1  ;;  %v1584_v61 = vpop.f32.mrb[15].mxu0 }
 0x101   : > { %6101 = vst [vmem:[%s7076_s6 + $0x28] sm:$0xff] %v5485_v40   ;;  %v2578_v59 = vmul.f32 %v6373_v53, %v7038_v48  ;;  %6165 = vst [vmem:[%s7076_s6 + $0x228] sm:$0xff] %v5805_v46   ;;  %v2968_v63 = vadd.f32 %v7045_v50, %v2705_v49  ;;  %v2838_v0 = vadd.f32 %v7045_v50, %v2575_v51  ;;  %v2096_v3 = vpop.f32.mrb[15].mxu1 }
 0x102   : > { %6100 = vst [vmem:[%s7076_s6 + $0x20] sm:$0xff] %v5480_v47   ;;  %v2706_v1 = vmul.f32 %v6501_v60, %v7038_v48  ;;  %v2576_v2 = vmul.f32 %v7038_v48, %v1584_v61  ;;  %6164 = vst [vmem:[%s7076_s6 + $0x220] sm:$0xff] %v5800_v56   ;;  %v2966_v4 = vadd.f32 %v7045_v50, %v2703_v58  ;;  %v3096_v9 = vmax.f32 %v2840_v57, 0.0 }
 0x103   : > { %v2841_v5 = vadd.f32 %v7045_v50, %v2578_v59  ;;  %v2704_v6 = vmul.f32 %v7038_v48, %v2096_v3  ;;  %6479 = vmatmul.mubr.msk.bf16.gmra.mrb[120].mxu0 %vm1114_vm0, %v6750_v45  ;;  %6607 = vmatmul.mubr.msk.bf16.gmra.mrb[120].mxu1 %vm1114_vm0, %v6751_v54  ;;  %v3224_v12 = vmax.f32 %v2968_v63, 0.0  ;;  %v3094_v13 = vmax.f32 %v2838_v0, 0.0 }
 0x104   : > { %v2969_v7 = vadd.f32 %v7045_v50, %v2706_v1  ;;  %v2839_v8 = vadd.f32 %v7045_v50, %v2576_v2  ;;  %6482 = vmatprep.mubr.msk.bf16.mxu0 %vm1114_vm0, %v6752_v55  ;;  %6610 = vmatprep.mubr.msk.bf16.mxu1 %vm1114_vm0, %v6753_v62  ;;  %v3222_v17 = vmax.f32 %v2966_v4, 0.0 }
 0x105   : > { %v3097_v10 = vmax.f32 %v2841_v5, 0.0  ;;  %v2967_v11 = vadd.f32 %v7045_v50, %v2704_v6  ;;  %v6376_v16 = vpop.f32.mrb[16].mxu0 }
 0x106   : > { %v3225_v14 = vmax.f32 %v2969_v7, 0.0  ;;  %v3095_v15 = vmax.f32 %v2839_v8, 0.0  ;;  %v2581_v20 = vmul.f32 %v6376_v16, %v7038_v48  ;;  %v6504_v21 = vpop.f32.mrb[16].mxu1  ;;  %v1597_v22 = vpop.f32.mrb[17].mxu0 }
 0x107   : > { %v5495_v18 = vpack.c.bf16 %v3097_v10, %v3096_v9  ;;  %v3223_v19 = vmax.f32 %v2967_v11, 0.0  ;;  %v2709_v26 = vmul.f32 %v6504_v21, %v7038_v48  ;;  %v2579_v27 = vmul.f32 %v7038_v48, %v1597_v22  ;;  %v2109_v28 = vpop.f32.mrb[17].mxu1  ;;  %v6377_v29 = vpop.f32.mrb[18].mxu0 }
 0x108   : > { %v5815_v24 = vpack.c.bf16 %v3225_v14, %v3224_v12  ;;  %v5490_v25 = vpack.c.bf16 %v3095_v15, %v3094_v13  ;;  %v2844_v32 = vadd.f32 %v7045_v50, %v2581_v20  ;;  %v2707_v33 = vmul.f32 %v7038_v48, %v2109_v28  ;;  %v6505_v35 = vpop.f32.mrb[18].mxu1  ;;  %v1600_v36 = vpop.f32.mrb[19].mxu0 }
 0x109   : > { %6103 = vst [vmem:[%s7076_s6 + $0x38] sm:$0xff] %v5495_v18   ;;  %v5810_v31 = vpack.c.bf16 %v3223_v19, %v3222_v17  ;;  %v2582_v34 = vmul.f32 %v6377_v29, %v7038_v48  ;;  %v2972_v37 = vadd.f32 %v7045_v50, %v2709_v26  ;;  %v2842_v38 = vadd.f32 %v7045_v50, %v2579_v27  ;;  %v2112_v41 = vpop.f32.mrb[19].mxu1 }
 0x10a   : > { %6167 = vst [vmem:[%s7076_s6 + $0x238] sm:$0xff] %v5815_v24   ;;  %6102 = vst [vmem:[%s7076_s6 + $0x30] sm:$0xff] %v5490_v25   ;;  %v2710_v39 = vmul.f32 %v6505_v35, %v7038_v48  ;;  %v2580_v40 = vmul.f32 %v7038_v48, %v1600_v36  ;;  %v2970_v42 = vadd.f32 %v7045_v50, %v2707_v33  ;;  %v3100_v47 = vmax.f32 %v2844_v32, 0.0 }
 0x10b   : > { %6166 = vst [vmem:[%s7076_s6 + $0x230] sm:$0xff] %v5810_v31   ;;  %v2845_v43 = vadd.f32 %v7045_v50, %v2582_v34  ;;  %v2708_v44 = vmul.f32 %v7038_v48, %v2112_v41  ;;  %6483 = vmatmul.mubr.msk.bf16.gmra.mrb[124].mxu0 %vm1114_vm0, %v6754_v23  ;;  %6611 = vmatmul.mubr.msk.bf16.gmra.mrb[124].mxu1 %vm1114_vm0, %v6755_v30  ;;  %v3228_v52 = vmax.f32 %v2972_v37, 0.0  ;;  %v3098_v53 = vmax.f32 %v2842_v38, 0.0 }
 0x10c   : > { %v2973_v45 = vadd.f32 %v7045_v50, %v2710_v39  ;;  %v2843_v46 = vadd.f32 %v7045_v50, %v2580_v40  ;;  %v3226_v57 = vmax.f32 %v2970_v42, 0.0 }
 0x10d   : > { %v3101_v49 = vmax.f32 %v2845_v43, 0.0  ;;  %v2971_v51 = vadd.f32 %v7045_v50, %v2708_v44  ;;  %v6380_v56 = vpop.f32.mrb[20].mxu0 }
 0x10e   : > { %v3229_v54 = vmax.f32 %v2973_v45, 0.0  ;;  %v3099_v55 = vmax.f32 %v2843_v46, 0.0  ;;  %v2585_v60 = vmul.f32 %v6380_v56, %v7038_v48  ;;  %v6508_v61 = vpop.f32.mrb[20].mxu1  ;;  %v1613_v62 = vpop.f32.mrb[21].mxu0 }
 0x10f   : > { %v5505_v58 = vpack.c.bf16 %v3101_v49, %v3100_v47  ;;  %v3227_v59 = vmax.f32 %v2971_v51, 0.0  ;;  %v2713_v1 = vmul.f32 %v6508_v61, %v7038_v48  ;;  %v2583_v2 = vmul.f32 %v7038_v48, %v1613_v62  ;;  %v2125_v3 = vpop.f32.mrb[21].mxu1  ;;  %v6381_v4 = vpop.f32.mrb[22].mxu0 }
 0x110   : > { %v5825_v63 = vpack.c.bf16 %v3229_v54, %v3228_v52  ;;  %v5500_v0 = vpack.c.bf16 %v3099_v55, %v3098_v53  ;;  %v2848_v6 = vadd.f32 %v7045_v50, %v2585_v60  ;;  %v2711_v7 = vmul.f32 %v7038_v48, %v2125_v3  ;;  %v6509_v9 = vpop.f32.mrb[22].mxu1  ;;  %v1616_v10 = vpop.f32.mrb[23].mxu0 }
 0x111   : > { %6105 = vst [vmem:[%s7076_s6 + $0x48] sm:$0xff] %v5505_v58   ;;  %v5820_v5 = vpack.c.bf16 %v3227_v59, %v3226_v57  ;;  %v2586_v8 = vmul.f32 %v6381_v4, %v7038_v48  ;;  %v2976_v11 = vadd.f32 %v7045_v50, %v2713_v1  ;;  %v2846_v12 = vadd.f32 %v7045_v50, %v2583_v2  ;;  %v2128_v15 = vpop.f32.mrb[23].mxu1 }
 0x112   : > { %6169 = vst [vmem:[%s7076_s6 + $0x248] sm:$0xff] %v5825_v63   ;;  %6104 = vst [vmem:[%s7076_s6 + $0x40] sm:$0xff] %v5500_v0   ;;  %v2714_v13 = vmul.f32 %v6509_v9, %v7038_v48  ;;  %v2584_v14 = vmul.f32 %v7038_v48, %v1616_v10  ;;  %v2974_v16 = vadd.f32 %v7045_v50, %v2711_v7  ;;  %v3104_v21 = vmax.f32 %v2848_v6, 0.0 }
 0x113   : > { %6168 = vst [vmem:[%s7076_s6 + $0x240] sm:$0xff] %v5820_v5   ;;  %v2849_v17 = vadd.f32 %v7045_v50, %v2586_v8  ;;  %v2712_v18 = vmul.f32 %v7038_v48, %v2128_v15  ;;  %v3232_v24 = vmax.f32 %v2976_v11, 0.0  ;;  %v3102_v25 = vmax.f32 %v2846_v12, 0.0 }
 0x114   : > { %v2977_v19 = vadd.f32 %v7045_v50, %v2714_v13  ;;  %v2847_v20 = vadd.f32 %v7045_v50, %v2584_v14  ;;  %v3230_v29 = vmax.f32 %v2974_v16, 0.0 }
 0x115   : > { %v3105_v22 = vmax.f32 %v2849_v17, 0.0  ;;  %v2975_v23 = vadd.f32 %v7045_v50, %v2712_v18  ;;  %v6384_v28 = vpop.f32.mrb[24].mxu0 }
 0x116   : > { %v3233_v26 = vmax.f32 %v2977_v19, 0.0  ;;  %v3103_v27 = vmax.f32 %v2847_v20, 0.0  ;;  %v2589_v32 = vmul.f32 %v6384_v28, %v7038_v48  ;;  %v6512_v33 = vpop.f32.mrb[24].mxu1  ;;  %v1629_v34 = vpop.f32.mrb[25].mxu0 }
 0x117   : > { %v5515_v30 = vpack.c.bf16 %v3105_v22, %v3104_v21  ;;  %v3231_v31 = vmax.f32 %v2975_v23, 0.0  ;;  %v2717_v37 = vmul.f32 %v6512_v33, %v7038_v48  ;;  %v2587_v38 = vmul.f32 %v7038_v48, %v1629_v34  ;;  %v2141_v39 = vpop.f32.mrb[25].mxu1  ;;  %v6385_v40 = vpop.f32.mrb[26].mxu0 }
 0x118   : > { %v5835_v35 = vpack.c.bf16 %v3233_v26, %v3232_v24  ;;  %v5510_v36 = vpack.c.bf16 %v3103_v27, %v3102_v25  ;;  %v2852_v42 = vadd.f32 %v7045_v50, %v2589_v32  ;;  %v2715_v43 = vmul.f32 %v7038_v48, %v2141_v39  ;;  %v6513_v45 = vpop.f32.mrb[26].mxu1  ;;  %v1632_v46 = vpop.f32.mrb[27].mxu0 }
 0x119   : > { %6107 = vst [vmem:[%s7076_s6 + $0x58] sm:$0xff] %v5515_v30   ;;  %v5830_v41 = vpack.c.bf16 %v3231_v31, %v3230_v29  ;;  %v2590_v44 = vmul.f32 %v6385_v40, %v7038_v48  ;;  %v2980_v47 = vadd.f32 %v7045_v50, %v2717_v37  ;;  %v2850_v49 = vadd.f32 %v7045_v50, %v2587_v38  ;;  %v2144_v53 = vpop.f32.mrb[27].mxu1 }
 0x11a   : > { %6171 = vst [vmem:[%s7076_s6 + $0x258] sm:$0xff] %v5835_v35   ;;  %6106 = vst [vmem:[%s7076_s6 + $0x50] sm:$0xff] %v5510_v36   ;;  %v2718_v51 = vmul.f32 %v6513_v45, %v7038_v48  ;;  %v2588_v52 = vmul.f32 %v7038_v48, %v1632_v46  ;;  %v2978_v54 = vadd.f32 %v7045_v50, %v2715_v43  ;;  %v3108_v59 = vmax.f32 %v2852_v42, 0.0 }
 0x11b   : > { %6170 = vst [vmem:[%s7076_s6 + $0x250] sm:$0xff] %v5830_v41   ;;  %v2853_v55 = vadd.f32 %v7045_v50, %v2590_v44  ;;  %v2716_v56 = vmul.f32 %v7038_v48, %v2144_v53  ;;  %v3236_v62 = vmax.f32 %v2980_v47, 0.0  ;;  %v3106_v63 = vmax.f32 %v2850_v49, 0.0 }
 0x11c   : > { %v2981_v57 = vadd.f32 %v7045_v50, %v2718_v51  ;;  %v2851_v58 = vadd.f32 %v7045_v50, %v2588_v52  ;;  %v3234_v3 = vmax.f32 %v2978_v54, 0.0 }
 0x11d   : > { %v3109_v60 = vmax.f32 %v2853_v55, 0.0  ;;  %v2979_v61 = vadd.f32 %v7045_v50, %v2716_v56  ;;  %v6388_v2 = vpop.f32.mrb[28].mxu0 }
 0x11e   : > { %v3237_v0 = vmax.f32 %v2981_v57, 0.0  ;;  %v3107_v1 = vmax.f32 %v2851_v58, 0.0  ;;  %v2593_v6 = vmul.f32 %v6388_v2, %v7038_v48  ;;  %v6516_v7 = vpop.f32.mrb[28].mxu1  ;;  %v1645_v8 = vpop.f32.mrb[29].mxu0 }
 0x11f   : > { %v5525_v4 = vpack.c.bf16 %v3109_v60, %v3108_v59  ;;  %v3235_v5 = vmax.f32 %v2979_v61, 0.0  ;;  %v2721_v11 = vmul.f32 %v6516_v7, %v7038_v48  ;;  %v2591_v12 = vmul.f32 %v7038_v48, %v1645_v8  ;;  %v2157_v13 = vpop.f32.mrb[29].mxu1  ;;  %v6389_v14 = vpop.f32.mrb[30].mxu0 }
 0x120   : > { %v5845_v9 = vpack.c.bf16 %v3237_v0, %v3236_v62  ;;  %v5520_v10 = vpack.c.bf16 %v3107_v1, %v3106_v63  ;;  %v2856_v16 = vadd.f32 %v7045_v50, %v2593_v6  ;;  %v2719_v17 = vmul.f32 %v7038_v48, %v2157_v13  ;;  %v6517_v19 = vpop.f32.mrb[30].mxu1  ;;  %v1648_v20 = vpop.f32.mrb[31].mxu0 }
 0x121   : > { %6109 = vst [vmem:[%s7076_s6 + $0x68] sm:$0xff] %v5525_v4   ;;  %v5840_v15 = vpack.c.bf16 %v3235_v5, %v3234_v3  ;;  %v2594_v18 = vmul.f32 %v6389_v14, %v7038_v48  ;;  %v2984_v21 = vadd.f32 %v7045_v50, %v2721_v11  ;;  %v2854_v22 = vadd.f32 %v7045_v50, %v2591_v12  ;;  %v2160_v25 = vpop.f32.mrb[31].mxu1 }
 0x122   : > { %6173 = vst [vmem:[%s7076_s6 + $0x268] sm:$0xff] %v5845_v9   ;;  %6108 = vst [vmem:[%s7076_s6 + $0x60] sm:$0xff] %v5520_v10   ;;  %v2722_v23 = vmul.f32 %v6517_v19, %v7038_v48  ;;  %v2592_v24 = vmul.f32 %v7038_v48, %v1648_v20  ;;  %v2982_v26 = vadd.f32 %v7045_v50, %v2719_v17  ;;  %v3112_v31 = vmax.f32 %v2856_v16, 0.0 }
 0x123   : > { %6172 = vst [vmem:[%s7076_s6 + $0x260] sm:$0xff] %v5840_v15   ;;  %v2857_v27 = vadd.f32 %v7045_v50, %v2594_v18  ;;  %v2720_v28 = vmul.f32 %v7038_v48, %v2160_v25  ;;  %v3240_v34 = vmax.f32 %v2984_v21, 0.0  ;;  %v3110_v35 = vmax.f32 %v2854_v22, 0.0 }
 0x124   : > { %v2985_v29 = vadd.f32 %v7045_v50, %v2722_v23  ;;  %v2855_v30 = vadd.f32 %v7045_v50, %v2592_v24  ;;  %v3238_v39 = vmax.f32 %v2982_v26, 0.0 }
 0x125   : > { %v3113_v32 = vmax.f32 %v2857_v27, 0.0  ;;  %v2983_v33 = vadd.f32 %v7045_v50, %v2720_v28  ;;  %v6392_v38 = vpop.f32.mrb[32].mxu0 }
 0x126   : > { %v3241_v36 = vmax.f32 %v2985_v29, 0.0  ;;  %v3111_v37 = vmax.f32 %v2855_v30, 0.0  ;;  %v2597_v42 = vmul.f32 %v6392_v38, %v7038_v48  ;;  %v6520_v43 = vpop.f32.mrb[32].mxu1  ;;  %v1661_v44 = vpop.f32.mrb[33].mxu0 }
 0x127   : > { %v5535_v40 = vpack.c.bf16 %v3113_v32, %v3112_v31  ;;  %v3239_v41 = vmax.f32 %v2983_v33, 0.0  ;;  %v2725_v47 = vmul.f32 %v6520_v43, %v7038_v48  ;;  %v2595_v49 = vmul.f32 %v7038_v48, %v1661_v44  ;;  %v2173_v51 = vpop.f32.mrb[33].mxu1  ;;  %v6393_v52 = vpop.f32.mrb[34].mxu0 }
 0x128   : > { %v5855_v45 = vpack.c.bf16 %v3241_v36, %v3240_v34  ;;  %v5530_v46 = vpack.c.bf16 %v3111_v37, %v3110_v35  ;;  %v2860_v54 = vadd.f32 %v7045_v50, %v2597_v42  ;;  %v2723_v55 = vmul.f32 %v7038_v48, %v2173_v51  ;;  %v6521_v57 = vpop.f32.mrb[34].mxu1  ;;  %v1664_v58 = vpop.f32.mrb[35].mxu0 }
 0x129   : > { %6111 = vst [vmem:[%s7076_s6 + $0x78] sm:$0xff] %v5535_v40   ;;  %v5850_v53 = vpack.c.bf16 %v3239_v41, %v3238_v39  ;;  %v2598_v56 = vmul.f32 %v6393_v52, %v7038_v48  ;;  %v2988_v59 = vadd.f32 %v7045_v50, %v2725_v47  ;;  %v2858_v60 = vadd.f32 %v7045_v50, %v2595_v49  ;;  %v2176_v63 = vpop.f32.mrb[35].mxu1 }
 0x12a   : > { %6175 = vst [vmem:[%s7076_s6 + $0x278] sm:$0xff] %v5855_v45   ;;  %6110 = vst [vmem:[%s7076_s6 + $0x70] sm:$0xff] %v5530_v46   ;;  %v2726_v61 = vmul.f32 %v6521_v57, %v7038_v48  ;;  %v2596_v62 = vmul.f32 %v7038_v48, %v1664_v58  ;;  %v2986_v0 = vadd.f32 %v7045_v50, %v2723_v55  ;;  %v3116_v5 = vmax.f32 %v2860_v54, 0.0 }
 0x12b   : > { %6174 = vst [vmem:[%s7076_s6 + $0x270] sm:$0xff] %v5850_v53   ;;  %v2861_v1 = vadd.f32 %v7045_v50, %v2598_v56  ;;  %v2724_v2 = vmul.f32 %v7038_v48, %v2176_v63  ;;  %v3244_v8 = vmax.f32 %v2988_v59, 0.0  ;;  %v3114_v9 = vmax.f32 %v2858_v60, 0.0 }
 0x12c   : > { %v2989_v3 = vadd.f32 %v7045_v50, %v2726_v61  ;;  %v2859_v4 = vadd.f32 %v7045_v50, %v2596_v62  ;;  %v3242_v13 = vmax.f32 %v2986_v0, 0.0 }
 0x12d   : > { %v3117_v6 = vmax.f32 %v2861_v1, 0.0  ;;  %v2987_v7 = vadd.f32 %v7045_v50, %v2724_v2  ;;  %v6396_v12 = vpop.f32.mrb[36].mxu0 }
 0x12e   : > { %v3245_v10 = vmax.f32 %v2989_v3, 0.0  ;;  %v3115_v11 = vmax.f32 %v2859_v4, 0.0  ;;  %v2601_v16 = vmul.f32 %v6396_v12, %v7038_v48  ;;  %v6524_v17 = vpop.f32.mrb[36].mxu1  ;;  %v1677_v18 = vpop.f32.mrb[37].mxu0 }
 0x12f   : > { %v5545_v14 = vpack.c.bf16 %v3117_v6, %v3116_v5  ;;  %v3243_v15 = vmax.f32 %v2987_v7, 0.0  ;;  %v2729_v21 = vmul.f32 %v6524_v17, %v7038_v48  ;;  %v2599_v22 = vmul.f32 %v7038_v48, %v1677_v18  ;;  %v2189_v23 = vpop.f32.mrb[37].mxu1  ;;  %v6397_v24 = vpop.f32.mrb[38].mxu0 }
 0x130   : > { %v5865_v19 = vpack.c.bf16 %v3245_v10, %v3244_v8  ;;  %v5540_v20 = vpack.c.bf16 %v3115_v11, %v3114_v9  ;;  %v2864_v26 = vadd.f32 %v7045_v50, %v2601_v16  ;;  %v2727_v27 = vmul.f32 %v7038_v48, %v2189_v23  ;;  %v6525_v29 = vpop.f32.mrb[38].mxu1  ;;  %v1680_v30 = vpop.f32.mrb[39].mxu0 }
 0x131   : > { %6113 = vst [vmem:[%s7076_s6 + $0x88] sm:$0xff] %v5545_v14   ;;  %v5860_v25 = vpack.c.bf16 %v3243_v15, %v3242_v13  ;;  %v2602_v28 = vmul.f32 %v6397_v24, %v7038_v48  ;;  %v2992_v31 = vadd.f32 %v7045_v50, %v2729_v21  ;;  %v2862_v32 = vadd.f32 %v7045_v50, %v2599_v22  ;;  %v2192_v35 = vpop.f32.mrb[39].mxu1 }
 0x132   : > { %6177 = vst [vmem:[%s7076_s6 + $0x288] sm:$0xff] %v5865_v19   ;;  %6112 = vst [vmem:[%s7076_s6 + $0x80] sm:$0xff] %v5540_v20   ;;  %v2730_v33 = vmul.f32 %v6525_v29, %v7038_v48  ;;  %v2600_v34 = vmul.f32 %v7038_v48, %v1680_v30  ;;  %v2990_v36 = vadd.f32 %v7045_v50, %v2727_v27  ;;  %v3120_v41 = vmax.f32 %v2864_v26, 0.0 }
 0x133   : > { %6176 = vst [vmem:[%s7076_s6 + $0x280] sm:$0xff] %v5860_v25   ;;  %v2865_v37 = vadd.f32 %v7045_v50, %v2602_v28  ;;  %v2728_v38 = vmul.f32 %v7038_v48, %v2192_v35  ;;  %v3248_v44 = vmax.f32 %v2992_v31, 0.0  ;;  %v3118_v45 = vmax.f32 %v2862_v32, 0.0 }
 0x134   : > { %v2993_v39 = vadd.f32 %v7045_v50, %v2730_v33  ;;  %v2863_v40 = vadd.f32 %v7045_v50, %v2600_v34  ;;  %v3246_v51 = vmax.f32 %v2990_v36, 0.0 }
 0x135   : > { %v3121_v42 = vmax.f32 %v2865_v37, 0.0  ;;  %v2991_v43 = vadd.f32 %v7045_v50, %v2728_v38  ;;  %v6400_v49 = vpop.f32.mrb[40].mxu0 }
 0x136   : > { %v3249_v46 = vmax.f32 %v2993_v39, 0.0  ;;  %v3119_v47 = vmax.f32 %v2863_v40, 0.0  ;;  %v2605_v54 = vmul.f32 %v6400_v49, %v7038_v48  ;;  %v6528_v55 = vpop.f32.mrb[40].mxu1  ;;  %v1693_v56 = vpop.f32.mrb[41].mxu0 }
 0x137   : > { %v5555_v52 = vpack.c.bf16 %v3121_v42, %v3120_v41  ;;  %v3247_v53 = vmax.f32 %v2991_v43, 0.0  ;;  %v2733_v59 = vmul.f32 %v6528_v55, %v7038_v48  ;;  %v2603_v60 = vmul.f32 %v7038_v48, %v1693_v56  ;;  %v2205_v61 = vpop.f32.mrb[41].mxu1  ;;  %v6401_v62 = vpop.f32.mrb[42].mxu0 }
 0x138   : > { %v5875_v57 = vpack.c.bf16 %v3249_v46, %v3248_v44  ;;  %v5550_v58 = vpack.c.bf16 %v3119_v47, %v3118_v45  ;;  %v2868_v0 = vadd.f32 %v7045_v50, %v2605_v54  ;;  %v2731_v1 = vmul.f32 %v7038_v48, %v2205_v61  ;;  %v6529_v3 = vpop.f32.mrb[42].mxu1  ;;  %v1696_v4 = vpop.f32.mrb[43].mxu0 }
 0x139   : > { %6115 = vst [vmem:[%s7076_s6 + $0x98] sm:$0xff] %v5555_v52   ;;  %v5870_v63 = vpack.c.bf16 %v3247_v53, %v3246_v51  ;;  %v2606_v2 = vmul.f32 %v6401_v62, %v7038_v48  ;;  %v2996_v5 = vadd.f32 %v7045_v50, %v2733_v59  ;;  %v2866_v6 = vadd.f32 %v7045_v50, %v2603_v60  ;;  %v2208_v9 = vpop.f32.mrb[43].mxu1 }
 0x13a   : > { %6179 = vst [vmem:[%s7076_s6 + $0x298] sm:$0xff] %v5875_v57   ;;  %6114 = vst [vmem:[%s7076_s6 + $0x90] sm:$0xff] %v5550_v58   ;;  %v2734_v7 = vmul.f32 %v6529_v3, %v7038_v48  ;;  %v2604_v8 = vmul.f32 %v7038_v48, %v1696_v4  ;;  %v2994_v10 = vadd.f32 %v7045_v50, %v2731_v1  ;;  %v3124_v15 = vmax.f32 %v2868_v0, 0.0 }
 0x13b   : > { %6178 = vst [vmem:[%s7076_s6 + $0x290] sm:$0xff] %v5870_v63   ;;  %v2869_v11 = vadd.f32 %v7045_v50, %v2606_v2  ;;  %v2732_v12 = vmul.f32 %v7038_v48, %v2208_v9  ;;  %v3252_v18 = vmax.f32 %v2996_v5, 0.0  ;;  %v3122_v19 = vmax.f32 %v2866_v6, 0.0  ;;  %v7338_v9 = vld [vmem:[%s7756_s3] ss:$0 sm:$0xff] }
 0x13c   : > { %v2997_v13 = vadd.f32 %v7045_v50, %v2734_v7  ;;  %v2867_v14 = vadd.f32 %v7045_v50, %v2604_v8  ;;  %v3250_v23 = vmax.f32 %v2994_v10, 0.0 }
 0x13d   : > { %v3125_v16 = vmax.f32 %v2869_v11, 0.0  ;;  %v2995_v17 = vadd.f32 %v7045_v50, %v2732_v12  ;;  %v6404_v22 = vpop.f32.mrb[44].mxu0 }
 0x13e   : > { %v3253_v20 = vmax.f32 %v2997_v13, 0.0  ;;  %v3123_v21 = vmax.f32 %v2867_v14, 0.0  ;;  %v2609_v26 = vmul.f32 %v6404_v22, %v7038_v48  ;;  %v6532_v27 = vpop.f32.mrb[44].mxu1  ;;  %v1709_v28 = vpop.f32.mrb[45].mxu0 }
 0x13f   : > { %v5565_v24 = vpack.c.bf16 %v3125_v16, %v3124_v15  ;;  %v3251_v25 = vmax.f32 %v2995_v17, 0.0  ;;  %v2737_v31 = vmul.f32 %v6532_v27, %v7038_v48  ;;  %v2607_v32 = vmul.f32 %v7038_v48, %v1709_v28  ;;  %v2221_v33 = vpop.f32.mrb[45].mxu1  ;;  %v6405_v34 = vpop.f32.mrb[46].mxu0 }
 0x140   : > { %v5885_v29 = vpack.c.bf16 %v3253_v20, %v3252_v18  ;;  %v5560_v30 = vpack.c.bf16 %v3123_v21, %v3122_v19  ;;  %v2872_v36 = vadd.f32 %v7045_v50, %v2609_v26  ;;  %v2735_v37 = vmul.f32 %v7038_v48, %v2221_v33  ;;  %v6533_v39 = vpop.f32.mrb[46].mxu1  ;;  %v1712_v40 = vpop.f32.mrb[47].mxu0 }
 0x141   : > { %6117 = vst [vmem:[%s7076_s6 + $0xa8] sm:$0xff] %v5565_v24   ;;  %v5880_v35 = vpack.c.bf16 %v3251_v25, %v3250_v23  ;;  %v2610_v38 = vmul.f32 %v6405_v34, %v7038_v48  ;;  %v3000_v41 = vadd.f32 %v7045_v50, %v2737_v31  ;;  %v2870_v42 = vadd.f32 %v7045_v50, %v2607_v32  ;;  %v2224_v45 = vpop.f32.mrb[47].mxu1 }
 0x142   : > { %6181 = vst [vmem:[%s7076_s6 + $0x2a8] sm:$0xff] %v5885_v29   ;;  %6116 = vst [vmem:[%s7076_s6 + $0xa0] sm:$0xff] %v5560_v30   ;;  %v2738_v43 = vmul.f32 %v6533_v39, %v7038_v48  ;;  %v2608_v44 = vmul.f32 %v7038_v48, %v1712_v40  ;;  %v2998_v46 = vadd.f32 %v7045_v50, %v2735_v37  ;;  %v3128_v53 = vmax.f32 %v2872_v36, 0.0 }
 0x143   : > { %6180 = vst [vmem:[%s7076_s6 + $0x2a0] sm:$0xff] %v5880_v35   ;;  %v2873_v47 = vadd.f32 %v7045_v50, %v2610_v38  ;;  %v2736_v49 = vmul.f32 %v7038_v48, %v2224_v45  ;;  %v3256_v56 = vmax.f32 %v3000_v41, 0.0  ;;  %v3126_v57 = vmax.f32 %v2870_v42, 0.0  ;;  %v7329_v48 = vld [vmem:[%s7755_s2] ss:$0 sm:$0xff] }
 0x144   : > { %v3001_v51 = vadd.f32 %v7045_v50, %v2738_v43  ;;  %v2871_v52 = vadd.f32 %v7045_v50, %v2608_v44  ;;  %v3254_v61 = vmax.f32 %v2998_v46, 0.0 }
 0x145   : > { %v3129_v54 = vmax.f32 %v2873_v47, 0.0  ;;  %v2999_v55 = vadd.f32 %v7045_v50, %v2736_v49  ;;  %v6408_v60 = vpop.f32.mrb[48].mxu0 }
 0x146   : > { %v3257_v58 = vmax.f32 %v3001_v51, 0.0  ;;  %v3127_v59 = vmax.f32 %v2871_v52, 0.0  ;;  %v2613_v0 = vmul.f32 %v7329_v48, %v6408_v60  ;;  %v6536_v1 = vpop.f32.mrb[48].mxu1  ;;  %v1725_v2 = vpop.f32.mrb[49].mxu0 }
 0x147   : > { %v5575_v62 = vpack.c.bf16 %v3129_v54, %v3128_v53  ;;  %v3255_v63 = vmax.f32 %v2999_v55, 0.0  ;;  %v2741_v4 = vmul.f32 %v7329_v48, %v6536_v1  ;;  %v2611_v5 = vmul.f32 %v7329_v48, %v1725_v2  ;;  %v2237_v6 = vpop.f32.mrb[49].mxu1  ;;  %v6409_v7 = vpop.f32.mrb[50].mxu0 }
 0x148   : > { %v5895_v50 = vpack.c.bf16 %v3257_v58, %v3256_v56  ;;  %v5570_v3 = vpack.c.bf16 %v3127_v59, %v3126_v57  ;;  %v2876_v10 = vadd.f32 %v7338_v9, %v2613_v0  ;;  %v2739_v11 = vmul.f32 %v7329_v48, %v2237_v6  ;;  %v6537_v13 = vpop.f32.mrb[50].mxu1  ;;  %v1728_v14 = vpop.f32.mrb[51].mxu0 }
 0x149   : > { %6119 = vst [vmem:[%s7076_s6 + $0xb8] sm:$0xff] %v5575_v62   ;;  %v5890_v8 = vpack.c.bf16 %v3255_v63, %v3254_v61  ;;  %v2614_v12 = vmul.f32 %v7329_v48, %v6409_v7  ;;  %v3004_v15 = vadd.f32 %v7338_v9, %v2741_v4  ;;  %v2874_v16 = vadd.f32 %v7338_v9, %v2611_v5  ;;  %v2240_v19 = vpop.f32.mrb[51].mxu1 }
 0x14a   : > { %6183 = vst [vmem:[%s7076_s6 + $0x2b8] sm:$0xff] %v5895_v50   ;;  %6118 = vst [vmem:[%s7076_s6 + $0xb0] sm:$0xff] %v5570_v3   ;;  %v2742_v17 = vmul.f32 %v7329_v48, %v6537_v13  ;;  %v2612_v18 = vmul.f32 %v7329_v48, %v1728_v14  ;;  %v3002_v20 = vadd.f32 %v7338_v9, %v2739_v11  ;;  %v3132_v25 = vmax.f32 %v2876_v10, 0.0 }
 0x14b   : > { %6182 = vst [vmem:[%s7076_s6 + $0x2b0] sm:$0xff] %v5890_v8   ;;  %v2877_v21 = vadd.f32 %v7338_v9, %v2614_v12  ;;  %v2740_v22 = vmul.f32 %v7329_v48, %v2240_v19  ;;  %v3260_v28 = vmax.f32 %v3004_v15, 0.0  ;;  %v3130_v29 = vmax.f32 %v2874_v16, 0.0 }
 0x14c   : > { %v3005_v23 = vadd.f32 %v7338_v9, %v2742_v17  ;;  %v2875_v24 = vadd.f32 %v7338_v9, %v2612_v18  ;;  %v3258_v33 = vmax.f32 %v3002_v20, 0.0 }
 0x14d   : > { %v3133_v26 = vmax.f32 %v2877_v21, 0.0  ;;  %v3003_v27 = vadd.f32 %v7338_v9, %v2740_v22  ;;  %v6412_v32 = vpop.f32.mrb[52].mxu0 }
 0x14e   : > { %v3261_v30 = vmax.f32 %v3005_v23, 0.0  ;;  %v3131_v31 = vmax.f32 %v2875_v24, 0.0  ;;  %v2617_v36 = vmul.f32 %v7329_v48, %v6412_v32  ;;  %v6540_v37 = vpop.f32.mrb[52].mxu1  ;;  %v1741_v38 = vpop.f32.mrb[53].mxu0 }
 0x14f   : > { %v5585_v34 = vpack.c.bf16 %v3133_v26, %v3132_v25  ;;  %v3259_v35 = vmax.f32 %v3003_v27, 0.0  ;;  %v2745_v41 = vmul.f32 %v7329_v48, %v6540_v37  ;;  %v2615_v42 = vmul.f32 %v7329_v48, %v1741_v38  ;;  %v2253_v43 = vpop.f32.mrb[53].mxu1  ;;  %v6413_v44 = vpop.f32.mrb[54].mxu0 }
 0x150   : > { %v5905_v39 = vpack.c.bf16 %v3261_v30, %v3260_v28  ;;  %v5580_v40 = vpack.c.bf16 %v3131_v31, %v3130_v29  ;;  %v2880_v46 = vadd.f32 %v7338_v9, %v2617_v36  ;;  %v2743_v47 = vmul.f32 %v7329_v48, %v2253_v43  ;;  %v6541_v51 = vpop.f32.mrb[54].mxu1  ;;  %v1744_v52 = vpop.f32.mrb[55].mxu0 }
 0x151   : > { %6121 = vst [vmem:[%s7076_s6 + $0xc8] sm:$0xff] %v5585_v34   ;;  %v5900_v45 = vpack.c.bf16 %v3259_v35, %v3258_v33  ;;  %v2618_v49 = vmul.f32 %v7329_v48, %v6413_v44  ;;  %v3008_v53 = vadd.f32 %v7338_v9, %v2745_v41  ;;  %v2878_v54 = vadd.f32 %v7338_v9, %v2615_v42  ;;  %v2256_v57 = vpop.f32.mrb[55].mxu1 }
 0x152   : > { %6185 = vst [vmem:[%s7076_s6 + $0x2c8] sm:$0xff] %v5905_v39   ;;  %6120 = vst [vmem:[%s7076_s6 + $0xc0] sm:$0xff] %v5580_v40   ;;  %v2746_v55 = vmul.f32 %v7329_v48, %v6541_v51  ;;  %v2616_v56 = vmul.f32 %v7329_v48, %v1744_v52  ;;  %v3006_v58 = vadd.f32 %v7338_v9, %v2743_v47  ;;  %v3136_v63 = vmax.f32 %v2880_v46, 0.0 }
 0x153   : > { %6184 = vst [vmem:[%s7076_s6 + $0x2c0] sm:$0xff] %v5900_v45   ;;  %v2881_v59 = vadd.f32 %v7338_v9, %v2618_v49  ;;  %v2744_v60 = vmul.f32 %v7329_v48, %v2256_v57  ;;  %v3264_v2 = vmax.f32 %v3008_v53, 0.0  ;;  %v3134_v50 = vmax.f32 %v2878_v54, 0.0 }
 0x154   : > { %v3009_v61 = vadd.f32 %v7338_v9, %v2746_v55  ;;  %v2879_v62 = vadd.f32 %v7338_v9, %v2616_v56  ;;  %v3262_v6 = vmax.f32 %v3006_v58, 0.0 }
 0x155   : > { %v3137_v0 = vmax.f32 %v2881_v59, 0.0  ;;  %v3007_v1 = vadd.f32 %v7338_v9, %v2744_v60  ;;  %v6416_v5 = vpop.f32.mrb[56].mxu0 }
 0x156   : > { %v3265_v3 = vmax.f32 %v3009_v61, 0.0  ;;  %v3135_v4 = vmax.f32 %v2879_v62, 0.0  ;;  %v2621_v10 = vmul.f32 %v7329_v48, %v6416_v5  ;;  %v6544_v11 = vpop.f32.mrb[56].mxu1  ;;  %v1757_v12 = vpop.f32.mrb[57].mxu0 }
 0x157   : > { %v5595_v7 = vpack.c.bf16 %v3137_v0, %v3136_v63  ;;  %v3263_v8 = vmax.f32 %v3007_v1, 0.0  ;;  %v2749_v15 = vmul.f32 %v7329_v48, %v6544_v11  ;;  %v2619_v16 = vmul.f32 %v7329_v48, %v1757_v12  ;;  %v2269_v17 = vpop.f32.mrb[57].mxu1  ;;  %v6417_v18 = vpop.f32.mrb[58].mxu0 }
 0x158   : > { %v5915_v13 = vpack.c.bf16 %v3265_v3, %v3264_v2  ;;  %v5590_v14 = vpack.c.bf16 %v3135_v4, %v3134_v50  ;;  %v2884_v20 = vadd.f32 %v7338_v9, %v2621_v10  ;;  %v2747_v21 = vmul.f32 %v7329_v48, %v2269_v17  ;;  %v6545_v23 = vpop.f32.mrb[58].mxu1  ;;  %v1760_v24 = vpop.f32.mrb[59].mxu0 }
 0x159   : > { %6123 = vst [vmem:[%s7076_s6 + $0xd8] sm:$0xff] %v5595_v7   ;;  %v5910_v19 = vpack.c.bf16 %v3263_v8, %v3262_v6  ;;  %v2622_v22 = vmul.f32 %v7329_v48, %v6417_v18  ;;  %v3012_v25 = vadd.f32 %v7338_v9, %v2749_v15  ;;  %v2882_v26 = vadd.f32 %v7338_v9, %v2619_v16  ;;  %v2272_v29 = vpop.f32.mrb[59].mxu1 }
 0x15a   : > { %6187 = vst [vmem:[%s7076_s6 + $0x2d8] sm:$0xff] %v5915_v13   ;;  %6122 = vst [vmem:[%s7076_s6 + $0xd0] sm:$0xff] %v5590_v14   ;;  %v2750_v27 = vmul.f32 %v7329_v48, %v6545_v23  ;;  %v2620_v28 = vmul.f32 %v7329_v48, %v1760_v24  ;;  %v3010_v30 = vadd.f32 %v7338_v9, %v2747_v21  ;;  %v3140_v35 = vmax.f32 %v2884_v20, 0.0 }
 0x15b   : > { %6186 = vst [vmem:[%s7076_s6 + $0x2d0] sm:$0xff] %v5910_v19   ;;  %v2885_v31 = vadd.f32 %v7338_v9, %v2622_v22  ;;  %v2748_v32 = vmul.f32 %v7329_v48, %v2272_v29  ;;  %v3268_v38 = vmax.f32 %v3012_v25, 0.0  ;;  %v3138_v39 = vmax.f32 %v2882_v26, 0.0 }
 0x15c   : > { %v3013_v33 = vadd.f32 %v7338_v9, %v2750_v27  ;;  %v2883_v34 = vadd.f32 %v7338_v9, %v2620_v28  ;;  %v3266_v43 = vmax.f32 %v3010_v30, 0.0 }
 0x15d   : > { %v3141_v36 = vmax.f32 %v2885_v31, 0.0  ;;  %v3011_v37 = vadd.f32 %v7338_v9, %v2748_v32  ;;  %v6420_v42 = vpop.f32.mrb[60].mxu0 }
 0x15e   : > { %v3269_v40 = vmax.f32 %v3013_v33, 0.0  ;;  %v3139_v41 = vmax.f32 %v2883_v34, 0.0  ;;  %v2625_v46 = vmul.f32 %v7329_v48, %v6420_v42  ;;  %v6548_v47 = vpop.f32.mrb[60].mxu1  ;;  %v1773_v49 = vpop.f32.mrb[61].mxu0 }
 0x15f   : > { %v5605_v44 = vpack.c.bf16 %v3141_v36, %v3140_v35  ;;  %v3267_v45 = vmax.f32 %v3011_v37, 0.0  ;;  %v2753_v53 = vmul.f32 %v7329_v48, %v6548_v47  ;;  %v2623_v54 = vmul.f32 %v7329_v48, %v1773_v49  ;;  %v2285_v55 = vpop.f32.mrb[61].mxu1  ;;  %v6421_v56 = vpop.f32.mrb[62].mxu0 }
 0x160   : > { %v5925_v51 = vpack.c.bf16 %v3269_v40, %v3268_v38  ;;  %v5600_v52 = vpack.c.bf16 %v3139_v41, %v3138_v39  ;;  %v2888_v58 = vadd.f32 %v7338_v9, %v2625_v46  ;;  %v2751_v59 = vmul.f32 %v7329_v48, %v2285_v55  ;;  %v6549_v61 = vpop.f32.mrb[62].mxu1  ;;  %v1776_v62 = vpop.f32.mrb[63].mxu0 }
 0x161   : > { %6125 = vst [vmem:[%s7076_s6 + $0xe8] sm:$0xff] %v5605_v44   ;;  %v5920_v57 = vpack.c.bf16 %v3267_v45, %v3266_v43  ;;  %v2626_v60 = vmul.f32 %v7329_v48, %v6421_v56  ;;  %v3016_v63 = vadd.f32 %v7338_v9, %v2753_v53  ;;  %v2886_v0 = vadd.f32 %v7338_v9, %v2623_v54  ;;  %v2288_v50 = vpop.f32.mrb[63].mxu1 }
 0x162   : > { %6189 = vst [vmem:[%s7076_s6 + $0x2e8] sm:$0xff] %v5925_v51   ;;  %6124 = vst [vmem:[%s7076_s6 + $0xe0] sm:$0xff] %v5600_v52   ;;  %v2754_v1 = vmul.f32 %v7329_v48, %v6549_v61  ;;  %v2624_v2 = vmul.f32 %v7329_v48, %v1776_v62  ;;  %v3014_v3 = vadd.f32 %v7338_v9, %v2751_v59  ;;  %v3144_v8 = vmax.f32 %v2888_v58, 0.0 }
 0x163   : > { %6188 = vst [vmem:[%s7076_s6 + $0x2e0] sm:$0xff] %v5920_v57   ;;  %v2889_v4 = vadd.f32 %v7338_v9, %v2626_v60  ;;  %v2752_v5 = vmul.f32 %v7329_v48, %v2288_v50  ;;  %v3272_v12 = vmax.f32 %v3016_v63, 0.0  ;;  %v3142_v13 = vmax.f32 %v2886_v0, 0.0 }
 0x164   : > { %v3017_v6 = vadd.f32 %v7338_v9, %v2754_v1  ;;  %v2887_v7 = vadd.f32 %v7338_v9, %v2624_v2  ;;  %v3270_v17 = vmax.f32 %v3014_v3, 0.0 }
 0x165   : > { %v3145_v10 = vmax.f32 %v2889_v4, 0.0  ;;  %v3015_v11 = vadd.f32 %v7338_v9, %v2752_v5  ;;  %v6424_v16 = vpop.f32.mrb[64].mxu0 }
 0x166   : > { %v3273_v14 = vmax.f32 %v3017_v6, 0.0  ;;  %v3143_v15 = vmax.f32 %v2887_v7, 0.0  ;;  %v2629_v20 = vmul.f32 %v7329_v48, %v6424_v16  ;;  %v6552_v21 = vpop.f32.mrb[64].mxu1  ;;  %v1789_v22 = vpop.f32.mrb[65].mxu0 }
 0x167   : > { %v5615_v18 = vpack.c.bf16 %v3145_v10, %v3144_v8  ;;  %v3271_v19 = vmax.f32 %v3015_v11, 0.0  ;;  %v2757_v25 = vmul.f32 %v7329_v48, %v6552_v21  ;;  %v2627_v26 = vmul.f32 %v7329_v48, %v1789_v22  ;;  %v2301_v27 = vpop.f32.mrb[65].mxu1  ;;  %v6425_v28 = vpop.f32.mrb[66].mxu0 }
 0x168   : > { %v5935_v23 = vpack.c.bf16 %v3273_v14, %v3272_v12  ;;  %v5610_v24 = vpack.c.bf16 %v3143_v15, %v3142_v13  ;;  %v2892_v30 = vadd.f32 %v7338_v9, %v2629_v20  ;;  %v2755_v31 = vmul.f32 %v7329_v48, %v2301_v27  ;;  %v6553_v33 = vpop.f32.mrb[66].mxu1  ;;  %v1792_v34 = vpop.f32.mrb[67].mxu0 }
 0x169   : > { %6127 = vst [vmem:[%s7076_s6 + $0xf8] sm:$0xff] %v5615_v18   ;;  %v5930_v29 = vpack.c.bf16 %v3271_v19, %v3270_v17  ;;  %v2630_v32 = vmul.f32 %v7329_v48, %v6425_v28  ;;  %v3020_v35 = vadd.f32 %v7338_v9, %v2757_v25  ;;  %v2890_v36 = vadd.f32 %v7338_v9, %v2627_v26  ;;  %v2304_v39 = vpop.f32.mrb[67].mxu1 }
 0x16a   : > { %6191 = vst [vmem:[%s7076_s6 + $0x2f8] sm:$0xff] %v5935_v23   ;;  %6126 = vst [vmem:[%s7076_s6 + $0xf0] sm:$0xff] %v5610_v24   ;;  %v2758_v37 = vmul.f32 %v7329_v48, %v6553_v33  ;;  %v2628_v38 = vmul.f32 %v7329_v48, %v1792_v34  ;;  %v3018_v40 = vadd.f32 %v7338_v9, %v2755_v31  ;;  %v3148_v45 = vmax.f32 %v2892_v30, 0.0 }
 0x16b   : > { %6190 = vst [vmem:[%s7076_s6 + $0x2f0] sm:$0xff] %v5930_v29   ;;  %v2893_v41 = vadd.f32 %v7338_v9, %v2630_v32  ;;  %v2756_v42 = vmul.f32 %v7329_v48, %v2304_v39  ;;  %v3276_v49 = vmax.f32 %v3020_v35, 0.0  ;;  %v3146_v51 = vmax.f32 %v2890_v36, 0.0 }
 0x16c   : > { %v3021_v43 = vadd.f32 %v7338_v9, %v2758_v37  ;;  %v2891_v44 = vadd.f32 %v7338_v9, %v2628_v38  ;;  %v3274_v55 = vmax.f32 %v3018_v40, 0.0 }
 0x16d   : > { %v3149_v46 = vmax.f32 %v2893_v41, 0.0  ;;  %v3019_v47 = vadd.f32 %v7338_v9, %v2756_v42  ;;  %v6428_v54 = vpop.f32.mrb[68].mxu0 }
 0x16e   : > { %v3277_v52 = vmax.f32 %v3021_v43, 0.0  ;;  %v3147_v53 = vmax.f32 %v2891_v44, 0.0  ;;  %v2633_v58 = vmul.f32 %v7329_v48, %v6428_v54  ;;  %v6556_v59 = vpop.f32.mrb[68].mxu1  ;;  %v1805_v60 = vpop.f32.mrb[69].mxu0 }
 0x16f   : > { %v5625_v56 = vpack.c.bf16 %v3149_v46, %v3148_v45  ;;  %v3275_v57 = vmax.f32 %v3019_v47, 0.0  ;;  %v2761_v63 = vmul.f32 %v7329_v48, %v6556_v59  ;;  %v2631_v0 = vmul.f32 %v7329_v48, %v1805_v60  ;;  %v2317_v1 = vpop.f32.mrb[69].mxu1  ;;  %v6429_v2 = vpop.f32.mrb[70].mxu0 }
 0x170   : > { %v5945_v61 = vpack.c.bf16 %v3277_v52, %v3276_v49  ;;  %v5620_v62 = vpack.c.bf16 %v3147_v53, %v3146_v51  ;;  %v2896_v3 = vadd.f32 %v7338_v9, %v2633_v58  ;;  %v2759_v4 = vmul.f32 %v7329_v48, %v2317_v1  ;;  %v6557_v6 = vpop.f32.mrb[70].mxu1  ;;  %v1808_v7 = vpop.f32.mrb[71].mxu0 }
 0x171   : > { %6129 = vst [vmem:[%s7076_s6 + $0x108] sm:$0xff] %v5625_v56   ;;  %v5940_v50 = vpack.c.bf16 %v3275_v57, %v3274_v55  ;;  %v2634_v5 = vmul.f32 %v7329_v48, %v6429_v2  ;;  %v3024_v8 = vadd.f32 %v7338_v9, %v2761_v63  ;;  %v2894_v10 = vadd.f32 %v7338_v9, %v2631_v0  ;;  %v2320_v13 = vpop.f32.mrb[71].mxu1 }
 0x172   : > { %6193 = vst [vmem:[%s7076_s6 + $0x308] sm:$0xff] %v5945_v61   ;;  %6128 = vst [vmem:[%s7076_s6 + $0x100] sm:$0xff] %v5620_v62   ;;  %v2762_v11 = vmul.f32 %v7329_v48, %v6557_v6  ;;  %v2632_v12 = vmul.f32 %v7329_v48, %v1808_v7  ;;  %v3022_v14 = vadd.f32 %v7338_v9, %v2759_v4  ;;  %v3152_v19 = vmax.f32 %v2896_v3, 0.0 }
 0x173   : > { %6192 = vst [vmem:[%s7076_s6 + $0x300] sm:$0xff] %v5940_v50   ;;  %v2897_v15 = vadd.f32 %v7338_v9, %v2634_v5  ;;  %v2760_v16 = vmul.f32 %v7329_v48, %v2320_v13  ;;  %v3280_v22 = vmax.f32 %v3024_v8, 0.0  ;;  %v3150_v23 = vmax.f32 %v2894_v10, 0.0 }
 0x174   : > { %v3025_v17 = vadd.f32 %v7338_v9, %v2762_v11  ;;  %v2895_v18 = vadd.f32 %v7338_v9, %v2632_v12  ;;  %v3278_v27 = vmax.f32 %v3022_v14, 0.0 }
 0x175   : > { %v3153_v20 = vmax.f32 %v2897_v15, 0.0  ;;  %v3023_v21 = vadd.f32 %v7338_v9, %v2760_v16  ;;  %v6432_v26 = vpop.f32.mrb[72].mxu0 }
 0x176   : > { %v3281_v24 = vmax.f32 %v3025_v17, 0.0  ;;  %v3151_v25 = vmax.f32 %v2895_v18, 0.0  ;;  %v2637_v30 = vmul.f32 %v7329_v48, %v6432_v26  ;;  %v6560_v31 = vpop.f32.mrb[72].mxu1  ;;  %v1821_v32 = vpop.f32.mrb[73].mxu0 }
 0x177   : > { %v5635_v28 = vpack.c.bf16 %v3153_v20, %v3152_v19  ;;  %v3279_v29 = vmax.f32 %v3023_v21, 0.0  ;;  %v2765_v35 = vmul.f32 %v7329_v48, %v6560_v31  ;;  %v2635_v36 = vmul.f32 %v7329_v48, %v1821_v32  ;;  %v2333_v37 = vpop.f32.mrb[73].mxu1  ;;  %v6433_v38 = vpop.f32.mrb[74].mxu0 }
 0x178   : > { %v5955_v33 = vpack.c.bf16 %v3281_v24, %v3280_v22  ;;  %v5630_v34 = vpack.c.bf16 %v3151_v25, %v3150_v23  ;;  %v2900_v40 = vadd.f32 %v7338_v9, %v2637_v30  ;;  %v2763_v41 = vmul.f32 %v7329_v48, %v2333_v37  ;;  %v6561_v43 = vpop.f32.mrb[74].mxu1  ;;  %v1824_v44 = vpop.f32.mrb[75].mxu0 }
 0x179   : > { %6131 = vst [vmem:[%s7076_s6 + $0x118] sm:$0xff] %v5635_v28   ;;  %v5950_v39 = vpack.c.bf16 %v3279_v29, %v3278_v27  ;;  %v2638_v42 = vmul.f32 %v7329_v48, %v6433_v38  ;;  %v3028_v45 = vadd.f32 %v7338_v9, %v2765_v35  ;;  %v2898_v46 = vadd.f32 %v7338_v9, %v2635_v36  ;;  %v2336_v51 = vpop.f32.mrb[75].mxu1 }
 0x17a   : > { %6195 = vst [vmem:[%s7076_s6 + $0x318] sm:$0xff] %v5955_v33   ;;  %6130 = vst [vmem:[%s7076_s6 + $0x110] sm:$0xff] %v5630_v34   ;;  %v2766_v47 = vmul.f32 %v7329_v48, %v6561_v43  ;;  %v2636_v49 = vmul.f32 %v7329_v48, %v1824_v44  ;;  %v3026_v52 = vadd.f32 %v7338_v9, %v2763_v41  ;;  %v3156_v57 = vmax.f32 %v2900_v40, 0.0 }
 0x17b   : > { %6194 = vst [vmem:[%s7076_s6 + $0x310] sm:$0xff] %v5950_v39   ;;  %v2901_v53 = vadd.f32 %v7338_v9, %v2638_v42  ;;  %v2764_v54 = vmul.f32 %v7329_v48, %v2336_v51  ;;  %v3284_v60 = vmax.f32 %v3028_v45, 0.0  ;;  %v3154_v61 = vmax.f32 %v2898_v46, 0.0 }
 0x17c   : > { %v3029_v55 = vadd.f32 %v7338_v9, %v2766_v47  ;;  %v2899_v56 = vadd.f32 %v7338_v9, %v2636_v49  ;;  %v3282_v1 = vmax.f32 %v3026_v52, 0.0 }
 0x17d   : > { %v3157_v58 = vmax.f32 %v2901_v53, 0.0  ;;  %v3027_v59 = vadd.f32 %v7338_v9, %v2764_v54  ;;  %v6436_v0 = vpop.f32.mrb[76].mxu0 }
 0x17e   : > { %v3285_v62 = vmax.f32 %v3029_v55, 0.0  ;;  %v3155_v63 = vmax.f32 %v2899_v56, 0.0  ;;  %v2641_v3 = vmul.f32 %v7329_v48, %v6436_v0  ;;  %v6564_v4 = vpop.f32.mrb[76].mxu1  ;;  %v1837_v5 = vpop.f32.mrb[77].mxu0 }
 0x17f   : > { %v5645_v2 = vpack.c.bf16 %v3157_v58, %v3156_v57  ;;  %v3283_v50 = vmax.f32 %v3027_v59, 0.0  ;;  %v2769_v8 = vmul.f32 %v7329_v48, %v6564_v4  ;;  %v2639_v10 = vmul.f32 %v7329_v48, %v1837_v5  ;;  %v2349_v11 = vpop.f32.mrb[77].mxu1  ;;  %v6437_v12 = vpop.f32.mrb[78].mxu0 }
 0x180   : > { %v5965_v6 = vpack.c.bf16 %v3285_v62, %v3284_v60  ;;  %v5640_v7 = vpack.c.bf16 %v3155_v63, %v3154_v61  ;;  %v2904_v14 = vadd.f32 %v7338_v9, %v2641_v3  ;;  %v2767_v15 = vmul.f32 %v7329_v48, %v2349_v11  ;;  %v6565_v17 = vpop.f32.mrb[78].mxu1  ;;  %v1840_v18 = vpop.f32.mrb[79].mxu0 }
 0x181   : > { %6133 = vst [vmem:[%s7076_s6 + $0x128] sm:$0xff] %v5645_v2   ;;  %v5960_v13 = vpack.c.bf16 %v3283_v50, %v3282_v1  ;;  %v2642_v16 = vmul.f32 %v7329_v48, %v6437_v12  ;;  %v3032_v19 = vadd.f32 %v7338_v9, %v2769_v8  ;;  %v2902_v20 = vadd.f32 %v7338_v9, %v2639_v10  ;;  %v2352_v23 = vpop.f32.mrb[79].mxu1 }
 0x182   : > { %6197 = vst [vmem:[%s7076_s6 + $0x328] sm:$0xff] %v5965_v6   ;;  %6132 = vst [vmem:[%s7076_s6 + $0x120] sm:$0xff] %v5640_v7   ;;  %v2770_v21 = vmul.f32 %v7329_v48, %v6565_v17  ;;  %v2640_v22 = vmul.f32 %v7329_v48, %v1840_v18  ;;  %v3030_v24 = vadd.f32 %v7338_v9, %v2767_v15  ;;  %v3160_v29 = vmax.f32 %v2904_v14, 0.0 }
 0x183   : > { %6196 = vst [vmem:[%s7076_s6 + $0x320] sm:$0xff] %v5960_v13   ;;  %v2905_v25 = vadd.f32 %v7338_v9, %v2642_v16  ;;  %v2768_v26 = vmul.f32 %v7329_v48, %v2352_v23  ;;  %v3288_v32 = vmax.f32 %v3032_v19, 0.0  ;;  %v3158_v33 = vmax.f32 %v2902_v20, 0.0 }
 0x184   : > { %v3033_v27 = vadd.f32 %v7338_v9, %v2770_v21  ;;  %v2903_v28 = vadd.f32 %v7338_v9, %v2640_v22  ;;  %v3286_v37 = vmax.f32 %v3030_v24, 0.0 }
 0x185   : > { %v3161_v30 = vmax.f32 %v2905_v25, 0.0  ;;  %v3031_v31 = vadd.f32 %v7338_v9, %v2768_v26  ;;  %v6440_v36 = vpop.f32.mrb[80].mxu0 }
 0x186   : > { %v3289_v34 = vmax.f32 %v3033_v27, 0.0  ;;  %v3159_v35 = vmax.f32 %v2903_v28, 0.0  ;;  %v2645_v40 = vmul.f32 %v7329_v48, %v6440_v36  ;;  %v6568_v41 = vpop.f32.mrb[80].mxu1  ;;  %v1853_v42 = vpop.f32.mrb[81].mxu0 }
 0x187   : > { %v5655_v38 = vpack.c.bf16 %v3161_v30, %v3160_v29  ;;  %v3287_v39 = vmax.f32 %v3031_v31, 0.0  ;;  %v2773_v45 = vmul.f32 %v7329_v48, %v6568_v41  ;;  %v2643_v46 = vmul.f32 %v7329_v48, %v1853_v42  ;;  %v2365_v47 = vpop.f32.mrb[81].mxu1  ;;  %v6441_v49 = vpop.f32.mrb[82].mxu0 }
 0x188   : > { %v5975_v43 = vpack.c.bf16 %v3289_v34, %v3288_v32  ;;  %v5650_v44 = vpack.c.bf16 %v3159_v35, %v3158_v33  ;;  %v2908_v52 = vadd.f32 %v7338_v9, %v2645_v40  ;;  %v2771_v53 = vmul.f32 %v7329_v48, %v2365_v47  ;;  %v6569_v55 = vpop.f32.mrb[82].mxu1  ;;  %v1856_v56 = vpop.f32.mrb[83].mxu0 }
 0x189   : > { %6135 = vst [vmem:[%s7076_s6 + $0x138] sm:$0xff] %v5655_v38   ;;  %v5970_v51 = vpack.c.bf16 %v3287_v39, %v3286_v37  ;;  %v2646_v54 = vmul.f32 %v7329_v48, %v6441_v49  ;;  %v3036_v57 = vadd.f32 %v7338_v9, %v2773_v45  ;;  %v2906_v58 = vadd.f32 %v7338_v9, %v2643_v46  ;;  %v2368_v61 = vpop.f32.mrb[83].mxu1 }
 0x18a   : > { %6199 = vst [vmem:[%s7076_s6 + $0x338] sm:$0xff] %v5975_v43   ;;  %6134 = vst [vmem:[%s7076_s6 + $0x130] sm:$0xff] %v5650_v44   ;;  %v2774_v59 = vmul.f32 %v7329_v48, %v6569_v55  ;;  %v2644_v60 = vmul.f32 %v7329_v48, %v1856_v56  ;;  %v3034_v62 = vadd.f32 %v7338_v9, %v2771_v53  ;;  %v3164_v50 = vmax.f32 %v2908_v52, 0.0 }
 0x18b   : > { %6198 = vst [vmem:[%s7076_s6 + $0x330] sm:$0xff] %v5970_v51   ;;  %v2909_v63 = vadd.f32 %v7338_v9, %v2646_v54  ;;  %v2772_v0 = vmul.f32 %v7329_v48, %v2368_v61  ;;  %v3292_v5 = vmax.f32 %v3036_v57, 0.0  ;;  %v3162_v6 = vmax.f32 %v2906_v58, 0.0 }
 0x18c   : > { %v3037_v1 = vadd.f32 %v7338_v9, %v2774_v59  ;;  %v2907_v2 = vadd.f32 %v7338_v9, %v2644_v60  ;;  %v3290_v11 = vmax.f32 %v3034_v62, 0.0 }
 0x18d   : > { %v3165_v3 = vmax.f32 %v2909_v63, 0.0  ;;  %v3035_v4 = vadd.f32 %v7338_v9, %v2772_v0  ;;  %v6444_v10 = vpop.f32.mrb[84].mxu0 }
 0x18e   : > { %v3293_v7 = vmax.f32 %v3037_v1, 0.0  ;;  %v3163_v8 = vmax.f32 %v2907_v2, 0.0  ;;  %v2649_v14 = vmul.f32 %v7329_v48, %v6444_v10  ;;  %v6572_v15 = vpop.f32.mrb[84].mxu1  ;;  %v1869_v16 = vpop.f32.mrb[85].mxu0 }
 0x18f   : > { %v5665_v12 = vpack.c.bf16 %v3165_v3, %v3164_v50  ;;  %v3291_v13 = vmax.f32 %v3035_v4, 0.0  ;;  %v2777_v19 = vmul.f32 %v7329_v48, %v6572_v15  ;;  %v2647_v20 = vmul.f32 %v7329_v48, %v1869_v16  ;;  %v2381_v21 = vpop.f32.mrb[85].mxu1  ;;  %v6445_v22 = vpop.f32.mrb[86].mxu0 }
 0x190   : > { %v5985_v17 = vpack.c.bf16 %v3293_v7, %v3292_v5  ;;  %v5660_v18 = vpack.c.bf16 %v3163_v8, %v3162_v6  ;;  %v2912_v24 = vadd.f32 %v7338_v9, %v2649_v14  ;;  %v2775_v25 = vmul.f32 %v7329_v48, %v2381_v21  ;;  %v6573_v27 = vpop.f32.mrb[86].mxu1  ;;  %v1872_v28 = vpop.f32.mrb[87].mxu0 }
 0x191   : > { %6137 = vst [vmem:[%s7076_s6 + $0x148] sm:$0xff] %v5665_v12   ;;  %v5980_v23 = vpack.c.bf16 %v3291_v13, %v3290_v11  ;;  %v2650_v26 = vmul.f32 %v7329_v48, %v6445_v22  ;;  %v3040_v29 = vadd.f32 %v7338_v9, %v2777_v19  ;;  %v2910_v30 = vadd.f32 %v7338_v9, %v2647_v20  ;;  %v2384_v33 = vpop.f32.mrb[87].mxu1 }
 0x192   : > { %6201 = vst [vmem:[%s7076_s6 + $0x348] sm:$0xff] %v5985_v17   ;;  %6136 = vst [vmem:[%s7076_s6 + $0x140] sm:$0xff] %v5660_v18   ;;  %v2778_v31 = vmul.f32 %v7329_v48, %v6573_v27  ;;  %v2648_v32 = vmul.f32 %v7329_v48, %v1872_v28  ;;  %v3038_v34 = vadd.f32 %v7338_v9, %v2775_v25  ;;  %v3168_v39 = vmax.f32 %v2912_v24, 0.0 }
 0x193   : > { %6200 = vst [vmem:[%s7076_s6 + $0x340] sm:$0xff] %v5980_v23   ;;  %v2913_v35 = vadd.f32 %v7338_v9, %v2650_v26  ;;  %v2776_v36 = vmul.f32 %v7329_v48, %v2384_v33  ;;  %v3296_v42 = vmax.f32 %v3040_v29, 0.0  ;;  %v3166_v43 = vmax.f32 %v2910_v30, 0.0 }
 0x194   : > { %v3041_v37 = vadd.f32 %v7338_v9, %v2778_v31  ;;  %v2911_v38 = vadd.f32 %v7338_v9, %v2648_v32  ;;  %v3294_v47 = vmax.f32 %v3038_v34, 0.0 }
 0x195   : > { %v3169_v40 = vmax.f32 %v2913_v35, 0.0  ;;  %v3039_v41 = vadd.f32 %v7338_v9, %v2776_v36  ;;  %v6448_v46 = vpop.f32.mrb[88].mxu0 }
 0x196   : > { %v3297_v44 = vmax.f32 %v3041_v37, 0.0  ;;  %v3167_v45 = vmax.f32 %v2911_v38, 0.0  ;;  %v2653_v52 = vmul.f32 %v7329_v48, %v6448_v46  ;;  %v6576_v53 = vpop.f32.mrb[88].mxu1  ;;  %v1885_v54 = vpop.f32.mrb[89].mxu0 }
 0x197   : > { %v5675_v49 = vpack.c.bf16 %v3169_v40, %v3168_v39  ;;  %v3295_v51 = vmax.f32 %v3039_v41, 0.0  ;;  %v2781_v57 = vmul.f32 %v7329_v48, %v6576_v53  ;;  %v2651_v58 = vmul.f32 %v7329_v48, %v1885_v54  ;;  %v2397_v59 = vpop.f32.mrb[89].mxu1  ;;  %v6449_v60 = vpop.f32.mrb[90].mxu0 }
 0x198   : > { %v5995_v55 = vpack.c.bf16 %v3297_v44, %v3296_v42  ;;  %v5670_v56 = vpack.c.bf16 %v3167_v45, %v3166_v43  ;;  %v2916_v62 = vadd.f32 %v7338_v9, %v2653_v52  ;;  %v2779_v63 = vmul.f32 %v7329_v48, %v2397_v59  ;;  %v6577_v1 = vpop.f32.mrb[90].mxu1  ;;  %v1888_v2 = vpop.f32.mrb[91].mxu0 }
 0x199   : > { %6139 = vst [vmem:[%s7076_s6 + $0x158] sm:$0xff] %v5675_v49   ;;  %v5990_v61 = vpack.c.bf16 %v3295_v51, %v3294_v47  ;;  %v2654_v0 = vmul.f32 %v7329_v48, %v6449_v60  ;;  %v3044_v50 = vadd.f32 %v7338_v9, %v2781_v57  ;;  %v2914_v3 = vadd.f32 %v7338_v9, %v2651_v58  ;;  %v2400_v6 = vpop.f32.mrb[91].mxu1 }
 0x19a   : > { %6203 = vst [vmem:[%s7076_s6 + $0x358] sm:$0xff] %v5995_v55   ;;  %6138 = vst [vmem:[%s7076_s6 + $0x150] sm:$0xff] %v5670_v56   ;;  %v2782_v4 = vmul.f32 %v7329_v48, %v6577_v1  ;;  %v2652_v5 = vmul.f32 %v7329_v48, %v1888_v2  ;;  %v3042_v7 = vadd.f32 %v7338_v9, %v2779_v63  ;;  %v3172_v13 = vmax.f32 %v2916_v62, 0.0 }
 0x19b   : > { %6202 = vst [vmem:[%s7076_s6 + $0x350] sm:$0xff] %v5990_v61   ;;  %v2917_v8 = vadd.f32 %v7338_v9, %v2654_v0  ;;  %v2780_v10 = vmul.f32 %v7329_v48, %v2400_v6  ;;  %v3300_v16 = vmax.f32 %v3044_v50, 0.0  ;;  %v3170_v17 = vmax.f32 %v2914_v3, 0.0 }
 0x19c   : > { %v3045_v11 = vadd.f32 %v7338_v9, %v2782_v4  ;;  %v2915_v12 = vadd.f32 %v7338_v9, %v2652_v5  ;;  %v3298_v21 = vmax.f32 %v3042_v7, 0.0 }
 0x19d   : > { %v3173_v14 = vmax.f32 %v2917_v8, 0.0  ;;  %v3043_v15 = vadd.f32 %v7338_v9, %v2780_v10  ;;  %v6452_v20 = vpop.f32.mrb[92].mxu0 }
 0x19e   : > { %v3301_v18 = vmax.f32 %v3045_v11, 0.0  ;;  %v3171_v19 = vmax.f32 %v2915_v12, 0.0  ;;  %v2657_v24 = vmul.f32 %v7329_v48, %v6452_v20  ;;  %v6580_v25 = vpop.f32.mrb[92].mxu1  ;;  %v1901_v26 = vpop.f32.mrb[93].mxu0 }
 0x19f   : > { %v5685_v22 = vpack.c.bf16 %v3173_v14, %v3172_v13  ;;  %v3299_v23 = vmax.f32 %v3043_v15, 0.0  ;;  %v2785_v29 = vmul.f32 %v7329_v48, %v6580_v25  ;;  %v2655_v30 = vmul.f32 %v7329_v48, %v1901_v26  ;;  %v2413_v31 = vpop.f32.mrb[93].mxu1  ;;  %v6453_v32 = vpop.f32.mrb[94].mxu0 }
 0x1a0   : > { %v6005_v27 = vpack.c.bf16 %v3301_v18, %v3300_v16  ;;  %v5680_v28 = vpack.c.bf16 %v3171_v19, %v3170_v17  ;;  %v2920_v34 = vadd.f32 %v7338_v9, %v2657_v24  ;;  %v2783_v35 = vmul.f32 %v7329_v48, %v2413_v31  ;;  %v6581_v37 = vpop.f32.mrb[94].mxu1  ;;  %v1904_v38 = vpop.f32.mrb[95].mxu0 }
 0x1a1   : > { %6141 = vst [vmem:[%s7076_s6 + $0x168] sm:$0xff] %v5685_v22   ;;  %v6000_v33 = vpack.c.bf16 %v3299_v23, %v3298_v21  ;;  %v2658_v36 = vmul.f32 %v7329_v48, %v6453_v32  ;;  %v3048_v39 = vadd.f32 %v7338_v9, %v2785_v29  ;;  %v2918_v40 = vadd.f32 %v7338_v9, %v2655_v30  ;;  %v2416_v43 = vpop.f32.mrb[95].mxu1 }
 0x1a2   : > { %6205 = vst [vmem:[%s7076_s6 + $0x368] sm:$0xff] %v6005_v27   ;;  %6140 = vst [vmem:[%s7076_s6 + $0x160] sm:$0xff] %v5680_v28   ;;  %v2786_v41 = vmul.f32 %v7329_v48, %v6581_v37  ;;  %v2656_v42 = vmul.f32 %v7329_v48, %v1904_v38  ;;  %v3046_v44 = vadd.f32 %v7338_v9, %v2783_v35  ;;  %v3176_v51 = vmax.f32 %v2920_v34, 0.0 }
 0x1a3   : > { %6204 = vst [vmem:[%s7076_s6 + $0x360] sm:$0xff] %v6000_v33   ;;  %v2921_v45 = vadd.f32 %v7338_v9, %v2658_v36  ;;  %v2784_v46 = vmul.f32 %v7329_v48, %v2416_v43  ;;  %v3304_v54 = vmax.f32 %v3048_v39, 0.0  ;;  %v3174_v55 = vmax.f32 %v2918_v40, 0.0  ;;  %v7608_v43 = vld [vmem:[%s7756_s3] ss:$0 sm:$0xff] }
 0x1a4   : > { %v3049_v47 = vadd.f32 %v7338_v9, %v2786_v41  ;;  %v2919_v49 = vadd.f32 %v7338_v9, %v2656_v42  ;;  %v3302_v59 = vmax.f32 %v3046_v44, 0.0 }
 0x1a5   : > { %v3177_v52 = vmax.f32 %v2921_v45, 0.0  ;;  %v3047_v53 = vadd.f32 %v7338_v9, %v2784_v46  ;;  %v6456_v58 = vpop.f32.mrb[96].mxu0 }
 0x1a6   : > { %v3305_v56 = vmax.f32 %v3049_v47, 0.0  ;;  %v3175_v57 = vmax.f32 %v2919_v49, 0.0  ;;  %v2661_v62 = vmul.f32 %v7329_v48, %v6456_v58  ;;  %v6584_v63 = vpop.f32.mrb[96].mxu1  ;;  %v1917_v0 = vpop.f32.mrb[97].mxu0 }
 0x1a7   : > { %v5695_v60 = vpack.c.bf16 %v3177_v52, %v3176_v51  ;;  %v3303_v61 = vmax.f32 %v3047_v53, 0.0  ;;  %v2789_v50 = vmul.f32 %v7329_v48, %v6584_v63  ;;  %v2659_v3 = vmul.f32 %v7329_v48, %v1917_v0  ;;  %v2429_v4 = vpop.f32.mrb[97].mxu1  ;;  %v6457_v5 = vpop.f32.mrb[98].mxu0 }
 0x1a8   : > { %v6015_v1 = vpack.c.bf16 %v3305_v56, %v3304_v54  ;;  %v5690_v2 = vpack.c.bf16 %v3175_v57, %v3174_v55  ;;  %v2924_v7 = vadd.f32 %v7338_v9, %v2661_v62  ;;  %v2787_v8 = vmul.f32 %v7329_v48, %v2429_v4  ;;  %v6585_v11 = vpop.f32.mrb[98].mxu1  ;;  %v1920_v12 = vpop.f32.mrb[99].mxu0 }
 0x1a9   : > { %6143 = vst [vmem:[%s7076_s6 + $0x178] sm:$0xff] %v5695_v60   ;;  %v6010_v6 = vpack.c.bf16 %v3303_v61, %v3302_v59  ;;  %v2662_v10 = vmul.f32 %v7329_v48, %v6457_v5  ;;  %v3052_v13 = vadd.f32 %v7338_v9, %v2789_v50  ;;  %v2922_v14 = vadd.f32 %v7338_v9, %v2659_v3  ;;  %v2432_v17 = vpop.f32.mrb[99].mxu1 }
 0x1aa   : > { %6207 = vst [vmem:[%s7076_s6 + $0x378] sm:$0xff] %v6015_v1   ;;  %6142 = vst [vmem:[%s7076_s6 + $0x170] sm:$0xff] %v5690_v2   ;;  %v2790_v15 = vmul.f32 %v7329_v48, %v6585_v11  ;;  %v2660_v16 = vmul.f32 %v7329_v48, %v1920_v12  ;;  %v3050_v18 = vadd.f32 %v7338_v9, %v2787_v8  ;;  %v3180_v23 = vmax.f32 %v2924_v7, 0.0 }
 0x1ab   : > { %6206 = vst [vmem:[%s7076_s6 + $0x370] sm:$0xff] %v6010_v6   ;;  %v2925_v19 = vadd.f32 %v7338_v9, %v2662_v10  ;;  %v2788_v20 = vmul.f32 %v7329_v48, %v2432_v17  ;;  %v3308_v26 = vmax.f32 %v3052_v13, 0.0  ;;  %v3178_v27 = vmax.f32 %v2922_v14, 0.0  ;;  %v7599_v48 = vld [vmem:[%s7755_s2] ss:$0 sm:$0xff] }
 0x1ac   : > { %v3053_v21 = vadd.f32 %v7338_v9, %v2790_v15  ;;  %v2923_v22 = vadd.f32 %v7338_v9, %v2660_v16  ;;  %v3306_v31 = vmax.f32 %v3050_v18, 0.0 }
 0x1ad   : > { %v3181_v24 = vmax.f32 %v2925_v19, 0.0  ;;  %v3051_v25 = vadd.f32 %v7338_v9, %v2788_v20  ;;  %v6460_v30 = vpop.f32.mrb[100].mxu0 }
 0x1ae   : > { %v3309_v28 = vmax.f32 %v3053_v21, 0.0  ;;  %v3179_v29 = vmax.f32 %v2923_v22, 0.0  ;;  %v2665_v34 = vmul.f32 %v7599_v48, %v6460_v30  ;;  %v6588_v35 = vpop.f32.mrb[100].mxu1  ;;  %v1933_v36 = vpop.f32.mrb[101].mxu0 }
 0x1af   : > { %v5705_v32 = vpack.c.bf16 %v3181_v24, %v3180_v23  ;;  %v3307_v33 = vmax.f32 %v3051_v25, 0.0  ;;  %v2793_v38 = vmul.f32 %v7599_v48, %v6588_v35  ;;  %v2663_v39 = vmul.f32 %v7599_v48, %v1933_v36  ;;  %v2445_v40 = vpop.f32.mrb[101].mxu1  ;;  %v6461_v41 = vpop.f32.mrb[102].mxu0 }
 0x1b0   : > { %v6025_v9 = vpack.c.bf16 %v3309_v28, %v3308_v26  ;;  %v5700_v37 = vpack.c.bf16 %v3179_v29, %v3178_v27  ;;  %v2928_v44 = vadd.f32 %v7608_v43, %v2665_v34  ;;  %v2791_v45 = vmul.f32 %v7599_v48, %v2445_v40  ;;  %v6589_v47 = vpop.f32.mrb[102].mxu1  ;;  %v1936_v49 = vpop.f32.mrb[103].mxu0 }
 0x1b1   : > { %6145 = vst [vmem:[%s7076_s6 + $0x188] sm:$0xff] %v5705_v32   ;;  %v6020_v42 = vpack.c.bf16 %v3307_v33, %v3306_v31  ;;  %v2666_v46 = vmul.f32 %v7599_v48, %v6461_v41  ;;  %v3056_v51 = vadd.f32 %v7608_v43, %v2793_v38  ;;  %v2926_v52 = vadd.f32 %v7608_v43, %v2663_v39  ;;  %v2448_v55 = vpop.f32.mrb[103].mxu1 }
 0x1b2   : > { %6209 = vst [vmem:[%s7076_s6 + $0x388] sm:$0xff] %v6025_v9   ;;  %6144 = vst [vmem:[%s7076_s6 + $0x180] sm:$0xff] %v5700_v37   ;;  %v2794_v53 = vmul.f32 %v7599_v48, %v6589_v47  ;;  %v2664_v54 = vmul.f32 %v7599_v48, %v1936_v49  ;;  %v3054_v56 = vadd.f32 %v7608_v43, %v2791_v45  ;;  %v3184_v61 = vmax.f32 %v2928_v44, 0.0 }
 0x1b3   : > { %6208 = vst [vmem:[%s7076_s6 + $0x380] sm:$0xff] %v6020_v42   ;;  %v2929_v57 = vadd.f32 %v7608_v43, %v2666_v46  ;;  %v2792_v58 = vmul.f32 %v7599_v48, %v2448_v55  ;;  %v3312_v0 = vmax.f32 %v3056_v51, 0.0  ;;  %v3182_v1 = vmax.f32 %v2926_v52, 0.0 }
 0x1b4   : > { %v3057_v59 = vadd.f32 %v7608_v43, %v2794_v53  ;;  %v2927_v60 = vadd.f32 %v7608_v43, %v2664_v54  ;;  %v3310_v4 = vmax.f32 %v3054_v56, 0.0 }
 0x1b5   : > { %v3185_v62 = vmax.f32 %v2929_v57, 0.0  ;;  %v3055_v63 = vadd.f32 %v7608_v43, %v2792_v58  ;;  %v6464_v3 = vpop.f32.mrb[104].mxu0 }
 0x1b6   : > { %v3313_v2 = vmax.f32 %v3057_v59, 0.0  ;;  %v3183_v50 = vmax.f32 %v2927_v60, 0.0  ;;  %v2669_v7 = vmul.f32 %v7599_v48, %v6464_v3  ;;  %v6592_v8 = vpop.f32.mrb[104].mxu1  ;;  %v1949_v10 = vpop.f32.mrb[105].mxu0 }
 0x1b7   : > { %v5715_v5 = vpack.c.bf16 %v3185_v62, %v3184_v61  ;;  %v3311_v6 = vmax.f32 %v3055_v63, 0.0  ;;  %v2797_v13 = vmul.f32 %v7599_v48, %v6592_v8  ;;  %v2667_v14 = vmul.f32 %v7599_v48, %v1949_v10  ;;  %v2461_v15 = vpop.f32.mrb[105].mxu1  ;;  %v6465_v16 = vpop.f32.mrb[106].mxu0 }
 0x1b8   : > { %v6035_v11 = vpack.c.bf16 %v3313_v2, %v3312_v0  ;;  %v5710_v12 = vpack.c.bf16 %v3183_v50, %v3182_v1  ;;  %v2932_v18 = vadd.f32 %v7608_v43, %v2669_v7  ;;  %v2795_v19 = vmul.f32 %v7599_v48, %v2461_v15  ;;  %v6593_v21 = vpop.f32.mrb[106].mxu1  ;;  %v1952_v22 = vpop.f32.mrb[107].mxu0 }
 0x1b9   : > { %6147 = vst [vmem:[%s7076_s6 + $0x198] sm:$0xff] %v5715_v5   ;;  %v6030_v17 = vpack.c.bf16 %v3311_v6, %v3310_v4  ;;  %v2670_v20 = vmul.f32 %v7599_v48, %v6465_v16  ;;  %v3060_v23 = vadd.f32 %v7608_v43, %v2797_v13  ;;  %v2930_v24 = vadd.f32 %v7608_v43, %v2667_v14  ;;  %v2464_v27 = vpop.f32.mrb[107].mxu1 }
 0x1ba   : > { %6211 = vst [vmem:[%s7076_s6 + $0x398] sm:$0xff] %v6035_v11   ;;  %6146 = vst [vmem:[%s7076_s6 + $0x190] sm:$0xff] %v5710_v12   ;;  %v2798_v25 = vmul.f32 %v7599_v48, %v6593_v21  ;;  %v2668_v26 = vmul.f32 %v7599_v48, %v1952_v22  ;;  %v3058_v28 = vadd.f32 %v7608_v43, %v2795_v19  ;;  %v3188_v33 = vmax.f32 %v2932_v18, 0.0 }
 0x1bb   : > { %6210 = vst [vmem:[%s7076_s6 + $0x390] sm:$0xff] %v6030_v17   ;;  %v2933_v29 = vadd.f32 %v7608_v43, %v2670_v20  ;;  %v2796_v30 = vmul.f32 %v7599_v48, %v2464_v27  ;;  %v3316_v36 = vmax.f32 %v3060_v23, 0.0  ;;  %v3186_v9 = vmax.f32 %v2930_v24, 0.0 }
 0x1bc   : > { %v3061_v31 = vadd.f32 %v7608_v43, %v2798_v25  ;;  %v2931_v32 = vadd.f32 %v7608_v43, %v2668_v26  ;;  %v3314_v40 = vmax.f32 %v3058_v28, 0.0 }
 0x1bd   : > { %v3189_v34 = vmax.f32 %v2933_v29, 0.0  ;;  %v3059_v35 = vadd.f32 %v7608_v43, %v2796_v30  ;;  %v6468_v39 = vpop.f32.mrb[108].mxu0 }
 0x1be   : > { %v3317_v37 = vmax.f32 %v3061_v31, 0.0  ;;  %v3187_v38 = vmax.f32 %v2931_v32, 0.0  ;;  %v2673_v44 = vmul.f32 %v7599_v48, %v6468_v39  ;;  %v6596_v45 = vpop.f32.mrb[108].mxu1  ;;  %v1965_v46 = vpop.f32.mrb[109].mxu0 }
 0x1bf   : > { %v5725_v41 = vpack.c.bf16 %v3189_v34, %v3188_v33  ;;  %v3315_v42 = vmax.f32 %v3059_v35, 0.0  ;;  %v2801_v51 = vmul.f32 %v7599_v48, %v6596_v45  ;;  %v2671_v52 = vmul.f32 %v7599_v48, %v1965_v46  ;;  %v2477_v53 = vpop.f32.mrb[109].mxu1  ;;  %v6469_v54 = vpop.f32.mrb[110].mxu0 }
 0x1c0   : > { %v6045_v47 = vpack.c.bf16 %v3317_v37, %v3316_v36  ;;  %v5720_v49 = vpack.c.bf16 %v3187_v38, %v3186_v9  ;;  %v2936_v56 = vadd.f32 %v7608_v43, %v2673_v44  ;;  %v2799_v57 = vmul.f32 %v7599_v48, %v2477_v53  ;;  %v6597_v59 = vpop.f32.mrb[110].mxu1  ;;  %v1968_v60 = vpop.f32.mrb[111].mxu0 }
 0x1c1   : > { %6149 = vst [vmem:[%s7076_s6 + $0x1a8] sm:$0xff] %v5725_v41   ;;  %v6040_v55 = vpack.c.bf16 %v3315_v42, %v3314_v40  ;;  %v2674_v58 = vmul.f32 %v7599_v48, %v6469_v54  ;;  %v3064_v61 = vadd.f32 %v7608_v43, %v2801_v51  ;;  %v2934_v62 = vadd.f32 %v7608_v43, %v2671_v52  ;;  %v2480_v1 = vpop.f32.mrb[111].mxu1 }
 0x1c2   : > { %6213 = vst [vmem:[%s7076_s6 + $0x3a8] sm:$0xff] %v6045_v47   ;;  %6148 = vst [vmem:[%s7076_s6 + $0x1a0] sm:$0xff] %v5720_v49   ;;  %v2802_v63 = vmul.f32 %v7599_v48, %v6597_v59  ;;  %v2672_v0 = vmul.f32 %v7599_v48, %v1968_v60  ;;  %v3062_v2 = vadd.f32 %v7608_v43, %v2799_v57  ;;  %v3192_v6 = vmax.f32 %v2936_v56, 0.0 }
 0x1c3   : > { %6212 = vst [vmem:[%s7076_s6 + $0x3a0] sm:$0xff] %v6040_v55   ;;  %v2937_v50 = vadd.f32 %v7608_v43, %v2674_v58  ;;  %v2800_v3 = vmul.f32 %v7599_v48, %v2480_v1  ;;  %v3320_v10 = vmax.f32 %v3064_v61, 0.0  ;;  %v3190_v11 = vmax.f32 %v2934_v62, 0.0 }
 0x1c4   : > { %v3065_v4 = vadd.f32 %v7608_v43, %v2802_v63  ;;  %v2935_v5 = vadd.f32 %v7608_v43, %v2672_v0  ;;  %v3318_v15 = vmax.f32 %v3062_v2, 0.0 }
 0x1c5   : > { %v3193_v7 = vmax.f32 %v2937_v50, 0.0  ;;  %v3063_v8 = vadd.f32 %v7608_v43, %v2800_v3 }
 0x1c6   : > { %v3321_v12 = vmax.f32 %v3065_v4, 0.0  ;;  %v3191_v13 = vmax.f32 %v2935_v5, 0.0  ;;  %v6472_v14 = vpop.f32.mrb[112].mxu0  ;;  %v6600_v19 = vpop.f32.mrb[112].mxu1 }
 0x1c7   : > { %v5735_v16 = vpack.c.bf16 %v3193_v7, %v3192_v6  ;;  %v3319_v17 = vmax.f32 %v3063_v8, 0.0  ;;  %v2677_v18 = vmul.f32 %v7599_v48, %v6472_v14  ;;  %v1981_v20 = vpop.f32.mrb[113].mxu0  ;;  %v2805_v23 = vmul.f32 %v7599_v48, %v6600_v19  ;;  %v2493_v25 = vpop.f32.mrb[113].mxu1 }
 0x1c8   : > { %v6055_v21 = vpack.c.bf16 %v3321_v12, %v3320_v10  ;;  %v5730_v22 = vpack.c.bf16 %v3191_v13, %v3190_v11  ;;  %v2675_v24 = vmul.f32 %v7599_v48, %v1981_v20  ;;  %v6473_v26 = vpop.f32.mrb[114].mxu0  ;;  %v2803_v29 = vmul.f32 %v7599_v48, %v2493_v25  ;;  %v6601_v31 = vpop.f32.mrb[114].mxu1 }
 0x1c9   : > { %6151 = vst [vmem:[%s7076_s6 + $0x1b8] sm:$0xff] %v5735_v16   ;;  %v6050_v27 = vpack.c.bf16 %v3319_v17, %v3318_v15  ;;  %v2940_v28 = vadd.f32 %v7608_v43, %v2677_v18  ;;  %v2678_v30 = vmul.f32 %v7599_v48, %v6473_v26  ;;  %v1984_v32 = vpop.f32.mrb[115].mxu0  ;;  %v3068_v33 = vadd.f32 %v7608_v43, %v2805_v23  ;;  %v2496_v9 = vpop.f32.mrb[115].mxu1 }
 0x1ca   : > { %6215 = vst [vmem:[%s7076_s6 + $0x3b8] sm:$0xff] %v6055_v21   ;;  %6150 = vst [vmem:[%s7076_s6 + $0x1b0] sm:$0xff] %v5730_v22   ;;  %v2938_v34 = vadd.f32 %v7608_v43, %v2675_v24  ;;  %v2806_v35 = vmul.f32 %v7599_v48, %v6601_v31  ;;  %v2676_v36 = vmul.f32 %v7599_v48, %v1984_v32 }
 0x1cb   : > { %6214 = vst [vmem:[%s7076_s6 + $0x3b0] sm:$0xff] %v6050_v27   ;;  %v3066_v37 = vadd.f32 %v7608_v43, %v2803_v29  ;;  %v2941_v38 = vadd.f32 %v7608_v43, %v2678_v30  ;;  %v2804_v39 = vmul.f32 %v7599_v48, %v2496_v9  ;;  %v3196_v42 = vmax.f32 %v2940_v28, 0.0 }
 0x1cc   : > { %v3069_v40 = vadd.f32 %v7608_v43, %v2806_v35  ;;  %v2939_v41 = vadd.f32 %v7608_v43, %v2676_v36  ;;  %v3324_v46 = vmax.f32 %v3068_v33, 0.0  ;;  %v3194_v47 = vmax.f32 %v2938_v34, 0.0 }
 0x1cd   : > { %v3197_v44 = vmax.f32 %v2941_v38, 0.0  ;;  %v3067_v45 = vadd.f32 %v7608_v43, %v2804_v39  ;;  %v3322_v53 = vmax.f32 %v3066_v37, 0.0 }
 0x1ce   : > { %v3325_v49 = vmax.f32 %v3069_v40, 0.0  ;;  %v3195_v51 = vmax.f32 %v2939_v41, 0.0  ;;  %v6476_v52 = vpop.f32.mrb[116].mxu0  ;;  %v6604_v57 = vpop.f32.mrb[116].mxu1 }
 0x1cf   : > { %v5745_v54 = vpack.c.bf16 %v3197_v44, %v3196_v42  ;;  %v3323_v55 = vmax.f32 %v3067_v45, 0.0  ;;  %v2681_v56 = vmul.f32 %v7599_v48, %v6476_v52  ;;  %v1997_v58 = vpop.f32.mrb[117].mxu0  ;;  %v2809_v61 = vmul.f32 %v7599_v48, %v6604_v57  ;;  %v2509_v63 = vpop.f32.mrb[117].mxu1 }
 0x1d0   : > { %v6065_v59 = vpack.c.bf16 %v3325_v49, %v3324_v46  ;;  %v5740_v60 = vpack.c.bf16 %v3195_v51, %v3194_v47  ;;  %v2679_v62 = vmul.f32 %v7599_v48, %v1997_v58  ;;  %v6477_v0 = vpop.f32.mrb[118].mxu0  ;;  %v2807_v50 = vmul.f32 %v7599_v48, %v2509_v63  ;;  %v6605_v4 = vpop.f32.mrb[118].mxu1 }
 0x1d1   : > { %6153 = vst [vmem:[%s7076_s6 + $0x1c8] sm:$0xff] %v5745_v54   ;;  %v6060_v1 = vpack.c.bf16 %v3323_v55, %v3322_v53  ;;  %v2944_v2 = vadd.f32 %v7608_v43, %v2681_v56  ;;  %v2682_v3 = vmul.f32 %v7599_v48, %v6477_v0  ;;  %v2000_v5 = vpop.f32.mrb[119].mxu0  ;;  %v3072_v6 = vadd.f32 %v7608_v43, %v2809_v61  ;;  %v2512_v11 = vpop.f32.mrb[119].mxu1 }
 0x1d2   : > { %6217 = vst [vmem:[%s7076_s6 + $0x3c8] sm:$0xff] %v6065_v59   ;;  %6152 = vst [vmem:[%s7076_s6 + $0x1c0] sm:$0xff] %v5740_v60   ;;  %v2942_v7 = vadd.f32 %v7608_v43, %v2679_v62  ;;  %v2810_v8 = vmul.f32 %v7599_v48, %v6605_v4  ;;  %v2680_v10 = vmul.f32 %v7599_v48, %v2000_v5 }
 0x1d3   : > { %6216 = vst [vmem:[%s7076_s6 + $0x3c0] sm:$0xff] %v6060_v1   ;;  %v3070_v12 = vadd.f32 %v7608_v43, %v2807_v50  ;;  %v2945_v13 = vadd.f32 %v7608_v43, %v2682_v3  ;;  %v2808_v14 = vmul.f32 %v7599_v48, %v2512_v11  ;;  %v3200_v17 = vmax.f32 %v2944_v2, 0.0 }
 0x1d4   : > { %v3073_v15 = vadd.f32 %v7608_v43, %v2810_v8  ;;  %v2943_v16 = vadd.f32 %v7608_v43, %v2680_v10  ;;  %v3328_v20 = vmax.f32 %v3072_v6, 0.0  ;;  %v3198_v21 = vmax.f32 %v2942_v7, 0.0 }
 0x1d5   : > { %v3201_v18 = vmax.f32 %v2945_v13, 0.0  ;;  %v3071_v19 = vadd.f32 %v7608_v43, %v2808_v14  ;;  %v3326_v25 = vmax.f32 %v3070_v12, 0.0 }
 0x1d6   : > { %v3329_v22 = vmax.f32 %v3073_v15, 0.0  ;;  %v3199_v23 = vmax.f32 %v2943_v16, 0.0  ;;  %v6480_v24 = vpop.f32.mrb[120].mxu0  ;;  %v6608_v29 = vpop.f32.mrb[120].mxu1 }
 0x1d7   : > { %v5755_v26 = vpack.c.bf16 %v3201_v18, %v3200_v17  ;;  %v3327_v27 = vmax.f32 %v3071_v19, 0.0  ;;  %v2685_v28 = vmul.f32 %v7599_v48, %v6480_v24  ;;  %v2013_v30 = vpop.f32.mrb[121].mxu0  ;;  %v2813_v33 = vmul.f32 %v7599_v48, %v6608_v29  ;;  %v2525_v35 = vpop.f32.mrb[121].mxu1 }
 0x1d8   : > { %v6075_v31 = vpack.c.bf16 %v3329_v22, %v3328_v20  ;;  %v5750_v32 = vpack.c.bf16 %v3199_v23, %v3198_v21  ;;  %v2683_v34 = vmul.f32 %v7599_v48, %v2013_v30  ;;  %v6481_v36 = vpop.f32.mrb[122].mxu0  ;;  %v2811_v38 = vmul.f32 %v7599_v48, %v2525_v35  ;;  %v6609_v40 = vpop.f32.mrb[122].mxu1 }
 0x1d9   : > { %6155 = vst [vmem:[%s7076_s6 + $0x1d8] sm:$0xff] %v5755_v26   ;;  %v6070_v9 = vpack.c.bf16 %v3327_v27, %v3326_v25  ;;  %v2948_v37 = vadd.f32 %v7608_v43, %v2685_v28  ;;  %v2686_v39 = vmul.f32 %v7599_v48, %v6481_v36  ;;  %v2016_v41 = vpop.f32.mrb[123].mxu0  ;;  %v3076_v42 = vadd.f32 %v7608_v43, %v2813_v33  ;;  %v2528_v47 = vpop.f32.mrb[123].mxu1 }
 0x1da   : > { %6219 = vst [vmem:[%s7076_s6 + $0x3d8] sm:$0xff] %v6075_v31   ;;  %6154 = vst [vmem:[%s7076_s6 + $0x1d0] sm:$0xff] %v5750_v32   ;;  %v2946_v44 = vadd.f32 %v7608_v43, %v2683_v34  ;;  %v2814_v45 = vmul.f32 %v7599_v48, %v6609_v40  ;;  %v2684_v46 = vmul.f32 %v7599_v48, %v2016_v41 }
 0x1db   : > { %6218 = vst [vmem:[%s7076_s6 + $0x3d0] sm:$0xff] %v6070_v9   ;;  %v3074_v49 = vadd.f32 %v7608_v43, %v2811_v38  ;;  %v2949_v51 = vadd.f32 %v7608_v43, %v2686_v39  ;;  %v2812_v52 = vmul.f32 %v7599_v48, %v2528_v47  ;;  %v3204_v55 = vmax.f32 %v2948_v37, 0.0 }
 0x1dc   : > { %v3077_v53 = vadd.f32 %v7608_v43, %v2814_v45  ;;  %v2947_v54 = vadd.f32 %v7608_v43, %v2684_v46  ;;  %v3332_v58 = vmax.f32 %v3076_v42, 0.0  ;;  %v3202_v59 = vmax.f32 %v2946_v44, 0.0 }
 0x1dd   : > { %v3205_v56 = vmax.f32 %v2949_v51, 0.0  ;;  %v3075_v57 = vadd.f32 %v7608_v43, %v2812_v52  ;;  %v3330_v63 = vmax.f32 %v3074_v49, 0.0 }
 0x1de   : > { %v3333_v60 = vmax.f32 %v3077_v53, 0.0  ;;  %v3203_v61 = vmax.f32 %v2947_v54, 0.0  ;;  %v6484_v62 = vpop.f32.mrb[124].mxu0  ;;  %v6612_v50 = vpop.f32.mrb[124].mxu1 }
 0x1df   : > { %v5765_v0 = vpack.c.bf16 %v3205_v56, %v3204_v55  ;;  %v3331_v1 = vmax.f32 %v3075_v57, 0.0  ;;  %v2689_v2 = vmul.f32 %v7599_v48, %v6484_v62  ;;  %v2029_v3 = vpop.f32.mrb[125].mxu0  ;;  %v2817_v6 = vmul.f32 %v7599_v48, %v6612_v50  ;;  %v2541_v8 = vpop.f32.mrb[125].mxu1 }
 0x1e0   : > { %v6085_v4 = vpack.c.bf16 %v3333_v60, %v3332_v58  ;;  %v5760_v5 = vpack.c.bf16 %v3203_v61, %v3202_v59  ;;  %v2687_v7 = vmul.f32 %v7599_v48, %v2029_v3  ;;  %v6485_v10 = vpop.f32.mrb[126].mxu0  ;;  %v2815_v13 = vmul.f32 %v7599_v48, %v2541_v8  ;;  %v6613_v15 = vpop.f32.mrb[126].mxu1 }
 0x1e1   : > { %6157 = vst [vmem:[%s7076_s6 + $0x1e8] sm:$0xff] %v5765_v0   ;;  %v6080_v11 = vpack.c.bf16 %v3331_v1, %v3330_v63  ;;  %v2952_v12 = vadd.f32 %v7608_v43, %v2689_v2  ;;  %v2690_v14 = vmul.f32 %v7599_v48, %v6485_v10  ;;  %v2032_v16 = vpop.f32.mrb[127].mxu0  ;;  %v3080_v17 = vadd.f32 %v7608_v43, %v2817_v6  ;;  %v2544_v21 = vpop.f32.mrb[127].mxu1 }
 0x1e2   : > { %6221 = vst [vmem:[%s7076_s6 + $0x3e8] sm:$0xff] %v6085_v4   ;;  %6156 = vst [vmem:[%s7076_s6 + $0x1e0] sm:$0xff] %v5760_v5   ;;  %v2950_v18 = vadd.f32 %v7608_v43, %v2687_v7  ;;  %v2818_v19 = vmul.f32 %v7599_v48, %v6613_v15  ;;  %v2688_v20 = vmul.f32 %v7599_v48, %v2032_v16 }
 0x1e3   : > { %6220 = vst [vmem:[%s7076_s6 + $0x3e0] sm:$0xff] %v6080_v11   ;;  %v3078_v22 = vadd.f32 %v7608_v43, %v2815_v13  ;;  %v2953_v23 = vadd.f32 %v7608_v43, %v2690_v14  ;;  %v2816_v24 = vmul.f32 %v7599_v48, %v2544_v21  ;;  %v3208_v27 = vmax.f32 %v2952_v12, 0.0 }
 0x1e4   : > { %v3081_v25 = vadd.f32 %v7608_v43, %v2818_v19  ;;  %v2951_v26 = vadd.f32 %v7608_v43, %v2688_v20  ;;  %v3336_v30 = vmax.f32 %v3080_v17, 0.0  ;;  %v3206_v31 = vmax.f32 %v2950_v18, 0.0 }
 0x1e5   : > { %v3209_v28 = vmax.f32 %v2953_v23, 0.0  ;;  %v3079_v29 = vadd.f32 %v7608_v43, %v2816_v24  ;;  %v3334_v34 = vmax.f32 %v3078_v22, 0.0 }
 0x1e6   : > { %v3337_v32 = vmax.f32 %v3081_v25, 0.0  ;;  %v3207_v33 = vmax.f32 %v2951_v26, 0.0 }
 0x1e7   : > { %v5775_v35 = vpack.c.bf16 %v3209_v28, %v3208_v27  ;;  %v3335_v36 = vmax.f32 %v3079_v29, 0.0 }
 0x1e8   : > { %v6095_v9 = vpack.c.bf16 %v3337_v32, %v3336_v30  ;;  %v5770_v48 = vpack.c.bf16 %v3207_v33, %v3206_v31 }
 0x1e9   : > { %6159 = vst [vmem:[%s7076_s6 + $0x1f8] sm:$0xff] %v5775_v35   ;;  %v6090_v37 = vpack.c.bf16 %v3335_v36, %v3334_v34 }
 0x1ea   : > { %6223 = vst [vmem:[%s7076_s6 + $0x3f8] sm:$0xff] %v6095_v9   ;;  %6158 = vst [vmem:[%s7076_s6 + $0x1f0] sm:$0xff] %v5770_v48  }
 0x1eb   : > { %6222 = vst [vmem:[%s7076_s6 + $0x3f0] sm:$0xff] %v6090_v37  }
 0x1ec PF: > { %s14_s15 = sadd.s32 1, %s6766_s15  }
 0x1ed   : > { %p11_p4 = scmp.ge.s32.totalorder %s14_s15, 6  }
 0x1ef   :  { %13 = sbr.rel (!%p11_p4) target bundleno = 1 (0x1), region = 66 }

// kernel: wav2lip_disc_forward.7
= control target key start
LH: loop header
LB: loop body
LE: loop exit
PB: predicated region body
PF: predicated region fallthrough
CT: control target
= control target key end

     0   :  { %s3944_s15 = smov 0   ;;  %s4531_s0 = inlined_call_operand.vmem [shape: bf16[2048,160], index: 0, kind: input, shape index: {}]   ;;  %s4532_s1 = inlined_call_operand.vmem [shape: bf16[160,128], index: 1, kind: input, shape index: {}]   ;;  %s4533_s2 = inlined_call_operand.vmem [shape: f32[1,128], index: 2, kind: input, shape index: {}]   ;;  %s4534_s3 = inlined_call_operand.vmem [shape: f32[1,128], index: 3, kind: input, shape index: {}]   ;;  %s4535_s4 = inlined_call_operand.vmem [shape: bf16[2048,128], index: 4, kind: output, shape index: {}]  }
   0x1 LB: > { %s2821_s16 = sadd.s32 4294967295, %s3916_s15   ;;  %p2825_p0 = scmp.ge.s32.totalorder %s3916_s15, 1  ;;  %s3916_s15 = sphi %s3944_s15, %s14_s15  }
   0x2   : > { %p164_p1 = scmp.lt.s32.totalorder %s3916_s15, 3 }
   0x4   : > { %p165_p2 = pnand %p2825_p0, %p164_p1 }
   0x5   : > { %v3706_v0 = vld [vmem:[%s4532_s1] sm:$0xff] (!%p165_p2)   ;;  %v3918_v1 = vmov (!%p165_p2), 0   ;;  %s2826_s19 = sshll.u32 (!%p165_p2), %s2821_s16, 7  ;;  %v3707_v2 = vld [vmem:[%s4532_s1 + $0x8] sm:$0xff] (!%p165_p2)   ;;  %v3708_v3 = vld [vmem:[%s4532_s1 + $0x10] sm:$0xff] (!%p165_p2)   ;;  %vm989_vm0 = vcmask (!%p165_p2), 261120  }
   0x6   : > { %168 = sbr.rel (%p165_p2) target bundleno = 518 (0x206), region = 36  ;;  %1182 = vmatprep.subr.bf16.mxu0 (!%p165_p2), %v3918_v1  ;;  %3677 = vmatprep.subr.bf16.mxu1 (!%p165_p2), %v3918_v1  ;;  %p192_p3 = scmp.lt.s32.totalorder (!%p165_p2), %s2826_s19, 255  ;;  %v3709_v4 = vld [vmem:[%s4532_s1 + $0x18] sm:$0xff] (!%p165_p2)   ;;  %v3710_v7 = vld [vmem:[%s4532_s1 + $0x20] sm:$0xff] (!%p165_p2)   ;;  %v3711_v8 = vld [vmem:[%s4532_s1 + $0x28] sm:$0xff] (!%p165_p2)  }
   0x7   : > { %1183 = vmatpush1.bf16.msra.mxu0 (!%p165_p2), %v3706_v0  ;;  %3687 = vmatpush1.bf16.msra.mxu1 (!%p165_p2), %v3706_v0  ;;  %v3712_v9 = vld [vmem:[%s4532_s1 + $0x30] sm:$0xff] (!%p165_p2)   ;;  %v3713_v10 = vld [vmem:[%s4532_s1 + $0x38] sm:$0xff] (!%p165_p2)   ;;  %v3714_v11 = vld [vmem:[%s4532_s1 + $0x40] sm:$0xff] (!%p165_p2)  }
   0x8   : > { %1184 = vmatprep.subr.bf16.mxu0 (!%p165_p2), %v3918_v1  ;;  %3678 = vmatprep.subr.bf16.mxu1 (!%p165_p2), %v3918_v1  ;;  %v3715_v12 = vld [vmem:[%s4532_s1 + $0x48] sm:$0xff] (!%p165_p2)  }
   0xb   : > { %1185 = vmatpush1.bf16.msra.mxu0 (!%p165_p2), %v3707_v2  ;;  %3688 = vmatpush1.bf16.msra.mxu1 (!%p165_p2), %v3707_v2 }
   0xc   : > { %1186 = vmatprep.subr.bf16.mxu0 (!%p165_p2), %v3918_v1  ;;  %3679 = vmatprep.subr.bf16.mxu1 (!%p165_p2), %v3918_v1 }
   0xd   : > { %s4537_s19 = smov (!%p192_p3, %s2826_s19), 255 }
   0xe   : > { %s3165_s24 = sshll.u32 %s4537_s19, 3  ;;  %s2830_s22 = sshll.u32 %s4537_s19, 2 }
   0xf   : > { %s3967_s27 = scalar_lea.vmem %s4531_s0, %s3165_s24  ;;  %1187 = vmatpush1.bf16.msra.mxu0 %v3708_v3  ;;  %3689 = vmatpush1.bf16.msra.mxu1 %v3708_v3  ;;  %s4184_s24 = scalar_lea.vmem %s4535_s4, %s2830_s22 }
  0x10   : > { %1188 = vmatprep.subr.bf16.mxu0 %v3918_v1  ;;  %3680 = vmatprep.subr.bf16.mxu1 %v3918_v1  ;;  %v3718_v5 = vld [vmem:[%s3967_s27 + $0x4] ss:$8 sps:$4 sm:$0xff]   ;;  %v3716_v13 = vld [vmem:[%s3967_s27] ss:$8 sps:$4 sm:$0xff]   ;;  %v3722_v15 = vld [vmem:[%s3967_s27 + $0x14] ss:$8 sps:$4 sm:$0xff]  }
  0x11   : > { %v3721_v6 = vld [vmem:[%s3967_s27 + $0x204] ss:$8 sps:$4 sm:$0xff]   ;;  %2969 = vmatprep.mubr.msk.bf16.mxu0 %vm989_vm0, %v3718_v5  ;;  %v3719_v14 = vld [vmem:[%s3967_s27 + $0x200] ss:$8 sps:$4 sm:$0xff]   ;;  %v3724_v16 = vld [vmem:[%s3967_s27 + $0x214] ss:$8 sps:$4 sm:$0xff]  }
  0x12   : > { %3001 = vmatprep.mubr.msk.bf16.mxu1 %vm989_vm0, %v3721_v6  ;;  %v3726_v17 = vld [vmem:[%s3967_s27 + $0x10] ss:$8 sps:$4 sm:$0xff]   ;;  %v3728_v19 = vld [vmem:[%s3967_s27 + $0x24] ss:$8 sps:$4 sm:$0xff]   ;;  %v3732_v21 = vld [vmem:[%s3967_s27 + $0x20] ss:$8 sps:$4 sm:$0xff]  }
  0x13   : > { %1189 = vmatpush1.bf16.msra.mxu0 %v3709_v4  ;;  %3690 = vmatpush1.bf16.msra.mxu1 %v3709_v4  ;;  %v3727_v18 = vld [vmem:[%s3967_s27 + $0x210] ss:$8 sps:$4 sm:$0xff]   ;;  %v3730_v20 = vld [vmem:[%s3967_s27 + $0x224] ss:$8 sps:$4 sm:$0xff]   ;;  %v3733_v22 = vld [vmem:[%s3967_s27 + $0x220] ss:$8 sps:$4 sm:$0xff]  }
  0x14   : > { %1190 = vmatprep.subr.bf16.mxu0 %v3918_v1  ;;  %3681 = vmatprep.subr.bf16.mxu1 %v3918_v1  ;;  %v3734_v23 = vld [vmem:[%s3967_s27 + $0x34] ss:$8 sps:$4 sm:$0xff]   ;;  %v3738_v25 = vld [vmem:[%s3967_s27 + $0x30] ss:$8 sps:$4 sm:$0xff]   ;;  %v3740_v27 = vld [vmem:[%s3967_s27 + $0x44] ss:$8 sps:$4 sm:$0xff]  }
  0x15   : > { %v3736_v24 = vld [vmem:[%s3967_s27 + $0x234] ss:$8 sps:$4 sm:$0xff]   ;;  %v3739_v26 = vld [vmem:[%s3967_s27 + $0x230] ss:$8 sps:$4 sm:$0xff]   ;;  %v3742_v28 = vld [vmem:[%s3967_s27 + $0x244] ss:$8 sps:$4 sm:$0xff]  }
  0x16   : > { %v3744_v29 = vld [vmem:[%s3967_s27 + $0x40] ss:$8 sps:$4 sm:$0xff]   ;;  %v3746_v31 = vld [vmem:[%s3967_s27 + $0x54] ss:$8 sps:$4 sm:$0xff]   ;;  %v3750_v33 = vld [vmem:[%s3967_s27 + $0x50] ss:$8 sps:$4 sm:$0xff]  }
  0x17   : > { %1191 = vmatpush1.bf16.msra.mxu0 %v3710_v7  ;;  %3691 = vmatpush1.bf16.msra.mxu1 %v3710_v7  ;;  %v3745_v30 = vld [vmem:[%s3967_s27 + $0x240] ss:$8 sps:$4 sm:$0xff]   ;;  %v3748_v32 = vld [vmem:[%s3967_s27 + $0x254] ss:$8 sps:$4 sm:$0xff]   ;;  %v3751_v34 = vld [vmem:[%s3967_s27 + $0x250] ss:$8 sps:$4 sm:$0xff]  }
  0x18   : > { %1192 = vmatprep.subr.bf16.mxu0 %v3918_v1  ;;  %3682 = vmatprep.subr.bf16.mxu1 %v3918_v1  ;;  %v3752_v35 = vld [vmem:[%s3967_s27 + $0x64] ss:$8 sps:$4 sm:$0xff]   ;;  %v3756_v37 = vld [vmem:[%s3967_s27 + $0x60] ss:$8 sps:$4 sm:$0xff]   ;;  %v3758_v39 = vld [vmem:[%s3967_s27 + $0x74] ss:$8 sps:$4 sm:$0xff]  }
  0x19   : > { %v3754_v36 = vld [vmem:[%s3967_s27 + $0x264] ss:$8 sps:$4 sm:$0xff]   ;;  %v3757_v38 = vld [vmem:[%s3967_s27 + $0x260] ss:$8 sps:$4 sm:$0xff]   ;;  %v3760_v40 = vld [vmem:[%s3967_s27 + $0x274] ss:$8 sps:$4 sm:$0xff]  }
  0x1a   : > { %v3762_v41 = vld [vmem:[%s3967_s27 + $0x70] ss:$8 sps:$4 sm:$0xff]   ;;  %v3764_v43 = vld [vmem:[%s3967_s27 + $0x84] ss:$8 sps:$4 sm:$0xff]   ;;  %v3768_v45 = vld [vmem:[%s3967_s27 + $0x80] ss:$8 sps:$4 sm:$0xff]  }
  0x1b   : > { %1193 = vmatpush1.bf16.msra.mxu0 %v3711_v8  ;;  %3692 = vmatpush1.bf16.msra.mxu1 %v3711_v8  ;;  %v3763_v42 = vld [vmem:[%s3967_s27 + $0x270] ss:$8 sps:$4 sm:$0xff]   ;;  %v3766_v44 = vld [vmem:[%s3967_s27 + $0x284] ss:$8 sps:$4 sm:$0xff]   ;;  %v3769_v46 = vld [vmem:[%s3967_s27 + $0x280] ss:$8 sps:$4 sm:$0xff]  }
  0x1c   : > { %1194 = vmatprep.subr.bf16.mxu0 %v3918_v1  ;;  %3683 = vmatprep.subr.bf16.mxu1 %v3918_v1  ;;  %v3770_v47 = vld [vmem:[%s3967_s27 + $0x94] ss:$8 sps:$4 sm:$0xff]   ;;  %v3774_v49 = vld [vmem:[%s3967_s27 + $0x90] ss:$8 sps:$4 sm:$0xff]   ;;  %v3776_v51 = vld [vmem:[%s3967_s27 + $0xa4] ss:$8 sps:$4 sm:$0xff]  }
  0x1d   : > { %v3772_v48 = vld [vmem:[%s3967_s27 + $0x294] ss:$8 sps:$4 sm:$0xff]   ;;  %v3775_v50 = vld [vmem:[%s3967_s27 + $0x290] ss:$8 sps:$4 sm:$0xff]   ;;  %v3778_v52 = vld [vmem:[%s3967_s27 + $0x2a4] ss:$8 sps:$4 sm:$0xff]  }
  0x1e   : > { %v3780_v53 = vld [vmem:[%s3967_s27 + $0xa0] ss:$8 sps:$4 sm:$0xff]   ;;  %v3782_v55 = vld [vmem:[%s3967_s27 + $0xb4] ss:$8 sps:$4 sm:$0xff]   ;;  %v3786_v57 = vld [vmem:[%s3967_s27 + $0xb0] ss:$8 sps:$4 sm:$0xff]  }
  0x1f   : > { %1195 = vmatpush1.bf16.msra.mxu0 %v3712_v9  ;;  %3693 = vmatpush1.bf16.msra.mxu1 %v3712_v9  ;;  %v3781_v54 = vld [vmem:[%s3967_s27 + $0x2a0] ss:$8 sps:$4 sm:$0xff]   ;;  %v3784_v56 = vld [vmem:[%s3967_s27 + $0x2b4] ss:$8 sps:$4 sm:$0xff]   ;;  %v3787_v58 = vld [vmem:[%s3967_s27 + $0x2b0] ss:$8 sps:$4 sm:$0xff]  }
  0x20   : > { %1196 = vmatprep.subr.bf16.mxu0 %v3918_v1  ;;  %3684 = vmatprep.subr.bf16.mxu1 %v3918_v1  ;;  %v3788_v59 = vld [vmem:[%s3967_s27 + $0xc4] ss:$8 sps:$4 sm:$0xff]   ;;  %v3792_v61 = vld [vmem:[%s3967_s27 + $0xc0] ss:$8 sps:$4 sm:$0xff]   ;;  %v3794_v63 = vld [vmem:[%s3967_s27 + $0xd4] ss:$8 sps:$4 sm:$0xff]  }
  0x21   : > { %v3790_v60 = vld [vmem:[%s3967_s27 + $0x2c4] ss:$8 sps:$4 sm:$0xff]   ;;  %v3793_v62 = vld [vmem:[%s3967_s27 + $0x2c0] ss:$8 sps:$4 sm:$0xff]   ;;  %v3796_v0 = vld [vmem:[%s3967_s27 + $0x2d4] ss:$8 sps:$4 sm:$0xff]  }
  0x22   : > { %v3799_v2 = vld [vmem:[%s3967_s27 + $0x2d0] ss:$8 sps:$4 sm:$0xff]   ;;  %v3800_v3 = vld [vmem:[%s3967_s27 + $0xe4] ss:$8 sps:$4 sm:$0xff]   ;;  %v3804_v5 = vld [vmem:[%s3967_s27 + $0xe0] ss:$8 sps:$4 sm:$0xff]  }
  0x23   : > { %1197 = vmatpush1.bf16.msra.mxu0 %v3713_v10  ;;  %3694 = vmatpush1.bf16.msra.mxu1 %v3713_v10  ;;  %v3802_v4 = vld [vmem:[%s3967_s27 + $0x2e4] ss:$8 sps:$4 sm:$0xff]   ;;  %v3805_v6 = vld [vmem:[%s3967_s27 + $0x2e0] ss:$8 sps:$4 sm:$0xff]   ;;  %v3806_v7 = vld [vmem:[%s3967_s27 + $0xf4] ss:$8 sps:$4 sm:$0xff]  }
  0x24   : > { %1198 = vmatprep.subr.bf16.mxu0 %v3918_v1  ;;  %3685 = vmatprep.subr.bf16.mxu1 %v3918_v1  ;;  %v3808_v8 = vld [vmem:[%s3967_s27 + $0x2f4] ss:$8 sps:$4 sm:$0xff]   ;;  %v3810_v9 = vld [vmem:[%s3967_s27 + $0xf0] ss:$8 sps:$4 sm:$0xff]  }
  0x25   : > { %v3811_v10 = vld [vmem:[%s3967_s27 + $0x2f0] ss:$8 sps:$4 sm:$0xff]  }
  0x27   : > { %1199 = vmatpush1.bf16.msra.mxu0 %v3714_v11  ;;  %3695 = vmatpush1.bf16.msra.mxu1 %v3714_v11  ;;  %v3812_v11 = vld [vmem:[%s3967_s27 + $0x104] ss:$8 sps:$4 sm:$0xff]  }
  0x28   : > { %1200 = vmatprep.subr.bf16.mxu0 %v3918_v1  ;;  %3686 = vmatprep.subr.bf16.mxu1 %v3918_v1  ;;  %v3798_v1 = vld [vmem:[%s3967_s27 + $0xd0] ss:$8 sps:$4 sm:$0xff]  }
  0x2b   : > { %1201 = vmatpush1.bf16.msra.mxu0 %v3715_v12  ;;  %3696 = vmatpush1.bf16.msra.mxu1 %v3715_v12  ;;  %v3814_v12 = vld [vmem:[%s3967_s27 + $0x304] ss:$8 sps:$4 sm:$0xff]  }
  0x2e   : > { %1215 = vmatmul.mubr.bf16.vlgmr.msra.gmra.mrb[0].mxu0 %v3716_v13  ;;  %1471 = vmatmul.mubr.bf16.vlgmr.msra.gmra.mrb[0].mxu1 %v3719_v14  ;;  %v3816_v13 = vld [vmem:[%s3967_s27 + $0x100] ss:$8 sps:$4 sm:$0xff]  }
  0x2f   : > { %2970 = vmatprep.mubr.msk.bf16.mxu0 %vm989_vm0, %v3722_v15  ;;  %3002 = vmatprep.mubr.msk.bf16.mxu1 %vm989_vm0, %v3724_v16  ;;  %v3817_v14 = vld [vmem:[%s3967_s27 + $0x300] ss:$8 sps:$4 sm:$0xff]   ;;  %v3818_v15 = vld [vmem:[%s3967_s27 + $0x114] ss:$8 sps:$4 sm:$0xff]  }
  0x30   : > { %v3820_v16 = vld [vmem:[%s3967_s27 + $0x314] ss:$8 sps:$4 sm:$0xff]  }
  0x36   : > { %1223 = vmatmul.mubr.bf16.gmra.mrb[4].mxu0 %v3726_v17  ;;  %1479 = vmatmul.mubr.bf16.gmra.mrb[4].mxu1 %v3727_v18  ;;  %v3822_v17 = vld [vmem:[%s3967_s27 + $0x110] ss:$8 sps:$4 sm:$0xff]  }
  0x37   : > { %2971 = vmatprep.mubr.msk.bf16.mxu0 %vm989_vm0, %v3728_v19  ;;  %3003 = vmatprep.mubr.msk.bf16.mxu1 %vm989_vm0, %v3730_v20  ;;  %v3823_v18 = vld [vmem:[%s3967_s27 + $0x310] ss:$8 sps:$4 sm:$0xff]   ;;  %v3824_v19 = vld [vmem:[%s3967_s27 + $0x124] ss:$8 sps:$4 sm:$0xff]  }
  0x38   : > { %v3826_v20 = vld [vmem:[%s3967_s27 + $0x324] ss:$8 sps:$4 sm:$0xff]  }
  0x3e   : > { %1231 = vmatmul.mubr.bf16.gmra.mrb[8].mxu0 %v3732_v21  ;;  %1487 = vmatmul.mubr.bf16.gmra.mrb[8].mxu1 %v3733_v22  ;;  %v3828_v21 = vld [vmem:[%s3967_s27 + $0x120] ss:$8 sps:$4 sm:$0xff]  }
  0x3f   : > { %2972 = vmatprep.mubr.msk.bf16.mxu0 %vm989_vm0, %v3734_v23  ;;  %3004 = vmatprep.mubr.msk.bf16.mxu1 %vm989_vm0, %v3736_v24  ;;  %v3829_v22 = vld [vmem:[%s3967_s27 + $0x320] ss:$8 sps:$4 sm:$0xff]   ;;  %v3830_v23 = vld [vmem:[%s3967_s27 + $0x134] ss:$8 sps:$4 sm:$0xff]  }
  0x40   : > { %v3832_v24 = vld [vmem:[%s3967_s27 + $0x334] ss:$8 sps:$4 sm:$0xff]  }
  0x46   : > { %1239 = vmatmul.mubr.bf16.gmra.mrb[12].mxu0 %v3738_v25  ;;  %1495 = vmatmul.mubr.bf16.gmra.mrb[12].mxu1 %v3739_v26  ;;  %v3834_v25 = vld [vmem:[%s3967_s27 + $0x130] ss:$8 sps:$4 sm:$0xff]  }
  0x47   : > { %2973 = vmatprep.mubr.msk.bf16.mxu0 %vm989_vm0, %v3740_v27  ;;  %3005 = vmatprep.mubr.msk.bf16.mxu1 %vm989_vm0, %v3742_v28  ;;  %v3835_v26 = vld [vmem:[%s3967_s27 + $0x330] ss:$8 sps:$4 sm:$0xff]   ;;  %v3836_v27 = vld [vmem:[%s3967_s27 + $0x144] ss:$8 sps:$4 sm:$0xff]  }
  0x48   : > { %v3838_v28 = vld [vmem:[%s3967_s27 + $0x344] ss:$8 sps:$4 sm:$0xff]  }
  0x4e   : > { %1247 = vmatmul.mubr.bf16.gmra.mrb[16].mxu0 %v3744_v29  ;;  %1503 = vmatmul.mubr.bf16.gmra.mrb[16].mxu1 %v3745_v30  ;;  %v3840_v29 = vld [vmem:[%s3967_s27 + $0x140] ss:$8 sps:$4 sm:$0xff]  }
  0x4f   : > { %2974 = vmatprep.mubr.msk.bf16.mxu0 %vm989_vm0, %v3746_v31  ;;  %3006 = vmatprep.mubr.msk.bf16.mxu1 %vm989_vm0, %v3748_v32  ;;  %v3841_v30 = vld [vmem:[%s3967_s27 + $0x340] ss:$8 sps:$4 sm:$0xff]   ;;  %v3842_v31 = vld [vmem:[%s3967_s27 + $0x154] ss:$8 sps:$4 sm:$0xff]  }
  0x50   : > { %v3844_v32 = vld [vmem:[%s3967_s27 + $0x354] ss:$8 sps:$4 sm:$0xff]  }
  0x56   : > { %1255 = vmatmul.mubr.bf16.gmra.mrb[20].mxu0 %v3750_v33  ;;  %1511 = vmatmul.mubr.bf16.gmra.mrb[20].mxu1 %v3751_v34  ;;  %v3846_v33 = vld [vmem:[%s3967_s27 + $0x150] ss:$8 sps:$4 sm:$0xff]  }
  0x57   : > { %2975 = vmatprep.mubr.msk.bf16.mxu0 %vm989_vm0, %v3752_v35  ;;  %3007 = vmatprep.mubr.msk.bf16.mxu1 %vm989_vm0, %v3754_v36  ;;  %v3847_v34 = vld [vmem:[%s3967_s27 + $0x350] ss:$8 sps:$4 sm:$0xff]   ;;  %v3848_v35 = vld [vmem:[%s3967_s27 + $0x164] ss:$8 sps:$4 sm:$0xff]  }
  0x58   : > { %v3850_v36 = vld [vmem:[%s3967_s27 + $0x364] ss:$8 sps:$4 sm:$0xff]  }
  0x5e   : > { %1263 = vmatmul.mubr.bf16.gmra.mrb[24].mxu0 %v3756_v37  ;;  %1519 = vmatmul.mubr.bf16.gmra.mrb[24].mxu1 %v3757_v38  ;;  %v3852_v37 = vld [vmem:[%s3967_s27 + $0x160] ss:$8 sps:$4 sm:$0xff]  }
  0x5f   : > { %2976 = vmatprep.mubr.msk.bf16.mxu0 %vm989_vm0, %v3758_v39  ;;  %3008 = vmatprep.mubr.msk.bf16.mxu1 %vm989_vm0, %v3760_v40  ;;  %v3853_v38 = vld [vmem:[%s3967_s27 + $0x360] ss:$8 sps:$4 sm:$0xff]   ;;  %v3854_v39 = vld [vmem:[%s3967_s27 + $0x174] ss:$8 sps:$4 sm:$0xff]  }
  0x60   : > { %v3856_v40 = vld [vmem:[%s3967_s27 + $0x374] ss:$8 sps:$4 sm:$0xff]  }
  0x66   : > { %1271 = vmatmul.mubr.bf16.gmra.mrb[28].mxu0 %v3762_v41  ;;  %1527 = vmatmul.mubr.bf16.gmra.mrb[28].mxu1 %v3763_v42  ;;  %v3858_v41 = vld [vmem:[%s3967_s27 + $0x170] ss:$8 sps:$4 sm:$0xff]  }
  0x67   : > { %2977 = vmatprep.mubr.msk.bf16.mxu0 %vm989_vm0, %v3764_v43  ;;  %3009 = vmatprep.mubr.msk.bf16.mxu1 %vm989_vm0, %v3766_v44  ;;  %v3859_v42 = vld [vmem:[%s3967_s27 + $0x370] ss:$8 sps:$4 sm:$0xff]   ;;  %v3860_v43 = vld [vmem:[%s3967_s27 + $0x184] ss:$8 sps:$4 sm:$0xff]  }
  0x68   : > { %v3862_v44 = vld [vmem:[%s3967_s27 + $0x384] ss:$8 sps:$4 sm:$0xff]  }
  0x6e   : > { %1279 = vmatmul.mubr.bf16.gmra.mrb[32].mxu0 %v3768_v45  ;;  %1535 = vmatmul.mubr.bf16.gmra.mrb[32].mxu1 %v3769_v46  ;;  %v3864_v45 = vld [vmem:[%s3967_s27 + $0x180] ss:$8 sps:$4 sm:$0xff]  }
  0x6f   : > { %2978 = vmatprep.mubr.msk.bf16.mxu0 %vm989_vm0, %v3770_v47  ;;  %3010 = vmatprep.mubr.msk.bf16.mxu1 %vm989_vm0, %v3772_v48  ;;  %v3865_v46 = vld [vmem:[%s3967_s27 + $0x380] ss:$8 sps:$4 sm:$0xff]   ;;  %v3866_v47 = vld [vmem:[%s3967_s27 + $0x194] ss:$8 sps:$4 sm:$0xff]  }
  0x70   : > { %v3868_v48 = vld [vmem:[%s3967_s27 + $0x394] ss:$8 sps:$4 sm:$0xff]  }
  0x76   : > { %1287 = vmatmul.mubr.bf16.gmra.mrb[36].mxu0 %v3774_v49  ;;  %1543 = vmatmul.mubr.bf16.gmra.mrb[36].mxu1 %v3775_v50  ;;  %v3870_v49 = vld [vmem:[%s3967_s27 + $0x190] ss:$8 sps:$4 sm:$0xff]  }
  0x77   : > { %2979 = vmatprep.mubr.msk.bf16.mxu0 %vm989_vm0, %v3776_v51  ;;  %3011 = vmatprep.mubr.msk.bf16.mxu1 %vm989_vm0, %v3778_v52  ;;  %v3871_v50 = vld [vmem:[%s3967_s27 + $0x390] ss:$8 sps:$4 sm:$0xff]   ;;  %v3872_v51 = vld [vmem:[%s3967_s27 + $0x1a4] ss:$8 sps:$4 sm:$0xff]  }
  0x78   : > { %v3874_v52 = vld [vmem:[%s3967_s27 + $0x3a4] ss:$8 sps:$4 sm:$0xff]  }
  0x7e   : > { %1295 = vmatmul.mubr.bf16.gmra.mrb[40].mxu0 %v3780_v53  ;;  %1551 = vmatmul.mubr.bf16.gmra.mrb[40].mxu1 %v3781_v54  ;;  %v3876_v53 = vld [vmem:[%s3967_s27 + $0x1a0] ss:$8 sps:$4 sm:$0xff]  }
  0x7f   : > { %2980 = vmatprep.mubr.msk.bf16.mxu0 %vm989_vm0, %v3782_v55  ;;  %3012 = vmatprep.mubr.msk.bf16.mxu1 %vm989_vm0, %v3784_v56  ;;  %v3877_v54 = vld [vmem:[%s3967_s27 + $0x3a0] ss:$8 sps:$4 sm:$0xff]   ;;  %v3878_v55 = vld [vmem:[%s3967_s27 + $0x1b4] ss:$8 sps:$4 sm:$0xff]  }
  0x80   : > { %v3880_v56 = vld [vmem:[%s3967_s27 + $0x3b4] ss:$8 sps:$4 sm:$0xff]  }
  0x86   : > { %1303 = vmatmul.mubr.bf16.gmra.mrb[44].mxu0 %v3786_v57  ;;  %1559 = vmatmul.mubr.bf16.gmra.mrb[44].mxu1 %v3787_v58  ;;  %v4157_v57 = vld [vmem:[%s4533_s2] ss:$0 sm:$0xff] }
  0x87   : > { %2981 = vmatprep.mubr.msk.bf16.mxu0 %vm989_vm0, %v3788_v59  ;;  %3013 = vmatprep.mubr.msk.bf16.mxu1 %vm989_vm0, %v3790_v60  ;;  %v4164_v59 = vld [vmem:[%s4534_s3] ss:$0 sm:$0xff] }
  0x8e   : > { %1311 = vmatmul.mubr.bf16.gmra.mrb[48].mxu0 %v3792_v61  ;;  %1567 = vmatmul.mubr.bf16.gmra.mrb[48].mxu1 %v3793_v62 }
  0x8f   : > { %2982 = vmatprep.mubr.msk.bf16.mxu0 %vm989_vm0, %v3794_v63  ;;  %3014 = vmatprep.mubr.msk.bf16.mxu1 %vm989_vm0, %v3796_v0 }
  0x96   : > { %1319 = vmatmul.mubr.bf16.gmra.mrb[52].mxu0 %v3798_v1  ;;  %1575 = vmatmul.mubr.bf16.gmra.mrb[52].mxu1 %v3799_v2  ;;  %v3882_v1 = vld [vmem:[%s3967_s27 + $0x1b0] ss:$8 sps:$4 sm:$0xff]  }
  0x97   : > { %2983 = vmatprep.mubr.msk.bf16.mxu0 %vm989_vm0, %v3800_v3  ;;  %3015 = vmatprep.mubr.msk.bf16.mxu1 %vm989_vm0, %v3802_v4  ;;  %v3883_v2 = vld [vmem:[%s3967_s27 + $0x3b0] ss:$8 sps:$4 sm:$0xff]  }
  0x9e   : > { %1327 = vmatmul.mubr.bf16.gmra.mrb[56].mxu0 %v3804_v5  ;;  %1583 = vmatmul.mubr.bf16.gmra.mrb[56].mxu1 %v3805_v6  ;;  %v3884_v5 = vld [vmem:[%s3967_s27 + $0x1c4] ss:$8 sps:$4 sm:$0xff]  }
  0x9f   : > { %2984 = vmatprep.mubr.msk.bf16.mxu0 %vm989_vm0, %v3806_v7  ;;  %3016 = vmatprep.mubr.msk.bf16.mxu1 %vm989_vm0, %v3808_v8  ;;  %v3886_v6 = vld [vmem:[%s3967_s27 + $0x3c4] ss:$8 sps:$4 sm:$0xff]  }
  0xa6   : > { %1335 = vmatmul.mubr.bf16.gmra.mrb[60].mxu0 %v3810_v9  ;;  %1591 = vmatmul.mubr.bf16.gmra.mrb[60].mxu1 %v3811_v10 }
  0xa7   : > { %2985 = vmatprep.mubr.msk.bf16.mxu0 %vm989_vm0, %v3812_v11  ;;  %3017 = vmatprep.mubr.msk.bf16.mxu1 %vm989_vm0, %v3814_v12 }
  0xae   : > { %1343 = vmatmul.mubr.bf16.gmra.mrb[64].mxu0 %v3816_v13  ;;  %1599 = vmatmul.mubr.bf16.gmra.mrb[64].mxu1 %v3817_v14 }
  0xaf   : > { %2986 = vmatprep.mubr.msk.bf16.mxu0 %vm989_vm0, %v3818_v15  ;;  %3018 = vmatprep.mubr.msk.bf16.mxu1 %vm989_vm0, %v3820_v16 }
  0xb6   : > { %1351 = vmatmul.mubr.bf16.gmra.mrb[68].mxu0 %v3822_v17  ;;  %1607 = vmatmul.mubr.bf16.gmra.mrb[68].mxu1 %v3823_v18 }
  0xb7   : > { %2987 = vmatprep.mubr.msk.bf16.mxu0 %vm989_vm0, %v3824_v19  ;;  %3019 = vmatprep.mubr.msk.bf16.mxu1 %vm989_vm0, %v3826_v20 }
  0xbe   : > { %1359 = vmatmul.mubr.bf16.gmra.mrb[72].mxu0 %v3828_v21  ;;  %1615 = vmatmul.mubr.bf16.gmra.mrb[72].mxu1 %v3829_v22 }
  0xbf   : > { %2988 = vmatprep.mubr.msk.bf16.mxu0 %vm989_vm0, %v3830_v23  ;;  %3020 = vmatprep.mubr.msk.bf16.mxu1 %vm989_vm0, %v3832_v24 }
  0xc6   : > { %1367 = vmatmul.mubr.bf16.gmra.mrb[76].mxu0 %v3834_v25  ;;  %1623 = vmatmul.mubr.bf16.gmra.mrb[76].mxu1 %v3835_v26 }
  0xc7   : > { %2989 = vmatprep.mubr.msk.bf16.mxu0 %vm989_vm0, %v3836_v27  ;;  %3021 = vmatprep.mubr.msk.bf16.mxu1 %vm989_vm0, %v3838_v28  ;;  %v3888_v27 = vld [vmem:[%s3967_s27 + $0x1c0] ss:$8 sps:$4 sm:$0xff]  }
  0xc8   : > { %v3889_v28 = vld [vmem:[%s3967_s27 + $0x3c0] ss:$8 sps:$4 sm:$0xff]  }
  0xce   : > { %1375 = vmatmul.mubr.bf16.gmra.mrb[80].mxu0 %v3840_v29  ;;  %1631 = vmatmul.mubr.bf16.gmra.mrb[80].mxu1 %v3841_v30 }
  0xcf   : > { %2990 = vmatprep.mubr.msk.bf16.mxu0 %vm989_vm0, %v3842_v31  ;;  %3022 = vmatprep.mubr.msk.bf16.mxu1 %vm989_vm0, %v3844_v32  ;;  %v3890_v31 = vld [vmem:[%s3967_s27 + $0x1d4] ss:$8 sps:$4 sm:$0xff]  }
  0xd0   : > { %v3892_v32 = vld [vmem:[%s3967_s27 + $0x3d4] ss:$8 sps:$4 sm:$0xff]  }
  0xd6   : > { %1383 = vmatmul.mubr.bf16.gmra.mrb[84].mxu0 %v3846_v33  ;;  %1639 = vmatmul.mubr.bf16.gmra.mrb[84].mxu1 %v3847_v34 }
  0xd7   : > { %2991 = vmatprep.mubr.msk.bf16.mxu0 %vm989_vm0, %v3848_v35  ;;  %3023 = vmatprep.mubr.msk.bf16.mxu1 %vm989_vm0, %v3850_v36 }
  0xde   : > { %1391 = vmatmul.mubr.bf16.gmra.mrb[88].mxu0 %v3852_v37  ;;  %1647 = vmatmul.mubr.bf16.gmra.mrb[88].mxu1 %v3853_v38 }
  0xdf   : > { %2992 = vmatprep.mubr.msk.bf16.mxu0 %vm989_vm0, %v3854_v39  ;;  %3024 = vmatprep.mubr.msk.bf16.mxu1 %vm989_vm0, %v3856_v40 }
  0xe6   : > { %1399 = vmatmul.mubr.bf16.gmra.mrb[92].mxu0 %v3858_v41  ;;  %1655 = vmatmul.mubr.bf16.gmra.mrb[92].mxu1 %v3859_v42 }
  0xe7   : > { %2993 = vmatprep.mubr.msk.bf16.mxu0 %vm989_vm0, %v3860_v43  ;;  %3025 = vmatprep.mubr.msk.bf16.mxu1 %vm989_vm0, %v3862_v44 }
  0xee   : > { %1407 = vmatmul.mubr.bf16.gmra.mrb[96].mxu0 %v3864_v45  ;;  %1663 = vmatmul.mubr.bf16.gmra.mrb[96].mxu1 %v3865_v46 }
  0xef   : > { %2994 = vmatprep.mubr.msk.bf16.mxu0 %vm989_vm0, %v3866_v47  ;;  %3026 = vmatprep.mubr.msk.bf16.mxu1 %vm989_vm0, %v3868_v48 }
  0xf6   : > { %1415 = vmatmul.mubr.bf16.gmra.mrb[100].mxu0 %v3870_v49  ;;  %1671 = vmatmul.mubr.bf16.gmra.mrb[100].mxu1 %v3871_v50 }
  0xf7   : > { %2995 = vmatprep.mubr.msk.bf16.mxu0 %vm989_vm0, %v3872_v51  ;;  %3027 = vmatprep.mubr.msk.bf16.mxu1 %vm989_vm0, %v3874_v52 }
  0xfe   : > { %1423 = vmatmul.mubr.bf16.gmra.mrb[104].mxu0 %v3876_v53  ;;  %1679 = vmatmul.mubr.bf16.gmra.mrb[104].mxu1 %v3877_v54  ;;  %v3894_v53 = vld [vmem:[%s3967_s27 + $0x1d0] ss:$8 sps:$4 sm:$0xff]  }
  0xff   : > { %2996 = vmatprep.mubr.msk.bf16.mxu0 %vm989_vm0, %v3878_v55  ;;  %3028 = vmatprep.mubr.msk.bf16.mxu1 %vm989_vm0, %v3880_v56  ;;  %v3895_v54 = vld [vmem:[%s3967_s27 + $0x3d0] ss:$8 sps:$4 sm:$0xff]  }
 0x101   : > { %v1216_v58 = vpop.f32.mrb[0].mxu0  ;;  %v1472_v60 = vpop.f32.mrb[0].mxu1 }
 0x102   : > { %v1734_v61 = vmul.f32 %v4157_v57, %v1216_v58  ;;  %v1798_v62 = vmul.f32 %v4157_v57, %v1472_v60  ;;  %v1218_v63 = vpop.f32.mrb[1].mxu0  ;;  %v1474_v0 = vpop.f32.mrb[1].mxu1  ;;  %v3896_v58 = vld [vmem:[%s3967_s27 + $0x1e4] ss:$8 sps:$4 sm:$0xff]  }
 0x103   : > { %v1219_v3 = vpop.f32.mrb[2].mxu0  ;;  %v1475_v4 = vpop.f32.mrb[2].mxu1  ;;  %v3898_v60 = vld [vmem:[%s3967_s27 + $0x3e4] ss:$8 sps:$4 sm:$0xff]  }
 0x104   : > { %v1869_v7 = vadd.f32 %v4164_v59, %v1734_v61  ;;  %v1933_v8 = vadd.f32 %v4164_v59, %v1798_v62  ;;  %v1735_v9 = vmul.f32 %v4157_v57, %v1219_v3  ;;  %v1799_v10 = vmul.f32 %v4157_v57, %v1475_v4  ;;  %v1221_v11 = vpop.f32.mrb[3].mxu0  ;;  %v1477_v12 = vpop.f32.mrb[3].mxu1 }
 0x106   : > { %v1870_v13 = vadd.f32 %v4164_v59, %v1735_v9  ;;  %v1934_v14 = vadd.f32 %v4164_v59, %v1799_v10  ;;  %1431 = vmatmul.mubr.bf16.gmra.mrb[108].mxu0 %v3882_v1  ;;  %1687 = vmatmul.mubr.bf16.gmra.mrb[108].mxu1 %v3883_v2  ;;  %v1997_v15 = vmax.f32 %v1869_v7, 0.0  ;;  %v2061_v16 = vmax.f32 %v1933_v8, 0.0 }
 0x107   : > { %2997 = vmatprep.mubr.msk.bf16.mxu0 %vm989_vm0, %v3884_v5  ;;  %3029 = vmatprep.mubr.msk.bf16.mxu1 %vm989_vm0, %v3886_v6 }
 0x108   : > { %v1998_v17 = vmax.f32 %v1870_v13, 0.0  ;;  %v2062_v18 = vmax.f32 %v1934_v14, 0.0 }
 0x109   : > { %v1224_v19 = vpop.f32.mrb[4].mxu0  ;;  %v1480_v20 = vpop.f32.mrb[4].mxu1 }
 0x10a   : > { %v3297_v21 = vpack.c.bf16 %v1998_v17, %v1997_v15  ;;  %v3457_v22 = vpack.c.bf16 %v2062_v18, %v2061_v16  ;;  %v1736_v23 = vmul.f32 %v4157_v57, %v1224_v19  ;;  %v1800_v24 = vmul.f32 %v4157_v57, %v1480_v20  ;;  %v1226_v25 = vpop.f32.mrb[5].mxu0  ;;  %v1482_v26 = vpop.f32.mrb[5].mxu1  ;;  %v3900_v17 = vld [vmem:[%s3967_s27 + $0x1e0] ss:$8 sps:$4 sm:$0xff]  }
 0x10b   : > { %v1227_v29 = vpop.f32.mrb[6].mxu0  ;;  %v1483_v30 = vpop.f32.mrb[6].mxu1  ;;  %v3901_v18 = vld [vmem:[%s3967_s27 + $0x3e0] ss:$8 sps:$4 sm:$0xff]  }
 0x10c   : > { %3298 = vst [vmem:[%s4184_s24] sm:$0xff] %v3297_v21   ;;  %3645 = vst [vmem:[%s4184_s24 + $0x100] sm:$0xff] %v3457_v22   ;;  %v1871_v33 = vadd.f32 %v4164_v59, %v1736_v23  ;;  %v1935_v34 = vadd.f32 %v4164_v59, %v1800_v24  ;;  %v1737_v35 = vmul.f32 %v4157_v57, %v1227_v29  ;;  %v1229_v37 = vpop.f32.mrb[7].mxu0  ;;  %v1485_v38 = vpop.f32.mrb[7].mxu1  ;;  %v3902_v21 = vld [vmem:[%s3967_s27 + $0x1f4] ss:$8 sps:$4 sm:$0xff]  }
 0x10d   : > { %v1801_v36 = vmul.f32 %v4157_v57, %v1483_v30  ;;  %v3904_v22 = vld [vmem:[%s3967_s27 + $0x3f4] ss:$8 sps:$4 sm:$0xff]  }
 0x10e   : > { %v1872_v39 = vadd.f32 %v4164_v59, %v1737_v35  ;;  %1439 = vmatmul.mubr.bf16.gmra.mrb[112].mxu0 %v3888_v27  ;;  %1695 = vmatmul.mubr.bf16.gmra.mrb[112].mxu1 %v3889_v28  ;;  %v1999_v41 = vmax.f32 %v1871_v33, 0.0  ;;  %v2063_v42 = vmax.f32 %v1935_v34, 0.0 }
 0x10f   : > { %v1936_v40 = vadd.f32 %v4164_v59, %v1801_v36  ;;  %2998 = vmatprep.mubr.msk.bf16.mxu0 %vm989_vm0, %v3890_v31  ;;  %3030 = vmatprep.mubr.msk.bf16.mxu1 %vm989_vm0, %v3892_v32 }
 0x110   : > { %v2000_v43 = vmax.f32 %v1872_v39, 0.0 }
 0x111   : > { %v2064_v44 = vmax.f32 %v1936_v40, 0.0  ;;  %v1232_v45 = vpop.f32.mrb[8].mxu0  ;;  %v1488_v46 = vpop.f32.mrb[8].mxu1 }
 0x112   : > { %v3302_v47 = vpack.c.bf16 %v2000_v43, %v1999_v41  ;;  %v1738_v49 = vmul.f32 %v4157_v57, %v1232_v45  ;;  %v1802_v50 = vmul.f32 %v4157_v57, %v1488_v46  ;;  %v1234_v51 = vpop.f32.mrb[9].mxu0  ;;  %v1490_v52 = vpop.f32.mrb[9].mxu1  ;;  %v3906_v43 = vld [vmem:[%s3967_s27 + $0x1f0] ss:$8 sps:$4 sm:$0xff]  }
 0x113   : > { %v3462_v48 = vpack.c.bf16 %v2064_v44, %v2063_v42  ;;  %v1235_v55 = vpop.f32.mrb[10].mxu0  ;;  %v1491_v56 = vpop.f32.mrb[10].mxu1  ;;  %v3907_v44 = vld [vmem:[%s3967_s27 + $0x3f0] ss:$8 sps:$4 sm:$0xff]  }
 0x114   : > { %3614 = vst [vmem:[%s4184_s24 + $0x8] sm:$0xff] %v3302_v47   ;;  %v1873_v61 = vadd.f32 %v4164_v59, %v1738_v49  ;;  %v1937_v62 = vadd.f32 %v4164_v59, %v1802_v50  ;;  %v1739_v63 = vmul.f32 %v4157_v57, %v1235_v55  ;;  %v1803_v0 = vmul.f32 %v4157_v57, %v1491_v56  ;;  %v1237_v1 = vpop.f32.mrb[11].mxu0  ;;  %v1493_v2 = vpop.f32.mrb[11].mxu1 }
 0x115   : > { %3646 = vst [vmem:[%s4184_s24 + $0x108] sm:$0xff] %v3462_v48  }
 0x116   : > { %v1874_v3 = vadd.f32 %v4164_v59, %v1739_v63  ;;  %v1938_v4 = vadd.f32 %v4164_v59, %v1803_v0  ;;  %1447 = vmatmul.mubr.bf16.gmra.mrb[116].mxu0 %v3894_v53  ;;  %1703 = vmatmul.mubr.bf16.gmra.mrb[116].mxu1 %v3895_v54  ;;  %v2001_v5 = vmax.f32 %v1873_v61, 0.0  ;;  %v2065_v6 = vmax.f32 %v1937_v62, 0.0 }
 0x117   : > { %2999 = vmatprep.mubr.msk.bf16.mxu0 %vm989_vm0, %v3896_v58  ;;  %3031 = vmatprep.mubr.msk.bf16.mxu1 %vm989_vm0, %v3898_v60 }
 0x118   : > { %v2002_v7 = vmax.f32 %v1874_v3, 0.0  ;;  %v2066_v8 = vmax.f32 %v1938_v4, 0.0 }
 0x119   : > { %v1240_v9 = vpop.f32.mrb[12].mxu0  ;;  %v1496_v10 = vpop.f32.mrb[12].mxu1 }
 0x11a   : > { %v3307_v11 = vpack.c.bf16 %v2002_v7, %v2001_v5  ;;  %v3467_v12 = vpack.c.bf16 %v2066_v8, %v2065_v6  ;;  %v1740_v13 = vmul.f32 %v4157_v57, %v1240_v9  ;;  %v1804_v14 = vmul.f32 %v4157_v57, %v1496_v10  ;;  %v1242_v15 = vpop.f32.mrb[13].mxu0  ;;  %v1498_v16 = vpop.f32.mrb[13].mxu1 }
 0x11b   : > { %v1243_v19 = vpop.f32.mrb[14].mxu0  ;;  %v1499_v20 = vpop.f32.mrb[14].mxu1 }
 0x11c   : > { %3615 = vst [vmem:[%s4184_s24 + $0x10] sm:$0xff] %v3307_v11   ;;  %3647 = vst [vmem:[%s4184_s24 + $0x110] sm:$0xff] %v3467_v12   ;;  %v1875_v23 = vadd.f32 %v4164_v59, %v1740_v13  ;;  %v1939_v24 = vadd.f32 %v4164_v59, %v1804_v14  ;;  %v1741_v25 = vmul.f32 %v4157_v57, %v1243_v19  ;;  %v1245_v27 = vpop.f32.mrb[15].mxu0  ;;  %v1501_v28 = vpop.f32.mrb[15].mxu1 }
 0x11d   : > { %v1805_v26 = vmul.f32 %v4157_v57, %v1499_v20 }
 0x11e   : > { %v1876_v29 = vadd.f32 %v4164_v59, %v1741_v25  ;;  %1455 = vmatmul.mubr.bf16.gmra.mrb[120].mxu0 %v3900_v17  ;;  %1711 = vmatmul.mubr.bf16.gmra.mrb[120].mxu1 %v3901_v18  ;;  %v2003_v31 = vmax.f32 %v1875_v23, 0.0  ;;  %v2067_v32 = vmax.f32 %v1939_v24, 0.0 }
 0x11f   : > { %v1940_v30 = vadd.f32 %v4164_v59, %v1805_v26  ;;  %3000 = vmatprep.mubr.msk.bf16.mxu0 %vm989_vm0, %v3902_v21  ;;  %3032 = vmatprep.mubr.msk.bf16.mxu1 %vm989_vm0, %v3904_v22 }
 0x120   : > { %v2004_v33 = vmax.f32 %v1876_v29, 0.0 }
 0x121   : > { %v2068_v34 = vmax.f32 %v1940_v30, 0.0  ;;  %v1248_v35 = vpop.f32.mrb[16].mxu0  ;;  %v1504_v36 = vpop.f32.mrb[16].mxu1 }
 0x122   : > { %v3312_v37 = vpack.c.bf16 %v2004_v33, %v2003_v31  ;;  %v1742_v39 = vmul.f32 %v4157_v57, %v1248_v35  ;;  %v1806_v40 = vmul.f32 %v4157_v57, %v1504_v36  ;;  %v1250_v41 = vpop.f32.mrb[17].mxu0  ;;  %v1506_v42 = vpop.f32.mrb[17].mxu1 }
 0x123   : > { %v3472_v38 = vpack.c.bf16 %v2068_v34, %v2067_v32  ;;  %v1251_v45 = vpop.f32.mrb[18].mxu0  ;;  %v1507_v46 = vpop.f32.mrb[18].mxu1 }
 0x124   : > { %3616 = vst [vmem:[%s4184_s24 + $0x18] sm:$0xff] %v3312_v37   ;;  %v1877_v47 = vadd.f32 %v4164_v59, %v1742_v39  ;;  %v1941_v48 = vadd.f32 %v4164_v59, %v1806_v40  ;;  %v1743_v49 = vmul.f32 %v4157_v57, %v1251_v45  ;;  %v1807_v50 = vmul.f32 %v4157_v57, %v1507_v46  ;;  %v1253_v51 = vpop.f32.mrb[19].mxu0  ;;  %v1509_v52 = vpop.f32.mrb[19].mxu1 }
 0x125   : > { %3648 = vst [vmem:[%s4184_s24 + $0x118] sm:$0xff] %v3472_v38  }
 0x126   : > { %v1878_v53 = vadd.f32 %v4164_v59, %v1743_v49  ;;  %v1942_v54 = vadd.f32 %v4164_v59, %v1807_v50  ;;  %1463 = vmatmul.mubr.bf16.gmra.mrb[124].mxu0 %v3906_v43  ;;  %1719 = vmatmul.mubr.bf16.gmra.mrb[124].mxu1 %v3907_v44  ;;  %v2005_v55 = vmax.f32 %v1877_v47, 0.0  ;;  %v2069_v56 = vmax.f32 %v1941_v48, 0.0 }
 0x128   : > { %v2006_v58 = vmax.f32 %v1878_v53, 0.0  ;;  %v2070_v60 = vmax.f32 %v1942_v54, 0.0 }
 0x129   : > { %v1256_v61 = vpop.f32.mrb[20].mxu0  ;;  %v1512_v62 = vpop.f32.mrb[20].mxu1 }
 0x12a   : > { %v3317_v63 = vpack.c.bf16 %v2006_v58, %v2005_v55  ;;  %v3477_v0 = vpack.c.bf16 %v2070_v60, %v2069_v56  ;;  %v1744_v1 = vmul.f32 %v4157_v57, %v1256_v61  ;;  %v1808_v2 = vmul.f32 %v4157_v57, %v1512_v62  ;;  %v1258_v3 = vpop.f32.mrb[21].mxu0  ;;  %v1514_v4 = vpop.f32.mrb[21].mxu1 }
 0x12b   : > { %v1259_v5 = vpop.f32.mrb[22].mxu0  ;;  %v1515_v6 = vpop.f32.mrb[22].mxu1 }
 0x12c   : > { %3617 = vst [vmem:[%s4184_s24 + $0x20] sm:$0xff] %v3317_v63   ;;  %3649 = vst [vmem:[%s4184_s24 + $0x120] sm:$0xff] %v3477_v0   ;;  %v1879_v7 = vadd.f32 %v4164_v59, %v1744_v1  ;;  %v1943_v8 = vadd.f32 %v4164_v59, %v1808_v2  ;;  %v1745_v9 = vmul.f32 %v4157_v57, %v1259_v5  ;;  %v1261_v11 = vpop.f32.mrb[23].mxu0  ;;  %v1517_v12 = vpop.f32.mrb[23].mxu1 }
 0x12d   : > { %v1809_v10 = vmul.f32 %v4157_v57, %v1515_v6 }
 0x12e   : > { %v1880_v13 = vadd.f32 %v4164_v59, %v1745_v9  ;;  %v2007_v15 = vmax.f32 %v1879_v7, 0.0  ;;  %v2071_v16 = vmax.f32 %v1943_v8, 0.0 }
 0x12f   : > { %v1944_v14 = vadd.f32 %v4164_v59, %v1809_v10 }
 0x130   : > { %v2008_v17 = vmax.f32 %v1880_v13, 0.0 }
 0x131   : > { %v2072_v18 = vmax.f32 %v1944_v14, 0.0  ;;  %v1264_v19 = vpop.f32.mrb[24].mxu0  ;;  %v1520_v20 = vpop.f32.mrb[24].mxu1 }
 0x132   : > { %v3322_v21 = vpack.c.bf16 %v2008_v17, %v2007_v15  ;;  %v1746_v23 = vmul.f32 %v4157_v57, %v1264_v19  ;;  %v1810_v24 = vmul.f32 %v4157_v57, %v1520_v20  ;;  %v1266_v25 = vpop.f32.mrb[25].mxu0  ;;  %v1522_v26 = vpop.f32.mrb[25].mxu1 }
 0x133   : > { %v3482_v22 = vpack.c.bf16 %v2072_v18, %v2071_v16  ;;  %v1267_v27 = vpop.f32.mrb[26].mxu0  ;;  %v1523_v28 = vpop.f32.mrb[26].mxu1 }
 0x134   : > { %3618 = vst [vmem:[%s4184_s24 + $0x28] sm:$0xff] %v3322_v21   ;;  %v1881_v29 = vadd.f32 %v4164_v59, %v1746_v23  ;;  %v1945_v30 = vadd.f32 %v4164_v59, %v1810_v24  ;;  %v1747_v31 = vmul.f32 %v4157_v57, %v1267_v27  ;;  %v1811_v32 = vmul.f32 %v4157_v57, %v1523_v28  ;;  %v1269_v33 = vpop.f32.mrb[27].mxu0  ;;  %v1525_v34 = vpop.f32.mrb[27].mxu1 }
 0x135   : > { %3650 = vst [vmem:[%s4184_s24 + $0x128] sm:$0xff] %v3482_v22  }
 0x136   : > { %v1882_v35 = vadd.f32 %v4164_v59, %v1747_v31  ;;  %v1946_v36 = vadd.f32 %v4164_v59, %v1811_v32  ;;  %v2009_v37 = vmax.f32 %v1881_v29, 0.0  ;;  %v2073_v38 = vmax.f32 %v1945_v30, 0.0 }
 0x138   : > { %v2010_v39 = vmax.f32 %v1882_v35, 0.0  ;;  %v2074_v40 = vmax.f32 %v1946_v36, 0.0 }
 0x139   : > { %v1272_v41 = vpop.f32.mrb[28].mxu0  ;;  %v1528_v42 = vpop.f32.mrb[28].mxu1 }
 0x13a   : > { %v3327_v43 = vpack.c.bf16 %v2010_v39, %v2009_v37  ;;  %v3487_v44 = vpack.c.bf16 %v2074_v40, %v2073_v38  ;;  %v1748_v45 = vmul.f32 %v4157_v57, %v1272_v41  ;;  %v1812_v46 = vmul.f32 %v4157_v57, %v1528_v42  ;;  %v1274_v47 = vpop.f32.mrb[29].mxu0  ;;  %v1530_v48 = vpop.f32.mrb[29].mxu1 }
 0x13b   : > { %v1275_v49 = vpop.f32.mrb[30].mxu0  ;;  %v1531_v50 = vpop.f32.mrb[30].mxu1 }
 0x13c   : > { %3619 = vst [vmem:[%s4184_s24 + $0x30] sm:$0xff] %v3327_v43   ;;  %3651 = vst [vmem:[%s4184_s24 + $0x130] sm:$0xff] %v3487_v44   ;;  %v1883_v51 = vadd.f32 %v4164_v59, %v1748_v45  ;;  %v1947_v52 = vadd.f32 %v4164_v59, %v1812_v46  ;;  %v1749_v53 = vmul.f32 %v4157_v57, %v1275_v49  ;;  %v1277_v55 = vpop.f32.mrb[31].mxu0  ;;  %v1533_v56 = vpop.f32.mrb[31].mxu1 }
 0x13d   : > { %v1813_v54 = vmul.f32 %v4157_v57, %v1531_v50 }
 0x13e   : > { %v1884_v58 = vadd.f32 %v4164_v59, %v1749_v53  ;;  %v2011_v61 = vmax.f32 %v1883_v51, 0.0  ;;  %v2075_v62 = vmax.f32 %v1947_v52, 0.0 }
 0x13f   : > { %v1948_v60 = vadd.f32 %v4164_v59, %v1813_v54 }
 0x140   : > { %v2012_v63 = vmax.f32 %v1884_v58, 0.0 }
 0x141   : > { %v2076_v0 = vmax.f32 %v1948_v60, 0.0  ;;  %v1280_v1 = vpop.f32.mrb[32].mxu0  ;;  %v1536_v2 = vpop.f32.mrb[32].mxu1 }
 0x142   : > { %v3332_v3 = vpack.c.bf16 %v2012_v63, %v2011_v61  ;;  %v1750_v5 = vmul.f32 %v4157_v57, %v1280_v1  ;;  %v1814_v6 = vmul.f32 %v4157_v57, %v1536_v2  ;;  %v1282_v7 = vpop.f32.mrb[33].mxu0  ;;  %v1538_v8 = vpop.f32.mrb[33].mxu1 }
 0x143   : > { %v3492_v4 = vpack.c.bf16 %v2076_v0, %v2075_v62  ;;  %v1283_v9 = vpop.f32.mrb[34].mxu0  ;;  %v1539_v10 = vpop.f32.mrb[34].mxu1 }
 0x144   : > { %3620 = vst [vmem:[%s4184_s24 + $0x38] sm:$0xff] %v3332_v3   ;;  %v1885_v11 = vadd.f32 %v4164_v59, %v1750_v5  ;;  %v1949_v12 = vadd.f32 %v4164_v59, %v1814_v6  ;;  %v1751_v13 = vmul.f32 %v4157_v57, %v1283_v9  ;;  %v1815_v14 = vmul.f32 %v4157_v57, %v1539_v10  ;;  %v1285_v15 = vpop.f32.mrb[35].mxu0  ;;  %v1541_v16 = vpop.f32.mrb[35].mxu1 }
 0x145   : > { %3652 = vst [vmem:[%s4184_s24 + $0x138] sm:$0xff] %v3492_v4  }
 0x146   : > { %v1886_v17 = vadd.f32 %v4164_v59, %v1751_v13  ;;  %v1950_v18 = vadd.f32 %v4164_v59, %v1815_v14  ;;  %v2013_v19 = vmax.f32 %v1885_v11, 0.0  ;;  %v2077_v20 = vmax.f32 %v1949_v12, 0.0 }
 0x148   : > { %v2014_v21 = vmax.f32 %v1886_v17, 0.0  ;;  %v2078_v22 = vmax.f32 %v1950_v18, 0.0 }
 0x149   : > { %v1288_v23 = vpop.f32.mrb[36].mxu0  ;;  %v1544_v24 = vpop.f32.mrb[36].mxu1 }
 0x14a   : > { %v3337_v25 = vpack.c.bf16 %v2014_v21, %v2013_v19  ;;  %v3497_v26 = vpack.c.bf16 %v2078_v22, %v2077_v20  ;;  %v1752_v27 = vmul.f32 %v4157_v57, %v1288_v23  ;;  %v1816_v28 = vmul.f32 %v4157_v57, %v1544_v24  ;;  %v1290_v29 = vpop.f32.mrb[37].mxu0  ;;  %v1546_v30 = vpop.f32.mrb[37].mxu1 }
 0x14b   : > { %v1291_v31 = vpop.f32.mrb[38].mxu0  ;;  %v1547_v32 = vpop.f32.mrb[38].mxu1 }
 0x14c   : > { %3621 = vst [vmem:[%s4184_s24 + $0x40] sm:$0xff] %v3337_v25   ;;  %3653 = vst [vmem:[%s4184_s24 + $0x140] sm:$0xff] %v3497_v26   ;;  %v1887_v33 = vadd.f32 %v4164_v59, %v1752_v27  ;;  %v1951_v34 = vadd.f32 %v4164_v59, %v1816_v28  ;;  %v1753_v35 = vmul.f32 %v4157_v57, %v1291_v31  ;;  %v1293_v37 = vpop.f32.mrb[39].mxu0  ;;  %v1549_v38 = vpop.f32.mrb[39].mxu1 }
 0x14d   : > { %v1817_v36 = vmul.f32 %v4157_v57, %v1547_v32 }
 0x14e   : > { %v1888_v39 = vadd.f32 %v4164_v59, %v1753_v35  ;;  %v2015_v41 = vmax.f32 %v1887_v33, 0.0  ;;  %v2079_v42 = vmax.f32 %v1951_v34, 0.0 }
 0x14f   : > { %v1952_v40 = vadd.f32 %v4164_v59, %v1817_v36 }
 0x150   : > { %v2016_v43 = vmax.f32 %v1888_v39, 0.0 }
 0x151   : > { %v2080_v44 = vmax.f32 %v1952_v40, 0.0  ;;  %v1296_v45 = vpop.f32.mrb[40].mxu0  ;;  %v1552_v46 = vpop.f32.mrb[40].mxu1 }
 0x152   : > { %v3342_v47 = vpack.c.bf16 %v2016_v43, %v2015_v41  ;;  %v1754_v49 = vmul.f32 %v4157_v57, %v1296_v45  ;;  %v1818_v50 = vmul.f32 %v4157_v57, %v1552_v46  ;;  %v1298_v51 = vpop.f32.mrb[41].mxu0  ;;  %v1554_v52 = vpop.f32.mrb[41].mxu1 }
 0x153   : > { %v3502_v48 = vpack.c.bf16 %v2080_v44, %v2079_v42  ;;  %v1299_v53 = vpop.f32.mrb[42].mxu0  ;;  %v1555_v54 = vpop.f32.mrb[42].mxu1 }
 0x154   : > { %3622 = vst [vmem:[%s4184_s24 + $0x48] sm:$0xff] %v3342_v47   ;;  %v1889_v55 = vadd.f32 %v4164_v59, %v1754_v49  ;;  %v1953_v56 = vadd.f32 %v4164_v59, %v1818_v50  ;;  %v1755_v58 = vmul.f32 %v4157_v57, %v1299_v53  ;;  %v1819_v60 = vmul.f32 %v4157_v57, %v1555_v54  ;;  %v1301_v61 = vpop.f32.mrb[43].mxu0  ;;  %v1557_v62 = vpop.f32.mrb[43].mxu1 }
 0x155   : > { %3654 = vst [vmem:[%s4184_s24 + $0x148] sm:$0xff] %v3502_v48  }
 0x156   : > { %v1890_v63 = vadd.f32 %v4164_v59, %v1755_v58  ;;  %v1954_v0 = vadd.f32 %v4164_v59, %v1819_v60  ;;  %v2017_v1 = vmax.f32 %v1889_v55, 0.0  ;;  %v2081_v2 = vmax.f32 %v1953_v56, 0.0 }
 0x158   : > { %v2018_v3 = vmax.f32 %v1890_v63, 0.0  ;;  %v2082_v4 = vmax.f32 %v1954_v0, 0.0 }
 0x159   : > { %v1304_v5 = vpop.f32.mrb[44].mxu0  ;;  %v1560_v6 = vpop.f32.mrb[44].mxu1 }
 0x15a   : > { %v3347_v7 = vpack.c.bf16 %v2018_v3, %v2017_v1  ;;  %v3507_v8 = vpack.c.bf16 %v2082_v4, %v2081_v2  ;;  %v1756_v9 = vmul.f32 %v4157_v57, %v1304_v5  ;;  %v1820_v10 = vmul.f32 %v4157_v57, %v1560_v6  ;;  %v1306_v11 = vpop.f32.mrb[45].mxu0  ;;  %v1562_v12 = vpop.f32.mrb[45].mxu1 }
 0x15b   : > { %v1307_v13 = vpop.f32.mrb[46].mxu0  ;;  %v1563_v14 = vpop.f32.mrb[46].mxu1 }
 0x15c   : > { %3623 = vst [vmem:[%s4184_s24 + $0x50] sm:$0xff] %v3347_v7   ;;  %3655 = vst [vmem:[%s4184_s24 + $0x150] sm:$0xff] %v3507_v8   ;;  %v1891_v15 = vadd.f32 %v4164_v59, %v1756_v9  ;;  %v1955_v16 = vadd.f32 %v4164_v59, %v1820_v10  ;;  %v1757_v17 = vmul.f32 %v4157_v57, %v1307_v13  ;;  %v1309_v19 = vpop.f32.mrb[47].mxu0  ;;  %v1565_v20 = vpop.f32.mrb[47].mxu1 }
 0x15d   : > { %v1821_v18 = vmul.f32 %v4157_v57, %v1563_v14 }
 0x15e   : > { %v1892_v21 = vadd.f32 %v4164_v59, %v1757_v17  ;;  %v2019_v23 = vmax.f32 %v1891_v15, 0.0  ;;  %v2083_v24 = vmax.f32 %v1955_v16, 0.0 }
 0x15f   : > { %v1956_v22 = vadd.f32 %v4164_v59, %v1821_v18 }
 0x160   : > { %v2020_v25 = vmax.f32 %v1892_v21, 0.0 }
 0x161   : > { %v2084_v26 = vmax.f32 %v1956_v22, 0.0  ;;  %v1312_v27 = vpop.f32.mrb[48].mxu0  ;;  %v1568_v28 = vpop.f32.mrb[48].mxu1 }
 0x162   : > { %v3352_v29 = vpack.c.bf16 %v2020_v25, %v2019_v23  ;;  %v1758_v31 = vmul.f32 %v4157_v57, %v1312_v27  ;;  %v1822_v32 = vmul.f32 %v4157_v57, %v1568_v28  ;;  %v1314_v33 = vpop.f32.mrb[49].mxu0  ;;  %v1570_v34 = vpop.f32.mrb[49].mxu1 }
 0x163   : > { %v3512_v30 = vpack.c.bf16 %v2084_v26, %v2083_v24  ;;  %v1315_v35 = vpop.f32.mrb[50].mxu0  ;;  %v1571_v36 = vpop.f32.mrb[50].mxu1 }
 0x164   : > { %3624 = vst [vmem:[%s4184_s24 + $0x58] sm:$0xff] %v3352_v29   ;;  %v1893_v37 = vadd.f32 %v4164_v59, %v1758_v31  ;;  %v1957_v38 = vadd.f32 %v4164_v59, %v1822_v32  ;;  %v1759_v39 = vmul.f32 %v4157_v57, %v1315_v35  ;;  %v1823_v40 = vmul.f32 %v4157_v57, %v1571_v36  ;;  %v1317_v41 = vpop.f32.mrb[51].mxu0  ;;  %v1573_v42 = vpop.f32.mrb[51].mxu1 }
 0x165   : > { %3656 = vst [vmem:[%s4184_s24 + $0x158] sm:$0xff] %v3512_v30  }
 0x166   : > { %v1894_v43 = vadd.f32 %v4164_v59, %v1759_v39  ;;  %v1958_v44 = vadd.f32 %v4164_v59, %v1823_v40  ;;  %v2021_v45 = vmax.f32 %v1893_v37, 0.0  ;;  %v2085_v46 = vmax.f32 %v1957_v38, 0.0 }
 0x168   : > { %v2022_v47 = vmax.f32 %v1894_v43, 0.0  ;;  %v2086_v48 = vmax.f32 %v1958_v44, 0.0 }
 0x169   : > { %v1320_v49 = vpop.f32.mrb[52].mxu0  ;;  %v1576_v50 = vpop.f32.mrb[52].mxu1 }
 0x16a   : > { %v3357_v51 = vpack.c.bf16 %v2022_v47, %v2021_v45  ;;  %v3517_v52 = vpack.c.bf16 %v2086_v48, %v2085_v46  ;;  %v1760_v53 = vmul.f32 %v4157_v57, %v1320_v49  ;;  %v1824_v54 = vmul.f32 %v4157_v57, %v1576_v50  ;;  %v1322_v55 = vpop.f32.mrb[53].mxu0  ;;  %v1578_v56 = vpop.f32.mrb[53].mxu1 }
 0x16b   : > { %v1323_v58 = vpop.f32.mrb[54].mxu0  ;;  %v1579_v60 = vpop.f32.mrb[54].mxu1 }
 0x16c   : > { %3625 = vst [vmem:[%s4184_s24 + $0x60] sm:$0xff] %v3357_v51   ;;  %3657 = vst [vmem:[%s4184_s24 + $0x160] sm:$0xff] %v3517_v52   ;;  %v1895_v61 = vadd.f32 %v4164_v59, %v1760_v53  ;;  %v1959_v62 = vadd.f32 %v4164_v59, %v1824_v54  ;;  %v1761_v63 = vmul.f32 %v4157_v57, %v1323_v58  ;;  %v1325_v1 = vpop.f32.mrb[55].mxu0  ;;  %v1581_v2 = vpop.f32.mrb[55].mxu1 }
 0x16d   : > { %v1825_v0 = vmul.f32 %v4157_v57, %v1579_v60 }
 0x16e   : > { %v1896_v3 = vadd.f32 %v4164_v59, %v1761_v63  ;;  %v2023_v5 = vmax.f32 %v1895_v61, 0.0  ;;  %v2087_v6 = vmax.f32 %v1959_v62, 0.0 }
 0x16f   : > { %v1960_v4 = vadd.f32 %v4164_v59, %v1825_v0 }
 0x170   : > { %v2024_v7 = vmax.f32 %v1896_v3, 0.0 }
 0x171   : > { %v2088_v8 = vmax.f32 %v1960_v4, 0.0  ;;  %v1328_v9 = vpop.f32.mrb[56].mxu0  ;;  %v1584_v10 = vpop.f32.mrb[56].mxu1 }
 0x172   : > { %v3362_v11 = vpack.c.bf16 %v2024_v7, %v2023_v5  ;;  %v1762_v13 = vmul.f32 %v4157_v57, %v1328_v9  ;;  %v1826_v14 = vmul.f32 %v4157_v57, %v1584_v10  ;;  %v1330_v15 = vpop.f32.mrb[57].mxu0  ;;  %v1586_v16 = vpop.f32.mrb[57].mxu1 }
 0x173   : > { %v3522_v12 = vpack.c.bf16 %v2088_v8, %v2087_v6  ;;  %v1331_v17 = vpop.f32.mrb[58].mxu0  ;;  %v1587_v18 = vpop.f32.mrb[58].mxu1 }
 0x174   : > { %3626 = vst [vmem:[%s4184_s24 + $0x68] sm:$0xff] %v3362_v11   ;;  %v1897_v19 = vadd.f32 %v4164_v59, %v1762_v13  ;;  %v1961_v20 = vadd.f32 %v4164_v59, %v1826_v14  ;;  %v1763_v21 = vmul.f32 %v4157_v57, %v1331_v17  ;;  %v1827_v22 = vmul.f32 %v4157_v57, %v1587_v18  ;;  %v1333_v23 = vpop.f32.mrb[59].mxu0  ;;  %v1589_v24 = vpop.f32.mrb[59].mxu1 }
 0x175   : > { %3658 = vst [vmem:[%s4184_s24 + $0x168] sm:$0xff] %v3522_v12  }
 0x176   : > { %v1898_v25 = vadd.f32 %v4164_v59, %v1763_v21  ;;  %v1962_v26 = vadd.f32 %v4164_v59, %v1827_v22  ;;  %v2025_v27 = vmax.f32 %v1897_v19, 0.0  ;;  %v2089_v28 = vmax.f32 %v1961_v20, 0.0 }
 0x178   : > { %v2026_v29 = vmax.f32 %v1898_v25, 0.0  ;;  %v2090_v30 = vmax.f32 %v1962_v26, 0.0 }
 0x179   : > { %v1336_v31 = vpop.f32.mrb[60].mxu0  ;;  %v1592_v32 = vpop.f32.mrb[60].mxu1 }
 0x17a   : > { %v3367_v33 = vpack.c.bf16 %v2026_v29, %v2025_v27  ;;  %v3527_v34 = vpack.c.bf16 %v2090_v30, %v2089_v28  ;;  %v1764_v35 = vmul.f32 %v4157_v57, %v1336_v31  ;;  %v1828_v36 = vmul.f32 %v4157_v57, %v1592_v32  ;;  %v1338_v37 = vpop.f32.mrb[61].mxu0  ;;  %v1594_v38 = vpop.f32.mrb[61].mxu1 }
 0x17b   : > { %v1339_v39 = vpop.f32.mrb[62].mxu0  ;;  %v1595_v40 = vpop.f32.mrb[62].mxu1 }
 0x17c   : > { %3627 = vst [vmem:[%s4184_s24 + $0x70] sm:$0xff] %v3367_v33   ;;  %3659 = vst [vmem:[%s4184_s24 + $0x170] sm:$0xff] %v3527_v34   ;;  %v1899_v41 = vadd.f32 %v4164_v59, %v1764_v35  ;;  %v1963_v42 = vadd.f32 %v4164_v59, %v1828_v36  ;;  %v1765_v43 = vmul.f32 %v4157_v57, %v1339_v39  ;;  %v1341_v45 = vpop.f32.mrb[63].mxu0  ;;  %v1597_v46 = vpop.f32.mrb[63].mxu1 }
 0x17d   : > { %v1829_v44 = vmul.f32 %v4157_v57, %v1595_v40 }
 0x17e   : > { %v1900_v47 = vadd.f32 %v4164_v59, %v1765_v43  ;;  %v2027_v49 = vmax.f32 %v1899_v41, 0.0  ;;  %v2091_v50 = vmax.f32 %v1963_v42, 0.0 }
 0x17f   : > { %v1964_v48 = vadd.f32 %v4164_v59, %v1829_v44 }
 0x180   : > { %v2028_v51 = vmax.f32 %v1900_v47, 0.0 }
 0x181   : > { %v2092_v52 = vmax.f32 %v1964_v48, 0.0  ;;  %v1344_v53 = vpop.f32.mrb[64].mxu0  ;;  %v1600_v54 = vpop.f32.mrb[64].mxu1 }
 0x182   : > { %v3372_v55 = vpack.c.bf16 %v2028_v51, %v2027_v49  ;;  %v1766_v58 = vmul.f32 %v4157_v57, %v1344_v53  ;;  %v1830_v60 = vmul.f32 %v4157_v57, %v1600_v54  ;;  %v1346_v61 = vpop.f32.mrb[65].mxu0  ;;  %v1602_v62 = vpop.f32.mrb[65].mxu1 }
 0x183   : > { %v3532_v56 = vpack.c.bf16 %v2092_v52, %v2091_v50  ;;  %v1347_v63 = vpop.f32.mrb[66].mxu0  ;;  %v1603_v0 = vpop.f32.mrb[66].mxu1 }
 0x184   : > { %3628 = vst [vmem:[%s4184_s24 + $0x78] sm:$0xff] %v3372_v55   ;;  %v1901_v1 = vadd.f32 %v4164_v59, %v1766_v58  ;;  %v1965_v2 = vadd.f32 %v4164_v59, %v1830_v60  ;;  %v1767_v3 = vmul.f32 %v4157_v57, %v1347_v63  ;;  %v1831_v4 = vmul.f32 %v4157_v57, %v1603_v0  ;;  %v1349_v5 = vpop.f32.mrb[67].mxu0  ;;  %v1605_v6 = vpop.f32.mrb[67].mxu1 }
 0x185   : > { %3660 = vst [vmem:[%s4184_s24 + $0x178] sm:$0xff] %v3532_v56  }
 0x186   : > { %v1902_v7 = vadd.f32 %v4164_v59, %v1767_v3  ;;  %v1966_v8 = vadd.f32 %v4164_v59, %v1831_v4  ;;  %v2029_v9 = vmax.f32 %v1901_v1, 0.0  ;;  %v2093_v10 = vmax.f32 %v1965_v2, 0.0 }
 0x188   : > { %v2030_v11 = vmax.f32 %v1902_v7, 0.0  ;;  %v2094_v12 = vmax.f32 %v1966_v8, 0.0 }
 0x189   : > { %v1352_v13 = vpop.f32.mrb[68].mxu0  ;;  %v1608_v14 = vpop.f32.mrb[68].mxu1 }
 0x18a   : > { %v3377_v15 = vpack.c.bf16 %v2030_v11, %v2029_v9  ;;  %v3537_v16 = vpack.c.bf16 %v2094_v12, %v2093_v10  ;;  %v1768_v17 = vmul.f32 %v4157_v57, %v1352_v13  ;;  %v1832_v18 = vmul.f32 %v4157_v57, %v1608_v14  ;;  %v1354_v19 = vpop.f32.mrb[69].mxu0  ;;  %v1610_v20 = vpop.f32.mrb[69].mxu1 }
 0x18b   : > { %v1355_v21 = vpop.f32.mrb[70].mxu0  ;;  %v1611_v22 = vpop.f32.mrb[70].mxu1 }
 0x18c   : > { %3629 = vst [vmem:[%s4184_s24 + $0x80] sm:$0xff] %v3377_v15   ;;  %3661 = vst [vmem:[%s4184_s24 + $0x180] sm:$0xff] %v3537_v16   ;;  %v1903_v23 = vadd.f32 %v4164_v59, %v1768_v17  ;;  %v1967_v24 = vadd.f32 %v4164_v59, %v1832_v18  ;;  %v1769_v25 = vmul.f32 %v4157_v57, %v1355_v21  ;;  %v1357_v27 = vpop.f32.mrb[71].mxu0  ;;  %v1613_v28 = vpop.f32.mrb[71].mxu1 }
 0x18d   : > { %v1833_v26 = vmul.f32 %v4157_v57, %v1611_v22 }
 0x18e   : > { %v1904_v29 = vadd.f32 %v4164_v59, %v1769_v25  ;;  %v2031_v31 = vmax.f32 %v1903_v23, 0.0  ;;  %v2095_v32 = vmax.f32 %v1967_v24, 0.0 }
 0x18f   : > { %v1968_v30 = vadd.f32 %v4164_v59, %v1833_v26  ;;  %v4408_v26 = vld [vmem:[%s4534_s3] ss:$0 sm:$0xff] }
 0x190   : > { %v2032_v33 = vmax.f32 %v1904_v29, 0.0 }
 0x191   : > { %v2096_v34 = vmax.f32 %v1968_v30, 0.0  ;;  %v1360_v35 = vpop.f32.mrb[72].mxu0  ;;  %v1616_v36 = vpop.f32.mrb[72].mxu1 }
 0x192   : > { %v3382_v37 = vpack.c.bf16 %v2032_v33, %v2031_v31  ;;  %v1770_v39 = vmul.f32 %v4157_v57, %v1360_v35  ;;  %v1834_v40 = vmul.f32 %v4157_v57, %v1616_v36  ;;  %v1362_v41 = vpop.f32.mrb[73].mxu0  ;;  %v1618_v42 = vpop.f32.mrb[73].mxu1 }
 0x193   : > { %v3542_v38 = vpack.c.bf16 %v2096_v34, %v2095_v32  ;;  %v1363_v43 = vpop.f32.mrb[74].mxu0  ;;  %v1619_v44 = vpop.f32.mrb[74].mxu1 }
 0x194   : > { %3630 = vst [vmem:[%s4184_s24 + $0x88] sm:$0xff] %v3382_v37   ;;  %v1905_v45 = vadd.f32 %v4164_v59, %v1770_v39  ;;  %v1969_v46 = vadd.f32 %v4164_v59, %v1834_v40  ;;  %v1771_v47 = vmul.f32 %v4157_v57, %v1363_v43  ;;  %v1835_v48 = vmul.f32 %v4157_v57, %v1619_v44  ;;  %v1365_v49 = vpop.f32.mrb[75].mxu0  ;;  %v1621_v50 = vpop.f32.mrb[75].mxu1 }
 0x195   : > { %3662 = vst [vmem:[%s4184_s24 + $0x188] sm:$0xff] %v3542_v38  }
 0x196   : > { %v1906_v51 = vadd.f32 %v4164_v59, %v1771_v47  ;;  %v1970_v52 = vadd.f32 %v4164_v59, %v1835_v48  ;;  %v2033_v53 = vmax.f32 %v1905_v45, 0.0  ;;  %v2097_v54 = vmax.f32 %v1969_v46, 0.0 }
 0x198   : > { %v2034_v55 = vmax.f32 %v1906_v51, 0.0  ;;  %v2098_v56 = vmax.f32 %v1970_v52, 0.0 }
 0x199   : > { %v1368_v58 = vpop.f32.mrb[76].mxu0  ;;  %v1624_v60 = vpop.f32.mrb[76].mxu1 }
 0x19a   : > { %v3387_v61 = vpack.c.bf16 %v2034_v55, %v2033_v53  ;;  %v3547_v62 = vpack.c.bf16 %v2098_v56, %v2097_v54  ;;  %v1772_v63 = vmul.f32 %v4157_v57, %v1368_v58  ;;  %v1836_v0 = vmul.f32 %v4157_v57, %v1624_v60  ;;  %v1370_v1 = vpop.f32.mrb[77].mxu0  ;;  %v1626_v2 = vpop.f32.mrb[77].mxu1 }
 0x19b   : > { %v1371_v3 = vpop.f32.mrb[78].mxu0  ;;  %v1627_v4 = vpop.f32.mrb[78].mxu1 }
 0x19c   : > { %3631 = vst [vmem:[%s4184_s24 + $0x90] sm:$0xff] %v3387_v61   ;;  %3663 = vst [vmem:[%s4184_s24 + $0x190] sm:$0xff] %v3547_v62   ;;  %v1907_v5 = vadd.f32 %v4164_v59, %v1772_v63  ;;  %v1971_v6 = vadd.f32 %v4164_v59, %v1836_v0  ;;  %v1773_v7 = vmul.f32 %v4157_v57, %v1371_v3  ;;  %v1373_v9 = vpop.f32.mrb[79].mxu0  ;;  %v1629_v10 = vpop.f32.mrb[79].mxu1 }
 0x19d   : > { %v1837_v8 = vmul.f32 %v4157_v57, %v1627_v4  ;;  %v4399_v57 = vld [vmem:[%s4533_s2] ss:$0 sm:$0xff] }
 0x19e   : > { %v1908_v11 = vadd.f32 %v4164_v59, %v1773_v7  ;;  %v2035_v13 = vmax.f32 %v1907_v5, 0.0  ;;  %v2099_v14 = vmax.f32 %v1971_v6, 0.0 }
 0x19f   : > { %v1972_v12 = vadd.f32 %v4164_v59, %v1837_v8 }
 0x1a0   : > { %v2036_v15 = vmax.f32 %v1908_v11, 0.0 }
 0x1a1   : > { %v2100_v16 = vmax.f32 %v1972_v12, 0.0  ;;  %v1376_v17 = vpop.f32.mrb[80].mxu0  ;;  %v1632_v18 = vpop.f32.mrb[80].mxu1 }
 0x1a2   : > { %v3392_v19 = vpack.c.bf16 %v2036_v15, %v2035_v13  ;;  %v1774_v21 = vmul.f32 %v4399_v57, %v1376_v17  ;;  %v1838_v22 = vmul.f32 %v4399_v57, %v1632_v18  ;;  %v1378_v59 = vpop.f32.mrb[81].mxu0  ;;  %v1634_v23 = vpop.f32.mrb[81].mxu1 }
 0x1a3   : > { %v3552_v20 = vpack.c.bf16 %v2100_v16, %v2099_v14  ;;  %v1379_v24 = vpop.f32.mrb[82].mxu0  ;;  %v1635_v25 = vpop.f32.mrb[82].mxu1 }
 0x1a4   : > { %3632 = vst [vmem:[%s4184_s24 + $0x98] sm:$0xff] %v3392_v19   ;;  %v1909_v27 = vadd.f32 %v4408_v26, %v1774_v21  ;;  %v1973_v28 = vadd.f32 %v4408_v26, %v1838_v22  ;;  %v1775_v29 = vmul.f32 %v4399_v57, %v1379_v24  ;;  %v1839_v30 = vmul.f32 %v4399_v57, %v1635_v25  ;;  %v1381_v31 = vpop.f32.mrb[83].mxu0  ;;  %v1637_v32 = vpop.f32.mrb[83].mxu1 }
 0x1a5   : > { %3664 = vst [vmem:[%s4184_s24 + $0x198] sm:$0xff] %v3552_v20  }
 0x1a6   : > { %v1910_v33 = vadd.f32 %v4408_v26, %v1775_v29  ;;  %v1974_v34 = vadd.f32 %v4408_v26, %v1839_v30  ;;  %v2037_v35 = vmax.f32 %v1909_v27, 0.0  ;;  %v2101_v36 = vmax.f32 %v1973_v28, 0.0 }
 0x1a8   : > { %v2038_v37 = vmax.f32 %v1910_v33, 0.0  ;;  %v2102_v38 = vmax.f32 %v1974_v34, 0.0 }
 0x1a9   : > { %v1384_v39 = vpop.f32.mrb[84].mxu0  ;;  %v1640_v40 = vpop.f32.mrb[84].mxu1 }
 0x1aa   : > { %v3397_v41 = vpack.c.bf16 %v2038_v37, %v2037_v35  ;;  %v3557_v42 = vpack.c.bf16 %v2102_v38, %v2101_v36  ;;  %v1776_v43 = vmul.f32 %v4399_v57, %v1384_v39  ;;  %v1840_v44 = vmul.f32 %v4399_v57, %v1640_v40  ;;  %v1386_v45 = vpop.f32.mrb[85].mxu0  ;;  %v1642_v46 = vpop.f32.mrb[85].mxu1 }
 0x1ab   : > { %v1387_v47 = vpop.f32.mrb[86].mxu0  ;;  %v1643_v48 = vpop.f32.mrb[86].mxu1 }
 0x1ac   : > { %3633 = vst [vmem:[%s4184_s24 + $0xa0] sm:$0xff] %v3397_v41   ;;  %3665 = vst [vmem:[%s4184_s24 + $0x1a0] sm:$0xff] %v3557_v42   ;;  %v1911_v49 = vadd.f32 %v4408_v26, %v1776_v43  ;;  %v1975_v50 = vadd.f32 %v4408_v26, %v1840_v44  ;;  %v1777_v51 = vmul.f32 %v4399_v57, %v1387_v47  ;;  %v1389_v53 = vpop.f32.mrb[87].mxu0  ;;  %v1645_v54 = vpop.f32.mrb[87].mxu1 }
 0x1ad   : > { %v1841_v52 = vmul.f32 %v4399_v57, %v1643_v48 }
 0x1ae   : > { %v1912_v55 = vadd.f32 %v4408_v26, %v1777_v51  ;;  %v2039_v58 = vmax.f32 %v1911_v49, 0.0  ;;  %v2103_v60 = vmax.f32 %v1975_v50, 0.0 }
 0x1af   : > { %v1976_v56 = vadd.f32 %v4408_v26, %v1841_v52 }
 0x1b0   : > { %v2040_v61 = vmax.f32 %v1912_v55, 0.0 }
 0x1b1   : > { %v2104_v62 = vmax.f32 %v1976_v56, 0.0  ;;  %v1392_v63 = vpop.f32.mrb[88].mxu0  ;;  %v1648_v0 = vpop.f32.mrb[88].mxu1 }
 0x1b2   : > { %v3402_v1 = vpack.c.bf16 %v2040_v61, %v2039_v58  ;;  %v1778_v3 = vmul.f32 %v4399_v57, %v1392_v63  ;;  %v1842_v4 = vmul.f32 %v4399_v57, %v1648_v0  ;;  %v1394_v5 = vpop.f32.mrb[89].mxu0  ;;  %v1650_v6 = vpop.f32.mrb[89].mxu1 }
 0x1b3   : > { %v3562_v2 = vpack.c.bf16 %v2104_v62, %v2103_v60  ;;  %v1395_v7 = vpop.f32.mrb[90].mxu0  ;;  %v1651_v8 = vpop.f32.mrb[90].mxu1 }
 0x1b4   : > { %3634 = vst [vmem:[%s4184_s24 + $0xa8] sm:$0xff] %v3402_v1   ;;  %v1913_v9 = vadd.f32 %v4408_v26, %v1778_v3  ;;  %v1977_v10 = vadd.f32 %v4408_v26, %v1842_v4  ;;  %v1779_v11 = vmul.f32 %v4399_v57, %v1395_v7  ;;  %v1843_v12 = vmul.f32 %v4399_v57, %v1651_v8  ;;  %v1397_v13 = vpop.f32.mrb[91].mxu0  ;;  %v1653_v14 = vpop.f32.mrb[91].mxu1 }
 0x1b5   : > { %3666 = vst [vmem:[%s4184_s24 + $0x1a8] sm:$0xff] %v3562_v2  }
 0x1b6   : > { %v1914_v15 = vadd.f32 %v4408_v26, %v1779_v11  ;;  %v1978_v16 = vadd.f32 %v4408_v26, %v1843_v12  ;;  %v2041_v17 = vmax.f32 %v1913_v9, 0.0  ;;  %v2105_v18 = vmax.f32 %v1977_v10, 0.0 }
 0x1b8   : > { %v2042_v19 = vmax.f32 %v1914_v15, 0.0  ;;  %v2106_v20 = vmax.f32 %v1978_v16, 0.0 }
 0x1b9   : > { %v1400_v21 = vpop.f32.mrb[92].mxu0  ;;  %v1656_v22 = vpop.f32.mrb[92].mxu1 }
 0x1ba   : > { %v3407_v59 = vpack.c.bf16 %v2042_v19, %v2041_v17  ;;  %v3567_v23 = vpack.c.bf16 %v2106_v20, %v2105_v18  ;;  %v1780_v24 = vmul.f32 %v4399_v57, %v1400_v21  ;;  %v1844_v25 = vmul.f32 %v4399_v57, %v1656_v22  ;;  %v1402_v27 = vpop.f32.mrb[93].mxu0  ;;  %v1658_v28 = vpop.f32.mrb[93].mxu1 }
 0x1bb   : > { %v1403_v29 = vpop.f32.mrb[94].mxu0  ;;  %v1659_v30 = vpop.f32.mrb[94].mxu1 }
 0x1bc   : > { %3635 = vst [vmem:[%s4184_s24 + $0xb0] sm:$0xff] %v3407_v59   ;;  %3667 = vst [vmem:[%s4184_s24 + $0x1b0] sm:$0xff] %v3567_v23   ;;  %v1915_v31 = vadd.f32 %v4408_v26, %v1780_v24  ;;  %v1979_v32 = vadd.f32 %v4408_v26, %v1844_v25  ;;  %v1781_v33 = vmul.f32 %v4399_v57, %v1403_v29  ;;  %v1405_v35 = vpop.f32.mrb[95].mxu0  ;;  %v1661_v36 = vpop.f32.mrb[95].mxu1 }
 0x1bd   : > { %v1845_v34 = vmul.f32 %v4399_v57, %v1659_v30 }
 0x1be   : > { %v1916_v37 = vadd.f32 %v4408_v26, %v1781_v33  ;;  %v2043_v39 = vmax.f32 %v1915_v31, 0.0  ;;  %v2107_v40 = vmax.f32 %v1979_v32, 0.0 }
 0x1bf   : > { %v1980_v38 = vadd.f32 %v4408_v26, %v1845_v34 }
 0x1c0   : > { %v2044_v41 = vmax.f32 %v1916_v37, 0.0 }
 0x1c1   : > { %v2108_v42 = vmax.f32 %v1980_v38, 0.0  ;;  %v1408_v43 = vpop.f32.mrb[96].mxu0  ;;  %v1664_v44 = vpop.f32.mrb[96].mxu1 }
 0x1c2   : > { %v3412_v45 = vpack.c.bf16 %v2044_v41, %v2043_v39  ;;  %v1782_v47 = vmul.f32 %v4399_v57, %v1408_v43  ;;  %v1846_v48 = vmul.f32 %v4399_v57, %v1664_v44  ;;  %v1410_v49 = vpop.f32.mrb[97].mxu0  ;;  %v1666_v50 = vpop.f32.mrb[97].mxu1 }
 0x1c3   : > { %v3572_v46 = vpack.c.bf16 %v2108_v42, %v2107_v40  ;;  %v1411_v51 = vpop.f32.mrb[98].mxu0  ;;  %v1667_v52 = vpop.f32.mrb[98].mxu1 }
 0x1c4   : > { %3636 = vst [vmem:[%s4184_s24 + $0xb8] sm:$0xff] %v3412_v45   ;;  %v1917_v53 = vadd.f32 %v4408_v26, %v1782_v47  ;;  %v1981_v54 = vadd.f32 %v4408_v26, %v1846_v48  ;;  %v1783_v55 = vmul.f32 %v4399_v57, %v1411_v51  ;;  %v1847_v56 = vmul.f32 %v4399_v57, %v1667_v52  ;;  %v1413_v58 = vpop.f32.mrb[99].mxu0  ;;  %v1669_v60 = vpop.f32.mrb[99].mxu1 }
 0x1c5   : > { %3668 = vst [vmem:[%s4184_s24 + $0x1b8] sm:$0xff] %v3572_v46  }
 0x1c6   : > { %v1918_v61 = vadd.f32 %v4408_v26, %v1783_v55  ;;  %v1982_v62 = vadd.f32 %v4408_v26, %v1847_v56  ;;  %v2045_v63 = vmax.f32 %v1917_v53, 0.0  ;;  %v2109_v0 = vmax.f32 %v1981_v54, 0.0 }
 0x1c8   : > { %v2046_v1 = vmax.f32 %v1918_v61, 0.0  ;;  %v2110_v2 = vmax.f32 %v1982_v62, 0.0 }
 0x1c9   : > { %v1416_v3 = vpop.f32.mrb[100].mxu0  ;;  %v1672_v4 = vpop.f32.mrb[100].mxu1 }
 0x1ca   : > { %v3417_v5 = vpack.c.bf16 %v2046_v1, %v2045_v63  ;;  %v3577_v6 = vpack.c.bf16 %v2110_v2, %v2109_v0  ;;  %v1784_v7 = vmul.f32 %v4399_v57, %v1416_v3  ;;  %v1848_v8 = vmul.f32 %v4399_v57, %v1672_v4  ;;  %v1418_v9 = vpop.f32.mrb[101].mxu0  ;;  %v1674_v10 = vpop.f32.mrb[101].mxu1 }
 0x1cb   : > { %v1419_v11 = vpop.f32.mrb[102].mxu0  ;;  %v1675_v12 = vpop.f32.mrb[102].mxu1 }
 0x1cc   : > { %3637 = vst [vmem:[%s4184_s24 + $0xc0] sm:$0xff] %v3417_v5   ;;  %3669 = vst [vmem:[%s4184_s24 + $0x1c0] sm:$0xff] %v3577_v6   ;;  %v1919_v13 = vadd.f32 %v4408_v26, %v1784_v7  ;;  %v1983_v14 = vadd.f32 %v4408_v26, %v1848_v8  ;;  %v1785_v15 = vmul.f32 %v4399_v57, %v1419_v11  ;;  %v1421_v17 = vpop.f32.mrb[103].mxu0  ;;  %v1677_v18 = vpop.f32.mrb[103].mxu1 }
 0x1cd   : > { %v1849_v16 = vmul.f32 %v4399_v57, %v1675_v12 }
 0x1ce   : > { %v1920_v19 = vadd.f32 %v4408_v26, %v1785_v15  ;;  %v2047_v21 = vmax.f32 %v1919_v13, 0.0  ;;  %v2111_v22 = vmax.f32 %v1983_v14, 0.0 }
 0x1cf   : > { %v1984_v20 = vadd.f32 %v4408_v26, %v1849_v16 }
 0x1d0   : > { %v2048_v59 = vmax.f32 %v1920_v19, 0.0 }
 0x1d1   : > { %v2112_v23 = vmax.f32 %v1984_v20, 0.0  ;;  %v1424_v24 = vpop.f32.mrb[104].mxu0  ;;  %v1680_v25 = vpop.f32.mrb[104].mxu1 }
 0x1d2   : > { %v3422_v27 = vpack.c.bf16 %v2048_v59, %v2047_v21  ;;  %v1786_v29 = vmul.f32 %v4399_v57, %v1424_v24  ;;  %v1850_v30 = vmul.f32 %v4399_v57, %v1680_v25  ;;  %v1426_v31 = vpop.f32.mrb[105].mxu0  ;;  %v1682_v32 = vpop.f32.mrb[105].mxu1 }
 0x1d3   : > { %v3582_v28 = vpack.c.bf16 %v2112_v23, %v2111_v22  ;;  %v1427_v33 = vpop.f32.mrb[106].mxu0  ;;  %v1683_v34 = vpop.f32.mrb[106].mxu1 }
 0x1d4   : > { %3638 = vst [vmem:[%s4184_s24 + $0xc8] sm:$0xff] %v3422_v27   ;;  %v1921_v35 = vadd.f32 %v4408_v26, %v1786_v29  ;;  %v1985_v36 = vadd.f32 %v4408_v26, %v1850_v30  ;;  %v1787_v37 = vmul.f32 %v4399_v57, %v1427_v33  ;;  %v1851_v38 = vmul.f32 %v4399_v57, %v1683_v34  ;;  %v1429_v39 = vpop.f32.mrb[107].mxu0  ;;  %v1685_v40 = vpop.f32.mrb[107].mxu1 }
 0x1d5   : > { %3670 = vst [vmem:[%s4184_s24 + $0x1c8] sm:$0xff] %v3582_v28  }
 0x1d6   : > { %v1922_v41 = vadd.f32 %v4408_v26, %v1787_v37  ;;  %v1986_v42 = vadd.f32 %v4408_v26, %v1851_v38  ;;  %v2049_v43 = vmax.f32 %v1921_v35, 0.0  ;;  %v2113_v44 = vmax.f32 %v1985_v36, 0.0 }
 0x1d8   : > { %v2050_v45 = vmax.f32 %v1922_v41, 0.0  ;;  %v2114_v46 = vmax.f32 %v1986_v42, 0.0 }
 0x1d9   : > { %v1432_v47 = vpop.f32.mrb[108].mxu0  ;;  %v1688_v48 = vpop.f32.mrb[108].mxu1 }
 0x1da   : > { %v3427_v49 = vpack.c.bf16 %v2050_v45, %v2049_v43  ;;  %v3587_v50 = vpack.c.bf16 %v2114_v46, %v2113_v44  ;;  %v1788_v51 = vmul.f32 %v4399_v57, %v1432_v47  ;;  %v1852_v52 = vmul.f32 %v4399_v57, %v1688_v48  ;;  %v1434_v53 = vpop.f32.mrb[109].mxu0  ;;  %v1690_v54 = vpop.f32.mrb[109].mxu1 }
 0x1db   : > { %v1435_v55 = vpop.f32.mrb[110].mxu0  ;;  %v1691_v56 = vpop.f32.mrb[110].mxu1 }
 0x1dc   : > { %3639 = vst [vmem:[%s4184_s24 + $0xd0] sm:$0xff] %v3427_v49   ;;  %3671 = vst [vmem:[%s4184_s24 + $0x1d0] sm:$0xff] %v3587_v50   ;;  %v1923_v58 = vadd.f32 %v4408_v26, %v1788_v51  ;;  %v1987_v60 = vadd.f32 %v4408_v26, %v1852_v52  ;;  %v1789_v61 = vmul.f32 %v4399_v57, %v1435_v55  ;;  %v1437_v63 = vpop.f32.mrb[111].mxu0  ;;  %v1693_v0 = vpop.f32.mrb[111].mxu1 }
 0x1dd   : > { %v1853_v62 = vmul.f32 %v4399_v57, %v1691_v56 }
 0x1de   : > { %v1924_v1 = vadd.f32 %v4408_v26, %v1789_v61  ;;  %v2051_v3 = vmax.f32 %v1923_v58, 0.0  ;;  %v2115_v4 = vmax.f32 %v1987_v60, 0.0 }
 0x1df   : > { %v1988_v2 = vadd.f32 %v4408_v26, %v1853_v62 }
 0x1e0   : > { %v2052_v5 = vmax.f32 %v1924_v1, 0.0 }
 0x1e1   : > { %v2116_v6 = vmax.f32 %v1988_v2, 0.0  ;;  %v1440_v7 = vpop.f32.mrb[112].mxu0  ;;  %v1696_v8 = vpop.f32.mrb[112].mxu1 }
 0x1e2   : > { %v3432_v9 = vpack.c.bf16 %v2052_v5, %v2051_v3  ;;  %v1790_v11 = vmul.f32 %v4399_v57, %v1440_v7  ;;  %v1854_v12 = vmul.f32 %v4399_v57, %v1696_v8  ;;  %v1442_v13 = vpop.f32.mrb[113].mxu0  ;;  %v1698_v14 = vpop.f32.mrb[113].mxu1 }
 0x1e3   : > { %v3592_v10 = vpack.c.bf16 %v2116_v6, %v2115_v4  ;;  %v1443_v15 = vpop.f32.mrb[114].mxu0  ;;  %v1699_v16 = vpop.f32.mrb[114].mxu1 }
 0x1e4   : > { %3640 = vst [vmem:[%s4184_s24 + $0xd8] sm:$0xff] %v3432_v9   ;;  %v1925_v17 = vadd.f32 %v4408_v26, %v1790_v11  ;;  %v1989_v18 = vadd.f32 %v4408_v26, %v1854_v12  ;;  %v1791_v19 = vmul.f32 %v4399_v57, %v1443_v15  ;;  %v1855_v20 = vmul.f32 %v4399_v57, %v1699_v16  ;;  %v1445_v21 = vpop.f32.mrb[115].mxu0  ;;  %v1701_v22 = vpop.f32.mrb[115].mxu1 }
 0x1e5   : > { %3672 = vst [vmem:[%s4184_s24 + $0x1d8] sm:$0xff] %v3592_v10  }
 0x1e6   : > { %v1926_v59 = vadd.f32 %v4408_v26, %v1791_v19  ;;  %v1990_v23 = vadd.f32 %v4408_v26, %v1855_v20  ;;  %v2053_v24 = vmax.f32 %v1925_v17, 0.0  ;;  %v2117_v25 = vmax.f32 %v1989_v18, 0.0 }
 0x1e8   : > { %v2054_v27 = vmax.f32 %v1926_v59, 0.0  ;;  %v2118_v28 = vmax.f32 %v1990_v23, 0.0 }
 0x1e9   : > { %v1448_v29 = vpop.f32.mrb[116].mxu0  ;;  %v1704_v30 = vpop.f32.mrb[116].mxu1 }
 0x1ea   : > { %v3437_v31 = vpack.c.bf16 %v2054_v27, %v2053_v24  ;;  %v3597_v32 = vpack.c.bf16 %v2118_v28, %v2117_v25  ;;  %v1792_v33 = vmul.f32 %v4399_v57, %v1448_v29  ;;  %v1856_v34 = vmul.f32 %v4399_v57, %v1704_v30  ;;  %v1450_v35 = vpop.f32.mrb[117].mxu0  ;;  %v1706_v36 = vpop.f32.mrb[117].mxu1 }
 0x1eb   : > { %v1451_v37 = vpop.f32.mrb[118].mxu0  ;;  %v1707_v38 = vpop.f32.mrb[118].mxu1 }
 0x1ec   : > { %3641 = vst [vmem:[%s4184_s24 + $0xe0] sm:$0xff] %v3437_v31   ;;  %3673 = vst [vmem:[%s4184_s24 + $0x1e0] sm:$0xff] %v3597_v32   ;;  %v1927_v39 = vadd.f32 %v4408_v26, %v1792_v33  ;;  %v1991_v40 = vadd.f32 %v4408_v26, %v1856_v34  ;;  %v1793_v41 = vmul.f32 %v4399_v57, %v1451_v37  ;;  %v1453_v43 = vpop.f32.mrb[119].mxu0  ;;  %v1709_v44 = vpop.f32.mrb[119].mxu1 }
 0x1ed   : > { %v1857_v42 = vmul.f32 %v4399_v57, %v1707_v38 }
 0x1ee   : > { %v1928_v45 = vadd.f32 %v4408_v26, %v1793_v41  ;;  %v2055_v47 = vmax.f32 %v1927_v39, 0.0  ;;  %v2119_v48 = vmax.f32 %v1991_v40, 0.0 }
 0x1ef   : > { %v1992_v46 = vadd.f32 %v4408_v26, %v1857_v42 }
 0x1f0   : > { %v2056_v49 = vmax.f32 %v1928_v45, 0.0 }
 0x1f1   : > { %v2120_v50 = vmax.f32 %v1992_v46, 0.0  ;;  %v1456_v51 = vpop.f32.mrb[120].mxu0  ;;  %v1712_v52 = vpop.f32.mrb[120].mxu1 }
 0x1f2   : > { %v3442_v53 = vpack.c.bf16 %v2056_v49, %v2055_v47  ;;  %v1794_v55 = vmul.f32 %v4399_v57, %v1456_v51  ;;  %v1858_v56 = vmul.f32 %v4399_v57, %v1712_v52  ;;  %v1458_v58 = vpop.f32.mrb[121].mxu0  ;;  %v1714_v60 = vpop.f32.mrb[121].mxu1 }
 0x1f3   : > { %v3602_v54 = vpack.c.bf16 %v2120_v50, %v2119_v48  ;;  %v1459_v61 = vpop.f32.mrb[122].mxu0  ;;  %v1715_v62 = vpop.f32.mrb[122].mxu1 }
 0x1f4   : > { %3642 = vst [vmem:[%s4184_s24 + $0xe8] sm:$0xff] %v3442_v53   ;;  %v1929_v63 = vadd.f32 %v4408_v26, %v1794_v55  ;;  %v1993_v0 = vadd.f32 %v4408_v26, %v1858_v56  ;;  %v1795_v1 = vmul.f32 %v4399_v57, %v1459_v61  ;;  %v1859_v2 = vmul.f32 %v4399_v57, %v1715_v62  ;;  %v1461_v3 = vpop.f32.mrb[123].mxu0  ;;  %v1717_v4 = vpop.f32.mrb[123].mxu1 }
 0x1f5   : > { %3674 = vst [vmem:[%s4184_s24 + $0x1e8] sm:$0xff] %v3602_v54  }
 0x1f6   : > { %v1930_v5 = vadd.f32 %v4408_v26, %v1795_v1  ;;  %v1994_v6 = vadd.f32 %v4408_v26, %v1859_v2  ;;  %v2057_v7 = vmax.f32 %v1929_v63, 0.0  ;;  %v2121_v8 = vmax.f32 %v1993_v0, 0.0 }
 0x1f8   : > { %v2058_v9 = vmax.f32 %v1930_v5, 0.0  ;;  %v2122_v10 = vmax.f32 %v1994_v6, 0.0 }
 0x1f9   : > { %v1464_v11 = vpop.f32.mrb[124].mxu0  ;;  %v1720_v12 = vpop.f32.mrb[124].mxu1 }
 0x1fa   : > { %v3447_v13 = vpack.c.bf16 %v2058_v9, %v2057_v7  ;;  %v3607_v14 = vpack.c.bf16 %v2122_v10, %v2121_v8  ;;  %v1796_v15 = vmul.f32 %v4399_v57, %v1464_v11  ;;  %v1860_v16 = vmul.f32 %v4399_v57, %v1720_v12  ;;  %v1466_v17 = vpop.f32.mrb[125].mxu0  ;;  %v1722_v18 = vpop.f32.mrb[125].mxu1 }
 0x1fb   : > { %v1467_v19 = vpop.f32.mrb[126].mxu0  ;;  %v1723_v20 = vpop.f32.mrb[126].mxu1 }
 0x1fc   : > { %3643 = vst [vmem:[%s4184_s24 + $0xf0] sm:$0xff] %v3447_v13   ;;  %3675 = vst [vmem:[%s4184_s24 + $0x1f0] sm:$0xff] %v3607_v14   ;;  %v1931_v21 = vadd.f32 %v4408_v26, %v1796_v15  ;;  %v1995_v22 = vadd.f32 %v4408_v26, %v1860_v16  ;;  %v1797_v59 = vmul.f32 %v4399_v57, %v1467_v19  ;;  %v1469_v24 = vpop.f32.mrb[127].mxu0  ;;  %v1725_v25 = vpop.f32.mrb[127].mxu1 }
 0x1fd   : > { %v1861_v23 = vmul.f32 %v4399_v57, %v1723_v20 }
 0x1fe   : > { %v1932_v27 = vadd.f32 %v4408_v26, %v1797_v59  ;;  %v2059_v29 = vmax.f32 %v1931_v21, 0.0  ;;  %v2123_v30 = vmax.f32 %v1995_v22, 0.0 }
 0x1ff   : > { %v1996_v28 = vadd.f32 %v4408_v26, %v1861_v23 }
 0x200   : > { %v2060_v31 = vmax.f32 %v1932_v27, 0.0 }
 0x201   : > { %v2124_v32 = vmax.f32 %v1996_v28, 0.0 }
 0x202   : > { %v3452_v33 = vpack.c.bf16 %v2060_v31, %v2059_v29 }
 0x203   : > { %v3612_v34 = vpack.c.bf16 %v2124_v32, %v2123_v30 }
 0x204   : > { %3644 = vst [vmem:[%s4184_s24 + $0xf8] sm:$0xff] %v3452_v33  }
 0x205   : > { %3676 = vst [vmem:[%s4184_s24 + $0x1f8] sm:$0xff] %v3612_v34  }
 0x206 PF: > { %s14_s15 = sadd.s32 1, %s3916_s15  }
 0x207   : > { %p11_p4 = scmp.ge.s32.totalorder %s14_s15, 4  }
 0x209   :  { %13 = sbr.rel (!%p11_p4) target bundleno = 1 (0x1), region = 66 }

// kernel: wav2lip_disc_forward.8
= control target key start
LH: loop header
LB: loop body
LE: loop exit
PB: predicated region body
PF: predicated region fallthrough
CT: control target
= control target key end

     0   :  { %s1910_s15 = smov 0   ;;  %s2173_s0 = inlined_call_operand.vmem [shape: bf16[512,288], index: 0, kind: input, shape index: {}]   ;;  %s2174_s1 = inlined_call_operand.vmem [shape: bf16[288,128], index: 1, kind: input, shape index: {}]   ;;  %s2175_s2 = inlined_call_operand.vmem [shape: f32[1,128], index: 2, kind: input, shape index: {}]   ;;  %s2176_s3 = inlined_call_operand.vmem [shape: f32[1,128], index: 3, kind: input, shape index: {}]   ;;  %s2177_s4 = inlined_call_operand.vmem [shape: bf16[512,128], index: 4, kind: output, shape index: {}]  }
   0x1 LB: > { %s1350_s16 = sadd.s32 4294967295, %s1883_s15   ;;  %p1354_p0 = scmp.ge.s32.totalorder %s1883_s15, 1  ;;  %s1883_s15 = sphi %s1910_s15, %s14_s15  }
   0x2   : > { %p164_p1 = scmp.lt.s32.totalorder %s1883_s15, 3 }
   0x4   : > { %p165_p2 = pnand %p1354_p0, %p164_p1 }
   0x5   : > { %v1795_v0 = vld [vmem:[%s2174_s1 + $0x40] sm:$0xff] (!%p165_p2)   ;;  %s1355_s19 = sshll.u32 (!%p165_p2), %s1350_s16, 5  ;;  %v1797_v2 = vld [vmem:[%s2174_s1 + $0x48] sm:$0xff] (!%p165_p2)   ;;  %v1799_v4 = vld [vmem:[%s2174_s1 + $0x50] sm:$0xff] (!%p165_p2)   ;;  %vm653_vm0 = vcmask (!%p165_p2), 261120  }
   0x6   : > { %168 = sbr.rel (%p165_p2) target bundleno = 354 (0x162), region = 36  ;;  %v1796_v1 = vld [vmem:[%s2174_s1] sm:$0xff] (!%p165_p2)   ;;  %1604 = vmatprep.subr.bf16.mxu0 (!%p165_p2), %v1795_v0  ;;  %1770 = vmatprep.subr.bf16.mxu1 (!%p165_p2), %v1795_v0  ;;  %p192_p3 = scmp.lt.s32.totalorder (!%p165_p2), %s1355_s19, 63  ;;  %v1798_v3 = vld [vmem:[%s2174_s1 + $0x8] sm:$0xff] (!%p165_p2)   ;;  %v1800_v5 = vld [vmem:[%s2174_s1 + $0x10] sm:$0xff] (!%p165_p2)  }
   0x7   : > { %1605 = vmatpush3.bf16.msra.mxu0 (!%p165_p2), %v1796_v1  ;;  %1778 = vmatpush3.bf16.msra.mxu1 (!%p165_p2), %v1796_v1  ;;  %v1801_v6 = vld [vmem:[%s2174_s1 + $0x58] sm:$0xff] (!%p165_p2)   ;;  %v1803_v8 = vld [vmem:[%s2174_s1 + $0x60] sm:$0xff] (!%p165_p2)   ;;  %v1805_v10 = vld [vmem:[%s2174_s1 + $0x68] sm:$0xff] (!%p165_p2)  }
   0x8   : > { %1606 = vmatprep.subr.bf16.mxu0 (!%p165_p2), %v1797_v2  ;;  %1771 = vmatprep.subr.bf16.mxu1 (!%p165_p2), %v1797_v2  ;;  %v1802_v7 = vld [vmem:[%s2174_s1 + $0x18] sm:$0xff] (!%p165_p2)   ;;  %v1804_v9 = vld [vmem:[%s2174_s1 + $0x20] sm:$0xff] (!%p165_p2)   ;;  %v1806_v13 = vld [vmem:[%s2174_s1 + $0x28] sm:$0xff] (!%p165_p2)  }
   0x9   : > { %v1807_v14 = vld [vmem:[%s2174_s1 + $0x70] sm:$0xff] (!%p165_p2)   ;;  %v1809_v16 = vld [vmem:[%s2174_s1 + $0x78] sm:$0xff] (!%p165_p2)   ;;  %v1817_v18 = vld [vmem:[%s2174_s1 + $0x80] sm:$0xff] (!%p165_p2)  }
   0xa   : > { %v1808_v15 = vld [vmem:[%s2174_s1 + $0x30] sm:$0xff] (!%p165_p2)   ;;  %v1810_v17 = vld [vmem:[%s2174_s1 + $0x38] sm:$0xff] (!%p165_p2)   ;;  %v1830_v23 = vld [vmem:[%s2174_s1 + $0x88] sm:$0xff] (!%p165_p2)  }
   0xb   : > { %1607 = vmatpush3.bf16.msra.mxu0 (!%p165_p2), %v1798_v3  ;;  %1779 = vmatpush3.bf16.msra.mxu1 (!%p165_p2), %v1798_v3 }
   0xc   : > { %1608 = vmatprep.subr.bf16.mxu0 (!%p165_p2), %v1799_v4  ;;  %1772 = vmatprep.subr.bf16.mxu1 (!%p165_p2), %v1799_v4 }
   0xd   : > { %s2179_s19 = smov (!%p192_p3, %s1355_s19), 63 }
   0xe   : > { %s1786_s6 = smul.u32 12, %s2179_s19  ;;  %s1358_s12 = sshll.u32 %s2179_s19, 2 }
   0xf   : > { %1609 = vmatpush3.bf16.msra.mxu0 %v1800_v5  ;;  %1780 = vmatpush3.bf16.msra.mxu1 %v1800_v5  ;;  %s2082_s16 = scalar_lea.vmem %s2177_s4, %s1358_s12 }
  0x10   : > { %1610 = vmatprep.subr.bf16.mxu0 %v1801_v6  ;;  %1773 = vmatprep.subr.bf16.mxu1 %v1801_v6  ;;  %s1951_s13 = scalar_lea.vmem %s2173_s0, %s1786_s6 }
  0x11   : > { %v1813_v11 = vld [vmem:[%s1951_s13 + $0x4] ss:$12 sps:$4 sm:$0xff]   ;;  %v1811_v19 = vld [vmem:[%s1951_s13] ss:$12 sps:$4 sm:$0xff]   ;;  %v1818_v21 = vld [vmem:[%s1951_s13 + $0x1c] ss:$12 sps:$4 sm:$0xff]  }
  0x12   : > { %v1816_v12 = vld [vmem:[%s1951_s13 + $0x124] ss:$12 sps:$4 sm:$0xff]   ;;  %734 = vmatprep.mubr.bf16.mxu0 %v1813_v11  ;;  %v1814_v20 = vld [vmem:[%s1951_s13 + $0x120] ss:$12 sps:$4 sm:$0xff]   ;;  %v1820_v22 = vld [vmem:[%s1951_s13 + $0x13c] ss:$12 sps:$4 sm:$0xff]  }
  0x13   : > { %1611 = vmatpush3.bf16.msra.mxu0 %v1802_v7  ;;  %1781 = vmatpush3.bf16.msra.mxu1 %v1802_v7  ;;  %v1822_v24 = vld [vmem:[%s1951_s13 + $0x18] ss:$12 sps:$4 sm:$0xff]   ;;  %v1824_v26 = vld [vmem:[%s1951_s13 + $0x34] ss:$12 sps:$4 sm:$0xff]   ;;  %v1828_v28 = vld [vmem:[%s1951_s13 + $0x30] ss:$12 sps:$4 sm:$0xff]  }
  0x14   : > { %1612 = vmatprep.subr.bf16.mxu0 %v1803_v8  ;;  %1774 = vmatprep.subr.bf16.mxu1 %v1803_v8  ;;  %v1823_v25 = vld [vmem:[%s1951_s13 + $0x138] ss:$12 sps:$4 sm:$0xff]   ;;  %v1826_v27 = vld [vmem:[%s1951_s13 + $0x154] ss:$12 sps:$4 sm:$0xff]   ;;  %v1829_v29 = vld [vmem:[%s1951_s13 + $0x150] ss:$12 sps:$4 sm:$0xff]  }
  0x15   : > { %830 = vmatprep.mubr.bf16.mxu1 %v1816_v12  ;;  %v1831_v30 = vld [vmem:[%s1951_s13 + $0x4c] ss:$12 sps:$4 sm:$0xff]   ;;  %v1835_v32 = vld [vmem:[%s1951_s13 + $0x48] ss:$12 sps:$4 sm:$0xff]   ;;  %v1837_v34 = vld [vmem:[%s1951_s13 + $0x64] ss:$12 sps:$4 sm:$0xff]  }
  0x16   : > { %v1833_v31 = vld [vmem:[%s1951_s13 + $0x16c] ss:$12 sps:$4 sm:$0xff]   ;;  %v1836_v33 = vld [vmem:[%s1951_s13 + $0x168] ss:$12 sps:$4 sm:$0xff]   ;;  %v1846_v41 = vld [vmem:[%s1951_s13 + $0x50] ss:$12 sps:$4 sm:$0xff]  }
  0x17   : > { %1613 = vmatpush3.bf16.msra.mxu0 %v1804_v9  ;;  %1782 = vmatpush3.bf16.msra.mxu1 %v1804_v9  ;;  %v1839_v35 = vld [vmem:[%s1951_s13 + $0x8] ss:$12 sps:$4 sm:$0xff]   ;;  %v1840_v36 = vld [vmem:[%s1951_s13 + $0x60] ss:$12 sps:$4 sm:$0xff]   ;;  %v1844_v39 = vld [vmem:[%s1951_s13 + $0x38] ss:$12 sps:$4 sm:$0xff]  }
  0x18   : > { %1614 = vmatprep.subr.bf16.mxu0 %v1805_v10  ;;  %1775 = vmatprep.subr.bf16.mxu1 %v1805_v10  ;;  %v1841_v37 = vld [vmem:[%s1951_s13 + $0x20] ss:$12 sps:$4 sm:$0xff]   ;;  %v1842_v38 = vld [vmem:[%s1951_s13 + $0x7c] ss:$12 sps:$4 sm:$0xff]   ;;  %v1845_v40 = vld [vmem:[%s1951_s13 + $0x78] ss:$12 sps:$4 sm:$0xff]  }
  0x19   : > { %v1847_v42 = vld [vmem:[%s1951_s13 + $0x94] ss:$12 sps:$4 sm:$0xff]   ;;  %v1850_v44 = vld [vmem:[%s1951_s13 + $0x90] ss:$12 sps:$4 sm:$0xff]   ;;  %v1852_v46 = vld [vmem:[%s1951_s13 + $0xac] ss:$12 sps:$4 sm:$0xff]  }
  0x1a   : > { %v1849_v43 = vld [vmem:[%s1951_s13 + $0x68] ss:$12 sps:$4 sm:$0xff]   ;;  %v1851_v45 = vld [vmem:[%s1951_s13 + $0x80] ss:$12 sps:$4 sm:$0xff]   ;;  %v1854_v47 = vld [vmem:[%s1951_s13 + $0x98] ss:$12 sps:$4 sm:$0xff]  }
  0x1b   : > { %1615 = vmatpush3.bf16.msra.mxu0 %v1806_v13  ;;  %1783 = vmatpush3.bf16.msra.mxu1 %v1806_v13  ;;  %v1855_v48 = vld [vmem:[%s1951_s13 + $0xa8] ss:$12 sps:$4 sm:$0xff]   ;;  %v1856_v49 = vld [vmem:[%s1951_s13 + $0xb0] ss:$12 sps:$4 sm:$0xff]   ;;  %v1860_v52 = vld [vmem:[%s1951_s13 + $0xc0] ss:$12 sps:$4 sm:$0xff]  }
  0x1c   : > { %1616 = vmatprep.subr.bf16.mxu0 %v1807_v14  ;;  %1776 = vmatprep.subr.bf16.mxu1 %v1807_v14  ;;  %v1857_v50 = vld [vmem:[%s1951_s13 + $0xc4] ss:$12 sps:$4 sm:$0xff]   ;;  %v1859_v51 = vld [vmem:[%s1951_s13 + $0xc8] ss:$12 sps:$4 sm:$0xff]   ;;  %v1861_v53 = vld [vmem:[%s1951_s13 + $0xe0] ss:$12 sps:$4 sm:$0xff]  }
  0x1d   : > { %v1862_v54 = vld [vmem:[%s1951_s13 + $0xdc] ss:$12 sps:$4 sm:$0xff]   ;;  %v1864_v55 = vld [vmem:[%s1951_s13 + $0xf8] ss:$12 sps:$4 sm:$0xff]   ;;  %v1867_v58 = vld [vmem:[%s1951_s13 + $0xf4] ss:$12 sps:$4 sm:$0xff]  }
  0x1e   : > { %v1865_v56 = vld [vmem:[%s1951_s13 + $0xd8] ss:$12 sps:$4 sm:$0xff]   ;;  %v1866_v57 = vld [vmem:[%s1951_s13 + $0x110] ss:$12 sps:$4 sm:$0xff]   ;;  %v1869_v59 = vld [vmem:[%s1951_s13 + $0x128] ss:$12 sps:$4 sm:$0xff]  }
  0x1f   : > { %1617 = vmatpush3.bf16.msra.mxu0 %v1808_v15  ;;  %1784 = vmatpush3.bf16.msra.mxu1 %v1808_v15  ;;  %v1870_v60 = vld [vmem:[%s1951_s13 + $0xf0] ss:$12 sps:$4 sm:$0xff]   ;;  %v1871_v61 = vld [vmem:[%s1951_s13 + $0x140] ss:$12 sps:$4 sm:$0xff]   ;;  %v1874_v63 = vld [vmem:[%s1951_s13 + $0x158] ss:$12 sps:$4 sm:$0xff]  }
  0x20   : > { %1618 = vmatprep.subr.bf16.mxu0 %v1809_v16  ;;  %1777 = vmatprep.subr.bf16.mxu1 %v1809_v16  ;;  %v1872_v62 = vld [vmem:[%s1951_s13 + $0x10c] ss:$12 sps:$4 sm:$0xff]   ;;  %v1875_v0 = vld [vmem:[%s1951_s13 + $0x108] ss:$12 sps:$4 sm:$0xff]   ;;  %v1876_v1 = vld [vmem:[%s1951_s13 + $0x170] ss:$12 sps:$4 sm:$0xff]  }
  0x23   : > { %1619 = vmatpush3.bf16.msra.mxu0 %v1810_v17  ;;  %1785 = vmatpush3.bf16.msra.mxu1 %v1810_v17 }
  0x24   : > { %1734 = vmatprep.subr.bf16.mxu1 %v1817_v18 }
  0x26   : > { %735 = vmatmul.mubr.bf16.vlgmr.msra.gmra.mrb[0].mxu0 %v1811_v19  ;;  %831 = vmatmul.mubr.bf16.vlgmr.msra.gmra.mrb[0].mxu1 %v1814_v20 }
  0x27   : > { %1735 = vmatpush3.bf16.msra.mxu1 %v1817_v18  ;;  %742 = vmatprep.mubr.bf16.mxu0 %v1818_v21 }
  0x28   : > { %838 = vmatprep.mubr.bf16.mxu1 %v1820_v22  ;;  %1736 = vmatprep.subr.bf16.mxu1 %v1830_v23 }
  0x2b   : > { %1737 = vmatpush3.bf16.msra.mxu1 %v1830_v23 }
  0x2e   : > { %743 = vmatmul.mubr.bf16.gmra.mrb[4].mxu0 %v1822_v24  ;;  %839 = vmatmul.mubr.bf16.gmra.mrb[4].mxu1 %v1823_v25 }
  0x2f   : > { %750 = vmatprep.mubr.bf16.mxu0 %v1824_v26  ;;  %846 = vmatprep.mubr.bf16.mxu1 %v1826_v27 }
  0x36   : > { %751 = vmatmul.mubr.bf16.gmra.mrb[8].mxu0 %v1828_v28  ;;  %847 = vmatmul.mubr.bf16.gmra.mrb[8].mxu1 %v1829_v29 }
  0x37   : > { %758 = vmatprep.mubr.bf16.mxu0 %v1831_v30  ;;  %854 = vmatprep.mubr.bf16.mxu1 %v1833_v31 }
  0x3e   : > { %759 = vmatmul.mubr.bf16.gmra.mrb[12].mxu0 %v1835_v32  ;;  %855 = vmatmul.mubr.bf16.gmra.mrb[12].mxu1 %v1836_v33 }
  0x3f   : > { %766 = vmatprep.mubr.bf16.mxu0 %v1837_v34  ;;  %1738 = vmatprep.mubr.msk.bf16.mxu1 %vm653_vm0, %v1839_v35 }
  0x46   : > { %767 = vmatmul.mubr.bf16.gmra.mrb[16].mxu0 %v1840_v36  ;;  %1739 = vmatmul.mubr.msk.bf16.vlgmr.msra.gmra.mrb[16].mxu1 %vm653_vm0, %v1841_v37 }
  0x47   : > { %774 = vmatprep.mubr.bf16.mxu0 %v1842_v38  ;;  %1742 = vmatprep.mubr.msk.bf16.mxu1 %vm653_vm0, %v1844_v39 }
  0x4e   : > { %775 = vmatmul.mubr.bf16.gmra.mrb[20].mxu0 %v1845_v40  ;;  %1743 = vmatmul.mubr.msk.bf16.gmra.mrb[20].mxu1 %vm653_vm0, %v1846_v41 }
  0x4f   : > { %782 = vmatprep.mubr.bf16.mxu0 %v1847_v42  ;;  %1746 = vmatprep.mubr.msk.bf16.mxu1 %vm653_vm0, %v1849_v43 }
  0x56   : > { %783 = vmatmul.mubr.bf16.gmra.mrb[24].mxu0 %v1850_v44  ;;  %1747 = vmatmul.mubr.msk.bf16.gmra.mrb[24].mxu1 %vm653_vm0, %v1851_v45 }
  0x57   : > { %790 = vmatprep.mubr.bf16.mxu0 %v1852_v46  ;;  %1750 = vmatprep.mubr.msk.bf16.mxu1 %vm653_vm0, %v1854_v47 }
  0x5e   : > { %791 = vmatmul.mubr.bf16.gmra.mrb[28].mxu0 %v1855_v48  ;;  %1751 = vmatmul.mubr.msk.bf16.gmra.mrb[28].mxu1 %vm653_vm0, %v1856_v49 }
  0x5f   : > { %798 = vmatprep.mubr.bf16.mxu0 %v1857_v50  ;;  %1754 = vmatprep.mubr.msk.bf16.mxu1 %vm653_vm0, %v1859_v51 }
  0x66   : > { %799 = vmatmul.mubr.bf16.gmra.mrb[32].mxu0 %v1860_v52  ;;  %1755 = vmatmul.mubr.msk.bf16.gmra.mrb[32].mxu1 %vm653_vm0, %v1861_v53  ;;  %v2063_v52 = vld [vmem:[%s2175_s2] ss:$0 sm:$0xff] }
  0x67   : > { %806 = vmatprep.mubr.bf16.mxu0 %v1862_v54  ;;  %1758 = vmatprep.mubr.msk.bf16.mxu1 %vm653_vm0, %v1864_v55 }
  0x6e   : > { %807 = vmatmul.mubr.bf16.gmra.mrb[36].mxu0 %v1865_v56  ;;  %1759 = vmatmul.mubr.msk.bf16.gmra.mrb[36].mxu1 %vm653_vm0, %v1866_v57  ;;  %v2068_v56 = vld [vmem:[%s2176_s3] ss:$0 sm:$0xff] }
  0x6f   : > { %814 = vmatprep.mubr.bf16.mxu0 %v1867_v58  ;;  %1762 = vmatprep.mubr.msk.bf16.mxu1 %vm653_vm0, %v1869_v59 }
  0x76   : > { %815 = vmatmul.mubr.bf16.gmra.mrb[40].mxu0 %v1870_v60  ;;  %1763 = vmatmul.mubr.msk.bf16.gmra.mrb[40].mxu1 %vm653_vm0, %v1871_v61 }
  0x77   : > { %822 = vmatprep.mubr.bf16.mxu0 %v1872_v62  ;;  %1766 = vmatprep.mubr.msk.bf16.mxu1 %vm653_vm0, %v1874_v63 }
  0x7e   : > { %823 = vmatmul.mubr.bf16.gmra.mrb[44].mxu0 %v1875_v0  ;;  %1767 = vmatmul.mubr.msk.bf16.gmra.mrb[44].mxu1 %vm653_vm0, %v1876_v1 }
  0xf9   : > { %v1620_v2 = vpop.f32.mrb[0].mxu0  ;;  %v1692_v3 = vpop.f32.mrb[0].mxu1 }
  0xfa   : > { %v1621_v4 = vpop.f32.mrb[1].mxu0  ;;  %v1693_v5 = vpop.f32.mrb[1].mxu1 }
  0xfb   : > { %v1622_v6 = vadd.f32 %v1621_v4, %v1620_v2  ;;  %v2044_v7 = vadd.f32 %v1693_v5, %v1692_v3  ;;  %v1623_v8 = vpop.f32.mrb[2].mxu0  ;;  %v1695_v9 = vpop.f32.mrb[2].mxu1 }
  0xfc   : > { %v1624_v10 = vpop.f32.mrb[3].mxu0  ;;  %v1696_v11 = vpop.f32.mrb[3].mxu1 }
  0xfd   : > { %v1625_v12 = vadd.f32 %v1624_v10, %v1623_v8  ;;  %v2046_v13 = vadd.f32 %v1696_v11, %v1695_v9 }
 0x101   : > { %v1626_v14 = vpop.f32.mrb[4].mxu0  ;;  %v1698_v15 = vpop.f32.mrb[4].mxu1 }
 0x102   : > { %v1627_v16 = vpop.f32.mrb[5].mxu0  ;;  %v1699_v17 = vpop.f32.mrb[5].mxu1 }
 0x103   : > { %v1628_v18 = vadd.f32 %v1627_v16, %v1626_v14  ;;  %v2048_v19 = vadd.f32 %v1699_v17, %v1698_v15  ;;  %v1629_v20 = vpop.f32.mrb[6].mxu0  ;;  %v1701_v21 = vpop.f32.mrb[6].mxu1 }
 0x104   : > { %v1630_v22 = vpop.f32.mrb[7].mxu0  ;;  %v1702_v23 = vpop.f32.mrb[7].mxu1 }
 0x105   : > { %v1631_v24 = vadd.f32 %v1630_v22, %v1629_v20  ;;  %v2050_v25 = vadd.f32 %v1702_v23, %v1701_v21 }
 0x109   : > { %v1632_v26 = vpop.f32.mrb[8].mxu0  ;;  %v1704_v27 = vpop.f32.mrb[8].mxu1 }
 0x10a   : > { %v1633_v28 = vpop.f32.mrb[9].mxu0  ;;  %v1705_v29 = vpop.f32.mrb[9].mxu1 }
 0x10b   : > { %v1634_v30 = vadd.f32 %v1633_v28, %v1632_v26  ;;  %v2052_v31 = vadd.f32 %v1705_v29, %v1704_v27  ;;  %v1635_v32 = vpop.f32.mrb[10].mxu0  ;;  %v1707_v33 = vpop.f32.mrb[10].mxu1 }
 0x10c   : > { %v1636_v34 = vpop.f32.mrb[11].mxu0  ;;  %v1708_v35 = vpop.f32.mrb[11].mxu1 }
 0x10d   : > { %v1637_v36 = vadd.f32 %v1636_v34, %v1635_v32  ;;  %v2054_v37 = vadd.f32 %v1708_v35, %v1707_v33 }
 0x111   : > { %v1638_v38 = vpop.f32.mrb[12].mxu0  ;;  %v1710_v39 = vpop.f32.mrb[12].mxu1 }
 0x112   : > { %v1639_v40 = vpop.f32.mrb[13].mxu0  ;;  %v1711_v41 = vpop.f32.mrb[13].mxu1 }
 0x113   : > { %v1640_v42 = vadd.f32 %v1639_v40, %v1638_v38  ;;  %v2056_v43 = vadd.f32 %v1711_v41, %v1710_v39  ;;  %v1641_v44 = vpop.f32.mrb[14].mxu0  ;;  %v1713_v45 = vpop.f32.mrb[14].mxu1 }
 0x114   : > { %v1642_v46 = vpop.f32.mrb[15].mxu0  ;;  %v1714_v47 = vpop.f32.mrb[15].mxu1 }
 0x115   : > { %v1643_v48 = vadd.f32 %v1642_v46, %v1641_v44  ;;  %v2058_v49 = vadd.f32 %v1714_v47, %v1713_v45 }
 0x119   : > { %v1644_v50 = vpop.f32.mrb[16].mxu0  ;;  %v1740_v51 = vpop.f32.mrb[16].mxu1 }
 0x11a   : > { %v906_v53 = vadd.f32 %v1740_v51, %v1628_v18  ;;  %v1645_v54 = vpop.f32.mrb[17].mxu0  ;;  %v897_v55 = vpop.f32.mrb[17].mxu1 }
 0x11b   : > { %v1646_v57 = vadd.f32 %v1645_v54, %v1644_v50  ;;  %v898_v58 = vadd.f32 %v1622_v6, %v897_v55  ;;  %v1647_v59 = vpop.f32.mrb[18].mxu0  ;;  %v1741_v60 = vpop.f32.mrb[18].mxu1 }
 0x11c   : > { %v1033_v61 = vmul.f32 %v2063_v52, %v906_v53  ;;  %v909_v62 = vadd.f32 %v1741_v60, %v1631_v24  ;;  %v1648_v63 = vpop.f32.mrb[19].mxu0  ;;  %v900_v0 = vpop.f32.mrb[19].mxu1 }
 0x11d   : > { %v1031_v1 = vmul.f32 %v2063_v52, %v898_v58  ;;  %v1649_v2 = vadd.f32 %v1648_v63, %v1647_v59  ;;  %v901_v3 = vadd.f32 %v1625_v12, %v900_v0 }
 0x11e   : > { %v1072_v4 = vadd.f32 %v2068_v56, %v1033_v61  ;;  %v1034_v5 = vmul.f32 %v2063_v52, %v909_v62 }
 0x11f   : > { %v1070_v8 = vadd.f32 %v2068_v56, %v1031_v1  ;;  %v1032_v9 = vmul.f32 %v2063_v52, %v901_v3 }
 0x120   : > { %v1073_v6 = vadd.f32 %v2068_v56, %v1034_v5  ;;  %v1104_v15 = vmax.f32 %v1072_v4, 0.0 }
 0x121   : > { %v1071_v10 = vadd.f32 %v2068_v56, %v1032_v9  ;;  %v1650_v11 = vpop.f32.mrb[20].mxu0  ;;  %v1744_v14 = vpop.f32.mrb[20].mxu1  ;;  %v1102_v20 = vmax.f32 %v1070_v8, 0.0 }
 0x122   : > { %v1105_v16 = vmax.f32 %v1073_v6, 0.0  ;;  %v922_v17 = vadd.f32 %v1744_v14, %v1640_v42  ;;  %v1651_v18 = vpop.f32.mrb[21].mxu0  ;;  %v913_v12 = vpop.f32.mrb[21].mxu1 }
 0x123   : > { %v1103_v21 = vmax.f32 %v1071_v10, 0.0  ;;  %v1652_v22 = vadd.f32 %v1651_v18, %v1650_v11  ;;  %v914_v23 = vadd.f32 %v1634_v30, %v913_v12  ;;  %v1653_v24 = vpop.f32.mrb[22].mxu0  ;;  %v1745_v26 = vpop.f32.mrb[22].mxu1 }
 0x124   : > { %v1517_v27 = vpack.c.bf16 %v1105_v16, %v1104_v15  ;;  %v1037_v28 = vmul.f32 %v2063_v52, %v922_v17  ;;  %v925_v29 = vadd.f32 %v1745_v26, %v1643_v48  ;;  %v1654_v32 = vpop.f32.mrb[23].mxu0  ;;  %v916_v33 = vpop.f32.mrb[23].mxu1 }
 0x125   : > { %v1512_v34 = vpack.c.bf16 %v1103_v21, %v1102_v20  ;;  %v1035_v35 = vmul.f32 %v2063_v52, %v914_v23  ;;  %v1655_v38 = vadd.f32 %v1654_v32, %v1653_v24  ;;  %v917_v39 = vadd.f32 %v1637_v36, %v916_v33 }
 0x126   : > { %1589 = vst [vmem:[%s2082_s16 + $0x8] sm:$0xff] %v1517_v27   ;;  %v1076_v40 = vadd.f32 %v2068_v56, %v1037_v28  ;;  %v1038_v41 = vmul.f32 %v2063_v52, %v925_v29 }
 0x127   : > { %1513 = vst [vmem:[%s2082_s16] sm:$0xff] %v1512_v34   ;;  %v1074_v30 = vadd.f32 %v2068_v56, %v1035_v35  ;;  %v1036_v42 = vmul.f32 %v2063_v52, %v917_v39 }
 0x128   : > { %v1077_v44 = vadd.f32 %v2068_v56, %v1038_v41  ;;  %v1108_v48 = vmax.f32 %v1076_v40, 0.0 }
 0x129   : > { %v1075_v45 = vadd.f32 %v2068_v56, %v1036_v42  ;;  %v1656_v46 = vpop.f32.mrb[24].mxu0  ;;  %v1748_v47 = vpop.f32.mrb[24].mxu1  ;;  %v1106_v54 = vmax.f32 %v1074_v30, 0.0 }
 0x12a   : > { %v1109_v50 = vmax.f32 %v1077_v44, 0.0  ;;  %v938_v51 = vadd.f32 %v1748_v47, %v1652_v22  ;;  %v1657_v36 = vpop.f32.mrb[25].mxu0  ;;  %v929_v53 = vpop.f32.mrb[25].mxu1 }
 0x12b   : > { %v1107_v55 = vmax.f32 %v1075_v45, 0.0  ;;  %v1658_v58 = vadd.f32 %v1657_v36, %v1656_v46  ;;  %v930_v59 = vadd.f32 %v1646_v57, %v929_v53  ;;  %v1659_v60 = vpop.f32.mrb[26].mxu0  ;;  %v1749_v61 = vpop.f32.mrb[26].mxu1 }
 0x12c   : > { %v1527_v62 = vpack.c.bf16 %v1109_v50, %v1108_v48  ;;  %v1041_v63 = vmul.f32 %v2063_v52, %v938_v51  ;;  %v941_v0 = vadd.f32 %v1749_v61, %v1655_v38  ;;  %v1660_v1 = vpop.f32.mrb[27].mxu0  ;;  %v932_v3 = vpop.f32.mrb[27].mxu1 }
 0x12d   : > { %v1522_v4 = vpack.c.bf16 %v1107_v55, %v1106_v54  ;;  %v1039_v5 = vmul.f32 %v2063_v52, %v930_v59  ;;  %v1661_v8 = vadd.f32 %v1660_v1, %v1659_v60  ;;  %v933_v9 = vadd.f32 %v1649_v2, %v932_v3 }
 0x12e   : > { %1591 = vst [vmem:[%s2082_s16 + $0x18] sm:$0xff] %v1527_v62   ;;  %v1080_v6 = vadd.f32 %v2068_v56, %v1041_v63  ;;  %v1042_v10 = vmul.f32 %v2063_v52, %v941_v0 }
 0x12f   : > { %1590 = vst [vmem:[%s2082_s16 + $0x10] sm:$0xff] %v1522_v4   ;;  %v1078_v57 = vadd.f32 %v2068_v56, %v1039_v5  ;;  %v1040_v11 = vmul.f32 %v2063_v52, %v933_v9 }
 0x130   : > { %v1081_v14 = vadd.f32 %v2068_v56, %v1042_v10  ;;  %v1112_v18 = vmax.f32 %v1080_v6, 0.0 }
 0x131   : > { %v1079_v15 = vadd.f32 %v2068_v56, %v1040_v11  ;;  %v1662_v16 = vpop.f32.mrb[28].mxu0  ;;  %v1752_v17 = vpop.f32.mrb[28].mxu1  ;;  %v1110_v21 = vmax.f32 %v1078_v57, 0.0 }
 0x132   : > { %v1113_v12 = vmax.f32 %v1081_v14, 0.0  ;;  %v1663_v2 = vpop.f32.mrb[29].mxu0  ;;  %v945_v20 = vpop.f32.mrb[29].mxu1 }
 0x133   : > { %v1111_v22 = vmax.f32 %v1079_v15, 0.0  ;;  %v1664_v23 = vadd.f32 %v1663_v2, %v1662_v16  ;;  %v946_v24 = vadd.f32 %v1658_v58, %v945_v20  ;;  %v1665_v26 = vpop.f32.mrb[30].mxu0  ;;  %v1753_v27 = vpop.f32.mrb[30].mxu1 }
 0x134   : > { %v1537_v28 = vpack.c.bf16 %v1113_v12, %v1112_v18  ;;  %v1666_v29 = vpop.f32.mrb[31].mxu0  ;;  %v948_v32 = vpop.f32.mrb[31].mxu1 }
 0x135   : > { %v1532_v33 = vpack.c.bf16 %v1111_v22, %v1110_v21  ;;  %v954_v34 = vadd.f32 %v1752_v17, %v1664_v23  ;;  %v1043_v35 = vmul.f32 %v2063_v52, %v946_v24  ;;  %v1667_v38 = vadd.f32 %v1666_v29, %v1665_v26 }
 0x136   : > { %1593 = vst [vmem:[%s2082_s16 + $0x28] sm:$0xff] %v1537_v28   ;;  %v949_v39 = vadd.f32 %v1661_v8, %v948_v32 }
 0x137   : > { %1592 = vst [vmem:[%s2082_s16 + $0x20] sm:$0xff] %v1532_v33   ;;  %v1045_v40 = vmul.f32 %v2063_v52, %v954_v34  ;;  %v957_v41 = vadd.f32 %v1753_v27, %v1667_v38  ;;  %v1082_v30 = vadd.f32 %v2068_v56, %v1043_v35 }
 0x138   : > { %v1044_v42 = vmul.f32 %v2063_v52, %v949_v39 }
 0x139   : > { %v1084_v44 = vadd.f32 %v2068_v56, %v1045_v40  ;;  %v1046_v45 = vmul.f32 %v2063_v52, %v957_v41  ;;  %v1668_v46 = vpop.f32.mrb[32].mxu0  ;;  %v1756_v47 = vpop.f32.mrb[32].mxu1  ;;  %v1114_v58 = vmax.f32 %v1082_v30, 0.0 }
 0x13a   : > { %v1083_v48 = vadd.f32 %v2068_v56, %v1044_v42  ;;  %v1669_v50 = vpop.f32.mrb[33].mxu0  ;;  %v961_v51 = vpop.f32.mrb[33].mxu1 }
 0x13b   : > { %v1085_v36 = vadd.f32 %v2068_v56, %v1046_v45  ;;  %v1670_v53 = vadd.f32 %v1669_v50, %v1668_v46  ;;  %v1671_v54 = vpop.f32.mrb[34].mxu0  ;;  %v1757_v55 = vpop.f32.mrb[34].mxu1  ;;  %v1116_v62 = vmax.f32 %v1084_v44, 0.0 }
 0x13c   : > { %v1115_v59 = vmax.f32 %v1083_v48, 0.0  ;;  %v1672_v60 = vpop.f32.mrb[35].mxu0  ;;  %v964_v61 = vpop.f32.mrb[35].mxu1 }
 0x13d   : > { %v1117_v63 = vmax.f32 %v1085_v36, 0.0  ;;  %v962_v0 = vadd.f32 %v1670_v53, %v961_v51  ;;  %v1673_v1 = vadd.f32 %v1672_v60, %v1671_v54 }
 0x13e   : > { %v1542_v3 = vpack.c.bf16 %v1115_v59, %v1114_v58 }
 0x13f   : > { %v1547_v4 = vpack.c.bf16 %v1117_v63, %v1116_v62  ;;  %v1047_v5 = vmul.f32 %v2063_v52, %v962_v0  ;;  %v965_v8 = vadd.f32 %v1673_v1, %v964_v61 }
 0x140   : > { %1594 = vst [vmem:[%s2082_s16 + $0x30] sm:$0xff] %v1542_v3  }
 0x141   : > { %1595 = vst [vmem:[%s2082_s16 + $0x38] sm:$0xff] %v1547_v4   ;;  %v1086_v9 = vadd.f32 %v2068_v56, %v1047_v5  ;;  %v1048_v6 = vmul.f32 %v2063_v52, %v965_v8  ;;  %v1674_v10 = vpop.f32.mrb[36].mxu0  ;;  %v2119_v57 = vpop.f32.mrb[36].mxu1 }
 0x142   : > { %v1675_v11 = vpop.f32.mrb[37].mxu0  ;;  %v977_v14 = vpop.f32.mrb[37].mxu1 }
 0x143   : > { %v1087_v15 = vadd.f32 %v2068_v56, %v1048_v6  ;;  %v1676_v16 = vadd.f32 %v1675_v11, %v1674_v10  ;;  %v1677_v17 = vpop.f32.mrb[38].mxu0  ;;  %v2122_v18 = vpop.f32.mrb[38].mxu1  ;;  %v1118_v20 = vmax.f32 %v1086_v9, 0.0 }
 0x144   : > { %v1678_v12 = vpop.f32.mrb[39].mxu0  ;;  %v980_v2 = vpop.f32.mrb[39].mxu1 }
 0x145   : > { %v1119_v21 = vmax.f32 %v1087_v15, 0.0  ;;  %v970_v22 = vadd.f32 %v1756_v47, %v1676_v16  ;;  %v1679_v23 = vadd.f32 %v1678_v12, %v1677_v17 }
 0x147   : > { %v1552_v24 = vpack.c.bf16 %v1119_v21, %v1118_v20  ;;  %v1049_v26 = vmul.f32 %v2063_v52, %v970_v22  ;;  %v973_v27 = vadd.f32 %v1757_v55, %v1679_v23 }
 0x149   : > { %1596 = vst [vmem:[%s2082_s16 + $0x40] sm:$0xff] %v1552_v24   ;;  %v1088_v28 = vadd.f32 %v2068_v56, %v1049_v26  ;;  %v1050_v29 = vmul.f32 %v2063_v52, %v973_v27  ;;  %v1680_v32 = vpop.f32.mrb[40].mxu0  ;;  %v1764_v33 = vpop.f32.mrb[40].mxu1 }
 0x14a   : > { %v1002_v34 = vadd.f32 %v1764_v33, %v2048_v19  ;;  %v1681_v35 = vpop.f32.mrb[41].mxu0  ;;  %v993_v38 = vpop.f32.mrb[41].mxu1 }
 0x14b   : > { %v1089_v39 = vadd.f32 %v2068_v56, %v1050_v29  ;;  %v1682_v40 = vadd.f32 %v1681_v35, %v1680_v32  ;;  %v994_v41 = vadd.f32 %v2044_v7, %v993_v38  ;;  %v1683_v30 = vpop.f32.mrb[42].mxu0  ;;  %v1765_v42 = vpop.f32.mrb[42].mxu1  ;;  %v1120_v44 = vmax.f32 %v1088_v28, 0.0 }
 0x14c   : > { %v1057_v45 = vmul.f32 %v2063_v52, %v1002_v34  ;;  %v1005_v46 = vadd.f32 %v1765_v42, %v2050_v25  ;;  %v1684_v47 = vpop.f32.mrb[43].mxu0  ;;  %v996_v48 = vpop.f32.mrb[43].mxu1 }
 0x14d   : > { %v1121_v50 = vmax.f32 %v1089_v39, 0.0  ;;  %v978_v51 = vadd.f32 %v1682_v40, %v977_v14  ;;  %v1055_v19 = vmul.f32 %v2063_v52, %v994_v41  ;;  %v1685_v36 = vadd.f32 %v1684_v47, %v1683_v30 }
 0x14e   : > { %v1096_v53 = vadd.f32 %v2068_v56, %v1057_v45  ;;  %v1058_v54 = vmul.f32 %v2063_v52, %v1005_v46  ;;  %v997_v7 = vadd.f32 %v2046_v13, %v996_v48 }
 0x14f   : > { %v1557_v55 = vpack.c.bf16 %v1121_v50, %v1120_v44  ;;  %v1051_v58 = vmul.f32 %v2063_v52, %v978_v51  ;;  %v1094_v59 = vadd.f32 %v2068_v56, %v1055_v19  ;;  %v981_v25 = vadd.f32 %v1685_v36, %v980_v2 }
 0x150   : > { %v1097_v60 = vadd.f32 %v2068_v56, %v1058_v54  ;;  %v1056_v61 = vmul.f32 %v2063_v52, %v997_v7  ;;  %v1128_v62 = vmax.f32 %v1096_v53, 0.0 }
 0x151   : > { %1597 = vst [vmem:[%s2082_s16 + $0x48] sm:$0xff] %v1557_v55   ;;  %v1090_v63 = vadd.f32 %v2068_v56, %v1051_v58  ;;  %v1052_v0 = vmul.f32 %v2063_v52, %v981_v25  ;;  %v1686_v1 = vpop.f32.mrb[44].mxu0  ;;  %v1768_v3 = vpop.f32.mrb[44].mxu1  ;;  %v1126_v4 = vmax.f32 %v1094_v59, 0.0 }
 0x152   : > { %v1129_v13 = vmax.f32 %v1097_v60, 0.0  ;;  %v1095_v5 = vadd.f32 %v2068_v56, %v1056_v61  ;;  %v1018_v8 = vadd.f32 %v1768_v3, %v2056_v43  ;;  %v1687_v9 = vpop.f32.mrb[45].mxu0  ;;  %v1009_v6 = vpop.f32.mrb[45].mxu1 }
 0x153   : > { %v1122_v10 = vmax.f32 %v1090_v63, 0.0  ;;  %v1091_v11 = vadd.f32 %v2068_v56, %v1052_v0  ;;  %v1688_v14 = vadd.f32 %v1687_v9, %v1686_v1  ;;  %v1010_v15 = vadd.f32 %v2052_v31, %v1009_v6  ;;  %v1689_v16 = vpop.f32.mrb[46].mxu0  ;;  %v1769_v17 = vpop.f32.mrb[46].mxu1 }
 0x154   : > { %v1577_v12 = vpack.c.bf16 %v1129_v13, %v1128_v62  ;;  %v1127_v2 = vmax.f32 %v1095_v5, 0.0  ;;  %v1061_v20 = vmul.f32 %v2063_v52, %v1018_v8  ;;  %v1021_v21 = vadd.f32 %v1769_v17, %v2058_v49  ;;  %v1690_v22 = vpop.f32.mrb[47].mxu0  ;;  %v1012_v43 = vpop.f32.mrb[47].mxu1 }
 0x155   : > { %v1123_v23 = vmax.f32 %v1091_v11, 0.0  ;;  %v986_v24 = vadd.f32 %v2119_v57, %v1688_v14  ;;  %v1059_v26 = vmul.f32 %v2063_v52, %v1010_v15  ;;  %v1691_v27 = vadd.f32 %v1690_v22, %v1689_v16 }
 0x156   : > { %1601 = vst [vmem:[%s2082_s16 + $0x68] sm:$0xff] %v1577_v12   ;;  %v1572_v31 = vpack.c.bf16 %v1127_v2, %v1126_v4  ;;  %v1100_v28 = vadd.f32 %v2068_v56, %v1061_v20  ;;  %v1062_v29 = vmul.f32 %v2063_v52, %v1021_v21  ;;  %v1013_v32 = vadd.f32 %v2054_v37, %v1012_v43 }
 0x157   : > { %v1562_v33 = vpack.c.bf16 %v1123_v23, %v1122_v10  ;;  %v1053_v49 = vmul.f32 %v2063_v52, %v986_v24  ;;  %v989_v34 = vadd.f32 %v2122_v18, %v1691_v27  ;;  %v1098_v57 = vadd.f32 %v2068_v56, %v1059_v26 }
 0x158   : > { %1600 = vst [vmem:[%s2082_s16 + $0x60] sm:$0xff] %v1572_v31   ;;  %v1101_v35 = vadd.f32 %v2068_v56, %v1062_v29  ;;  %v1060_v38 = vmul.f32 %v2063_v52, %v1013_v32  ;;  %v1132_v40 = vmax.f32 %v1100_v28, 0.0 }
 0x159   : > { %1598 = vst [vmem:[%s2082_s16 + $0x50] sm:$0xff] %v1562_v33   ;;  %v1092_v39 = vadd.f32 %v2068_v56, %v1053_v49  ;;  %v1054_v37 = vmul.f32 %v2063_v52, %v989_v34  ;;  %v1130_v42 = vmax.f32 %v1098_v57, 0.0 }
 0x15a   : > { %v1133_v41 = vmax.f32 %v1101_v35, 0.0  ;;  %v1099_v30 = vadd.f32 %v2068_v56, %v1060_v38 }
 0x15b   : > { %v1093_v18 = vadd.f32 %v2068_v56, %v1054_v37  ;;  %v1124_v46 = vmax.f32 %v1092_v39, 0.0 }
 0x15c   : > { %v1587_v44 = vpack.c.bf16 %v1133_v41, %v1132_v40  ;;  %v1131_v45 = vmax.f32 %v1099_v30, 0.0 }
 0x15d   : > { %v1125_v47 = vmax.f32 %v1093_v18, 0.0 }
 0x15e   : > { %1603 = vst [vmem:[%s2082_s16 + $0x78] sm:$0xff] %v1587_v44   ;;  %v1582_v48 = vpack.c.bf16 %v1131_v45, %v1130_v42 }
 0x15f   : > { %v1567_v50 = vpack.c.bf16 %v1125_v47, %v1124_v46 }
 0x160   : > { %1602 = vst [vmem:[%s2082_s16 + $0x70] sm:$0xff] %v1582_v48  }
 0x161   : > { %1599 = vst [vmem:[%s2082_s16 + $0x58] sm:$0xff] %v1567_v50  }
 0x162 PF: > { %s14_s15 = sadd.s32 1, %s1883_s15  }
 0x163   : > { %p11_p4 = scmp.ge.s32.totalorder %s14_s15, 4  }
 0x165   :  { %13 = sbr.rel (!%p11_p4) target bundleno = 1 (0x1), region = 66 }

// kernel: wav2lip_disc_forward.9
= control target key start
LH: loop header
LB: loop body
LE: loop exit
PB: predicated region body
PF: predicated region fallthrough
CT: control target
= control target key end

     0   :  { %vm554_vm0 = vcmask 523264   ;;  %s1808_s1 = inlined_call_operand.vmem [shape: bf16[576,128], index: 1, kind: input, shape index: {}]   ;;  %s1809_s0 = inlined_call_operand.vmem [shape: bf16[128,576], index: 0, kind: input, shape index: {}]   ;;  %s1810_s2 = inlined_call_operand.vmem [shape: f32[1,128], index: 2, kind: input, shape index: {}]   ;;  %s1811_s3 = inlined_call_operand.vmem [shape: f32[1,128], index: 3, kind: input, shape index: {}]   ;;  %s1812_s4 = inlined_call_operand.vmem [shape: bf16[128,128], index: 4, kind: output, shape index: {}]  }
   0x1   :  { %v1353_v0 = vld [vmem:[%s1808_s1 + $0x40] sm:$0xff]   ;;  %v1357_v4 = vld [vmem:[%s1808_s1 + $0x48] sm:$0xff]   ;;  %v1361_v8 = vld [vmem:[%s1808_s1 + $0x50] sm:$0xff]  }
   0x2   :  { %v1354_v1 = vld [vmem:[%s1808_s1 + $0xc0] sm:$0xff]   ;;  %1181 = vmatprep.subr.bf16.mxu0 %v1353_v0  ;;  %v1358_v5 = vld [vmem:[%s1808_s1 + $0xc8] sm:$0xff]   ;;  %v1362_v9 = vld [vmem:[%s1808_s1 + $0xd0] sm:$0xff]  }
   0x3   :  { %v1355_v2 = vld [vmem:[%s1808_s1] sm:$0xff]   ;;  %1245 = vmatprep.subr.bf16.mxu1 %v1354_v1  ;;  %v1359_v6 = vld [vmem:[%s1808_s1 + $0x8] sm:$0xff]   ;;  %v1363_v10 = vld [vmem:[%s1808_s1 + $0x10] sm:$0xff]  }
   0x4   :  { %v1356_v3 = vld [vmem:[%s1808_s1 + $0x80] sm:$0xff]   ;;  %1182 = vmatpush3.bf16.msra.mxu0 %v1355_v2  ;;  %v1360_v7 = vld [vmem:[%s1808_s1 + $0x88] sm:$0xff]   ;;  %v1364_v11 = vld [vmem:[%s1808_s1 + $0x90] sm:$0xff]  }
   0x5   :  { %1246 = vmatpush3.bf16.msra.mxu1 %v1356_v3  ;;  %1183 = vmatprep.subr.bf16.mxu0 %v1357_v4  ;;  %v1365_v12 = vld [vmem:[%s1808_s1 + $0x58] sm:$0xff]   ;;  %v1369_v16 = vld [vmem:[%s1808_s1 + $0x60] sm:$0xff]   ;;  %v1373_v20 = vld [vmem:[%s1808_s1 + $0x68] sm:$0xff]  }
   0x6   :  { %1247 = vmatprep.subr.bf16.mxu1 %v1358_v5  ;;  %v1366_v13 = vld [vmem:[%s1808_s1 + $0xd8] sm:$0xff]   ;;  %v1370_v17 = vld [vmem:[%s1808_s1 + $0xe0] sm:$0xff]   ;;  %v1374_v21 = vld [vmem:[%s1808_s1 + $0xe8] sm:$0xff]  }
   0x7   :  { %v1367_v14 = vld [vmem:[%s1808_s1 + $0x18] sm:$0xff]   ;;  %v1371_v18 = vld [vmem:[%s1808_s1 + $0x20] sm:$0xff]   ;;  %v1375_v22 = vld [vmem:[%s1808_s1 + $0x28] sm:$0xff]  }
   0x8   :  { %1184 = vmatpush3.bf16.msra.mxu0 %v1359_v6  ;;  %v1368_v15 = vld [vmem:[%s1808_s1 + $0x98] sm:$0xff]   ;;  %v1372_v19 = vld [vmem:[%s1808_s1 + $0xa0] sm:$0xff]   ;;  %v1376_v23 = vld [vmem:[%s1808_s1 + $0xa8] sm:$0xff]  }
   0x9   :  { %1248 = vmatpush3.bf16.msra.mxu1 %v1360_v7  ;;  %1185 = vmatprep.subr.bf16.mxu0 %v1361_v8  ;;  %v1377_v24 = vld [vmem:[%s1808_s1 + $0x70] sm:$0xff]   ;;  %v1381_v28 = vld [vmem:[%s1808_s1 + $0x78] sm:$0xff]   ;;  %v1390_v35 = vld [vmem:[%s1809_s0 + $0xc] ss:$20 sps:$4 sm:$0xff]  }
   0xa   :  { %1249 = vmatprep.subr.bf16.mxu1 %v1362_v9  ;;  %v1378_v25 = vld [vmem:[%s1808_s1 + $0xf0] sm:$0xff]   ;;  %v1382_v29 = vld [vmem:[%s1808_s1 + $0xf8] sm:$0xff]   ;;  %v1391_v36 = vld [vmem:[%s1808_s1 + $0x100] sm:$0xff]   ;;  %708 = vmatprep.mubr.bf16.mxu1 %v1390_v35 }
   0xb   :  { %v1379_v26 = vld [vmem:[%s1808_s1 + $0x30] sm:$0xff]   ;;  %v1383_v30 = vld [vmem:[%s1808_s1 + $0x38] sm:$0xff]   ;;  %v1392_v37 = vld [vmem:[%s1809_s0 + $0x2c] ss:$20 sps:$4 sm:$0xff]  }
   0xc   :  { %1186 = vmatpush3.bf16.msra.mxu0 %v1363_v10  ;;  %v1380_v27 = vld [vmem:[%s1808_s1 + $0xb0] sm:$0xff]   ;;  %v1384_v31 = vld [vmem:[%s1808_s1 + $0xb8] sm:$0xff]   ;;  %v1404_v42 = vld [vmem:[%s1808_s1 + $0x108] sm:$0xff]  }
   0xd   :  { %1250 = vmatpush3.bf16.msra.mxu1 %v1364_v11  ;;  %1187 = vmatprep.subr.bf16.mxu0 %v1365_v12  ;;  %v1385_v32 = vld [vmem:[%s1809_s0] ss:$20 sps:$4 sm:$0xff]   ;;  %v1387_v33 = vld [vmem:[%s1809_s0 + $0x4] ss:$20 sps:$4 sm:$0xff]   ;;  %v1388_v34 = vld [vmem:[%s1809_s0 + $0x8] ss:$20 sps:$4 sm:$0xff]  }
   0xe   :  { %1251 = vmatprep.subr.bf16.mxu1 %v1366_v13  ;;  %611 = vmatprep.mubr.bf16.mxu0 %v1387_v33  ;;  %v1394_v38 = vld [vmem:[%s1809_s0 + $0x34] ss:$20 sps:$4 sm:$0xff]   ;;  %v1397_v40 = vld [vmem:[%s1809_s0 + $0x30] ss:$20 sps:$4 sm:$0xff]   ;;  %v1403_v45 = vld [vmem:[%s1809_s0 + $0x58] ss:$20 sps:$4 sm:$0xff]  }
   0xf   :  { %v1396_v39 = vld [vmem:[%s1809_s0 + $0x28] ss:$20 sps:$4 sm:$0xff]   ;;  %v1402_v44 = vld [vmem:[%s1809_s0 + $0x50] ss:$20 sps:$4 sm:$0xff]   ;;  %v1409_v50 = vld [vmem:[%s1809_s0 + $0x78] ss:$20 sps:$4 sm:$0xff]  }
  0x10   :  { %1188 = vmatpush3.bf16.msra.mxu0 %v1367_v14  ;;  %v1398_v41 = vld [vmem:[%s1809_s0 + $0x54] ss:$20 sps:$4 sm:$0xff]   ;;  %v1400_v43 = vld [vmem:[%s1809_s0 + $0x5c] ss:$20 sps:$4 sm:$0xff]   ;;  %v1407_v48 = vld [vmem:[%s1809_s0 + $0x84] ss:$20 sps:$4 sm:$0xff]  }
  0x11   :  { %1252 = vmatpush3.bf16.msra.mxu1 %v1368_v15  ;;  %1189 = vmatprep.subr.bf16.mxu0 %v1369_v16  ;;  %v1417_v46 = vld [vmem:[%s1808_s1 + $0x110] sm:$0xff]   ;;  %v1430_v49 = vld [vmem:[%s1808_s1 + $0x118] sm:$0xff]   ;;  %v1413_v53 = vld [vmem:[%s1809_s0 + $0xac] ss:$20 sps:$4 sm:$0xff]  }
  0x12   :  { %1253 = vmatprep.subr.bf16.mxu1 %v1370_v17  ;;  %v1405_v47 = vld [vmem:[%s1809_s0 + $0x7c] ss:$20 sps:$4 sm:$0xff]   ;;  %v1410_v51 = vld [vmem:[%s1809_s0 + $0x80] ss:$20 sps:$4 sm:$0xff]   ;;  %v1411_v52 = vld [vmem:[%s1809_s0 + $0xa4] ss:$20 sps:$4 sm:$0xff]  }
  0x13   :  { %v1415_v54 = vld [vmem:[%s1809_s0 + $0xa0] ss:$20 sps:$4 sm:$0xff]   ;;  %v1416_v55 = vld [vmem:[%s1809_s0 + $0xa8] ss:$20 sps:$4 sm:$0xff]   ;;  %v1423_v59 = vld [vmem:[%s1809_s0 + $0xd0] ss:$20 sps:$4 sm:$0xff]  }
  0x14   :  { %1190 = vmatpush3.bf16.msra.mxu0 %v1371_v18  ;;  %v1418_v56 = vld [vmem:[%s1809_s0 + $0xcc] ss:$20 sps:$4 sm:$0xff]   ;;  %v1420_v57 = vld [vmem:[%s1809_s0 + $0xd4] ss:$20 sps:$4 sm:$0xff]   ;;  %v1426_v61 = vld [vmem:[%s1809_s0 + $0xfc] ss:$20 sps:$4 sm:$0xff]  }
  0x15   :  { %1254 = vmatpush3.bf16.msra.mxu1 %v1372_v19  ;;  %1191 = vmatprep.subr.bf16.mxu0 %v1373_v20  ;;  %v1422_v58 = vld [vmem:[%s1809_s0 + $0xc8] ss:$20 sps:$4 sm:$0xff]   ;;  %v1428_v62 = vld [vmem:[%s1809_s0 + $0xf0] ss:$20 sps:$4 sm:$0xff]   ;;  %v1429_v63 = vld [vmem:[%s1809_s0 + $0xf8] ss:$20 sps:$4 sm:$0xff]  }
  0x16   :  { %1255 = vmatprep.subr.bf16.mxu1 %v1374_v21  ;;  %v1424_v60 = vld [vmem:[%s1809_s0 + $0xf4] ss:$20 sps:$4 sm:$0xff]   ;;  %v1431_v0 = vld [vmem:[%s1809_s0 + $0x11c] ss:$20 sps:$4 sm:$0xff]   ;;  %v1433_v1 = vld [vmem:[%s1809_s0 + $0x124] ss:$20 sps:$4 sm:$0xff]  }
  0x17   :  { %v1435_v2 = vld [vmem:[%s1809_s0 + $0x118] ss:$20 sps:$4 sm:$0xff]   ;;  %v1436_v3 = vld [vmem:[%s1809_s0 + $0x120] ss:$20 sps:$4 sm:$0xff]   ;;  %v1437_v4 = vld [vmem:[%s1809_s0 + $0x10] ss:$20 sps:$4 sm:$0xff]  }
  0x18   :  { %1192 = vmatpush3.bf16.msra.mxu0 %v1375_v22  ;;  %v1438_v5 = vld [vmem:[%s1809_s0 + $0xb0] ss:$20 sps:$4 sm:$0xff]   ;;  %v1439_v6 = vld [vmem:[%s1809_s0 + $0x38] ss:$20 sps:$4 sm:$0xff]   ;;  %v1441_v8 = vld [vmem:[%s1809_s0 + $0x60] ss:$20 sps:$4 sm:$0xff]  }
  0x19   :  { %1256 = vmatpush3.bf16.msra.mxu1 %v1376_v23  ;;  %1193 = vmatprep.subr.bf16.mxu0 %v1377_v24  ;;  %v1440_v7 = vld [vmem:[%s1809_s0 + $0xd8] ss:$20 sps:$4 sm:$0xff]   ;;  %v1442_v9 = vld [vmem:[%s1809_s0 + $0x100] ss:$20 sps:$4 sm:$0xff]   ;;  %v1443_v10 = vld [vmem:[%s1809_s0 + $0x88] ss:$20 sps:$4 sm:$0xff]  }
  0x1a   :  { %1257 = vmatprep.subr.bf16.mxu1 %v1378_v25  ;;  %v1444_v11 = vld [vmem:[%s1809_s0 + $0x128] ss:$20 sps:$4 sm:$0xff]  }
  0x1c   :  { %1194 = vmatpush3.bf16.msra.mxu0 %v1379_v26 }
  0x1d   :  { %1258 = vmatpush3.bf16.msra.mxu1 %v1380_v27  ;;  %1195 = vmatprep.subr.bf16.mxu0 %v1381_v28 }
  0x1e   :  { %1259 = vmatprep.subr.bf16.mxu1 %v1382_v29 }
  0x20   :  { %1196 = vmatpush3.bf16.msra.mxu0 %v1383_v30 }
  0x21   :  { %1260 = vmatpush3.bf16.msra.mxu1 %v1384_v31  ;;  %1321 = vmatprep.subr.bf16.mxu0 %v1391_v36 }
  0x22   :  { %1345 = vmatprep.subr.bf16.mxu1 %v1391_v36 }
  0x23   :  { %612 = vmatmul.mubr.bf16.vlgmr.msra.gmra.mrb[0].mxu0 %v1385_v32 }
  0x24   :  { %709 = vmatmul.mubr.bf16.vlgmr.msra.gmra.mrb[0].mxu1 %v1388_v34  ;;  %1322 = vmatpush3.bf16.msra.mxu0 %v1391_v36 }
  0x25   :  { %1349 = vmatpush3.bf16.msra.mxu1 %v1391_v36  ;;  %619 = vmatprep.mubr.bf16.mxu0 %v1392_v37 }
  0x26   :  { %716 = vmatprep.mubr.bf16.mxu1 %v1394_v38  ;;  %1323 = vmatprep.subr.bf16.mxu0 %v1404_v42 }
  0x27   :  { %1346 = vmatprep.subr.bf16.mxu1 %v1404_v42 }
  0x28   :  { %1324 = vmatpush3.bf16.msra.mxu0 %v1404_v42 }
  0x29   :  { %1350 = vmatpush3.bf16.msra.mxu1 %v1404_v42  ;;  %1325 = vmatprep.subr.bf16.mxu0 %v1417_v46 }
  0x2a   :  { %1347 = vmatprep.subr.bf16.mxu1 %v1417_v46 }
  0x2b   :  { %620 = vmatmul.mubr.bf16.gmra.mrb[4].mxu0 %v1396_v39 }
  0x2c   :  { %717 = vmatmul.mubr.bf16.gmra.mrb[4].mxu1 %v1397_v40  ;;  %627 = vmatprep.mubr.bf16.mxu0 %v1398_v41 }
  0x2d   :  { %724 = vmatprep.mubr.bf16.mxu1 %v1400_v43  ;;  %1326 = vmatpush3.bf16.msra.mxu0 %v1417_v46 }
  0x2e   :  { %1351 = vmatpush3.bf16.msra.mxu1 %v1417_v46  ;;  %1327 = vmatprep.subr.bf16.mxu0 %v1430_v49 }
  0x2f   :  { %1348 = vmatprep.subr.bf16.mxu1 %v1430_v49 }
  0x31   :  { %1328 = vmatpush3.bf16.msra.mxu0 %v1430_v49 }
  0x32   :  { %1352 = vmatpush3.bf16.msra.mxu1 %v1430_v49 }
  0x33   :  { %628 = vmatmul.mubr.bf16.gmra.mrb[8].mxu0 %v1402_v44 }
  0x34   :  { %725 = vmatmul.mubr.bf16.gmra.mrb[8].mxu1 %v1403_v45  ;;  %635 = vmatprep.mubr.bf16.mxu0 %v1405_v47 }
  0x35   :  { %732 = vmatprep.mubr.bf16.mxu1 %v1407_v48 }
  0x3b   :  { %636 = vmatmul.mubr.bf16.gmra.mrb[12].mxu0 %v1409_v50 }
  0x3c   :  { %733 = vmatmul.mubr.bf16.gmra.mrb[12].mxu1 %v1410_v51  ;;  %643 = vmatprep.mubr.bf16.mxu0 %v1411_v52 }
  0x3d   :  { %740 = vmatprep.mubr.bf16.mxu1 %v1413_v53 }
  0x43   :  { %644 = vmatmul.mubr.bf16.gmra.mrb[16].mxu0 %v1415_v54 }
  0x44   :  { %741 = vmatmul.mubr.bf16.gmra.mrb[16].mxu1 %v1416_v55  ;;  %651 = vmatprep.mubr.bf16.mxu0 %v1418_v56 }
  0x45   :  { %748 = vmatprep.mubr.bf16.mxu1 %v1420_v57 }
  0x4b   :  { %652 = vmatmul.mubr.bf16.gmra.mrb[20].mxu0 %v1422_v58 }
  0x4c   :  { %749 = vmatmul.mubr.bf16.gmra.mrb[20].mxu1 %v1423_v59  ;;  %659 = vmatprep.mubr.bf16.mxu0 %v1424_v60 }
  0x4d   :  { %756 = vmatprep.mubr.bf16.mxu1 %v1426_v61 }
  0x53   :  { %660 = vmatmul.mubr.bf16.gmra.mrb[24].mxu0 %v1428_v62 }
  0x54   :  { %757 = vmatmul.mubr.bf16.gmra.mrb[24].mxu1 %v1429_v63  ;;  %667 = vmatprep.mubr.bf16.mxu0 %v1431_v0 }
  0x55   :  { %764 = vmatprep.mubr.bf16.mxu1 %v1433_v1 }
  0x5b   :  { %668 = vmatmul.mubr.bf16.gmra.mrb[28].mxu0 %v1435_v2 }
  0x5c   :  { %765 = vmatmul.mubr.bf16.gmra.mrb[28].mxu1 %v1436_v3  ;;  %1329 = vmatprep.mubr.msk.bf16.mxu0 %vm554_vm0, %v1437_v4 }
  0x5d   :  { %1337 = vmatprep.mubr.msk.bf16.mxu1 %vm554_vm0, %v1438_v5 }
  0x63   :  { %1330 = vmatmul.mubr.msk.bf16.vlgmr.msra.gmra.mrb[32].mxu0 %vm554_vm0, %v1439_v6 }
  0x64   :  { %1338 = vmatmul.mubr.msk.bf16.vlgmr.msra.gmra.mrb[32].mxu1 %vm554_vm0, %v1440_v7  ;;  %1333 = vmatprep.mubr.msk.bf16.mxu0 %vm554_vm0, %v1441_v8 }
  0x65   :  { %1341 = vmatprep.mubr.msk.bf16.mxu1 %vm554_vm0, %v1442_v9 }
  0x6b   :  { %1334 = vmatmul.mubr.msk.bf16.gmra.mrb[36].mxu0 %vm554_vm0, %v1443_v10 }
  0x6c   :  { %1342 = vmatmul.mubr.msk.bf16.gmra.mrb[36].mxu1 %vm554_vm0, %v1444_v11 }
  0xf6   :  { %v1197_v12 = vpop.f32.mrb[0].mxu0 }
  0xf7   :  { %v1261_v13 = vpop.f32.mrb[0].mxu1  ;;  %v1198_v14 = vpop.f32.mrb[1].mxu0 }
  0xf8   :  { %v1199_v15 = vadd.f32 %v1198_v14, %v1197_v12  ;;  %v1262_v16 = vpop.f32.mrb[1].mxu1  ;;  %v1200_v17 = vpop.f32.mrb[2].mxu0 }
  0xf9   :  { %v1263_v18 = vadd.f32 %v1262_v16, %v1261_v13  ;;  %v1264_v19 = vpop.f32.mrb[2].mxu1  ;;  %v1201_v20 = vpop.f32.mrb[3].mxu0 }
  0xfa   :  { %v1202_v21 = vadd.f32 %v1201_v20, %v1200_v17  ;;  %v1265_v22 = vpop.f32.mrb[3].mxu1 }
  0xfb   :  { %v1266_v23 = vadd.f32 %v1265_v22, %v1264_v19  ;;  %v1706_v24 = vadd.f32 %v1263_v18, %v1199_v15 }
  0xfd   :  { %v1708_v25 = vadd.f32 %v1266_v23, %v1202_v21 }
  0xfe   :  { %v1203_v26 = vpop.f32.mrb[4].mxu0 }
  0xff   :  { %v1267_v27 = vpop.f32.mrb[4].mxu1  ;;  %v1204_v28 = vpop.f32.mrb[5].mxu0 }
 0x100   :  { %v1205_v29 = vadd.f32 %v1204_v28, %v1203_v26  ;;  %v1268_v30 = vpop.f32.mrb[5].mxu1  ;;  %v1206_v31 = vpop.f32.mrb[6].mxu0 }
 0x101   :  { %v1269_v32 = vadd.f32 %v1268_v30, %v1267_v27  ;;  %v1270_v33 = vpop.f32.mrb[6].mxu1  ;;  %v1207_v34 = vpop.f32.mrb[7].mxu0 }
 0x102   :  { %v1208_v35 = vadd.f32 %v1207_v34, %v1206_v31  ;;  %v1271_v36 = vpop.f32.mrb[7].mxu1 }
 0x103   :  { %v1272_v37 = vadd.f32 %v1271_v36, %v1270_v33  ;;  %v1710_v38 = vadd.f32 %v1269_v32, %v1205_v29 }
 0x105   :  { %v1712_v39 = vadd.f32 %v1272_v37, %v1208_v35 }
 0x106   :  { %v1209_v40 = vpop.f32.mrb[8].mxu0 }
 0x107   :  { %v1273_v41 = vpop.f32.mrb[8].mxu1  ;;  %v1210_v42 = vpop.f32.mrb[9].mxu0 }
 0x108   :  { %v1211_v43 = vadd.f32 %v1210_v42, %v1209_v40  ;;  %v1274_v44 = vpop.f32.mrb[9].mxu1  ;;  %v1212_v45 = vpop.f32.mrb[10].mxu0 }
 0x109   :  { %v1275_v46 = vadd.f32 %v1274_v44, %v1273_v41  ;;  %v1276_v47 = vpop.f32.mrb[10].mxu1  ;;  %v1213_v48 = vpop.f32.mrb[11].mxu0 }
 0x10a   :  { %v1214_v49 = vadd.f32 %v1213_v48, %v1212_v45  ;;  %v1277_v50 = vpop.f32.mrb[11].mxu1 }
 0x10b   :  { %v1278_v51 = vadd.f32 %v1277_v50, %v1276_v47  ;;  %v1714_v52 = vadd.f32 %v1275_v46, %v1211_v43 }
 0x10d   :  { %v1716_v53 = vadd.f32 %v1278_v51, %v1214_v49 }
 0x10e   :  { %v1215_v54 = vpop.f32.mrb[12].mxu0 }
 0x10f   :  { %v1279_v55 = vpop.f32.mrb[12].mxu1  ;;  %v1216_v56 = vpop.f32.mrb[13].mxu0 }
 0x110   :  { %v1217_v57 = vadd.f32 %v1216_v56, %v1215_v54  ;;  %v1280_v58 = vpop.f32.mrb[13].mxu1  ;;  %v1218_v59 = vpop.f32.mrb[14].mxu0 }
 0x111   :  { %v1281_v60 = vadd.f32 %v1280_v58, %v1279_v55  ;;  %v1282_v61 = vpop.f32.mrb[14].mxu1  ;;  %v1219_v62 = vpop.f32.mrb[15].mxu0 }
 0x112   :  { %v1220_v63 = vadd.f32 %v1219_v62, %v1218_v59  ;;  %v1283_v0 = vpop.f32.mrb[15].mxu1 }
 0x113   :  { %v1284_v1 = vadd.f32 %v1283_v0, %v1282_v61  ;;  %v1718_v2 = vadd.f32 %v1281_v60, %v1217_v57 }
 0x115   :  { %v1720_v3 = vadd.f32 %v1284_v1, %v1220_v63 }
 0x116   :  { %v1221_v4 = vpop.f32.mrb[16].mxu0 }
 0x117   :  { %v1285_v5 = vpop.f32.mrb[16].mxu1  ;;  %v1222_v6 = vpop.f32.mrb[17].mxu0 }
 0x118   :  { %v1223_v7 = vadd.f32 %v1222_v6, %v1221_v4  ;;  %v1286_v8 = vpop.f32.mrb[17].mxu1  ;;  %v1224_v9 = vpop.f32.mrb[18].mxu0 }
 0x119   :  { %v1287_v10 = vadd.f32 %v1286_v8, %v1285_v5  ;;  %v1288_v11 = vpop.f32.mrb[18].mxu1  ;;  %v1225_v12 = vpop.f32.mrb[19].mxu0  ;;  %v1733_v5 = vld [vmem:[%s1810_s2] ss:$0 sm:$0xff] }
 0x11a   :  { %v1226_v13 = vadd.f32 %v1225_v12, %v1224_v9  ;;  %v1289_v14 = vpop.f32.mrb[19].mxu1  ;;  %v1739_v9 = vld [vmem:[%s1811_s3] ss:$0 sm:$0xff] }
 0x11b   :  { %v1290_v15 = vadd.f32 %v1289_v14, %v1288_v11  ;;  %v743_v16 = vadd.f32 %v1287_v10, %v1223_v7 }
 0x11d   :  { %v1722_v17 = vadd.f32 %v1290_v15, %v1226_v13 }
 0x11e   :  { %v1227_v18 = vpop.f32.mrb[20].mxu0 }
 0x11f   :  { %v1291_v19 = vpop.f32.mrb[20].mxu1  ;;  %v1228_v20 = vpop.f32.mrb[21].mxu0 }
 0x120   :  { %v1229_v21 = vadd.f32 %v1228_v20, %v1227_v18  ;;  %v1292_v22 = vpop.f32.mrb[21].mxu1  ;;  %v1230_v23 = vpop.f32.mrb[22].mxu0 }
 0x121   :  { %v1293_v26 = vadd.f32 %v1292_v22, %v1291_v19  ;;  %v1294_v27 = vpop.f32.mrb[22].mxu1  ;;  %v1231_v28 = vpop.f32.mrb[23].mxu0 }
 0x122   :  { %v1232_v29 = vadd.f32 %v1231_v28, %v1230_v23  ;;  %v1295_v30 = vpop.f32.mrb[23].mxu1 }
 0x123   :  { %v1296_v31 = vadd.f32 %v1295_v30, %v1294_v27  ;;  %v751_v32 = vadd.f32 %v1293_v26, %v1229_v21 }
 0x125   :  { %v754_v33 = vadd.f32 %v1296_v31, %v1232_v29 }
 0x126   :  { %v1233_v34 = vpop.f32.mrb[24].mxu0 }
 0x127   :  { %v1297_v35 = vpop.f32.mrb[24].mxu1  ;;  %v1234_v36 = vpop.f32.mrb[25].mxu0 }
 0x128   :  { %v1235_v37 = vadd.f32 %v1234_v36, %v1233_v34  ;;  %v1298_v40 = vpop.f32.mrb[25].mxu1  ;;  %v1236_v41 = vpop.f32.mrb[26].mxu0 }
 0x129   :  { %v1299_v42 = vadd.f32 %v1298_v40, %v1297_v35  ;;  %v1300_v43 = vpop.f32.mrb[26].mxu1  ;;  %v1237_v44 = vpop.f32.mrb[27].mxu0 }
 0x12a   :  { %v1238_v45 = vadd.f32 %v1237_v44, %v1236_v41  ;;  %v1301_v46 = vpop.f32.mrb[27].mxu1 }
 0x12b   :  { %v1302_v47 = vadd.f32 %v1301_v46, %v1300_v43  ;;  %v1724_v48 = vadd.f32 %v1299_v42, %v1235_v37 }
 0x12d   :  { %v1726_v49 = vadd.f32 %v1302_v47, %v1238_v45 }
 0x12e   :  { %v1239_v50 = vpop.f32.mrb[28].mxu0 }
 0x12f   :  { %v1303_v51 = vpop.f32.mrb[28].mxu1  ;;  %v1240_v54 = vpop.f32.mrb[29].mxu0 }
 0x130   :  { %v1241_v55 = vadd.f32 %v1240_v54, %v1239_v50  ;;  %v1304_v56 = vpop.f32.mrb[29].mxu1  ;;  %v1242_v57 = vpop.f32.mrb[30].mxu0 }
 0x131   :  { %v1305_v58 = vadd.f32 %v1304_v56, %v1303_v51  ;;  %v1306_v59 = vpop.f32.mrb[30].mxu1  ;;  %v1243_v60 = vpop.f32.mrb[31].mxu0 }
 0x132   :  { %v1244_v61 = vadd.f32 %v1243_v60, %v1242_v57  ;;  %v1307_v62 = vpop.f32.mrb[31].mxu1 }
 0x133   :  { %v1308_v63 = vadd.f32 %v1307_v62, %v1306_v59  ;;  %v767_v0 = vadd.f32 %v1305_v58, %v1241_v55 }
 0x135   :  { %v1728_v1 = vadd.f32 %v1308_v63, %v1244_v61 }
 0x136   :  { %v1331_v4 = vpop.f32.mrb[32].mxu0 }
 0x137   :  { %v816_v6 = vadd.f32 %v1331_v4, %v1710_v38  ;;  %v1339_v7 = vpop.f32.mrb[32].mxu1  ;;  %v807_v8 = vpop.f32.mrb[33].mxu0 }
 0x138   :  { %v848_v10 = vadd.f32 %v1339_v7, %v751_v32  ;;  %v808_v11 = vadd.f32 %v807_v8, %v1706_v24  ;;  %v839_v12 = vpop.f32.mrb[33].mxu1  ;;  %v1332_v13 = vpop.f32.mrb[34].mxu0 }
 0x139   :  { %v879_v14 = vmul.f32 %v1733_v5, %v816_v6  ;;  %v840_v15 = vadd.f32 %v839_v12, %v743_v16  ;;  %v819_v18 = vadd.f32 %v1332_v13, %v1712_v39  ;;  %v1340_v19 = vpop.f32.mrb[34].mxu1  ;;  %v810_v20 = vpop.f32.mrb[35].mxu0 }
 0x13a   :  { %v887_v38 = vmul.f32 %v1733_v5, %v848_v10  ;;  %v877_v21 = vmul.f32 %v1733_v5, %v808_v11  ;;  %v851_v22 = vadd.f32 %v1340_v19, %v754_v33  ;;  %v811_v23 = vadd.f32 %v810_v20, %v1708_v25  ;;  %v842_v26 = vpop.f32.mrb[35].mxu1 }
 0x13b   :  { %v902_v27 = vadd.f32 %v1739_v9, %v879_v14  ;;  %v885_v24 = vmul.f32 %v1733_v5, %v840_v15  ;;  %v880_v28 = vmul.f32 %v1733_v5, %v819_v18  ;;  %v843_v16 = vadd.f32 %v842_v26, %v1722_v17 }
 0x13c   :  { %v910_v39 = vadd.f32 %v1739_v9, %v887_v38  ;;  %v900_v29 = vadd.f32 %v1739_v9, %v877_v21  ;;  %v888_v30 = vmul.f32 %v1733_v5, %v851_v22  ;;  %v878_v31 = vmul.f32 %v1733_v5, %v811_v23 }
 0x13d   :  { %v918_v32 = vmax.f32 %v902_v27, 0.0  ;;  %v908_v25 = vadd.f32 %v1739_v9, %v885_v24  ;;  %v903_v33 = vadd.f32 %v1739_v9, %v880_v28  ;;  %v886_v34 = vmul.f32 %v1733_v5, %v843_v16 }
 0x13e   :  { %v926_v35 = vmax.f32 %v910_v39, 0.0  ;;  %v916_v36 = vmax.f32 %v900_v29, 0.0  ;;  %v911_v37 = vadd.f32 %v1739_v9, %v888_v30  ;;  %v901_v17 = vadd.f32 %v1739_v9, %v878_v31  ;;  %v1335_v40 = vpop.f32.mrb[36].mxu0 }
 0x13f   :  { %v924_v41 = vmax.f32 %v908_v25, 0.0  ;;  %v919_v42 = vmax.f32 %v903_v33, 0.0  ;;  %v909_v43 = vadd.f32 %v1739_v9, %v886_v34  ;;  %v832_v44 = vadd.f32 %v1335_v40, %v1718_v2  ;;  %v1343_v45 = vpop.f32.mrb[36].mxu1  ;;  %v823_v46 = vpop.f32.mrb[37].mxu0 }
 0x140   :  { %v927_v47 = vmax.f32 %v911_v37, 0.0  ;;  %v917_v50 = vmax.f32 %v901_v17, 0.0  ;;  %v864_v51 = vadd.f32 %v1343_v45, %v767_v0  ;;  %v824_v54 = vadd.f32 %v823_v46, %v1714_v52  ;;  %v855_v55 = vpop.f32.mrb[37].mxu1  ;;  %v1336_v56 = vpop.f32.mrb[38].mxu0 }
 0x141   :  { %v1142_v57 = vpack.c.bf16 %v919_v42, %v918_v32  ;;  %v925_v58 = vmax.f32 %v909_v43, 0.0  ;;  %v883_v59 = vmul.f32 %v1733_v5, %v832_v44  ;;  %v856_v60 = vadd.f32 %v855_v55, %v1724_v48  ;;  %v1344_v61 = vpop.f32.mrb[38].mxu1  ;;  %v826_v62 = vpop.f32.mrb[39].mxu0 }
 0x142   :  { %v1162_v63 = vpack.c.bf16 %v927_v47, %v926_v35  ;;  %v1137_v4 = vpack.c.bf16 %v917_v50, %v916_v36  ;;  %v891_v2 = vmul.f32 %v1733_v5, %v864_v51  ;;  %v881_v6 = vmul.f32 %v1733_v5, %v824_v54  ;;  %v858_v7 = vpop.f32.mrb[39].mxu1 }
 0x143   :  { %1174 = vst [vmem:[%s1812_s4 + $0x8] sm:$0xff] %v1142_v57   ;;  %v1157_v52 = vpack.c.bf16 %v925_v58, %v924_v41  ;;  %v889_v0 = vmul.f32 %v1733_v5, %v856_v60  ;;  %v835_v8 = vadd.f32 %v1336_v56, %v1720_v3  ;;  %v867_v48 = vadd.f32 %v1344_v61, %v1728_v1 }
 0x144   :  { %1178 = vst [vmem:[%s1812_s4 + $0x28] sm:$0xff] %v1162_v63   ;;  %1138 = vst [vmem:[%s1812_s4] sm:$0xff] %v1137_v4   ;;  %v827_v10 = vadd.f32 %v826_v62, %v1716_v53  ;;  %v906_v11 = vadd.f32 %v1739_v9, %v883_v59  ;;  %v859_v12 = vadd.f32 %v858_v7, %v1726_v49 }
 0x145   :  { %1177 = vst [vmem:[%s1812_s4 + $0x20] sm:$0xff] %v1157_v52   ;;  %v884_v3 = vmul.f32 %v1733_v5, %v835_v8  ;;  %v914_v13 = vadd.f32 %v1739_v9, %v891_v2  ;;  %v904_v14 = vadd.f32 %v1739_v9, %v881_v6  ;;  %v892_v15 = vmul.f32 %v1733_v5, %v867_v48 }
 0x146   :  { %v882_v1 = vmul.f32 %v1733_v5, %v827_v10  ;;  %v912_v53 = vadd.f32 %v1739_v9, %v889_v0  ;;  %v890_v19 = vmul.f32 %v1733_v5, %v859_v12  ;;  %v922_v21 = vmax.f32 %v906_v11, 0.0 }
 0x147   :  { %v907_v18 = vadd.f32 %v1739_v9, %v884_v3  ;;  %v915_v20 = vadd.f32 %v1739_v9, %v892_v15  ;;  %v930_v23 = vmax.f32 %v914_v13, 0.0  ;;  %v920_v26 = vmax.f32 %v904_v14, 0.0 }
 0x148   :  { %v905_v38 = vadd.f32 %v1739_v9, %v882_v1  ;;  %v913_v22 = vadd.f32 %v1739_v9, %v890_v19  ;;  %v928_v28 = vmax.f32 %v912_v53, 0.0 }
 0x149   :  { %v923_v49 = vmax.f32 %v907_v18, 0.0  ;;  %v931_v27 = vmax.f32 %v915_v20, 0.0 }
 0x14a   :  { %v921_v24 = vmax.f32 %v905_v38, 0.0  ;;  %v929_v39 = vmax.f32 %v913_v22, 0.0 }
 0x14b   :  { %v1152_v16 = vpack.c.bf16 %v923_v49, %v922_v21  ;;  %v1172_v29 = vpack.c.bf16 %v931_v27, %v930_v23 }
 0x14c   :  { %v1147_v30 = vpack.c.bf16 %v921_v24, %v920_v26  ;;  %v1167_v5 = vpack.c.bf16 %v929_v39, %v928_v28 }
 0x14d   :  { %1176 = vst [vmem:[%s1812_s4 + $0x18] sm:$0xff] %v1152_v16   ;;  %1180 = vst [vmem:[%s1812_s4 + $0x38] sm:$0xff] %v1172_v29  }
 0x14e   :  { %1175 = vst [vmem:[%s1812_s4 + $0x10] sm:$0xff] %v1147_v30   ;;  %1179 = vst [vmem:[%s1812_s4 + $0x30] sm:$0xff] %v1167_v5  }

// kernel: wav2lip_disc_forward.10
= control target key start
LH: loop header
LB: loop body
LE: loop exit
PB: predicated region body
PF: predicated region fallthrough
CT: control target
= control target key end

     0   :  { %s2330_s1 = inlined_call_operand.vmem [shape: bf16[1152,256], index: 1, kind: input, shape index: {}]   ;;  %s2331_s0 = inlined_call_operand.vmem [shape: bf16[32,1152], index: 0, kind: input, shape index: {}]   ;;  %s2332_s2 = inlined_call_operand.vmem [shape: f32[1,256], index: 2, kind: input, shape index: {}]   ;;  %s2333_s3 = inlined_call_operand.vmem [shape: f32[1,256], index: 3, kind: input, shape index: {}]   ;;  %s2334_s4 = inlined_call_operand.vmem [shape: bf16[32,256], index: 4, kind: output, shape index: {}]  }
   0x1   :  { %v1558_v0 = vld [vmem:[%s2330_s1 + $0x4] ss:$8 sps:$4 sm:$0xff]   ;;  %v1562_v2 = vld [vmem:[%s2330_s1] ss:$8 sps:$4 sm:$0xff]   ;;  %v1564_v4 = vld [vmem:[%s2330_s1 + $0x14] ss:$8 sps:$4 sm:$0xff]  }
   0x2   :  { %v1560_v1 = vld [vmem:[%s2330_s1 + $0x204] ss:$8 sps:$4 sm:$0xff]   ;;  %994 = vmatprep.subr.bf16.mxu1 %v1558_v0  ;;  %v1563_v3 = vld [vmem:[%s2330_s1 + $0x200] ss:$8 sps:$4 sm:$0xff]   ;;  %v1566_v5 = vld [vmem:[%s2330_s1 + $0x214] ss:$8 sps:$4 sm:$0xff]  }
   0x3   :  { %1100 = vmatprep.subr.bf16.mxu0 %v1560_v1  ;;  %995 = vmatpush1.bf16.msra.mxu1 %v1562_v2  ;;  %v1568_v6 = vld [vmem:[%s2330_s1 + $0x10] ss:$8 sps:$4 sm:$0xff]   ;;  %v1570_v8 = vld [vmem:[%s2330_s1 + $0x24] ss:$8 sps:$4 sm:$0xff]   ;;  %v1574_v10 = vld [vmem:[%s2330_s1 + $0x20] ss:$8 sps:$4 sm:$0xff]  }
   0x4   :  { %1101 = vmatpush1.bf16.msra.mxu0 %v1563_v3  ;;  %996 = vmatprep.subr.bf16.mxu1 %v1564_v4  ;;  %v1569_v7 = vld [vmem:[%s2330_s1 + $0x210] ss:$8 sps:$4 sm:$0xff]   ;;  %v1572_v9 = vld [vmem:[%s2330_s1 + $0x224] ss:$8 sps:$4 sm:$0xff]   ;;  %v1575_v11 = vld [vmem:[%s2330_s1 + $0x220] ss:$8 sps:$4 sm:$0xff]  }
   0x5   :  { %1102 = vmatprep.subr.bf16.mxu0 %v1566_v5  ;;  %v1576_v12 = vld [vmem:[%s2330_s1 + $0x34] ss:$8 sps:$4 sm:$0xff]   ;;  %v1580_v14 = vld [vmem:[%s2330_s1 + $0x30] ss:$8 sps:$4 sm:$0xff]   ;;  %v1582_v16 = vld [vmem:[%s2330_s1 + $0x44] ss:$8 sps:$4 sm:$0xff]  }
   0x6   :  { %v1578_v13 = vld [vmem:[%s2330_s1 + $0x234] ss:$8 sps:$4 sm:$0xff]   ;;  %v1581_v15 = vld [vmem:[%s2330_s1 + $0x230] ss:$8 sps:$4 sm:$0xff]   ;;  %v1584_v17 = vld [vmem:[%s2330_s1 + $0x244] ss:$8 sps:$4 sm:$0xff]  }
   0x7   :  { %997 = vmatpush1.bf16.msra.mxu1 %v1568_v6  ;;  %v1586_v18 = vld [vmem:[%s2330_s1 + $0x40] ss:$8 sps:$4 sm:$0xff]   ;;  %v1588_v20 = vld [vmem:[%s2330_s1 + $0x54] ss:$8 sps:$4 sm:$0xff]   ;;  %v1592_v22 = vld [vmem:[%s2330_s1 + $0x50] ss:$8 sps:$4 sm:$0xff]  }
   0x8   :  { %1103 = vmatpush1.bf16.msra.mxu0 %v1569_v7  ;;  %998 = vmatprep.subr.bf16.mxu1 %v1570_v8  ;;  %v1587_v19 = vld [vmem:[%s2330_s1 + $0x240] ss:$8 sps:$4 sm:$0xff]   ;;  %v1590_v21 = vld [vmem:[%s2330_s1 + $0x254] ss:$8 sps:$4 sm:$0xff]   ;;  %v1593_v23 = vld [vmem:[%s2330_s1 + $0x250] ss:$8 sps:$4 sm:$0xff]  }
   0x9   :  { %1104 = vmatprep.subr.bf16.mxu0 %v1572_v9  ;;  %v1594_v24 = vld [vmem:[%s2330_s1 + $0x64] ss:$8 sps:$4 sm:$0xff]   ;;  %v1598_v26 = vld [vmem:[%s2330_s1 + $0x60] ss:$8 sps:$4 sm:$0xff]   ;;  %v1600_v28 = vld [vmem:[%s2330_s1 + $0x74] ss:$8 sps:$4 sm:$0xff]  }
   0xa   :  { %v1596_v25 = vld [vmem:[%s2330_s1 + $0x264] ss:$8 sps:$4 sm:$0xff]   ;;  %v1599_v27 = vld [vmem:[%s2330_s1 + $0x260] ss:$8 sps:$4 sm:$0xff]   ;;  %v1602_v29 = vld [vmem:[%s2330_s1 + $0x274] ss:$8 sps:$4 sm:$0xff]  }
   0xb   :  { %999 = vmatpush1.bf16.msra.mxu1 %v1574_v10  ;;  %v1604_v30 = vld [vmem:[%s2330_s1 + $0x70] ss:$8 sps:$4 sm:$0xff]   ;;  %v1606_v32 = vld [vmem:[%s2330_s1 + $0x84] ss:$8 sps:$4 sm:$0xff]   ;;  %v1610_v34 = vld [vmem:[%s2330_s1 + $0x80] ss:$8 sps:$4 sm:$0xff]  }
   0xc   :  { %1105 = vmatpush1.bf16.msra.mxu0 %v1575_v11  ;;  %1000 = vmatprep.subr.bf16.mxu1 %v1576_v12  ;;  %v1605_v31 = vld [vmem:[%s2330_s1 + $0x270] ss:$8 sps:$4 sm:$0xff]   ;;  %v1608_v33 = vld [vmem:[%s2330_s1 + $0x284] ss:$8 sps:$4 sm:$0xff]   ;;  %v1611_v35 = vld [vmem:[%s2330_s1 + $0x280] ss:$8 sps:$4 sm:$0xff]  }
   0xd   :  { %1106 = vmatprep.subr.bf16.mxu0 %v1578_v13  ;;  %v1612_v36 = vld [vmem:[%s2330_s1 + $0x94] ss:$8 sps:$4 sm:$0xff]   ;;  %v1616_v38 = vld [vmem:[%s2330_s1 + $0x90] ss:$8 sps:$4 sm:$0xff]   ;;  %v1618_v40 = vld [vmem:[%s2330_s1 + $0xa4] ss:$8 sps:$4 sm:$0xff]  }
   0xe   :  { %v1614_v37 = vld [vmem:[%s2330_s1 + $0x294] ss:$8 sps:$4 sm:$0xff]   ;;  %v1617_v39 = vld [vmem:[%s2330_s1 + $0x290] ss:$8 sps:$4 sm:$0xff]   ;;  %v1620_v41 = vld [vmem:[%s2330_s1 + $0x2a4] ss:$8 sps:$4 sm:$0xff]  }
   0xf   :  { %1001 = vmatpush1.bf16.msra.mxu1 %v1580_v14  ;;  %v1622_v42 = vld [vmem:[%s2330_s1 + $0xa0] ss:$8 sps:$4 sm:$0xff]   ;;  %v1624_v44 = vld [vmem:[%s2330_s1 + $0xb4] ss:$8 sps:$4 sm:$0xff]   ;;  %v1628_v46 = vld [vmem:[%s2330_s1 + $0xb0] ss:$8 sps:$4 sm:$0xff]  }
  0x10   :  { %1107 = vmatpush1.bf16.msra.mxu0 %v1581_v15  ;;  %1002 = vmatprep.subr.bf16.mxu1 %v1582_v16  ;;  %v1623_v43 = vld [vmem:[%s2330_s1 + $0x2a0] ss:$8 sps:$4 sm:$0xff]   ;;  %v1626_v45 = vld [vmem:[%s2330_s1 + $0x2b4] ss:$8 sps:$4 sm:$0xff]   ;;  %v1629_v47 = vld [vmem:[%s2330_s1 + $0x2b0] ss:$8 sps:$4 sm:$0xff]  }
  0x11   :  { %1108 = vmatprep.subr.bf16.mxu0 %v1584_v17  ;;  %v1656_v48 = vld [vmem:[%s2331_s0 + $0x4] ss:$36 sps:$4 sm:$0xff]   ;;  %v1662_v51 = vld [vmem:[%s2331_s0 + $0x14] ss:$36 sps:$4 sm:$0xff]  }
  0x12   :  { %v1630_v49 = vld [vmem:[%s2330_s1 + $0xc4] ss:$8 sps:$4 sm:$0xff]   ;;  %1026 = vmatprep.mubr.bf16.mxu1 %v1656_v48  ;;  %v1634_v52 = vld [vmem:[%s2330_s1 + $0xc0] ss:$8 sps:$4 sm:$0xff]   ;;  %v1636_v54 = vld [vmem:[%s2330_s1 + $0xd4] ss:$8 sps:$4 sm:$0xff]   ;;  %1132 = vmatprep.mubr.bf16.mxu0 %v1662_v51 }
  0x13   :  { %1003 = vmatpush1.bf16.msra.mxu1 %v1586_v18  ;;  %v1632_v50 = vld [vmem:[%s2330_s1 + $0x2c4] ss:$8 sps:$4 sm:$0xff]   ;;  %v1635_v53 = vld [vmem:[%s2330_s1 + $0x2c0] ss:$8 sps:$4 sm:$0xff]   ;;  %v1638_v55 = vld [vmem:[%s2330_s1 + $0x2d4] ss:$8 sps:$4 sm:$0xff]  }
  0x14   :  { %1109 = vmatpush1.bf16.msra.mxu0 %v1587_v19  ;;  %1004 = vmatprep.subr.bf16.mxu1 %v1588_v20  ;;  %v1640_v56 = vld [vmem:[%s2330_s1 + $0xd0] ss:$8 sps:$4 sm:$0xff]   ;;  %v1642_v58 = vld [vmem:[%s2330_s1 + $0xe4] ss:$8 sps:$4 sm:$0xff]   ;;  %v1646_v60 = vld [vmem:[%s2330_s1 + $0xe0] ss:$8 sps:$4 sm:$0xff]  }
  0x15   :  { %1110 = vmatprep.subr.bf16.mxu0 %v1590_v21  ;;  %v1641_v57 = vld [vmem:[%s2330_s1 + $0x2d0] ss:$8 sps:$4 sm:$0xff]   ;;  %v1644_v59 = vld [vmem:[%s2330_s1 + $0x2e4] ss:$8 sps:$4 sm:$0xff]   ;;  %v1647_v61 = vld [vmem:[%s2330_s1 + $0x2e0] ss:$8 sps:$4 sm:$0xff]  }
  0x16   :  { %v1648_v62 = vld [vmem:[%s2330_s1 + $0xf4] ss:$8 sps:$4 sm:$0xff]   ;;  %v1652_v0 = vld [vmem:[%s2330_s1 + $0xf0] ss:$8 sps:$4 sm:$0xff]   ;;  %v1659_v2 = vld [vmem:[%s2330_s1 + $0x104] ss:$8 sps:$4 sm:$0xff]  }
  0x17   :  { %1005 = vmatpush1.bf16.msra.mxu1 %v1592_v22  ;;  %v1650_v63 = vld [vmem:[%s2330_s1 + $0x2f4] ss:$8 sps:$4 sm:$0xff]   ;;  %v1653_v1 = vld [vmem:[%s2330_s1 + $0x2f0] ss:$8 sps:$4 sm:$0xff]   ;;  %v1665_v3 = vld [vmem:[%s2330_s1 + $0x304] ss:$8 sps:$4 sm:$0xff]  }
  0x18   :  { %1111 = vmatpush1.bf16.msra.mxu0 %v1593_v23  ;;  %1006 = vmatprep.subr.bf16.mxu1 %v1594_v24  ;;  %v1654_v4 = vld [vmem:[%s2331_s0] ss:$36 sps:$4 sm:$0xff]   ;;  %v1660_v6 = vld [vmem:[%s2331_s0 + $0x10] ss:$36 sps:$4 sm:$0xff]  }
  0x19   :  { %1112 = vmatprep.subr.bf16.mxu0 %v1596_v25  ;;  %v1657_v5 = vld [vmem:[%s2330_s1 + $0x100] ss:$8 sps:$4 sm:$0xff]   ;;  %v1668_v8 = vld [vmem:[%s2330_s1 + $0x114] ss:$8 sps:$4 sm:$0xff]   ;;  %v1666_v10 = vld [vmem:[%s2330_s1 + $0x110] ss:$8 sps:$4 sm:$0xff]  }
  0x1a   :  { %v1663_v7 = vld [vmem:[%s2330_s1 + $0x300] ss:$8 sps:$4 sm:$0xff]   ;;  %v1671_v9 = vld [vmem:[%s2330_s1 + $0x314] ss:$8 sps:$4 sm:$0xff]   ;;  %v1669_v11 = vld [vmem:[%s2330_s1 + $0x310] ss:$8 sps:$4 sm:$0xff]  }
  0x1b   :  { %1007 = vmatpush1.bf16.msra.mxu1 %v1598_v26  ;;  %v1674_v12 = vld [vmem:[%s2330_s1 + $0x124] ss:$8 sps:$4 sm:$0xff]   ;;  %v1672_v14 = vld [vmem:[%s2330_s1 + $0x120] ss:$8 sps:$4 sm:$0xff]   ;;  %v1680_v16 = vld [vmem:[%s2330_s1 + $0x134] ss:$8 sps:$4 sm:$0xff]  }
  0x1c   :  { %1113 = vmatpush1.bf16.msra.mxu0 %v1599_v27  ;;  %1008 = vmatprep.subr.bf16.mxu1 %v1600_v28  ;;  %v1677_v13 = vld [vmem:[%s2330_s1 + $0x324] ss:$8 sps:$4 sm:$0xff]   ;;  %v1675_v15 = vld [vmem:[%s2330_s1 + $0x320] ss:$8 sps:$4 sm:$0xff]   ;;  %v1683_v17 = vld [vmem:[%s2330_s1 + $0x334] ss:$8 sps:$4 sm:$0xff]  }
  0x1d   :  { %1114 = vmatprep.subr.bf16.mxu0 %v1602_v29  ;;  %v1678_v18 = vld [vmem:[%s2330_s1 + $0x130] ss:$8 sps:$4 sm:$0xff]   ;;  %v1686_v20 = vld [vmem:[%s2330_s1 + $0x144] ss:$8 sps:$4 sm:$0xff]   ;;  %v1684_v22 = vld [vmem:[%s2330_s1 + $0x140] ss:$8 sps:$4 sm:$0xff]  }
  0x1e   :  { %v1681_v19 = vld [vmem:[%s2330_s1 + $0x330] ss:$8 sps:$4 sm:$0xff]   ;;  %v1689_v21 = vld [vmem:[%s2330_s1 + $0x344] ss:$8 sps:$4 sm:$0xff]   ;;  %v1687_v23 = vld [vmem:[%s2330_s1 + $0x340] ss:$8 sps:$4 sm:$0xff]  }
  0x1f   :  { %1009 = vmatpush1.bf16.msra.mxu1 %v1604_v30  ;;  %v1692_v24 = vld [vmem:[%s2330_s1 + $0x154] ss:$8 sps:$4 sm:$0xff]   ;;  %v1690_v26 = vld [vmem:[%s2330_s1 + $0x150] ss:$8 sps:$4 sm:$0xff]   ;;  %v1698_v28 = vld [vmem:[%s2330_s1 + $0x164] ss:$8 sps:$4 sm:$0xff]  }
  0x20   :  { %1115 = vmatpush1.bf16.msra.mxu0 %v1605_v31  ;;  %1010 = vmatprep.subr.bf16.mxu1 %v1606_v32  ;;  %v1695_v25 = vld [vmem:[%s2330_s1 + $0x354] ss:$8 sps:$4 sm:$0xff]   ;;  %v1693_v27 = vld [vmem:[%s2330_s1 + $0x350] ss:$8 sps:$4 sm:$0xff]   ;;  %v1748_v31 = vld [vmem:[%s2331_s0 + $0x48] ss:$36 sps:$4 sm:$0xff]  }
  0x21   :  { %1116 = vmatprep.subr.bf16.mxu0 %v1608_v33  ;;  %v1744_v29 = vld [vmem:[%s2331_s0 + $0x4c] ss:$36 sps:$4 sm:$0xff]   ;;  %v1746_v30 = vld [vmem:[%s2331_s0 + $0x5c] ss:$36 sps:$4 sm:$0xff]  }
  0x22   :  { %v1701_v32 = vld [vmem:[%s2330_s1 + $0x364] ss:$8 sps:$4 sm:$0xff]   ;;  %v1752_v33 = vld [vmem:[%s2331_s0 + $0x58] ss:$36 sps:$4 sm:$0xff]  }
  0x23   :  { %1011 = vmatpush1.bf16.msra.mxu1 %v1610_v34  ;;  %v1696_v34 = vld [vmem:[%s2330_s1 + $0x160] ss:$8 sps:$4 sm:$0xff]   ;;  %v1714_v48 = vld [vmem:[%s2330_s1 + $0x190] ss:$8 sps:$4 sm:$0xff]   ;;  %v1725_v51 = vld [vmem:[%s2330_s1 + $0x3a4] ss:$8 sps:$4 sm:$0xff]  }
  0x24   :  { %1117 = vmatpush1.bf16.msra.mxu0 %v1611_v35  ;;  %1012 = vmatprep.subr.bf16.mxu1 %v1612_v36  ;;  %v1699_v35 = vld [vmem:[%s2330_s1 + $0x360] ss:$8 sps:$4 sm:$0xff]   ;;  %v1704_v36 = vld [vmem:[%s2330_s1 + $0x174] ss:$8 sps:$4 sm:$0xff]  }
  0x25   :  { %1118 = vmatprep.subr.bf16.mxu0 %v1614_v37  ;;  %v1707_v37 = vld [vmem:[%s2330_s1 + $0x374] ss:$8 sps:$4 sm:$0xff]  }
  0x27   :  { %1013 = vmatpush1.bf16.msra.mxu1 %v1616_v38  ;;  %v1702_v38 = vld [vmem:[%s2330_s1 + $0x170] ss:$8 sps:$4 sm:$0xff]  }
  0x28   :  { %1119 = vmatpush1.bf16.msra.mxu0 %v1617_v39  ;;  %1014 = vmatprep.subr.bf16.mxu1 %v1618_v40  ;;  %v1705_v39 = vld [vmem:[%s2330_s1 + $0x370] ss:$8 sps:$4 sm:$0xff]   ;;  %v1710_v40 = vld [vmem:[%s2330_s1 + $0x184] ss:$8 sps:$4 sm:$0xff]  }
  0x29   :  { %1120 = vmatprep.subr.bf16.mxu0 %v1620_v41  ;;  %v1764_v41 = vld [vmem:[%s2331_s0 + $0xc] ss:$36 sps:$4 sm:$0xff]  }
  0x2b   :  { %1015 = vmatpush1.bf16.msra.mxu1 %v1622_v42  ;;  %v1713_v42 = vld [vmem:[%s2330_s1 + $0x384] ss:$8 sps:$4 sm:$0xff]  }
  0x2c   :  { %1121 = vmatpush1.bf16.msra.mxu0 %v1623_v43  ;;  %1016 = vmatprep.subr.bf16.mxu1 %v1624_v44  ;;  %v1767_v43 = vld [vmem:[%s2331_s0 + $0x1c] ss:$36 sps:$4 sm:$0xff]  }
  0x2d   :  { %1122 = vmatprep.subr.bf16.mxu0 %v1626_v45  ;;  %v1708_v44 = vld [vmem:[%s2330_s1 + $0x180] ss:$8 sps:$4 sm:$0xff]  }
  0x2e   :  { %v1711_v45 = vld [vmem:[%s2330_s1 + $0x380] ss:$8 sps:$4 sm:$0xff]  }
  0x2f   :  { %1017 = vmatpush1.bf16.msra.mxu1 %v1628_v46  ;;  %v1716_v46 = vld [vmem:[%s2330_s1 + $0x194] ss:$8 sps:$4 sm:$0xff]  }
  0x30   :  { %1123 = vmatpush1.bf16.msra.mxu0 %v1629_v47  ;;  %1018 = vmatprep.subr.bf16.mxu1 %v1630_v49  ;;  %v1719_v47 = vld [vmem:[%s2330_s1 + $0x394] ss:$8 sps:$4 sm:$0xff]   ;;  %v1717_v49 = vld [vmem:[%s2330_s1 + $0x390] ss:$8 sps:$4 sm:$0xff]  }
  0x31   :  { %1124 = vmatprep.subr.bf16.mxu0 %v1632_v50  ;;  %v1722_v50 = vld [vmem:[%s2330_s1 + $0x1a4] ss:$8 sps:$4 sm:$0xff]  }
  0x33   :  { %1019 = vmatpush1.bf16.msra.mxu1 %v1634_v52  ;;  %v1720_v52 = vld [vmem:[%s2330_s1 + $0x1a0] ss:$8 sps:$4 sm:$0xff]  }
  0x34   :  { %1125 = vmatpush1.bf16.msra.mxu0 %v1635_v53  ;;  %1020 = vmatprep.subr.bf16.mxu1 %v1636_v54  ;;  %v1723_v53 = vld [vmem:[%s2330_s1 + $0x3a0] ss:$8 sps:$4 sm:$0xff]   ;;  %v1728_v54 = vld [vmem:[%s2330_s1 + $0x1b4] ss:$8 sps:$4 sm:$0xff]  }
  0x35   :  { %1126 = vmatprep.subr.bf16.mxu0 %v1638_v55  ;;  %v1731_v55 = vld [vmem:[%s2330_s1 + $0x3b4] ss:$8 sps:$4 sm:$0xff]  }
  0x37   :  { %1021 = vmatpush1.bf16.msra.mxu1 %v1640_v56  ;;  %v1726_v56 = vld [vmem:[%s2330_s1 + $0x1b0] ss:$8 sps:$4 sm:$0xff]  }
  0x38   :  { %1127 = vmatpush1.bf16.msra.mxu0 %v1641_v57  ;;  %1022 = vmatprep.subr.bf16.mxu1 %v1642_v58  ;;  %v1729_v57 = vld [vmem:[%s2330_s1 + $0x3b0] ss:$8 sps:$4 sm:$0xff]   ;;  %v1734_v58 = vld [vmem:[%s2330_s1 + $0x1c4] ss:$8 sps:$4 sm:$0xff]  }
  0x39   :  { %1128 = vmatprep.subr.bf16.mxu0 %v1644_v59  ;;  %v1737_v59 = vld [vmem:[%s2330_s1 + $0x3c4] ss:$8 sps:$4 sm:$0xff]  }
  0x3b   :  { %1023 = vmatpush1.bf16.msra.mxu1 %v1646_v60  ;;  %v1732_v60 = vld [vmem:[%s2330_s1 + $0x1c0] ss:$8 sps:$4 sm:$0xff]  }
  0x3c   :  { %1129 = vmatpush1.bf16.msra.mxu0 %v1647_v61  ;;  %1024 = vmatprep.subr.bf16.mxu1 %v1648_v62  ;;  %v1735_v61 = vld [vmem:[%s2330_s1 + $0x3c0] ss:$8 sps:$4 sm:$0xff]   ;;  %v1740_v62 = vld [vmem:[%s2330_s1 + $0x1d4] ss:$8 sps:$4 sm:$0xff]  }
  0x3d   :  { %1130 = vmatprep.subr.bf16.mxu0 %v1650_v63  ;;  %v1743_v63 = vld [vmem:[%s2330_s1 + $0x3d4] ss:$8 sps:$4 sm:$0xff]  }
  0x3f   :  { %1025 = vmatpush1.bf16.msra.mxu1 %v1652_v0  ;;  %v1738_v0 = vld [vmem:[%s2330_s1 + $0x1d0] ss:$8 sps:$4 sm:$0xff]  }
  0x40   :  { %1131 = vmatpush1.bf16.msra.mxu0 %v1653_v1  ;;  %1047 = vmatprep.subr.bf16.mxu1 %v1659_v2  ;;  %v1741_v1 = vld [vmem:[%s2330_s1 + $0x3d0] ss:$8 sps:$4 sm:$0xff]   ;;  %v1751_v2 = vld [vmem:[%s2330_s1 + $0x1e4] ss:$8 sps:$4 sm:$0xff]  }
  0x41   :  { %1153 = vmatprep.subr.bf16.mxu0 %v1665_v3  ;;  %v1755_v3 = vld [vmem:[%s2330_s1 + $0x3e4] ss:$8 sps:$4 sm:$0xff]  }
  0x42   :  { %1027 = vmatmul.mubr.bf16.vlgmr.msra.gmra.mrb[0].mxu1 %v1654_v4  ;;  %v1749_v4 = vld [vmem:[%s2330_s1 + $0x1e0] ss:$8 sps:$4 sm:$0xff]  }
  0x43   :  { %1133 = vmatmul.mubr.bf16.vlgmr.msra.gmra.mrb[0].mxu0 %v1660_v6  ;;  %1048 = vmatpush1.bf16.msra.mxu1 %v1657_v5  ;;  %v1753_v5 = vld [vmem:[%s2330_s1 + $0x3e0] ss:$8 sps:$4 sm:$0xff]   ;;  %v1758_v6 = vld [vmem:[%s2330_s1 + $0x1f4] ss:$8 sps:$4 sm:$0xff]  }
  0x44   :  { %1154 = vmatpush1.bf16.msra.mxu0 %v1663_v7  ;;  %1049 = vmatprep.subr.bf16.mxu1 %v1668_v8  ;;  %v1761_v7 = vld [vmem:[%s2330_s1 + $0x3f4] ss:$8 sps:$4 sm:$0xff]   ;;  %v1756_v8 = vld [vmem:[%s2330_s1 + $0x1f0] ss:$8 sps:$4 sm:$0xff]  }
  0x45   :  { %1155 = vmatprep.subr.bf16.mxu0 %v1671_v9  ;;  %1036 = vmatprep.mubr.bf16.mxu1 %v1744_v29  ;;  %v1759_v9 = vld [vmem:[%s2330_s1 + $0x3f0] ss:$8 sps:$4 sm:$0xff]   ;;  %v1794_v29 = vld [vmem:[%s2330_s1 + $0x464] ss:$8 sps:$4 sm:$0xff]  }
  0x46   :  { %1142 = vmatprep.mubr.bf16.mxu0 %v1746_v30  ;;  %v1792_v30 = vld [vmem:[%s2330_s1 + $0x460] ss:$8 sps:$4 sm:$0xff]  }
  0x47   :  { %1050 = vmatpush1.bf16.msra.mxu1 %v1666_v10  ;;  %v1770_v10 = vld [vmem:[%s2330_s1 + $0x404] ss:$8 sps:$4 sm:$0xff]  }
  0x48   :  { %1156 = vmatpush1.bf16.msra.mxu0 %v1669_v11  ;;  %1051 = vmatprep.subr.bf16.mxu1 %v1674_v12  ;;  %v1762_v11 = vld [vmem:[%s2331_s0 + $0x8] ss:$36 sps:$4 sm:$0xff]   ;;  %v1765_v12 = vld [vmem:[%s2331_s0 + $0x18] ss:$36 sps:$4 sm:$0xff]  }
  0x49   :  { %1157 = vmatprep.subr.bf16.mxu0 %v1677_v13  ;;  %v1768_v13 = vld [vmem:[%s2330_s1 + $0x400] ss:$8 sps:$4 sm:$0xff]  }
  0x4a   :  { %1037 = vmatmul.mubr.bf16.gmra.mrb[4].mxu1 %v1748_v31  ;;  %v1797_v31 = vld [vmem:[%s2330_s1 + $0x474] ss:$8 sps:$4 sm:$0xff]  }
  0x4b   :  { %1052 = vmatpush1.bf16.msra.mxu1 %v1672_v14  ;;  %1143 = vmatmul.mubr.bf16.gmra.mrb[4].mxu0 %v1752_v33  ;;  %v1773_v14 = vld [vmem:[%s2330_s1 + $0x414] ss:$8 sps:$4 sm:$0xff]   ;;  %v1798_v33 = vld [vmem:[%s2331_s0 + $0x20] ss:$36 sps:$4 sm:$0xff]  }
  0x4c   :  { %1158 = vmatpush1.bf16.msra.mxu0 %v1675_v15  ;;  %1053 = vmatprep.subr.bf16.mxu1 %v1680_v16  ;;  %v1774_v15 = vld [vmem:[%s2331_s0 + $0x54] ss:$36 sps:$4 sm:$0xff]   ;;  %v1776_v16 = vld [vmem:[%s2331_s0 + $0x64] ss:$36 sps:$4 sm:$0xff]  }
  0x4d   :  { %1159 = vmatprep.subr.bf16.mxu0 %v1683_v17  ;;  %1079 = vmatprep.mubr.bf16.mxu1 %v1764_v41  ;;  %v1771_v17 = vld [vmem:[%s2330_s1 + $0x410] ss:$8 sps:$4 sm:$0xff]  }
  0x4e   :  { %1185 = vmatprep.mubr.bf16.mxu0 %v1767_v43 }
  0x4f   :  { %1054 = vmatpush1.bf16.msra.mxu1 %v1678_v18  ;;  %v1782_v18 = vld [vmem:[%s2330_s1 + $0x424] ss:$8 sps:$4 sm:$0xff]  }
  0x50   :  { %1160 = vmatpush1.bf16.msra.mxu0 %v1681_v19  ;;  %1055 = vmatprep.subr.bf16.mxu1 %v1686_v20  ;;  %v1778_v19 = vld [vmem:[%s2331_s0 + $0x50] ss:$36 sps:$4 sm:$0xff]   ;;  %v1779_v20 = vld [vmem:[%s2331_s0 + $0x60] ss:$36 sps:$4 sm:$0xff]  }
  0x51   :  { %1161 = vmatprep.subr.bf16.mxu0 %v1689_v21  ;;  %v1780_v21 = vld [vmem:[%s2330_s1 + $0x420] ss:$8 sps:$4 sm:$0xff]  }
  0x53   :  { %1056 = vmatpush1.bf16.msra.mxu1 %v1684_v22  ;;  %v1785_v22 = vld [vmem:[%s2330_s1 + $0x434] ss:$8 sps:$4 sm:$0xff]  }
  0x54   :  { %1162 = vmatpush1.bf16.msra.mxu0 %v1687_v23  ;;  %1057 = vmatprep.subr.bf16.mxu1 %v1692_v24  ;;  %v1783_v23 = vld [vmem:[%s2330_s1 + $0x430] ss:$8 sps:$4 sm:$0xff]   ;;  %v1788_v24 = vld [vmem:[%s2330_s1 + $0x444] ss:$8 sps:$4 sm:$0xff]  }
  0x55   :  { %1163 = vmatprep.subr.bf16.mxu0 %v1695_v25  ;;  %v1800_v25 = vmov 0  }
  0x57   :  { %1058 = vmatpush1.bf16.msra.mxu1 %v1690_v26  ;;  %v1786_v26 = vld [vmem:[%s2330_s1 + $0x440] ss:$8 sps:$4 sm:$0xff]  }
  0x58   :  { %1164 = vmatpush1.bf16.msra.mxu0 %v1693_v27  ;;  %1059 = vmatprep.subr.bf16.mxu1 %v1698_v28  ;;  %v1791_v27 = vld [vmem:[%s2330_s1 + $0x454] ss:$8 sps:$4 sm:$0xff]   ;;  %v1789_v28 = vld [vmem:[%s2330_s1 + $0x450] ss:$8 sps:$4 sm:$0xff]  }
  0x59   :  { %1165 = vmatprep.subr.bf16.mxu0 %v1701_v32  ;;  %v1795_v32 = vld [vmem:[%s2330_s1 + $0x470] ss:$8 sps:$4 sm:$0xff]  }
  0x5b   :  { %1060 = vmatpush1.bf16.msra.mxu1 %v1696_v34  ;;  %v1799_v34 = vld [vmem:[%s2331_s0 + $0x68] ss:$36 sps:$4 sm:$0xff]  }
  0x5c   :  { %1166 = vmatpush1.bf16.msra.mxu0 %v1699_v35  ;;  %1061 = vmatprep.subr.bf16.mxu1 %v1704_v36 }
  0x5d   :  { %1167 = vmatprep.subr.bf16.mxu0 %v1707_v37 }
  0x5f   :  { %1062 = vmatpush1.bf16.msra.mxu1 %v1702_v38 }
  0x60   :  { %1168 = vmatpush1.bf16.msra.mxu0 %v1705_v39  ;;  %1063 = vmatprep.subr.bf16.mxu1 %v1710_v40 }
  0x61   :  { %1169 = vmatprep.subr.bf16.mxu0 %v1713_v42 }
  0x63   :  { %1064 = vmatpush1.bf16.msra.mxu1 %v1708_v44 }
  0x64   :  { %1170 = vmatpush1.bf16.msra.mxu0 %v1711_v45  ;;  %1065 = vmatprep.subr.bf16.mxu1 %v1716_v46 }
  0x65   :  { %1171 = vmatprep.subr.bf16.mxu0 %v1719_v47 }
  0x67   :  { %1066 = vmatpush1.bf16.msra.mxu1 %v1714_v48 }
  0x68   :  { %1172 = vmatpush1.bf16.msra.mxu0 %v1717_v49  ;;  %1067 = vmatprep.subr.bf16.mxu1 %v1722_v50 }
  0x69   :  { %1173 = vmatprep.subr.bf16.mxu0 %v1725_v51  ;;  %v1261_v51 = vlaneseq }
  0x6b   :  { %1068 = vmatpush1.bf16.msra.mxu1 %v1720_v52  ;;  %v1262_v52 = vshrl.u32 %v1261_v51, 7 }
  0x6c   :  { %1174 = vmatpush1.bf16.msra.mxu0 %v1723_v53  ;;  %1069 = vmatprep.subr.bf16.mxu1 %v1728_v54  ;;  %v1259_v54 = vld [vmem:[%s2332_s2] sm:$0x3] }
  0x6d   :  { %1175 = vmatprep.subr.bf16.mxu0 %v1731_v55  ;;  %v1263_v53 = vsub.s32 0, %v1262_v52  ;;  %v1267_v55 = vsub.s32 1, %v1262_v52 }
  0x6f   :  { %1070 = vmatpush1.bf16.msra.mxu1 %v1726_v56  ;;  %v1279_v56 = vld [vmem:[%s2333_s3] sm:$0x3] }
  0x70   :  { %1176 = vmatpush1.bf16.msra.mxu0 %v1729_v57  ;;  %1071 = vmatprep.subr.bf16.mxu1 %v1734_v58  ;;  %v1264_v57 = vrot.slane %v1259_v54, %v1263_v53 }
  0x71   :  { %1177 = vmatprep.subr.bf16.mxu0 %v1737_v59 }
  0x73   :  { %1072 = vmatpush1.bf16.msra.mxu1 %v1732_v60  ;;  %v1268_v60 = vrot.slane %v1259_v54, %v1267_v55 }
  0x74   :  { %1178 = vmatpush1.bf16.msra.mxu0 %v1735_v61  ;;  %1073 = vmatprep.subr.bf16.mxu1 %v1740_v62  ;;  %v1284_v62 = vrot.slane %v1279_v56, %v1263_v53 }
  0x75   :  { %1179 = vmatprep.subr.bf16.mxu0 %v1743_v63 }
  0x77   :  { %1074 = vmatpush1.bf16.msra.mxu1 %v1738_v0 }
  0x78   :  { %1180 = vmatpush1.bf16.msra.mxu0 %v1741_v1  ;;  %1075 = vmatprep.subr.bf16.mxu1 %v1751_v2 }
  0x79   :  { %1181 = vmatprep.subr.bf16.mxu0 %v1755_v3  ;;  %v1288_v3 = vrot.slane %v1279_v56, %v1267_v55 }
  0x7b   :  { %1076 = vmatpush1.bf16.msra.mxu1 %v1749_v4 }
  0x7c   :  { %1182 = vmatpush1.bf16.msra.mxu0 %v1753_v5  ;;  %1077 = vmatprep.subr.bf16.mxu1 %v1758_v6 }
  0x7d   :  { %1183 = vmatprep.subr.bf16.mxu0 %v1761_v7 }
  0x7f   :  { %1078 = vmatpush1.bf16.msra.mxu1 %v1756_v8 }
  0x80   :  { %1184 = vmatpush1.bf16.msra.mxu0 %v1759_v9  ;;  %1509 = vmatprep.subr.bf16.mxu1 %v1770_v10 }
  0x81   :  { %1206 = vmatprep.subr.bf16.mxu0 %v1770_v10 }
  0x82   :  { %1080 = vmatmul.mubr.bf16.vlgmr.msra.gmra.mrb[0].mxu1 %v1762_v11 }
  0x83   :  { %1186 = vmatmul.mubr.bf16.vlgmr.msra.gmra.mrb[0].mxu0 %v1765_v12  ;;  %1517 = vmatpush1.bf16.msra.mxu1 %v1768_v13 }
  0x84   :  { %1207 = vmatpush1.bf16.msra.mxu0 %v1768_v13  ;;  %1510 = vmatprep.subr.bf16.mxu1 %v1773_v14 }
  0x85   :  { %1208 = vmatprep.subr.bf16.mxu0 %v1773_v14  ;;  %1089 = vmatprep.mubr.bf16.mxu1 %v1774_v15 }
  0x86   :  { %1195 = vmatprep.mubr.bf16.mxu0 %v1776_v16 }
  0x87   :  { %1518 = vmatpush1.bf16.msra.mxu1 %v1771_v17 }
  0x88   :  { %1209 = vmatpush1.bf16.msra.mxu0 %v1771_v17  ;;  %1511 = vmatprep.subr.bf16.mxu1 %v1782_v18 }
  0x89   :  { %1210 = vmatprep.subr.bf16.mxu0 %v1782_v18 }
  0x8a   :  { %1090 = vmatmul.mubr.bf16.gmra.mrb[4].mxu1 %v1778_v19 }
  0x8b   :  { %1196 = vmatmul.mubr.bf16.gmra.mrb[4].mxu0 %v1779_v20  ;;  %1519 = vmatpush1.bf16.msra.mxu1 %v1780_v21 }
  0x8c   :  { %1211 = vmatpush1.bf16.msra.mxu0 %v1780_v21  ;;  %1512 = vmatprep.subr.bf16.mxu1 %v1785_v22 }
  0x8d   :  { %1212 = vmatprep.subr.bf16.mxu0 %v1785_v22  ;;  %1238 = vmatprep.mubr.bf16.mxu0 %v1800_v25 }
  0x8e   :  { %1248 = vmatprep.mubr.bf16.mxu1 %v1800_v25 }
  0x8f   :  { %1520 = vmatpush1.bf16.msra.mxu1 %v1783_v23 }
  0x90   :  { %1213 = vmatpush1.bf16.msra.mxu0 %v1783_v23  ;;  %1513 = vmatprep.subr.bf16.mxu1 %v1788_v24 }
  0x91   :  { %1214 = vmatprep.subr.bf16.mxu0 %v1788_v24 }
  0x93   :  { %1521 = vmatpush1.bf16.msra.mxu1 %v1786_v26 }
  0x94   :  { %1215 = vmatpush1.bf16.msra.mxu0 %v1786_v26  ;;  %1514 = vmatprep.subr.bf16.mxu1 %v1791_v27 }
  0x95   :  { %1216 = vmatprep.subr.bf16.mxu0 %v1791_v27 }
  0x97   :  { %1522 = vmatpush1.bf16.msra.mxu1 %v1789_v28 }
  0x98   :  { %1217 = vmatpush1.bf16.msra.mxu0 %v1789_v28  ;;  %1515 = vmatprep.subr.bf16.mxu1 %v1794_v29 }
  0x99   :  { %1218 = vmatprep.subr.bf16.mxu0 %v1794_v29 }
  0x9b   :  { %1523 = vmatpush1.bf16.msra.mxu1 %v1792_v30 }
  0x9c   :  { %1219 = vmatpush1.bf16.msra.mxu0 %v1792_v30  ;;  %1516 = vmatprep.subr.bf16.mxu1 %v1797_v31 }
  0x9d   :  { %1220 = vmatprep.subr.bf16.mxu0 %v1797_v31 }
  0x9f   :  { %1524 = vmatpush1.bf16.msra.mxu1 %v1795_v32 }
  0xa0   :  { %1221 = vmatpush1.bf16.msra.mxu0 %v1795_v32 }
  0xa2   :  { %1249 = vmatmul.mubr.bf16.vlgmr.msra.gmra.mrb[8].mxu1 %v1799_v34 }
  0xa3   :  { %1239 = vmatmul.mubr.bf16.vlgmr.msra.gmra.mrb[0].mxu0 %v1798_v33 }
 0x155   :  { %v1081_v35 = vpop.f32.mrb[0].mxu1 }
 0x156   :  { %v1083_v36 = vpop.f32.mrb[1].mxu1 }
 0x157   :  { %v1085_v37 = vpop.f32.mrb[2].mxu1 }
 0x158   :  { %v1087_v38 = vpop.f32.mrb[3].mxu1 }
 0x15d   :  { %v1091_v39 = vpop.f32.mrb[4].mxu1 }
 0x15e   :  { %v1197_v40 = vpop.f32.mrb[4].mxu0  ;;  %v1093_v42 = vpop.f32.mrb[5].mxu1 }
 0x15f   :  { %v1529_v41 = vadd.f32 %v1197_v40, %v1091_v39  ;;  %v1199_v43 = vpop.f32.mrb[5].mxu0  ;;  %v1095_v45 = vpop.f32.mrb[6].mxu1 }
 0x160   :  { %v1531_v44 = vadd.f32 %v1199_v43, %v1093_v42  ;;  %v1201_v46 = vpop.f32.mrb[6].mxu0  ;;  %v1097_v48 = vpop.f32.mrb[7].mxu1 }
 0x161   :  { %v1533_v47 = vadd.f32 %v1201_v46, %v1095_v45  ;;  %v1203_v49 = vpop.f32.mrb[7].mxu0 }
 0x162   :  { %v1535_v50 = vadd.f32 %v1203_v49, %v1097_v48 }
 0x175   :  { %v1250_v59 = vpop.f32.mrb[8].mxu1 }
 0x176   :  { %v1240_v58 = vpop.f32.mrb[0].mxu0  ;;  %v1530_v63 = vadd.f32 %v1529_v41, %v1250_v59  ;;  %v1252_v1 = vpop.f32.mrb[9].mxu1 }
 0x177   :  { %v1525_v61 = vadd.f32 %v1240_v58, %v1081_v35  ;;  %v1242_v0 = vpop.f32.mrb[1].mxu0  ;;  %v1532_v4 = vadd.f32 %v1531_v44, %v1252_v1  ;;  %v1254_v6 = vpop.f32.mrb[10].mxu1 }
 0x178   :  { %v1526_v2 = vadd.f32 %v1242_v0, %v1083_v36  ;;  %v1244_v5 = vpop.f32.mrb[2].mxu0  ;;  %v1275_v8 = vmul.f32 %v1530_v63, %v1264_v57  ;;  %v1534_v10 = vadd.f32 %v1533_v47, %v1254_v6  ;;  %v1256_v12 = vpop.f32.mrb[11].mxu1 }
 0x179   :  { %v1271_v7 = vmul.f32 %v1525_v61, %v1264_v57  ;;  %v1527_v9 = vadd.f32 %v1244_v5, %v1085_v37  ;;  %v1246_v11 = vpop.f32.mrb[3].mxu0  ;;  %v1276_v14 = vmul.f32 %v1532_v4, %v1268_v60  ;;  %v1536_v16 = vadd.f32 %v1535_v50, %v1256_v12 }
 0x17a   :  { %v1272_v13 = vmul.f32 %v1526_v2, %v1268_v60  ;;  %v1528_v15 = vadd.f32 %v1246_v11, %v1087_v38  ;;  %v1295_v18 = vadd.f32 %v1284_v62, %v1275_v8  ;;  %v1277_v20 = vmul.f32 %v1534_v10, %v1264_v57 }
 0x17b   :  { %v1291_v17 = vadd.f32 %v1284_v62, %v1271_v7  ;;  %v1273_v19 = vmul.f32 %v1527_v9, %v1264_v57  ;;  %v1296_v22 = vadd.f32 %v1288_v3, %v1276_v14  ;;  %v1278_v24 = vmul.f32 %v1536_v16, %v1268_v60 }
 0x17c   :  { %v1292_v21 = vadd.f32 %v1288_v3, %v1272_v13  ;;  %v1274_v23 = vmul.f32 %v1528_v15, %v1268_v60  ;;  %v1303_v26 = vmax.f32 %v1295_v18, 0.0  ;;  %v1297_v28 = vadd.f32 %v1284_v62, %v1277_v20 }
 0x17d   :  { %v1299_v25 = vmax.f32 %v1291_v17, 0.0  ;;  %v1293_v27 = vadd.f32 %v1284_v62, %v1273_v19  ;;  %v1304_v30 = vmax.f32 %v1296_v22, 0.0  ;;  %v1298_v32 = vadd.f32 %v1288_v3, %v1278_v24 }
 0x17e   :  { %v1300_v29 = vmax.f32 %v1292_v21, 0.0  ;;  %v1294_v31 = vadd.f32 %v1288_v3, %v1274_v23  ;;  %v1305_v34 = vmax.f32 %v1297_v28, 0.0 }
 0x17f   :  { %v1301_v33 = vmax.f32 %v1293_v27, 0.0  ;;  %v1507_v36 = vpack.c.bf16 %v1304_v30, %v1303_v26  ;;  %v1306_v38 = vmax.f32 %v1298_v32, 0.0 }
 0x180   :  { %v1505_v35 = vpack.c.bf16 %v1300_v29, %v1299_v25  ;;  %v1302_v37 = vmax.f32 %v1294_v31, 0.0 }
 0x181   :  { %1333 = vst [vmem:[%s2334_s4 + $0x10] sm:$0xff] %v1507_v36  ;;  %v1508_v40 = vpack.c.bf16 %v1306_v38, %v1305_v34 }
 0x182   :  { %1331 = vst [vmem:[%s2334_s4] sm:$0xff] %v1505_v35  ;;  %v1506_v39 = vpack.c.bf16 %v1302_v37, %v1301_v33 }
 0x183   :  { %1334 = vst [vmem:[%s2334_s4 + $0x18] sm:$0xff] %v1508_v40 }
 0x184   :  { %1332 = vst [vmem:[%s2334_s4 + $0x8] sm:$0xff] %v1506_v39 }

// kernel: wav2lip_disc_forward.11
= control target key start
LH: loop header
LB: loop body
LE: loop exit
PB: predicated region body
PF: predicated region fallthrough
CT: control target
= control target key end

     0   :  { %s3132_s1 = inlined_call_operand.vmem [shape: bf16[2304,128], index: 1, kind: input, shape index: {}]   ;;  %s3133_s0 = inlined_call_operand.vmem [shape: bf16[32,2304], index: 0, kind: input, shape index: {}]   ;;  %s3134_s2 = inlined_call_operand.vmem [shape: f32[1,128], index: 2, kind: input, shape index: {}]   ;;  %s3135_s3 = inlined_call_operand.vmem [shape: f32[1,128], index: 3, kind: input, shape index: {}]   ;;  %s3136_s4 = inlined_call_operand.vmem [shape: f32[32,128], index: 4, kind: output, shape index: {}]  }
   0x1   :  { %v2335_v0 = vld [vmem:[%s3132_s1 + $0x40] sm:$0xff]   ;;  %v2339_v4 = vld [vmem:[%s3132_s1 + $0x48] sm:$0xff]   ;;  %v2343_v8 = vld [vmem:[%s3132_s1 + $0x50] sm:$0xff]  }
   0x2   :  { %v2336_v1 = vld [vmem:[%s3132_s1 + $0xc0] sm:$0xff]   ;;  %2067 = vmatprep.subr.bf16.mxu0 %v2335_v0  ;;  %v2340_v5 = vld [vmem:[%s3132_s1 + $0xc8] sm:$0xff]   ;;  %v2344_v9 = vld [vmem:[%s3132_s1 + $0xd0] sm:$0xff]  }
   0x3   :  { %v2337_v2 = vld [vmem:[%s3132_s1] sm:$0xff]   ;;  %2095 = vmatprep.subr.bf16.mxu1 %v2336_v1  ;;  %v2341_v6 = vld [vmem:[%s3132_s1 + $0x8] sm:$0xff]   ;;  %v2345_v10 = vld [vmem:[%s3132_s1 + $0x10] sm:$0xff]  }
   0x4   :  { %v2338_v3 = vld [vmem:[%s3132_s1 + $0x80] sm:$0xff]   ;;  %2068 = vmatpush3.bf16.msra.mxu0 %v2337_v2  ;;  %v2342_v7 = vld [vmem:[%s3132_s1 + $0x88] sm:$0xff]   ;;  %v2346_v11 = vld [vmem:[%s3132_s1 + $0x90] sm:$0xff]  }
   0x5   :  { %2096 = vmatpush3.bf16.msra.mxu1 %v2338_v3  ;;  %2069 = vmatprep.subr.bf16.mxu0 %v2339_v4  ;;  %v2347_v12 = vld [vmem:[%s3132_s1 + $0x58] sm:$0xff]   ;;  %v2351_v16 = vld [vmem:[%s3132_s1 + $0x60] sm:$0xff]   ;;  %v2355_v20 = vld [vmem:[%s3132_s1 + $0x68] sm:$0xff]  }
   0x6   :  { %2097 = vmatprep.subr.bf16.mxu1 %v2340_v5  ;;  %v2348_v13 = vld [vmem:[%s3132_s1 + $0xd8] sm:$0xff]   ;;  %v2352_v17 = vld [vmem:[%s3132_s1 + $0xe0] sm:$0xff]   ;;  %v2356_v21 = vld [vmem:[%s3132_s1 + $0xe8] sm:$0xff]  }
   0x7   :  { %v2349_v14 = vld [vmem:[%s3132_s1 + $0x18] sm:$0xff]   ;;  %v2353_v18 = vld [vmem:[%s3132_s1 + $0x20] sm:$0xff]   ;;  %v2357_v22 = vld [vmem:[%s3132_s1 + $0x28] sm:$0xff]  }
   0x8   :  { %2070 = vmatpush3.bf16.msra.mxu0 %v2341_v6  ;;  %v2350_v15 = vld [vmem:[%s3132_s1 + $0x98] sm:$0xff]   ;;  %v2354_v19 = vld [vmem:[%s3132_s1 + $0xa0] sm:$0xff]   ;;  %v2358_v23 = vld [vmem:[%s3132_s1 + $0xa8] sm:$0xff]  }
   0x9   :  { %2098 = vmatpush3.bf16.msra.mxu1 %v2342_v7  ;;  %2071 = vmatprep.subr.bf16.mxu0 %v2343_v8  ;;  %v2359_v24 = vld [vmem:[%s3132_s1 + $0x70] sm:$0xff]   ;;  %v2363_v28 = vld [vmem:[%s3132_s1 + $0x78] sm:$0xff]   ;;  %v2367_v32 = vld [vmem:[%s3133_s0] ss:$72 sps:$4 sm:$0xff]  }
   0xa   :  { %2099 = vmatprep.subr.bf16.mxu1 %v2344_v9  ;;  %v2360_v25 = vld [vmem:[%s3132_s1 + $0xf0] sm:$0xff]   ;;  %v2364_v29 = vld [vmem:[%s3132_s1 + $0xf8] sm:$0xff]   ;;  %v2369_v33 = vld [vmem:[%s3133_s0 + $0x4] ss:$72 sps:$4 sm:$0xff]  }
   0xb   :  { %v2361_v26 = vld [vmem:[%s3132_s1 + $0x30] sm:$0xff]   ;;  %v2365_v30 = vld [vmem:[%s3132_s1 + $0x38] sm:$0xff]   ;;  %1418 = vmatprep.mubr.bf16.mxu0 %v2369_v33  ;;  %v2373_v36 = vld [vmem:[%s3132_s1 + $0x140] sm:$0xff]  }
   0xc   :  { %2072 = vmatpush3.bf16.msra.mxu0 %v2345_v10  ;;  %v2362_v27 = vld [vmem:[%s3132_s1 + $0xb0] sm:$0xff]   ;;  %v2366_v31 = vld [vmem:[%s3132_s1 + $0xb8] sm:$0xff]   ;;  %v2374_v37 = vld [vmem:[%s3132_s1 + $0x1c0] sm:$0xff]  }
   0xd   :  { %2100 = vmatpush3.bf16.msra.mxu1 %v2346_v11  ;;  %2073 = vmatprep.subr.bf16.mxu0 %v2347_v12  ;;  %v2370_v34 = vld [vmem:[%s3133_s0 + $0x8] ss:$72 sps:$4 sm:$0xff]   ;;  %v2372_v35 = vld [vmem:[%s3133_s0 + $0xc] ss:$72 sps:$4 sm:$0xff]   ;;  %v2375_v38 = vld [vmem:[%s3132_s1 + $0x100] sm:$0xff]  }
   0xe   :  { %2101 = vmatprep.subr.bf16.mxu1 %v2348_v13  ;;  %1467 = vmatprep.mubr.bf16.mxu1 %v2372_v35  ;;  %v2376_v39 = vld [vmem:[%s3132_s1 + $0x180] sm:$0xff]   ;;  %v2377_v40 = vld [vmem:[%s3132_s1 + $0x148] sm:$0xff]   ;;  %v2381_v44 = vld [vmem:[%s3132_s1 + $0x150] sm:$0xff]  }
   0xf   :  { %v2378_v41 = vld [vmem:[%s3132_s1 + $0x1c8] sm:$0xff]   ;;  %v2382_v45 = vld [vmem:[%s3132_s1 + $0x1d0] sm:$0xff]   ;;  %v2385_v48 = vld [vmem:[%s3132_s1 + $0x158] sm:$0xff]  }
  0x10   :  { %2074 = vmatpush3.bf16.msra.mxu0 %v2349_v14  ;;  %v2379_v42 = vld [vmem:[%s3132_s1 + $0x108] sm:$0xff]   ;;  %v2383_v46 = vld [vmem:[%s3132_s1 + $0x110] sm:$0xff]   ;;  %v2386_v49 = vld [vmem:[%s3132_s1 + $0x1d8] sm:$0xff]  }
  0x11   :  { %2102 = vmatpush3.bf16.msra.mxu1 %v2350_v15  ;;  %2075 = vmatprep.subr.bf16.mxu0 %v2351_v16  ;;  %v2380_v43 = vld [vmem:[%s3132_s1 + $0x188] sm:$0xff]   ;;  %v2384_v47 = vld [vmem:[%s3132_s1 + $0x190] sm:$0xff]   ;;  %v2387_v50 = vld [vmem:[%s3132_s1 + $0x118] sm:$0xff]  }
  0x12   :  { %2103 = vmatprep.subr.bf16.mxu1 %v2352_v17  ;;  %v2388_v51 = vld [vmem:[%s3132_s1 + $0x198] sm:$0xff]   ;;  %v2389_v52 = vld [vmem:[%s3132_s1 + $0x160] sm:$0xff]   ;;  %v2393_v56 = vld [vmem:[%s3132_s1 + $0x168] sm:$0xff]  }
  0x13   :  { %v2390_v53 = vld [vmem:[%s3132_s1 + $0x1e0] sm:$0xff]   ;;  %v2394_v57 = vld [vmem:[%s3132_s1 + $0x1e8] sm:$0xff]   ;;  %v2395_v58 = vld [vmem:[%s3133_s0 + $0x94] ss:$72 sps:$4 sm:$0xff]  }
  0x14   :  { %2076 = vmatpush3.bf16.msra.mxu0 %v2353_v18  ;;  %v2391_v54 = vld [vmem:[%s3132_s1 + $0x120] sm:$0xff]   ;;  %v2399_v60 = vld [vmem:[%s3132_s1 + $0x128] sm:$0xff]   ;;  %v2401_v62 = vld [vmem:[%s3133_s0 + $0x90] ss:$72 sps:$4 sm:$0xff]  }
  0x15   :  { %2104 = vmatpush3.bf16.msra.mxu1 %v2354_v19  ;;  %2077 = vmatprep.subr.bf16.mxu0 %v2355_v20  ;;  %v2392_v55 = vld [vmem:[%s3132_s1 + $0x1a0] sm:$0xff]   ;;  %v2400_v61 = vld [vmem:[%s3132_s1 + $0x1a8] sm:$0xff]   ;;  %v2403_v0 = vld [vmem:[%s3132_s1 + $0x170] sm:$0xff]  }
  0x16   :  { %2105 = vmatprep.subr.bf16.mxu1 %v2356_v21  ;;  %v2397_v59 = vld [vmem:[%s3133_s0 + $0x9c] ss:$72 sps:$4 sm:$0xff]   ;;  %v2402_v63 = vld [vmem:[%s3133_s0 + $0x98] ss:$72 sps:$4 sm:$0xff]   ;;  %v2404_v1 = vld [vmem:[%s3132_s1 + $0x1f0] sm:$0xff]  }
  0x17   :  { %v2405_v2 = vld [vmem:[%s3132_s1 + $0x130] sm:$0xff]   ;;  %v2407_v4 = vld [vmem:[%s3132_s1 + $0x178] sm:$0xff]   ;;  %v2417_v12 = vld [vmem:[%s3132_s1 + $0x240] sm:$0xff]  }
  0x18   :  { %2078 = vmatpush3.bf16.msra.mxu0 %v2357_v22  ;;  %v2406_v3 = vld [vmem:[%s3132_s1 + $0x1b0] sm:$0xff]   ;;  %v2408_v5 = vld [vmem:[%s3132_s1 + $0x1f8] sm:$0xff]   ;;  %v2418_v13 = vld [vmem:[%s3132_s1 + $0x2c0] sm:$0xff]  }
  0x19   :  { %2106 = vmatpush3.bf16.msra.mxu1 %v2358_v23  ;;  %2079 = vmatprep.subr.bf16.mxu0 %v2359_v24  ;;  %v2409_v6 = vld [vmem:[%s3132_s1 + $0x138] sm:$0xff]   ;;  %v2419_v14 = vld [vmem:[%s3132_s1 + $0x200] sm:$0xff]   ;;  %v2421_v16 = vld [vmem:[%s3132_s1 + $0x248] sm:$0xff]  }
  0x1a   :  { %2107 = vmatprep.subr.bf16.mxu1 %v2360_v25  ;;  %v2410_v7 = vld [vmem:[%s3132_s1 + $0x1b8] sm:$0xff]   ;;  %v2420_v15 = vld [vmem:[%s3132_s1 + $0x280] sm:$0xff]   ;;  %v2422_v17 = vld [vmem:[%s3132_s1 + $0x2c8] sm:$0xff]  }
  0x1b   :  { %v2411_v8 = vld [vmem:[%s3133_s0 + $0x10] ss:$72 sps:$4 sm:$0xff]   ;;  %v2413_v9 = vld [vmem:[%s3133_s0 + $0x14] ss:$72 sps:$4 sm:$0xff]   ;;  %v2423_v18 = vld [vmem:[%s3132_s1 + $0x208] sm:$0xff]  }
  0x1c   :  { %2080 = vmatpush3.bf16.msra.mxu0 %v2361_v26  ;;  %v2414_v10 = vld [vmem:[%s3133_s0 + $0x18] ss:$72 sps:$4 sm:$0xff]   ;;  %v2416_v11 = vld [vmem:[%s3133_s0 + $0x1c] ss:$72 sps:$4 sm:$0xff]   ;;  %v2424_v19 = vld [vmem:[%s3132_s1 + $0x288] sm:$0xff]  }
  0x1d   :  { %2108 = vmatpush3.bf16.msra.mxu1 %v2362_v27  ;;  %2081 = vmatprep.subr.bf16.mxu0 %v2363_v28  ;;  %v2425_v20 = vld [vmem:[%s3133_s0 + $0xa4] ss:$72 sps:$4 sm:$0xff]   ;;  %v2427_v21 = vld [vmem:[%s3133_s0 + $0xa0] ss:$72 sps:$4 sm:$0xff]   ;;  %v2428_v22 = vld [vmem:[%s3132_s1 + $0x250] sm:$0xff]  }
  0x1e   :  { %2109 = vmatprep.subr.bf16.mxu1 %v2364_v29  ;;  %v2429_v23 = vld [vmem:[%s3132_s1 + $0x2d0] sm:$0xff]   ;;  %v2435_v28 = vld [vmem:[%s3132_s1 + $0x258] sm:$0xff]   ;;  %v2440_v33 = vld [vmem:[%s3132_s1 + $0x2e0] sm:$0xff]  }
  0x1f   :  { %v2430_v24 = vld [vmem:[%s3133_s0 + $0xac] ss:$72 sps:$4 sm:$0xff]   ;;  %v2434_v27 = vld [vmem:[%s3133_s0 + $0xa8] ss:$72 sps:$4 sm:$0xff]   ;;  %v2436_v29 = vld [vmem:[%s3132_s1 + $0x2d8] sm:$0xff]  }
  0x20   :  { %2082 = vmatpush3.bf16.msra.mxu0 %v2365_v30  ;;  %v2432_v25 = vld [vmem:[%s3132_s1 + $0x210] sm:$0xff]   ;;  %v2437_v30 = vld [vmem:[%s3132_s1 + $0x218] sm:$0xff]   ;;  %v2442_v35 = vld [vmem:[%s3132_s1 + $0x2a0] sm:$0xff]  }
  0x21   :  { %2110 = vmatpush3.bf16.msra.mxu1 %v2366_v31  ;;  %2123 = vmatprep.subr.bf16.mxu0 %v2373_v36  ;;  %v2433_v26 = vld [vmem:[%s3132_s1 + $0x290] sm:$0xff]   ;;  %v2438_v31 = vld [vmem:[%s3132_s1 + $0x298] sm:$0xff]   ;;  %v2443_v36 = vld [vmem:[%s3132_s1 + $0x268] sm:$0xff]  }
  0x22   :  { %2151 = vmatprep.subr.bf16.mxu1 %v2374_v37  ;;  %v2444_v37 = vld [vmem:[%s3132_s1 + $0x2e8] sm:$0xff]  }
  0x23   :  { %1419 = vmatmul.mubr.bf16.vlgmr.msra.gmra.mrb[0].mxu0 %v2367_v32  ;;  %v2439_v32 = vld [vmem:[%s3132_s1 + $0x260] sm:$0xff]  }
  0x24   :  { %1468 = vmatmul.mubr.bf16.vlgmr.msra.gmra.mrb[0].mxu1 %v2370_v34  ;;  %2124 = vmatpush3.bf16.msra.mxu0 %v2375_v38  ;;  %v2441_v34 = vld [vmem:[%s3132_s1 + $0x220] sm:$0xff]   ;;  %v2445_v38 = vld [vmem:[%s3132_s1 + $0x228] sm:$0xff]  }
  0x25   :  { %2152 = vmatpush3.bf16.msra.mxu1 %v2376_v39  ;;  %2125 = vmatprep.subr.bf16.mxu0 %v2377_v40  ;;  %v2446_v39 = vld [vmem:[%s3132_s1 + $0x2a8] sm:$0xff]   ;;  %v2447_v40 = vld [vmem:[%s3132_s1 + $0x270] sm:$0xff]  }
  0x26   :  { %2153 = vmatprep.subr.bf16.mxu1 %v2378_v41  ;;  %1426 = vmatprep.mubr.bf16.mxu0 %v2395_v58  ;;  %v2448_v41 = vld [vmem:[%s3132_s1 + $0x2f0] sm:$0xff]   ;;  %v2467_v58 = vld [vmem:[%s3132_s1 + $0x308] sm:$0xff]  }
  0x27   :  { %1475 = vmatprep.mubr.bf16.mxu1 %v2397_v59  ;;  %v2468_v59 = vld [vmem:[%s3132_s1 + $0x388] sm:$0xff]  }
  0x28   :  { %2126 = vmatpush3.bf16.msra.mxu0 %v2379_v42  ;;  %v2449_v42 = vld [vmem:[%s3132_s1 + $0x230] sm:$0xff]  }
  0x29   :  { %2154 = vmatpush3.bf16.msra.mxu1 %v2380_v43  ;;  %2127 = vmatprep.subr.bf16.mxu0 %v2381_v44  ;;  %v2450_v43 = vld [vmem:[%s3132_s1 + $0x2b0] sm:$0xff]   ;;  %v2451_v44 = vld [vmem:[%s3132_s1 + $0x278] sm:$0xff]  }
  0x2a   :  { %2155 = vmatprep.subr.bf16.mxu1 %v2382_v45  ;;  %v2452_v45 = vld [vmem:[%s3132_s1 + $0x2f8] sm:$0xff]  }
  0x2b   :  { %1427 = vmatmul.mubr.bf16.gmra.mrb[4].mxu0 %v2401_v62  ;;  %v2472_v62 = vld [vmem:[%s3132_s1 + $0x350] sm:$0xff]  }
  0x2c   :  { %2128 = vmatpush3.bf16.msra.mxu0 %v2383_v46  ;;  %1476 = vmatmul.mubr.bf16.gmra.mrb[4].mxu1 %v2402_v63  ;;  %v2453_v46 = vld [vmem:[%s3132_s1 + $0x238] sm:$0xff]   ;;  %v2473_v63 = vld [vmem:[%s3132_s1 + $0x3d0] sm:$0xff]  }
  0x2d   :  { %2156 = vmatpush3.bf16.msra.mxu1 %v2384_v47  ;;  %2129 = vmatprep.subr.bf16.mxu0 %v2385_v48  ;;  %v2454_v47 = vld [vmem:[%s3132_s1 + $0x2b8] sm:$0xff]   ;;  %v2455_v48 = vld [vmem:[%s3133_s0 + $0x20] ss:$72 sps:$4 sm:$0xff]  }
  0x2e   :  { %2157 = vmatprep.subr.bf16.mxu1 %v2386_v49  ;;  %1516 = vmatprep.mubr.bf16.mxu0 %v2413_v9  ;;  %v2457_v49 = vld [vmem:[%s3133_s0 + $0x24] ss:$72 sps:$4 sm:$0xff]  }
  0x2f   :  { %1565 = vmatprep.mubr.bf16.mxu1 %v2416_v11  ;;  %v2484_v9 = vld [vmem:[%s3132_s1 + $0x3e0] sm:$0xff]  }
  0x30   :  { %2130 = vmatpush3.bf16.msra.mxu0 %v2387_v50  ;;  %v2458_v50 = vld [vmem:[%s3133_s0 + $0x28] ss:$72 sps:$4 sm:$0xff]   ;;  %v2486_v11 = vld [vmem:[%s3132_s1 + $0x3a0] sm:$0xff]  }
  0x31   :  { %2158 = vmatpush3.bf16.msra.mxu1 %v2388_v51  ;;  %2131 = vmatprep.subr.bf16.mxu0 %v2389_v52  ;;  %v2460_v51 = vld [vmem:[%s3133_s0 + $0x2c] ss:$72 sps:$4 sm:$0xff]   ;;  %v2461_v52 = vld [vmem:[%s3132_s1 + $0x340] sm:$0xff]  }
  0x32   :  { %2159 = vmatprep.subr.bf16.mxu1 %v2390_v53  ;;  %v2462_v53 = vld [vmem:[%s3132_s1 + $0x3c0] sm:$0xff]  }
  0x34   :  { %2132 = vmatpush3.bf16.msra.mxu0 %v2391_v54  ;;  %v2463_v54 = vld [vmem:[%s3132_s1 + $0x300] sm:$0xff]  }
  0x35   :  { %2160 = vmatpush3.bf16.msra.mxu1 %v2392_v55  ;;  %2133 = vmatprep.subr.bf16.mxu0 %v2393_v56  ;;  %v2464_v55 = vld [vmem:[%s3132_s1 + $0x380] sm:$0xff]   ;;  %v2465_v56 = vld [vmem:[%s3132_s1 + $0x348] sm:$0xff]  }
  0x36   :  { %2161 = vmatprep.subr.bf16.mxu1 %v2394_v57  ;;  %v2466_v57 = vld [vmem:[%s3132_s1 + $0x3c8] sm:$0xff]  }
  0x38   :  { %2134 = vmatpush3.bf16.msra.mxu0 %v2399_v60  ;;  %v2469_v60 = vld [vmem:[%s3133_s0 + $0xb4] ss:$72 sps:$4 sm:$0xff]  }
  0x39   :  { %2162 = vmatpush3.bf16.msra.mxu1 %v2400_v61  ;;  %2135 = vmatprep.subr.bf16.mxu0 %v2403_v0  ;;  %v2471_v61 = vld [vmem:[%s3133_s0 + $0xb0] ss:$72 sps:$4 sm:$0xff]   ;;  %v2474_v0 = vld [vmem:[%s3133_s0 + $0xbc] ss:$72 sps:$4 sm:$0xff]  }
  0x3a   :  { %2163 = vmatprep.subr.bf16.mxu1 %v2404_v1  ;;  %v2476_v1 = vld [vmem:[%s3132_s1 + $0x310] sm:$0xff]  }
  0x3c   :  { %2136 = vmatpush3.bf16.msra.mxu0 %v2405_v2  ;;  %v2477_v2 = vld [vmem:[%s3132_s1 + $0x390] sm:$0xff]  }
  0x3d   :  { %2164 = vmatpush3.bf16.msra.mxu1 %v2406_v3  ;;  %2137 = vmatprep.subr.bf16.mxu0 %v2407_v4  ;;  %v2478_v3 = vld [vmem:[%s3133_s0 + $0xb8] ss:$72 sps:$4 sm:$0xff]  }
  0x3e   :  { %2165 = vmatprep.subr.bf16.mxu1 %v2408_v5  ;;  %v2479_v4 = vld [vmem:[%s3132_s1 + $0x358] sm:$0xff]  }
  0x3f   :  { %v2480_v5 = vld [vmem:[%s3132_s1 + $0x3d8] sm:$0xff]  }
  0x40   :  { %2138 = vmatpush3.bf16.msra.mxu0 %v2409_v6  ;;  %v2481_v6 = vld [vmem:[%s3132_s1 + $0x318] sm:$0xff]  }
  0x41   :  { %2166 = vmatpush3.bf16.msra.mxu1 %v2410_v7  ;;  %2179 = vmatprep.subr.bf16.mxu0 %v2417_v12  ;;  %v2482_v7 = vld [vmem:[%s3132_s1 + $0x398] sm:$0xff]   ;;  %v2487_v12 = vld [vmem:[%s3132_s1 + $0x368] sm:$0xff]  }
  0x42   :  { %2207 = vmatprep.subr.bf16.mxu1 %v2418_v13  ;;  %v2488_v13 = vld [vmem:[%s3132_s1 + $0x3e8] sm:$0xff]  }
  0x43   :  { %1517 = vmatmul.mubr.bf16.vlgmr.msra.gmra.mrb[8].mxu0 %v2411_v8  ;;  %v2483_v8 = vld [vmem:[%s3132_s1 + $0x360] sm:$0xff]  }
  0x44   :  { %1566 = vmatmul.mubr.bf16.vlgmr.msra.gmra.mrb[8].mxu1 %v2414_v10  ;;  %2180 = vmatpush3.bf16.msra.mxu0 %v2419_v14  ;;  %v2485_v10 = vld [vmem:[%s3132_s1 + $0x320] sm:$0xff]   ;;  %v2489_v14 = vld [vmem:[%s3132_s1 + $0x328] sm:$0xff]  }
  0x45   :  { %2208 = vmatpush3.bf16.msra.mxu1 %v2420_v15  ;;  %2181 = vmatprep.subr.bf16.mxu0 %v2421_v16  ;;  %v2490_v15 = vld [vmem:[%s3132_s1 + $0x3a8] sm:$0xff]   ;;  %v2491_v16 = vld [vmem:[%s3132_s1 + $0x370] sm:$0xff]  }
  0x46   :  { %2209 = vmatprep.subr.bf16.mxu1 %v2422_v17  ;;  %1524 = vmatprep.mubr.bf16.mxu0 %v2425_v20  ;;  %v2492_v17 = vld [vmem:[%s3132_s1 + $0x3f0] sm:$0xff]   ;;  %v2495_v20 = vld [vmem:[%s3132_s1 + $0x378] sm:$0xff]  }
  0x47   :  { %1573 = vmatprep.mubr.bf16.mxu1 %v2430_v24  ;;  %v2499_v24 = vld [vmem:[%s3133_s0 + $0x30] ss:$72 sps:$4 sm:$0xff]  }
  0x48   :  { %2182 = vmatpush3.bf16.msra.mxu0 %v2423_v18  ;;  %v2493_v18 = vld [vmem:[%s3132_s1 + $0x330] sm:$0xff]  }
  0x49   :  { %2210 = vmatpush3.bf16.msra.mxu1 %v2424_v19  ;;  %2183 = vmatprep.subr.bf16.mxu0 %v2428_v22  ;;  %v2494_v19 = vld [vmem:[%s3132_s1 + $0x3b0] sm:$0xff]   ;;  %v2497_v22 = vld [vmem:[%s3132_s1 + $0x338] sm:$0xff]  }
  0x4a   :  { %2211 = vmatprep.subr.bf16.mxu1 %v2429_v23  ;;  %v2498_v23 = vld [vmem:[%s3132_s1 + $0x3b8] sm:$0xff]  }
  0x4b   :  { %1525 = vmatmul.mubr.bf16.gmra.mrb[12].mxu0 %v2427_v21  ;;  %v2496_v21 = vld [vmem:[%s3132_s1 + $0x3f8] sm:$0xff]  }
  0x4c   :  { %2184 = vmatpush3.bf16.msra.mxu0 %v2432_v25  ;;  %1574 = vmatmul.mubr.bf16.gmra.mrb[12].mxu1 %v2434_v27  ;;  %v2501_v25 = vld [vmem:[%s3133_s0 + $0x34] ss:$72 sps:$4 sm:$0xff]  }
  0x4d   :  { %2212 = vmatpush3.bf16.msra.mxu1 %v2433_v26  ;;  %2185 = vmatprep.subr.bf16.mxu0 %v2435_v28  ;;  %v2502_v26 = vld [vmem:[%s3133_s0 + $0x38] ss:$72 sps:$4 sm:$0xff]   ;;  %v2504_v27 = vld [vmem:[%s3133_s0 + $0x3c] ss:$72 sps:$4 sm:$0xff]  }
  0x4e   :  { %2213 = vmatprep.subr.bf16.mxu1 %v2436_v29  ;;  %1614 = vmatprep.mubr.bf16.mxu0 %v2457_v49  ;;  %v2505_v28 = vld [vmem:[%s3132_s1 + $0x440] sm:$0xff]   ;;  %v2526_v49 = vld [vmem:[%s3132_s1 + $0x438] sm:$0xff]  }
  0x4f   :  { %1663 = vmatprep.mubr.bf16.mxu1 %v2460_v51  ;;  %v2506_v29 = vld [vmem:[%s3132_s1 + $0x400] sm:$0xff]   ;;  %v2530_v51 = vld [vmem:[%s3133_s0 + $0xd0] ss:$72 sps:$4 sm:$0xff]  }
  0x50   :  { %2186 = vmatpush3.bf16.msra.mxu0 %v2437_v30  ;;  %v2507_v30 = vld [vmem:[%s3132_s1 + $0x448] sm:$0xff]  }
  0x51   :  { %2214 = vmatpush3.bf16.msra.mxu1 %v2438_v31  ;;  %2187 = vmatprep.subr.bf16.mxu0 %v2439_v32  ;;  %v2508_v31 = vld [vmem:[%s3132_s1 + $0x408] sm:$0xff]  }
  0x52   :  { %2215 = vmatprep.subr.bf16.mxu1 %v2440_v33  ;;  %v2509_v32 = vld [vmem:[%s3133_s0 + $0xc4] ss:$72 sps:$4 sm:$0xff]   ;;  %v2511_v33 = vld [vmem:[%s3133_s0 + $0xc0] ss:$72 sps:$4 sm:$0xff]  }
  0x54   :  { %2188 = vmatpush3.bf16.msra.mxu0 %v2441_v34  ;;  %v2512_v34 = vld [vmem:[%s3132_s1 + $0x450] sm:$0xff]  }
  0x55   :  { %2216 = vmatpush3.bf16.msra.mxu1 %v2442_v35  ;;  %2189 = vmatprep.subr.bf16.mxu0 %v2443_v36  ;;  %v2513_v35 = vld [vmem:[%s3133_s0 + $0xcc] ss:$72 sps:$4 sm:$0xff]  }
  0x56   :  { %2217 = vmatprep.subr.bf16.mxu1 %v2444_v37  ;;  %v2515_v36 = vld [vmem:[%s3132_s1 + $0x410] sm:$0xff]  }
  0x57   :  { %v2516_v37 = vld [vmem:[%s3133_s0 + $0xc8] ss:$72 sps:$4 sm:$0xff]  }
  0x58   :  { %2190 = vmatpush3.bf16.msra.mxu0 %v2445_v38  ;;  %v2517_v38 = vld [vmem:[%s3132_s1 + $0x458] sm:$0xff]  }
  0x59   :  { %2218 = vmatpush3.bf16.msra.mxu1 %v2446_v39  ;;  %2191 = vmatprep.subr.bf16.mxu0 %v2447_v40  ;;  %v2518_v39 = vld [vmem:[%s3132_s1 + $0x418] sm:$0xff]   ;;  %v2519_v40 = vld [vmem:[%s3132_s1 + $0x460] sm:$0xff]  }
  0x5a   :  { %2219 = vmatprep.subr.bf16.mxu1 %v2448_v41  ;;  %v2520_v41 = vld [vmem:[%s3132_s1 + $0x420] sm:$0xff]  }
  0x5c   :  { %2192 = vmatpush3.bf16.msra.mxu0 %v2449_v42  ;;  %v2521_v42 = vld [vmem:[%s3132_s1 + $0x468] sm:$0xff]  }
  0x5d   :  { %2220 = vmatpush3.bf16.msra.mxu1 %v2450_v43  ;;  %2193 = vmatprep.subr.bf16.mxu0 %v2451_v44  ;;  %v2522_v43 = vld [vmem:[%s3132_s1 + $0x428] sm:$0xff]  }
  0x5e   :  { %2221 = vmatprep.subr.bf16.mxu1 %v2452_v45  ;;  %v2529_v44 = vld [vmem:[%s3133_s0 + $0x44] ss:$72 sps:$4 sm:$0xff]   ;;  %v2523_v45 = vld [vmem:[%s3132_s1 + $0x470] sm:$0xff]  }
  0x60   :  { %2194 = vmatpush3.bf16.msra.mxu0 %v2453_v46  ;;  %v2532_v46 = vld [vmem:[%s3133_s0 + $0xd4] ss:$72 sps:$4 sm:$0xff]  }
  0x61   :  { %2222 = vmatpush3.bf16.msra.mxu1 %v2454_v47  ;;  %2235 = vmatprep.subr.bf16.mxu0 %v2461_v52  ;;  %v2524_v47 = vld [vmem:[%s3132_s1 + $0x430] sm:$0xff]  }
  0x62   :  { %2263 = vmatprep.subr.bf16.mxu1 %v2462_v53 }
  0x63   :  { %1615 = vmatmul.mubr.bf16.vlgmr.msra.gmra.mrb[16].mxu0 %v2455_v48  ;;  %v2525_v48 = vld [vmem:[%s3132_s1 + $0x478] sm:$0xff]  }
  0x64   :  { %1664 = vmatmul.mubr.bf16.vlgmr.msra.gmra.mrb[16].mxu1 %v2458_v50  ;;  %2236 = vmatpush3.bf16.msra.mxu0 %v2463_v54  ;;  %v2527_v50 = vld [vmem:[%s3133_s0 + $0x40] ss:$72 sps:$4 sm:$0xff]  }
  0x65   :  { %2264 = vmatpush3.bf16.msra.mxu1 %v2464_v55  ;;  %2237 = vmatprep.subr.bf16.mxu0 %v2465_v56 }
  0x66   :  { %2265 = vmatprep.subr.bf16.mxu1 %v2466_v57  ;;  %1622 = vmatprep.mubr.bf16.mxu0 %v2469_v60 }
  0x67   :  { %1671 = vmatprep.mubr.bf16.mxu1 %v2474_v0 }
  0x68   :  { %2238 = vmatpush3.bf16.msra.mxu0 %v2467_v58 }
  0x69   :  { %2266 = vmatpush3.bf16.msra.mxu1 %v2468_v59  ;;  %2239 = vmatprep.subr.bf16.mxu0 %v2472_v62 }
  0x6a   :  { %2267 = vmatprep.subr.bf16.mxu1 %v2473_v63 }
  0x6b   :  { %1623 = vmatmul.mubr.bf16.gmra.mrb[20].mxu0 %v2471_v61 }
  0x6c   :  { %2240 = vmatpush3.bf16.msra.mxu0 %v2476_v1  ;;  %1672 = vmatmul.mubr.bf16.gmra.mrb[20].mxu1 %v2478_v3 }
  0x6d   :  { %2268 = vmatpush3.bf16.msra.mxu1 %v2477_v2  ;;  %2241 = vmatprep.subr.bf16.mxu0 %v2479_v4 }
  0x6e   :  { %2269 = vmatprep.subr.bf16.mxu1 %v2480_v5  ;;  %1712 = vmatprep.mubr.bf16.mxu0 %v2501_v25 }
  0x6f   :  { %1761 = vmatprep.mubr.bf16.mxu1 %v2504_v27 }
  0x70   :  { %2242 = vmatpush3.bf16.msra.mxu0 %v2481_v6 }
  0x71   :  { %2270 = vmatpush3.bf16.msra.mxu1 %v2482_v7  ;;  %2243 = vmatprep.subr.bf16.mxu0 %v2483_v8 }
  0x72   :  { %2271 = vmatprep.subr.bf16.mxu1 %v2484_v9 }
  0x74   :  { %2244 = vmatpush3.bf16.msra.mxu0 %v2485_v10 }
  0x75   :  { %2272 = vmatpush3.bf16.msra.mxu1 %v2486_v11  ;;  %2245 = vmatprep.subr.bf16.mxu0 %v2487_v12 }
  0x76   :  { %2273 = vmatprep.subr.bf16.mxu1 %v2488_v13 }
  0x78   :  { %2246 = vmatpush3.bf16.msra.mxu0 %v2489_v14 }
  0x79   :  { %2274 = vmatpush3.bf16.msra.mxu1 %v2490_v15  ;;  %2247 = vmatprep.subr.bf16.mxu0 %v2491_v16 }
  0x7a   :  { %2275 = vmatprep.subr.bf16.mxu1 %v2492_v17 }
  0x7c   :  { %2248 = vmatpush3.bf16.msra.mxu0 %v2493_v18 }
  0x7d   :  { %2276 = vmatpush3.bf16.msra.mxu1 %v2494_v19  ;;  %2249 = vmatprep.subr.bf16.mxu0 %v2495_v20 }
  0x7e   :  { %2277 = vmatprep.subr.bf16.mxu1 %v2496_v21 }
  0x80   :  { %2250 = vmatpush3.bf16.msra.mxu0 %v2497_v22 }
  0x81   :  { %2278 = vmatpush3.bf16.msra.mxu1 %v2498_v23  ;;  %2291 = vmatprep.subr.bf16.mxu0 %v2505_v28 }
  0x82   :  { %2319 = vmatprep.subr.bf16.mxu1 %v2505_v28 }
  0x83   :  { %1713 = vmatmul.mubr.bf16.vlgmr.msra.gmra.mrb[24].mxu0 %v2499_v24 }
  0x84   :  { %1762 = vmatmul.mubr.bf16.vlgmr.msra.gmra.mrb[24].mxu1 %v2502_v26  ;;  %2292 = vmatpush3.bf16.msra.mxu0 %v2506_v29 }
  0x85   :  { %2327 = vmatpush3.bf16.msra.mxu1 %v2506_v29  ;;  %2293 = vmatprep.subr.bf16.mxu0 %v2507_v30 }
  0x86   :  { %2320 = vmatprep.subr.bf16.mxu1 %v2507_v30  ;;  %1720 = vmatprep.mubr.bf16.mxu0 %v2509_v32 }
  0x87   :  { %1769 = vmatprep.mubr.bf16.mxu1 %v2513_v35 }
  0x88   :  { %2294 = vmatpush3.bf16.msra.mxu0 %v2508_v31 }
  0x89   :  { %2328 = vmatpush3.bf16.msra.mxu1 %v2508_v31  ;;  %2295 = vmatprep.subr.bf16.mxu0 %v2512_v34 }
  0x8a   :  { %2321 = vmatprep.subr.bf16.mxu1 %v2512_v34 }
  0x8b   :  { %1721 = vmatmul.mubr.bf16.gmra.mrb[28].mxu0 %v2511_v33 }
  0x8c   :  { %2296 = vmatpush3.bf16.msra.mxu0 %v2515_v36  ;;  %1770 = vmatmul.mubr.bf16.gmra.mrb[28].mxu1 %v2516_v37 }
  0x8d   :  { %2329 = vmatpush3.bf16.msra.mxu1 %v2515_v36  ;;  %2297 = vmatprep.subr.bf16.mxu0 %v2517_v38 }
  0x8e   :  { %2322 = vmatprep.subr.bf16.mxu1 %v2517_v38  ;;  %1810 = vmatprep.mubr.bf16.mxu0 %v2529_v44 }
  0x8f   :  { %1818 = vmatprep.mubr.bf16.mxu1 %v2532_v46 }
  0x90   :  { %2298 = vmatpush3.bf16.msra.mxu0 %v2518_v39 }
  0x91   :  { %2330 = vmatpush3.bf16.msra.mxu1 %v2518_v39  ;;  %2299 = vmatprep.subr.bf16.mxu0 %v2519_v40 }
  0x92   :  { %2323 = vmatprep.subr.bf16.mxu1 %v2519_v40 }
  0x94   :  { %2300 = vmatpush3.bf16.msra.mxu0 %v2520_v41 }
  0x95   :  { %2331 = vmatpush3.bf16.msra.mxu1 %v2520_v41  ;;  %2301 = vmatprep.subr.bf16.mxu0 %v2521_v42 }
  0x96   :  { %2324 = vmatprep.subr.bf16.mxu1 %v2521_v42 }
  0x98   :  { %2302 = vmatpush3.bf16.msra.mxu0 %v2522_v43 }
  0x99   :  { %2332 = vmatpush3.bf16.msra.mxu1 %v2522_v43  ;;  %2303 = vmatprep.subr.bf16.mxu0 %v2523_v45 }
  0x9a   :  { %2325 = vmatprep.subr.bf16.mxu1 %v2523_v45 }
  0x9c   :  { %2304 = vmatpush3.bf16.msra.mxu0 %v2524_v47 }
  0x9d   :  { %2333 = vmatpush3.bf16.msra.mxu1 %v2524_v47  ;;  %2305 = vmatprep.subr.bf16.mxu0 %v2525_v48 }
  0x9e   :  { %2326 = vmatprep.subr.bf16.mxu1 %v2525_v48 }
  0xa0   :  { %2306 = vmatpush3.bf16.msra.mxu0 %v2526_v49 }
  0xa1   :  { %2334 = vmatpush3.bf16.msra.mxu1 %v2526_v49 }
  0xa3   :  { %1811 = vmatmul.mubr.bf16.vlgmr.msra.gmra.mrb[32].mxu0 %v2527_v50 }
  0xa4   :  { %1819 = vmatmul.mubr.bf16.vlgmr.msra.gmra.mrb[32].mxu1 %v2530_v51 }
  0xf6   :  { %v2083_v52 = vpop.f32.mrb[0].mxu0 }
  0xf7   :  { %v2111_v53 = vpop.f32.mrb[0].mxu1  ;;  %v2084_v54 = vpop.f32.mrb[1].mxu0 }
  0xf8   :  { %v2085_v55 = vadd.f32 %v2084_v54, %v2083_v52  ;;  %v2112_v56 = vpop.f32.mrb[1].mxu1  ;;  %v2086_v57 = vpop.f32.mrb[2].mxu0 }
  0xf9   :  { %v2113_v58 = vadd.f32 %v2112_v56, %v2111_v53  ;;  %v2114_v59 = vpop.f32.mrb[2].mxu1  ;;  %v2087_v60 = vpop.f32.mrb[3].mxu0 }
  0xfa   :  { %v2088_v61 = vadd.f32 %v2087_v60, %v2086_v57  ;;  %v2115_v62 = vpop.f32.mrb[3].mxu1 }
  0xfb   :  { %v1470_v63 = vadd.f32 %v2113_v58, %v2085_v55  ;;  %v2116_v0 = vadd.f32 %v2115_v62, %v2114_v59 }
  0xfd   :  { %v1473_v1 = vadd.f32 %v2116_v0, %v2088_v61 }
  0xfe   :  { %v2089_v2 = vpop.f32.mrb[4].mxu0 }
  0xff   :  { %v2117_v3 = vpop.f32.mrb[4].mxu1  ;;  %v2090_v4 = vpop.f32.mrb[5].mxu0 }
 0x100   :  { %v2091_v5 = vadd.f32 %v2090_v4, %v2089_v2  ;;  %v2118_v6 = vpop.f32.mrb[5].mxu1  ;;  %v2092_v7 = vpop.f32.mrb[6].mxu0 }
 0x101   :  { %v2119_v8 = vadd.f32 %v2118_v6, %v2117_v3  ;;  %v2120_v9 = vpop.f32.mrb[6].mxu1  ;;  %v2093_v10 = vpop.f32.mrb[7].mxu0 }
 0x102   :  { %v2094_v11 = vadd.f32 %v2093_v10, %v2092_v7  ;;  %v2121_v12 = vpop.f32.mrb[7].mxu1 }
 0x103   :  { %v1478_v13 = vadd.f32 %v2119_v8, %v2091_v5  ;;  %v2122_v14 = vadd.f32 %v2121_v12, %v2120_v9 }
 0x105   :  { %v1481_v15 = vadd.f32 %v2122_v14, %v2094_v11 }
 0x116   :  { %v2139_v16 = vpop.f32.mrb[8].mxu0 }
 0x117   :  { %v2167_v17 = vpop.f32.mrb[8].mxu1  ;;  %v2140_v18 = vpop.f32.mrb[9].mxu0 }
 0x118   :  { %v2141_v19 = vadd.f32 %v2140_v18, %v2139_v16  ;;  %v2168_v20 = vpop.f32.mrb[9].mxu1  ;;  %v2142_v21 = vpop.f32.mrb[10].mxu0 }
 0x119   :  { %v2169_v22 = vadd.f32 %v2168_v20, %v2167_v17  ;;  %v2170_v23 = vpop.f32.mrb[10].mxu1  ;;  %v2143_v24 = vpop.f32.mrb[11].mxu0 }
 0x11a   :  { %v1519_v25 = vadd.f32 %v2141_v19, %v1470_v63  ;;  %v2144_v26 = vadd.f32 %v2143_v24, %v2142_v21  ;;  %v2171_v27 = vpop.f32.mrb[11].mxu1 }
 0x11b   :  { %v2172_v28 = vadd.f32 %v2171_v27, %v2170_v23 }
 0x11c   :  { %v1568_v29 = vadd.f32 %v2169_v22, %v1519_v25  ;;  %v1522_v30 = vadd.f32 %v2144_v26, %v1473_v1 }
 0x11e   :  { %v1571_v31 = vadd.f32 %v2172_v28, %v1522_v30  ;;  %v2145_v32 = vpop.f32.mrb[12].mxu0 }
 0x11f   :  { %v2146_v33 = vpop.f32.mrb[13].mxu0  ;;  %v2173_v39 = vpop.f32.mrb[12].mxu1 }
 0x120   :  { %v2147_v34 = vadd.f32 %v2146_v33, %v2145_v32  ;;  %v2148_v35 = vpop.f32.mrb[14].mxu0  ;;  %v2174_v41 = vpop.f32.mrb[13].mxu1 }
 0x121   :  { %v2149_v36 = vpop.f32.mrb[15].mxu0  ;;  %v2175_v42 = vadd.f32 %v2174_v41, %v2173_v39  ;;  %v2176_v43 = vpop.f32.mrb[14].mxu1 }
 0x122   :  { %v1527_v37 = vadd.f32 %v2147_v34, %v1478_v13  ;;  %v2150_v38 = vadd.f32 %v2149_v36, %v2148_v35  ;;  %v2177_v44 = vpop.f32.mrb[15].mxu1 }
 0x123   :  { %v2178_v46 = vadd.f32 %v2177_v44, %v2176_v43 }
 0x124   :  { %v1530_v40 = vadd.f32 %v2150_v38, %v1481_v15  ;;  %v1576_v45 = vadd.f32 %v2175_v42, %v1527_v37 }
 0x126   :  { %v1579_v47 = vadd.f32 %v2178_v46, %v1530_v40 }
 0x136   :  { %v2195_v48 = vpop.f32.mrb[16].mxu0 }
 0x137   :  { %v2196_v49 = vpop.f32.mrb[17].mxu0  ;;  %v2223_v50 = vpop.f32.mrb[16].mxu1 }
 0x138   :  { %v2197_v51 = vadd.f32 %v2196_v49, %v2195_v48  ;;  %v2198_v52 = vpop.f32.mrb[18].mxu0  ;;  %v2224_v53 = vpop.f32.mrb[17].mxu1 }
 0x139   :  { %v2199_v54 = vpop.f32.mrb[19].mxu0  ;;  %v2225_v56 = vadd.f32 %v2224_v53, %v2223_v50  ;;  %v2226_v57 = vpop.f32.mrb[18].mxu1 }
 0x13a   :  { %v1617_v55 = vadd.f32 %v2197_v51, %v1568_v29  ;;  %v2200_v58 = vadd.f32 %v2199_v54, %v2198_v52  ;;  %v2227_v59 = vpop.f32.mrb[19].mxu1  ;;  %v2061_v54 = vld [vmem:[%s3134_s2] ss:$0 sm:$0xff] }
 0x13b   :  { %v2228_v62 = vadd.f32 %v2227_v59, %v2226_v57 }
 0x13c   :  { %v1666_v60 = vadd.f32 %v2225_v56, %v1617_v55  ;;  %v1620_v61 = vadd.f32 %v2200_v58, %v1571_v31 }
 0x13e   :  { %v1669_v63 = vadd.f32 %v2228_v62, %v1620_v61  ;;  %v2201_v0 = vpop.f32.mrb[20].mxu0  ;;  %v2062_v61 = vld [vmem:[%s3135_s3] ss:$0 sm:$0xff] }
 0x13f   :  { %v2202_v1 = vpop.f32.mrb[21].mxu0  ;;  %v2229_v7 = vpop.f32.mrb[20].mxu1 }
 0x140   :  { %v2203_v2 = vadd.f32 %v2202_v1, %v2201_v0  ;;  %v2204_v3 = vpop.f32.mrb[22].mxu0  ;;  %v2230_v9 = vpop.f32.mrb[21].mxu1 }
 0x141   :  { %v2205_v4 = vpop.f32.mrb[23].mxu0  ;;  %v2231_v10 = vadd.f32 %v2230_v9, %v2229_v7  ;;  %v2232_v11 = vpop.f32.mrb[22].mxu1 }
 0x142   :  { %v1625_v5 = vadd.f32 %v2203_v2, %v1576_v45  ;;  %v2206_v6 = vadd.f32 %v2205_v4, %v2204_v3  ;;  %v2233_v12 = vpop.f32.mrb[23].mxu1 }
 0x143   :  { %v2234_v14 = vadd.f32 %v2233_v12, %v2232_v11 }
 0x144   :  { %v1628_v8 = vadd.f32 %v2206_v6, %v1579_v47  ;;  %v1674_v13 = vadd.f32 %v2231_v10, %v1625_v5 }
 0x146   :  { %v1677_v15 = vadd.f32 %v2234_v14, %v1628_v8 }
 0x156   :  { %v2251_v16 = vpop.f32.mrb[24].mxu0 }
 0x157   :  { %v2279_v17 = vpop.f32.mrb[24].mxu1  ;;  %v2252_v18 = vpop.f32.mrb[25].mxu0 }
 0x158   :  { %v2253_v19 = vadd.f32 %v2252_v18, %v2251_v16  ;;  %v2280_v20 = vpop.f32.mrb[25].mxu1  ;;  %v2254_v21 = vpop.f32.mrb[26].mxu0 }
 0x159   :  { %v2281_v22 = vadd.f32 %v2280_v20, %v2279_v17  ;;  %v2282_v23 = vpop.f32.mrb[26].mxu1  ;;  %v2255_v24 = vpop.f32.mrb[27].mxu0 }
 0x15a   :  { %v1715_v25 = vadd.f32 %v2253_v19, %v1666_v60  ;;  %v2256_v26 = vadd.f32 %v2255_v24, %v2254_v21  ;;  %v2283_v27 = vpop.f32.mrb[27].mxu1 }
 0x15b   :  { %v2284_v28 = vadd.f32 %v2283_v27, %v2282_v23 }
 0x15c   :  { %v1764_v29 = vadd.f32 %v2281_v22, %v1715_v25  ;;  %v1718_v30 = vadd.f32 %v2256_v26, %v1669_v63 }
 0x15e   :  { %v1767_v31 = vadd.f32 %v2284_v28, %v1718_v30  ;;  %v2257_v32 = vpop.f32.mrb[28].mxu0 }
 0x15f   :  { %v2258_v33 = vpop.f32.mrb[29].mxu0  ;;  %v2285_v36 = vpop.f32.mrb[28].mxu1 }
 0x160   :  { %v2259_v34 = vadd.f32 %v2258_v33, %v2257_v32  ;;  %v2260_v35 = vpop.f32.mrb[30].mxu0  ;;  %v2286_v38 = vpop.f32.mrb[29].mxu1 }
 0x161   :  { %v2261_v37 = vpop.f32.mrb[31].mxu0  ;;  %v2287_v41 = vadd.f32 %v2286_v38, %v2285_v36  ;;  %v2288_v42 = vpop.f32.mrb[30].mxu1 }
 0x162   :  { %v1723_v39 = vadd.f32 %v2259_v34, %v1674_v13  ;;  %v2262_v40 = vadd.f32 %v2261_v37, %v2260_v35  ;;  %v2289_v43 = vpop.f32.mrb[31].mxu1 }
 0x163   :  { %v2290_v46 = vadd.f32 %v2289_v43, %v2288_v42 }
 0x164   :  { %v1726_v44 = vadd.f32 %v2262_v40, %v1677_v15  ;;  %v1772_v45 = vadd.f32 %v2287_v41, %v1723_v39 }
 0x166   :  { %v1775_v47 = vadd.f32 %v2290_v46, %v1726_v44 }
 0x176   :  { %v2307_v48 = vpop.f32.mrb[32].mxu0 }
 0x177   :  { %v2313_v49 = vpop.f32.mrb[32].mxu1  ;;  %v2308_v50 = vpop.f32.mrb[33].mxu0 }
 0x178   :  { %v2309_v51 = vadd.f32 %v2308_v50, %v2307_v48  ;;  %v2314_v52 = vpop.f32.mrb[33].mxu1  ;;  %v2310_v53 = vpop.f32.mrb[34].mxu0 }
 0x179   :  { %v2315_v55 = vadd.f32 %v2314_v52, %v2313_v49  ;;  %v2316_v56 = vpop.f32.mrb[34].mxu1  ;;  %v2311_v57 = vpop.f32.mrb[35].mxu0 }
 0x17a   :  { %v1813_v58 = vadd.f32 %v2309_v51, %v1764_v29  ;;  %v2312_v59 = vadd.f32 %v2311_v57, %v2310_v53  ;;  %v2317_v60 = vpop.f32.mrb[35].mxu1 }
 0x17b   :  { %v1821_v62 = vadd.f32 %v2315_v55, %v1772_v45  ;;  %v2318_v63 = vadd.f32 %v2317_v60, %v2316_v56 }
 0x17c   :  { %v1834_v0 = vmul.f32 %v2061_v54, %v1813_v58  ;;  %v1816_v1 = vadd.f32 %v2312_v59, %v1767_v31 }
 0x17d   :  { %v1836_v2 = vmul.f32 %v2061_v54, %v1821_v62  ;;  %v1824_v3 = vadd.f32 %v2318_v63, %v1775_v47 }
 0x17e   :  { %v1845_v4 = vadd.f32 %v2062_v61, %v1834_v0  ;;  %v1835_v5 = vmul.f32 %v2061_v54, %v1816_v1 }
 0x17f   :  { %v1847_v6 = vadd.f32 %v2062_v61, %v1836_v2  ;;  %v1837_v7 = vmul.f32 %v2061_v54, %v1824_v3 }
 0x180   :  { %v2063_v8 = vmul.f32 -1.442695, %v1845_v4  ;;  %v1846_v9 = vadd.f32 %v2062_v61, %v1835_v5 }
 0x181   :  { %v2065_v10 = vmul.f32 -1.442695, %v1847_v6  ;;  %v1848_v11 = vadd.f32 %v2062_v61, %v1837_v7 }
 0x182   :  { %2533 = vpow2.f32 %v2063_v8  ;;  %v2064_v12 = vmul.f32 -1.442695, %v1846_v9 }
 0x183   :  { %2535 = vpow2.f32 %v2065_v10  ;;  %v2066_v13 = vmul.f32 -1.442695, %v1848_v11 }
 0x184   :  { %2537 = vpow2.f32 %v2064_v12 }
 0x185   :  { %2539 = vpow2.f32 %v2066_v13 }
 0x18c   :  { %v2534_v14 = vpop.eup %2533 }
 0x18d   :  { %v2536_v15 = vpop.eup %2535  ;;  %v1861_v16 = vadd.f32 1.0, %v2534_v14 }
 0x18e   :  { %v2538_v17 = vpop.eup %2537  ;;  %v1863_v18 = vadd.f32 1.0, %v2536_v15 }
 0x18f   :  { %v2540_v19 = vpop.eup %2539  ;;  %2541 = vrcp.f32 %v1861_v16  ;;  %v1862_v20 = vadd.f32 1.0, %v2538_v17 }
 0x190   :  { %2543 = vrcp.f32 %v1863_v18  ;;  %v1864_v21 = vadd.f32 1.0, %v2540_v19 }
 0x191   :  { %2545 = vrcp.f32 %v1862_v20 }
 0x192   :  { %2547 = vrcp.f32 %v1864_v21 }
 0x199   :  { %v2542_v22 = vpop.eup %2541 }
 0x19a   :  { %v2544_v23 = vpop.eup %2543  ;;  %1873 = vst [vmem:[%s3136_s4] sm:$0xff] %v2542_v22 }
 0x19b   :  { %v2546_v24 = vpop.eup %2545  ;;  %1875 = vst [vmem:[%s3136_s4 + $0x10] sm:$0xff] %v2544_v23 }
 0x19c   :  { %v2548_v25 = vpop.eup %2547  ;;  %1874 = vst [vmem:[%s3136_s4 + $0x8] sm:$0xff] %v2546_v24 }
 0x19d   :  { %1876 = vst [vmem:[%s3136_s4 + $0x18] sm:$0xff] %v2548_v25 }

</bundles_post_ra>
